<compile_context>
chip_gen: v6e
topology: v6e:2x2x1
jax: 0.10.0
libtpu: 0.0.40
codegen_flags: <defaults>
</compile_context>

<pallas_src>
import jax
import jax.numpy as jnp
from jax.experimental import pallas as pl
from jax.experimental.pallas import tpu as pltpu

POOL_DIM = 2048          # fixed in embed_GNN.__init__ (pool_dim = 2048)
LOW_DIM = 32             # args.low_dim (small test value)
BN_EPS = 1e-5            # nn.BatchNorm1d default eps
LANE = 128
SUBLANE = 8
_BLOCK_BYTES = 2 * 1024 * 1024   # per-buffer budget for the bf16 feature-map block


def head_kernel(x_ref, w_ref, b_ref, out_feat_ref, out_vec_ref, pool_acc):
    k = pl.program_id(1)

    @pl.when(k == 0)
    def _init():
        # Max accumulator must start at -inf (not 0) for general inputs.
        pool_acc[...] = jnp.full(pool_acc.shape, -jnp.inf, pool_acc.dtype)

    # AdaptiveMaxPool2d((1,1)): running max over the spatial (HW) axis.
    # Cast the bf16 block to f32 right after load (no bf16 VPU on v5e); max is
    # exact relative to the bf16 inputs either way.
    blk = x_ref[...].astype(jnp.float32)                      # [tb, thw, C]
    pool_acc[...] = jnp.maximum(pool_acc[...], jnp.max(blk, axis=1))

    @pl.when(k == pl.num_programs(1) - 1)
    def _finalize():
        pooled = pool_acc[...]                                # [tb, C] f32
        # Normalize(power=2) on the pooled backbone feature.
        out_feat_ref[...] = pooled * jax.lax.rsqrt(
            jnp.sum(pooled * pooled, axis=-1, keepdims=True))
        # FeatureBlock = Linear(2048, low_dim) + eval BatchNorm1d, pre-folded
        # into (w', b'); padded columns of w'/b' are zero so they contribute
        # nothing to the l2 norm.
        y = jnp.dot(pooled, w_ref[...],
                    preferred_element_type=jnp.float32) + b_ref[...]
        out_vec_ref[...] = y * jax.lax.rsqrt(
            jnp.sum(y * y, axis=-1, keepdims=True))


def _fold_bn(params, n_pad):
    """Fold eval-mode BatchNorm1d into the Linear; pad columns to n_pad lanes."""
    scale = params["gamma"] * jax.lax.rsqrt(params["running_var"] + BN_EPS)
    w_f = params["w"] * scale                                           # [C, low]
    b_f = (params["b"] - params["running_mean"]) * scale + params["beta"]
    low = w_f.shape[1]
    w_p = jnp.zeros((w_f.shape[0], n_pad), jnp.float32).at[:, :low].set(w_f)
    b_p = jnp.zeros((1, n_pad), jnp.float32).at[:, :low].set(b_f)
    return w_p, b_p


def _pick_batch_tile(b):
    # Multiple-of-8 divisor of B (or B itself when B < 8 / no aligned divisor)
    # so the [tb, C] output blocks satisfy the (8,128) rule; capped at 32 so a
    # large batch still yields several "parallel" blocks for megacore sharding.
    if b <= SUBLANE:
        return b
    cand = [t for t in range(SUBLANE, min(b, 32) + 1, SUBLANE) if b % t == 0]
    return max(cand) if cand else b


def _pick_spatial_tile(hw, tb, c):
    # Largest multiple-of-8 divisor of HW whose bf16 block [tb, thw, C] fits
    # the per-buffer VMEM budget; fall back to the full spatial extent.
    cap = max(SUBLANE, _BLOCK_BYTES // (tb * c * 2))
    if hw <= cap:
        return hw
    cand = [t for t in range(SUBLANE, (cap // SUBLANE) * SUBLANE + 1, SUBLANE)
            if hw % t == 0]
    return max(cand) if cand else hw


@jax.jit
def embed_gnn_head(x_bhwc, params):
    """x_bhwc: [B, H, W, C] (NHWC, ideally bf16) post-backbone feature map."""
    B, H, W, C = x_bhwc.shape
    hw = H * W
    low_dim = params["w"].shape[1]
    n_pad = max(LANE, pl.cdiv(low_dim, LANE) * LANE)

    x = x_bhwc.reshape(B, hw, C)          # collapse H,W: layout no-op, no transpose
    w_f, b_f = _fold_bn(params, n_pad)

    tb = _pick_batch_tile(B)
    thw = _pick_spatial_tile(hw, tb, C)
    grid = (B // tb, hw // thw)

    out_feat, out_vec = pl.pallas_call(
        head_kernel,
        grid=grid,
        in_specs=[
            pl.BlockSpec((tb, thw, C), lambda i, k: (i, k, 0)),   # feature map (bf16)
            pl.BlockSpec((C, n_pad), lambda i, k: (0, 0)),        # folded linear weight
            pl.BlockSpec((1, n_pad), lambda i, k: (0, 0)),        # folded linear bias
        ],
        out_specs=[
            pl.BlockSpec((tb, C), lambda i, k: (i, 0)),
            pl.BlockSpec((tb, n_pad), lambda i, k: (i, 0)),
        ],
        out_shape=(
            jax.ShapeDtypeStruct((B, C), jnp.float32),
            jax.ShapeDtypeStruct((B, n_pad), jnp.float32),
        ),
        scratch_shapes=[pltpu.VMEM((tb, C), jnp.float32)],        # running-max acc
        compiler_params=pltpu.CompilerParams(
            dimension_semantics=("parallel", "arbitrary"),
            vmem_limit_bytes=32 * 1024 * 1024),
    )(x, w_f, b_f)
    return out_feat, out_vec[:, :low_dim]


def _reference(x_bhwc, params):
    """Module-faithful reference: AdaptiveMaxPool2d + Linear + BN(eval) + l2norm."""
    x = x_bhwc.astype(jnp.float32)
    pooled = jnp.max(x, axis=(1, 2))                              # [B, C]
    y = pooled @ params["w"] + params["b"]
    y = (y - params["running_mean"]) / jnp.sqrt(params["running_var"] + BN_EPS)
    y = y * params["gamma"] + params["beta"]
    out_vec = y / jnp.sqrt(jnp.sum(y * y, axis=-1, keepdims=True))
    out_feat = pooled / jnp.sqrt(jnp.sum(pooled * pooled, axis=-1, keepdims=True))
    return out_feat, out_vec


if __name__ == "__main__":
    key = jax.random.PRNGKey(0)
    k_sar, k_opt, k_w, k_g = jax.random.split(key, 4)

    batch, H, W = 2, 16, 16   # HW=256 -> two spatial blocks: exercises the max accumulator

    # TODO(synk): the pretrained ResNet50 backbones (opt_net / sar_net /
    # common_layers) are not re-implemented; the kernel starts from the
    # post-backbone feature map, kept in NHWC bf16 (what a JAX backbone would
    # naturally emit) so no transpose / upcast is needed before the kernel.
    data = {
        "sar": {"feat": jax.nn.relu(jax.random.normal(
            k_sar, (batch, H, W, POOL_DIM), jnp.float32)).astype(jnp.bfloat16)},
        "opt": {"feat": jax.nn.relu(jax.random.normal(
            k_opt, (batch, H, W, POOL_DIM), jnp.float32)).astype(jnp.bfloat16)},
    }

    # Parameters per FeatureBlock / weights_init_kaiming:
    #   Linear(2048, low_dim): kaiming_normal_(mode='fan_out') weight, zero bias
    #   BatchNorm1d(low_dim): gamma ~ N(1, 0.02), beta = 0, running stats (0, 1)
    params = {
        "w": jax.random.normal(k_w, (POOL_DIM, LOW_DIM), jnp.float32)
             * jnp.sqrt(2.0 / LOW_DIM),
        "b": jnp.zeros((1, LOW_DIM), jnp.float32),
        "gamma": 1.0 + 0.02 * jax.random.normal(k_g, (1, LOW_DIM), jnp.float32),
        "beta": jnp.zeros((1, LOW_DIM), jnp.float32),
        "running_mean": jnp.zeros((1, LOW_DIM), jnp.float32),
        "running_var": jnp.ones((1, LOW_DIM), jnp.float32),
    }

    # The module forward concatenates all modalities along the batch axis
    # before the shared head, then splits the results back per modality.
    x_all = jnp.concatenate([data[k]["feat"] for k in data], axis=0)

    out_feat, out_vec = embed_gnn_head(x_all, params)
    jax.block_until_ready((out_feat, out_vec))

    for i, k in enumerate(data):
        data[k]["out_feat"] = out_feat[i * batch:(i + 1) * batch]
        data[k]["out_vec"] = out_vec[i * batch:(i + 1) * batch]

    ref_feat, ref_vec = _reference(x_all, params)
    # Pool + l2norm path is near-exact.
    assert jnp.allclose(out_feat, ref_feat, atol=1e-4, rtol=1e-4)
    # out_vec goes through the MXU at default f32 precision with BN folded into
    # the linear (reassociated vs. the unfused XLA reference) -> slightly looser.
    assert jnp.allclose(out_vec, ref_vec, atol=2e-3, rtol=2e-3)

    print("KERNEL_OK")
</pallas_src>

<mosaic_0001>
module attributes {stable_mosaic.version = 11 : i64} {
  func.func @head_kernel(%arg0: i32, %arg1: i32, %arg2: memref<4x128x2048xbf16, #tpu.memory_space<vmem>>, %arg3: memref<2048x128xf32, #tpu.memory_space<vmem>>, %arg4: memref<1x128xf32, #tpu.memory_space<vmem>>, %arg5: memref<4x2048xf32, #tpu.memory_space<vmem>>, %arg6: memref<4x128xf32, #tpu.memory_space<vmem>>, %arg7: memref<4x2048xf32, #tpu.memory_space<vmem>>) attributes {dimension_semantics = [#tpu.dimension_semantics<parallel>, #tpu.dimension_semantics<arbitrary>], iteration_bounds = array<i64: 1, 2>, scalar_prefetch = 0 : i64, scratch_operands = 1 : i64, tpu.core_type = #tpu.core_type<tc>, window_params = [{transform_indices = @transform_0, window_bounds = array<i64: 4, 128, 2048>}, {pipeline_mode = #tpu.pipeline_mode<synchronous>, transform_indices = @transform_1, window_bounds = array<i64: 2048, 128>}, {pipeline_mode = #tpu.pipeline_mode<synchronous>, transform_indices = @transform_2, window_bounds = array<i64: 1, 128>}, {transform_indices = @transform_3, window_bounds = array<i64: 4, 2048>}, {transform_indices = @transform_4, window_bounds = array<i64: 4, 128>}]} {
    %c0_i32 = arith.constant 0 : i32
    %0 = arith.cmpi eq, %arg1, %c0_i32 : i32
    %1 = arith.extui %0 : i1 to i32
    %c0_i32_0 = arith.constant 0 : i32
    %2 = arith.cmpi ne, %1, %c0_i32_0 : i32
    scf.if %2 {
      %cst_8 = arith.constant 0xFF800000 : f32
      %12 = vector.broadcast %cst_8 : f32 to vector<4x2048xf32>
      %c0_9 = arith.constant 0 : index
      %c0_10 = arith.constant 0 : index
      %13 = vector.load %arg7[%c0_9, %c0_10] : memref<4x2048xf32, #tpu.memory_space<vmem>>, vector<4x2048xf32>
      tpu.vector_store %arg7[%c0_9, %c0_10], %12 {strides = array<i32>} : memref<4x2048xf32, #tpu.memory_space<vmem>>, vector<4x2048xf32>,
    } else {
    }
    %c0 = arith.constant 0 : index
    %c0_1 = arith.constant 0 : index
    %c0_2 = arith.constant 0 : index
    %3 = vector.load %arg2[%c0, %c0_1, %c0_2] : memref<4x128x2048xbf16, #tpu.memory_space<vmem>>, vector<4x128x2048xbf16>
    %4 = arith.extf %3 : vector<4x128x2048xbf16> to vector<4x128x2048xf32>
    %c0_3 = arith.constant 0 : index
    %c0_4 = arith.constant 0 : index
    %5 = vector.load %arg7[%c0_3, %c0_4] : memref<4x2048xf32, #tpu.memory_space<vmem>>, vector<4x2048xf32>
    %cst = arith.constant dense<0xFF800000> : vector<4x2048xf32>
    %6 = vector.multi_reduction <maximumf>, %4, %cst [1] : vector<4x128x2048xf32> to vector<4x2048xf32>
    %7 = arith.maximumf %5, %6 : vector<4x2048xf32>
    %c0_5 = arith.constant 0 : index
    %c0_6 = arith.constant 0 : index
    %8 = vector.load %arg7[%c0_5, %c0_6] : memref<4x2048xf32, #tpu.memory_space<vmem>>, vector<4x2048xf32>
    tpu.vector_store %arg7[%c0_5, %c0_6], %7 {strides = array<i32>} : memref<4x2048xf32, #tpu.memory_space<vmem>>, vector<4x2048xf32>,
    %c1_i32 = arith.constant 1 : i32
    %9 = arith.cmpi eq, %arg1, %c1_i32 : i32
    %10 = arith.extui %9 : i1 to i32
    %c0_i32_7 = arith.constant 0 : i32
    %11 = arith.cmpi ne, %10, %c0_i32_7 : i32
    scf.if %11 {
      %c0_8 = arith.constant 0 : index
      %c0_9 = arith.constant 0 : index
      %12 = vector.load %arg7[%c0_8, %c0_9] : memref<4x2048xf32, #tpu.memory_space<vmem>>, vector<4x2048xf32>
      %13 = arith.mulf %12, %12 : vector<4x2048xf32>
      %cst_10 = arith.constant dense<0.000000e+00> : vector<4xf32>
      %14 = vector.multi_reduction <add>, %13, %cst_10 [1] : vector<4x2048xf32> to vector<4xf32>
      %15 = vector.shape_cast %14 : vector<4xf32> to vector<4x1xf32>
      %16 = math.rsqrt %15 : vector<4x1xf32>
      %17 = vector.broadcast %16 : vector<4x1xf32> to vector<4x2048xf32>
      %18 = arith.mulf %12, %17 : vector<4x2048xf32>
      %c0_11 = arith.constant 0 : index
      %c0_12 = arith.constant 0 : index
      %19 = vector.load %arg5[%c0_11, %c0_12] : memref<4x2048xf32, #tpu.memory_space<vmem>>, vector<4x2048xf32>
      tpu.vector_store %arg5[%c0_11, %c0_12], %18 {strides = array<i32>} : memref<4x2048xf32, #tpu.memory_space<vmem>>, vector<4x2048xf32>,
      %c0_13 = arith.constant 0 : index
      %c0_14 = arith.constant 0 : index
      %20 = vector.load %arg3[%c0_13, %c0_14] : memref<2048x128xf32, #tpu.memory_space<vmem>>, vector<2048x128xf32>
      %cst_15 = arith.constant dense<0.000000e+00> : vector<4x128xf32>
      %21 = tpu.matmul %12, %20, %cst_15 {dimension_numbers = #tpu.dot_dimension_numbers<[1], [0], [0], [1], [0, 0, 1, 1], [], []>} : vector<4x2048xf32>, vector<2048x128xf32>, vector<4x128xf32> -> vector<4x128xf32>
      %c0_16 = arith.constant 0 : index
      %c0_17 = arith.constant 0 : index
      %22 = vector.load %arg4[%c0_16, %c0_17] : memref<1x128xf32, #tpu.memory_space<vmem>>, vector<1x128xf32>
      %23 = vector.broadcast %22 : vector<1x128xf32> to vector<4x128xf32>
      %24 = arith.addf %21, %23 : vector<4x128xf32>
      %25 = arith.mulf %24, %24 : vector<4x128xf32>
      %cst_18 = arith.constant dense<0.000000e+00> : vector<4xf32>
      %26 = vector.multi_reduction <add>, %25, %cst_18 [1] : vector<4x128xf32> to vector<4xf32>
      %27 = vector.shape_cast %26 : vector<4xf32> to vector<4x1xf32>
      %28 = math.rsqrt %27 : vector<4x1xf32>
      %29 = vector.broadcast %28 : vector<4x1xf32> to vector<4x128xf32>
      %30 = arith.mulf %24, %29 : vector<4x128xf32>
      %c0_19 = arith.constant 0 : index
      %c0_20 = arith.constant 0 : index
      %31 = vector.load %arg6[%c0_19, %c0_20] : memref<4x128xf32, #tpu.memory_space<vmem>>, vector<4x128xf32>
      tpu.vector_store %arg6[%c0_19, %c0_20], %30 {strides = array<i32>} : memref<4x128xf32, #tpu.memory_space<vmem>>, vector<4x128xf32>,
    } else {
    }
    return
  }
  func.func @transform_0(%arg0: i32, %arg1: i32) -> (i32, i32, i32) {
    %c0_i32 = arith.constant 0 : i32
    %c0_i32_0 = arith.constant 0 : i32
    return %arg0, %arg1, %c0_i32 : i32, i32, i32
  }
  func.func @transform_1(%arg0: i32, %arg1: i32) -> (i32, i32) {
    %c0_i32 = arith.constant 0 : i32
    %c0_i32_0 = arith.constant 0 : i32
    %c0_i32_1 = arith.constant 0 : i32
    return %c0_i32, %c0_i32_0 : i32, i32
  }
  func.func @transform_2(%arg0: i32, %arg1: i32) -> (i32, i32) {
    %c0_i32 = arith.constant 0 : i32
    %c0_i32_0 = arith.constant 0 : i32
    %c0_i32_1 = arith.constant 0 : i32
    return %c0_i32, %c0_i32_0 : i32, i32
  }
  func.func @transform_3(%arg0: i32, %arg1: i32) -> (i32, i32) {
    %c0_i32 = arith.constant 0 : i32
    %c0_i32_0 = arith.constant 0 : i32
    return %arg0, %c0_i32 : i32, i32
  }
  func.func @transform_4(%arg0: i32, %arg1: i32) -> (i32, i32) {
    %c0_i32 = arith.constant 0 : i32
    %c0_i32_0 = arith.constant 0 : i32
    return %arg0, %c0_i32 : i32, i32
  }
}

</mosaic_0001>

<bundles_post_ra>
// kernel: embed_gnn_head.1
= control target key start
LH: loop header
LB: loop body
LE: loop exit
PB: predicated region body
PF: predicated region fallthrough
CT: control target
= control target key end

     0   :  { %10 = vsyncpa [#allocation5], 0  ;;  %s9419_s0 = inlined_call_operand.vmem [shape: bf16[4,256,2048], index: 0, kind: input, shape index: {}]   ;;  %s9420_s1 = inlined_call_operand.vmem [shape: f32[2048,128], index: 1, kind: input, shape index: {}]   ;;  %s9421_s2 = inlined_call_operand.vmem [shape: f32[1,128], index: 2, kind: input, shape index: {}]   ;;  %s9422_s3 = inlined_call_operand.hbm [shape: f32[4,2048], index: 3, kind: output, shape index: {0}]   ;;  %s9423_s4 = inlined_call_operand.hbm [shape: f32[4,128], index: 4, kind: output, shape index: {1}]  }
   0x1   :  { %11 = vsyncpa [#allocation7], 0  ;;  %s5901_s15 = smov 0   ;;  %s5903_s16 = smov 0  }
   0x2   :  { %s5905_s17 = smov 0   ;;  %s5907_s18 = smov 0  }
   0x3   :  { %s5909_s19 = smov 0  }
   0x4 LB: > { %s5406_s20 = sadd.s32 4294967295, %s5870_s19   ;;  %s26_s21 = sadd.s32 1, %s5866_s18  ;;  %s5870_s19 = sphi %s5909_s19, %s17_s19   ;;  %s5866_s18 = sphi %s5907_s18, %s9923_s18   ;;  %s5862_s17 = sphi %s5905_s17, %s9922_s17   ;;  %s5858_s16 = sphi %s5903_s16, %s9921_s16   ;;  %s5854_s15 = sphi %s5901_s15, %s9920_s15  }
   0x5   : > { %p27_p0 = scmp.ge.s32.totalorder %s26_s21, 2  ;;  %p45_p1 = scmp.ne.s32.totalorder %s5858_s16, %s5854_s15 }
   0x6   : > { %p46_p2 = scmp.eq.s32.totalorder %s5870_s19, 0  ;;  %s38_s23 = sadd.s32 1, %s5858_s16 }
   0x7   : > { %s9925_s21 = smov (%p27_p0, %s26_s21), 0  ;;  %p5408_p5 = scmp.ge.s32.totalorder %s5870_s19, 2 }
   0x8   : > { %p47_p3 = por %p46_p2, %p45_p1  ;;  %s34_s22 = ssub.s32 %s5866_s18, %s9925_s21 }
   0x9   : > { %p36_p4 = scmp.eq.s32.totalorder %s34_s22, 0  ;;  %171 = sbr.rel (%p5408_p5) target bundleno = 274 (0x112), region = 24 }
   0xb   : > { %s5937_s24 = scalar_select %p36_p4, %s5858_s16, %s38_s23  }
   0xe   : > { %174 = sbr.rel (!%p47_p3) target bundleno = 274 (0x112), region = 28  ;;  %s176_s25 = sand.u32 (%p47_p3), 1, %s5858_s16  }
   0xf   : > { %s5425_s26 = sshll.u32 (%p47_p3), %s5866_s18, 10  ;;  %s5409_s27 = sshll.u32 (%p47_p3), %s176_s25, 12 }
  0x10   : > { %s5945_s30 = scalar_lea.vmem (%p47_p3), %s9419_s0, %s5425_s26  ;;  %s5950_s5 = scalar_lea.vmem (%p47_p3), [#allocation3], %s5409_s27 }
  0x11   : > { %v198_v0 = vld [vmem:[%s5945_s30] sm:$0xff] (%p47_p3)  ;;  %v200_v1 = vld [vmem:[%s5945_s30 + $0x8] sm:$0xff] (%p47_p3)  ;;  %v202_v2 = vld [vmem:[%s5945_s30 + $0x10] sm:$0xff] (%p47_p3) }
  0x12   : > { %199 = vst [vmem:[%s5950_s5] sm:$0xff] (%p47_p3), %v198_v0  ;;  %201 = vst [vmem:[%s5950_s5 + $0x8] sm:$0xff] (%p47_p3), %v200_v1  ;;  %v204_v3 = vld [vmem:[%s5945_s30 + $0x18] sm:$0xff] (%p47_p3)  ;;  %v206_v4 = vld [vmem:[%s5945_s30 + $0x20] sm:$0xff] (%p47_p3) }
  0x13   : > { %203 = vst [vmem:[%s5950_s5 + $0x10] sm:$0xff] %v202_v2  ;;  %v208_v5 = vld [vmem:[%s5945_s30 + $0x28] sm:$0xff]  ;;  %205 = vst [vmem:[%s5950_s5 + $0x18] sm:$0xff] %v204_v3  ;;  %v210_v6 = vld [vmem:[%s5945_s30 + $0x30] sm:$0xff] }
  0x14   : > { %207 = vst [vmem:[%s5950_s5 + $0x20] sm:$0xff] %v206_v4  ;;  %209 = vst [vmem:[%s5950_s5 + $0x28] sm:$0xff] %v208_v5  ;;  %v212_v7 = vld [vmem:[%s5945_s30 + $0x38] sm:$0xff]  ;;  %v214_v8 = vld [vmem:[%s5945_s30 + $0x40] sm:$0xff] }
  0x15   : > { %211 = vst [vmem:[%s5950_s5 + $0x30] sm:$0xff] %v210_v6  ;;  %213 = vst [vmem:[%s5950_s5 + $0x38] sm:$0xff] %v212_v7  ;;  %v216_v9 = vld [vmem:[%s5945_s30 + $0x48] sm:$0xff]  ;;  %v218_v10 = vld [vmem:[%s5945_s30 + $0x50] sm:$0xff] }
  0x16   : > { %215 = vst [vmem:[%s5950_s5 + $0x40] sm:$0xff] %v214_v8  ;;  %v220_v11 = vld [vmem:[%s5945_s30 + $0x58] sm:$0xff]  ;;  %217 = vst [vmem:[%s5950_s5 + $0x48] sm:$0xff] %v216_v9  ;;  %v222_v12 = vld [vmem:[%s5945_s30 + $0x60] sm:$0xff] }
  0x17   : > { %219 = vst [vmem:[%s5950_s5 + $0x50] sm:$0xff] %v218_v10  ;;  %221 = vst [vmem:[%s5950_s5 + $0x58] sm:$0xff] %v220_v11  ;;  %v224_v13 = vld [vmem:[%s5945_s30 + $0x68] sm:$0xff]  ;;  %v226_v14 = vld [vmem:[%s5945_s30 + $0x70] sm:$0xff] }
  0x18   : > { %223 = vst [vmem:[%s5950_s5 + $0x60] sm:$0xff] %v222_v12  ;;  %225 = vst [vmem:[%s5950_s5 + $0x68] sm:$0xff] %v224_v13  ;;  %v228_v15 = vld [vmem:[%s5945_s30 + $0x78] sm:$0xff]  ;;  %v230_v16 = vld [vmem:[%s5945_s30 + $0x80] sm:$0xff] }
  0x19   : > { %227 = vst [vmem:[%s5950_s5 + $0x70] sm:$0xff] %v226_v14  ;;  %v232_v17 = vld [vmem:[%s5945_s30 + $0x88] sm:$0xff]  ;;  %229 = vst [vmem:[%s5950_s5 + $0x78] sm:$0xff] %v228_v15  ;;  %v234_v18 = vld [vmem:[%s5945_s30 + $0x90] sm:$0xff] }
  0x1a   : > { %231 = vst [vmem:[%s5950_s5 + $0x80] sm:$0xff] %v230_v16  ;;  %233 = vst [vmem:[%s5950_s5 + $0x88] sm:$0xff] %v232_v17  ;;  %v236_v19 = vld [vmem:[%s5945_s30 + $0x98] sm:$0xff]  ;;  %v238_v20 = vld [vmem:[%s5945_s30 + $0xa0] sm:$0xff] }
  0x1b   : > { %235 = vst [vmem:[%s5950_s5 + $0x90] sm:$0xff] %v234_v18  ;;  %237 = vst [vmem:[%s5950_s5 + $0x98] sm:$0xff] %v236_v19  ;;  %v240_v21 = vld [vmem:[%s5945_s30 + $0xa8] sm:$0xff]  ;;  %v242_v22 = vld [vmem:[%s5945_s30 + $0xb0] sm:$0xff] }
  0x1c   : > { %239 = vst [vmem:[%s5950_s5 + $0xa0] sm:$0xff] %v238_v20  ;;  %v244_v23 = vld [vmem:[%s5945_s30 + $0xb8] sm:$0xff]  ;;  %241 = vst [vmem:[%s5950_s5 + $0xa8] sm:$0xff] %v240_v21  ;;  %v246_v24 = vld [vmem:[%s5945_s30 + $0xc0] sm:$0xff] }
  0x1d   : > { %243 = vst [vmem:[%s5950_s5 + $0xb0] sm:$0xff] %v242_v22  ;;  %245 = vst [vmem:[%s5950_s5 + $0xb8] sm:$0xff] %v244_v23  ;;  %v248_v25 = vld [vmem:[%s5945_s30 + $0xc8] sm:$0xff]  ;;  %v250_v26 = vld [vmem:[%s5945_s30 + $0xd0] sm:$0xff] }
  0x1e   : > { %247 = vst [vmem:[%s5950_s5 + $0xc0] sm:$0xff] %v246_v24  ;;  %249 = vst [vmem:[%s5950_s5 + $0xc8] sm:$0xff] %v248_v25  ;;  %v252_v27 = vld [vmem:[%s5945_s30 + $0xd8] sm:$0xff]  ;;  %v254_v28 = vld [vmem:[%s5945_s30 + $0xe0] sm:$0xff] }
  0x1f   : > { %251 = vst [vmem:[%s5950_s5 + $0xd0] sm:$0xff] %v250_v26  ;;  %v256_v29 = vld [vmem:[%s5945_s30 + $0xe8] sm:$0xff]  ;;  %253 = vst [vmem:[%s5950_s5 + $0xd8] sm:$0xff] %v252_v27  ;;  %v258_v30 = vld [vmem:[%s5945_s30 + $0xf0] sm:$0xff] }
  0x20   : > { %255 = vst [vmem:[%s5950_s5 + $0xe0] sm:$0xff] %v254_v28  ;;  %257 = vst [vmem:[%s5950_s5 + $0xe8] sm:$0xff] %v256_v29  ;;  %v260_v31 = vld [vmem:[%s5945_s30 + $0xf8] sm:$0xff]  ;;  %v262_v32 = vld [vmem:[%s5945_s30 + $0x100] sm:$0xff] }
  0x21   : > { %259 = vst [vmem:[%s5950_s5 + $0xf0] sm:$0xff] %v258_v30  ;;  %261 = vst [vmem:[%s5950_s5 + $0xf8] sm:$0xff] %v260_v31  ;;  %v264_v33 = vld [vmem:[%s5945_s30 + $0x108] sm:$0xff]  ;;  %v266_v34 = vld [vmem:[%s5945_s30 + $0x110] sm:$0xff] }
  0x22   : > { %263 = vst [vmem:[%s5950_s5 + $0x100] sm:$0xff] %v262_v32  ;;  %v268_v35 = vld [vmem:[%s5945_s30 + $0x118] sm:$0xff]  ;;  %265 = vst [vmem:[%s5950_s5 + $0x108] sm:$0xff] %v264_v33  ;;  %v270_v36 = vld [vmem:[%s5945_s30 + $0x120] sm:$0xff] }
  0x23   : > { %267 = vst [vmem:[%s5950_s5 + $0x110] sm:$0xff] %v266_v34  ;;  %269 = vst [vmem:[%s5950_s5 + $0x118] sm:$0xff] %v268_v35  ;;  %v272_v37 = vld [vmem:[%s5945_s30 + $0x128] sm:$0xff]  ;;  %v274_v38 = vld [vmem:[%s5945_s30 + $0x130] sm:$0xff] }
  0x24   : > { %271 = vst [vmem:[%s5950_s5 + $0x120] sm:$0xff] %v270_v36  ;;  %273 = vst [vmem:[%s5950_s5 + $0x128] sm:$0xff] %v272_v37  ;;  %v276_v39 = vld [vmem:[%s5945_s30 + $0x138] sm:$0xff]  ;;  %v278_v40 = vld [vmem:[%s5945_s30 + $0x140] sm:$0xff] }
  0x25   : > { %275 = vst [vmem:[%s5950_s5 + $0x130] sm:$0xff] %v274_v38  ;;  %v280_v41 = vld [vmem:[%s5945_s30 + $0x148] sm:$0xff]  ;;  %277 = vst [vmem:[%s5950_s5 + $0x138] sm:$0xff] %v276_v39  ;;  %v282_v42 = vld [vmem:[%s5945_s30 + $0x150] sm:$0xff] }
  0x26   : > { %279 = vst [vmem:[%s5950_s5 + $0x140] sm:$0xff] %v278_v40  ;;  %281 = vst [vmem:[%s5950_s5 + $0x148] sm:$0xff] %v280_v41  ;;  %v284_v43 = vld [vmem:[%s5945_s30 + $0x158] sm:$0xff]  ;;  %v286_v44 = vld [vmem:[%s5945_s30 + $0x160] sm:$0xff] }
  0x27   : > { %283 = vst [vmem:[%s5950_s5 + $0x150] sm:$0xff] %v282_v42  ;;  %285 = vst [vmem:[%s5950_s5 + $0x158] sm:$0xff] %v284_v43  ;;  %v288_v45 = vld [vmem:[%s5945_s30 + $0x168] sm:$0xff]  ;;  %v290_v46 = vld [vmem:[%s5945_s30 + $0x170] sm:$0xff] }
  0x28   : > { %287 = vst [vmem:[%s5950_s5 + $0x160] sm:$0xff] %v286_v44  ;;  %v292_v47 = vld [vmem:[%s5945_s30 + $0x178] sm:$0xff]  ;;  %289 = vst [vmem:[%s5950_s5 + $0x168] sm:$0xff] %v288_v45  ;;  %v294_v48 = vld [vmem:[%s5945_s30 + $0x180] sm:$0xff] }
  0x29   : > { %291 = vst [vmem:[%s5950_s5 + $0x170] sm:$0xff] %v290_v46  ;;  %293 = vst [vmem:[%s5950_s5 + $0x178] sm:$0xff] %v292_v47  ;;  %v296_v49 = vld [vmem:[%s5945_s30 + $0x188] sm:$0xff]  ;;  %v298_v50 = vld [vmem:[%s5945_s30 + $0x190] sm:$0xff] }
  0x2a   : > { %295 = vst [vmem:[%s5950_s5 + $0x180] sm:$0xff] %v294_v48  ;;  %297 = vst [vmem:[%s5950_s5 + $0x188] sm:$0xff] %v296_v49  ;;  %v300_v51 = vld [vmem:[%s5945_s30 + $0x198] sm:$0xff]  ;;  %v302_v52 = vld [vmem:[%s5945_s30 + $0x1a0] sm:$0xff] }
  0x2b   : > { %299 = vst [vmem:[%s5950_s5 + $0x190] sm:$0xff] %v298_v50  ;;  %v304_v53 = vld [vmem:[%s5945_s30 + $0x1a8] sm:$0xff]  ;;  %301 = vst [vmem:[%s5950_s5 + $0x198] sm:$0xff] %v300_v51  ;;  %v306_v54 = vld [vmem:[%s5945_s30 + $0x1b0] sm:$0xff] }
  0x2c   : > { %303 = vst [vmem:[%s5950_s5 + $0x1a0] sm:$0xff] %v302_v52  ;;  %305 = vst [vmem:[%s5950_s5 + $0x1a8] sm:$0xff] %v304_v53  ;;  %v308_v55 = vld [vmem:[%s5945_s30 + $0x1b8] sm:$0xff]  ;;  %v310_v56 = vld [vmem:[%s5945_s30 + $0x1c0] sm:$0xff] }
  0x2d   : > { %307 = vst [vmem:[%s5950_s5 + $0x1b0] sm:$0xff] %v306_v54  ;;  %309 = vst [vmem:[%s5950_s5 + $0x1b8] sm:$0xff] %v308_v55  ;;  %v312_v57 = vld [vmem:[%s5945_s30 + $0x1c8] sm:$0xff]  ;;  %v314_v58 = vld [vmem:[%s5945_s30 + $0x1d0] sm:$0xff] }
  0x2e   : > { %311 = vst [vmem:[%s5950_s5 + $0x1c0] sm:$0xff] %v310_v56  ;;  %v316_v59 = vld [vmem:[%s5945_s30 + $0x1d8] sm:$0xff]  ;;  %313 = vst [vmem:[%s5950_s5 + $0x1c8] sm:$0xff] %v312_v57  ;;  %v318_v60 = vld [vmem:[%s5945_s30 + $0x1e0] sm:$0xff] }
  0x2f   : > { %315 = vst [vmem:[%s5950_s5 + $0x1d0] sm:$0xff] %v314_v58  ;;  %317 = vst [vmem:[%s5950_s5 + $0x1d8] sm:$0xff] %v316_v59  ;;  %v320_v61 = vld [vmem:[%s5945_s30 + $0x1e8] sm:$0xff]  ;;  %v322_v62 = vld [vmem:[%s5945_s30 + $0x1f0] sm:$0xff] }
  0x30   : > { %319 = vst [vmem:[%s5950_s5 + $0x1e0] sm:$0xff] %v318_v60  ;;  %321 = vst [vmem:[%s5950_s5 + $0x1e8] sm:$0xff] %v320_v61  ;;  %v324_v63 = vld [vmem:[%s5945_s30 + $0x1f8] sm:$0xff]  ;;  %v326_v0 = vld [vmem:[%s5945_s30 + $0x200] sm:$0xff] }
  0x31   : > { %323 = vst [vmem:[%s5950_s5 + $0x1f0] sm:$0xff] %v322_v62  ;;  %v328_v1 = vld [vmem:[%s5945_s30 + $0x208] sm:$0xff]  ;;  %325 = vst [vmem:[%s5950_s5 + $0x1f8] sm:$0xff] %v324_v63  ;;  %v330_v2 = vld [vmem:[%s5945_s30 + $0x210] sm:$0xff] }
  0x32   : > { %327 = vst [vmem:[%s5950_s5 + $0x200] sm:$0xff] %v326_v0  ;;  %329 = vst [vmem:[%s5950_s5 + $0x208] sm:$0xff] %v328_v1  ;;  %v332_v3 = vld [vmem:[%s5945_s30 + $0x218] sm:$0xff]  ;;  %v334_v4 = vld [vmem:[%s5945_s30 + $0x220] sm:$0xff] }
  0x33   : > { %331 = vst [vmem:[%s5950_s5 + $0x210] sm:$0xff] %v330_v2  ;;  %333 = vst [vmem:[%s5950_s5 + $0x218] sm:$0xff] %v332_v3  ;;  %v336_v5 = vld [vmem:[%s5945_s30 + $0x228] sm:$0xff]  ;;  %v338_v6 = vld [vmem:[%s5945_s30 + $0x230] sm:$0xff] }
  0x34   : > { %335 = vst [vmem:[%s5950_s5 + $0x220] sm:$0xff] %v334_v4  ;;  %v340_v7 = vld [vmem:[%s5945_s30 + $0x238] sm:$0xff]  ;;  %337 = vst [vmem:[%s5950_s5 + $0x228] sm:$0xff] %v336_v5  ;;  %v342_v8 = vld [vmem:[%s5945_s30 + $0x240] sm:$0xff] }
  0x35   : > { %339 = vst [vmem:[%s5950_s5 + $0x230] sm:$0xff] %v338_v6  ;;  %341 = vst [vmem:[%s5950_s5 + $0x238] sm:$0xff] %v340_v7  ;;  %v344_v9 = vld [vmem:[%s5945_s30 + $0x248] sm:$0xff]  ;;  %v346_v10 = vld [vmem:[%s5945_s30 + $0x250] sm:$0xff] }
  0x36   : > { %343 = vst [vmem:[%s5950_s5 + $0x240] sm:$0xff] %v342_v8  ;;  %345 = vst [vmem:[%s5950_s5 + $0x248] sm:$0xff] %v344_v9  ;;  %v348_v11 = vld [vmem:[%s5945_s30 + $0x258] sm:$0xff]  ;;  %v350_v12 = vld [vmem:[%s5945_s30 + $0x260] sm:$0xff] }
  0x37   : > { %347 = vst [vmem:[%s5950_s5 + $0x250] sm:$0xff] %v346_v10  ;;  %v352_v13 = vld [vmem:[%s5945_s30 + $0x268] sm:$0xff]  ;;  %349 = vst [vmem:[%s5950_s5 + $0x258] sm:$0xff] %v348_v11  ;;  %v354_v14 = vld [vmem:[%s5945_s30 + $0x270] sm:$0xff] }
  0x38   : > { %351 = vst [vmem:[%s5950_s5 + $0x260] sm:$0xff] %v350_v12  ;;  %353 = vst [vmem:[%s5950_s5 + $0x268] sm:$0xff] %v352_v13  ;;  %v356_v15 = vld [vmem:[%s5945_s30 + $0x278] sm:$0xff]  ;;  %v358_v16 = vld [vmem:[%s5945_s30 + $0x280] sm:$0xff] }
  0x39   : > { %355 = vst [vmem:[%s5950_s5 + $0x270] sm:$0xff] %v354_v14  ;;  %357 = vst [vmem:[%s5950_s5 + $0x278] sm:$0xff] %v356_v15  ;;  %v360_v17 = vld [vmem:[%s5945_s30 + $0x288] sm:$0xff]  ;;  %v362_v18 = vld [vmem:[%s5945_s30 + $0x290] sm:$0xff] }
  0x3a   : > { %359 = vst [vmem:[%s5950_s5 + $0x280] sm:$0xff] %v358_v16  ;;  %v364_v19 = vld [vmem:[%s5945_s30 + $0x298] sm:$0xff]  ;;  %361 = vst [vmem:[%s5950_s5 + $0x288] sm:$0xff] %v360_v17  ;;  %v366_v20 = vld [vmem:[%s5945_s30 + $0x2a0] sm:$0xff] }
  0x3b   : > { %363 = vst [vmem:[%s5950_s5 + $0x290] sm:$0xff] %v362_v18  ;;  %365 = vst [vmem:[%s5950_s5 + $0x298] sm:$0xff] %v364_v19  ;;  %v368_v21 = vld [vmem:[%s5945_s30 + $0x2a8] sm:$0xff]  ;;  %v370_v22 = vld [vmem:[%s5945_s30 + $0x2b0] sm:$0xff] }
  0x3c   : > { %367 = vst [vmem:[%s5950_s5 + $0x2a0] sm:$0xff] %v366_v20  ;;  %369 = vst [vmem:[%s5950_s5 + $0x2a8] sm:$0xff] %v368_v21  ;;  %v372_v23 = vld [vmem:[%s5945_s30 + $0x2b8] sm:$0xff]  ;;  %v374_v24 = vld [vmem:[%s5945_s30 + $0x2c0] sm:$0xff] }
  0x3d   : > { %371 = vst [vmem:[%s5950_s5 + $0x2b0] sm:$0xff] %v370_v22  ;;  %v376_v25 = vld [vmem:[%s5945_s30 + $0x2c8] sm:$0xff]  ;;  %373 = vst [vmem:[%s5950_s5 + $0x2b8] sm:$0xff] %v372_v23  ;;  %v378_v26 = vld [vmem:[%s5945_s30 + $0x2d0] sm:$0xff] }
  0x3e   : > { %375 = vst [vmem:[%s5950_s5 + $0x2c0] sm:$0xff] %v374_v24  ;;  %377 = vst [vmem:[%s5950_s5 + $0x2c8] sm:$0xff] %v376_v25  ;;  %v380_v27 = vld [vmem:[%s5945_s30 + $0x2d8] sm:$0xff]  ;;  %v382_v28 = vld [vmem:[%s5945_s30 + $0x2e0] sm:$0xff] }
  0x3f   : > { %379 = vst [vmem:[%s5950_s5 + $0x2d0] sm:$0xff] %v378_v26  ;;  %381 = vst [vmem:[%s5950_s5 + $0x2d8] sm:$0xff] %v380_v27  ;;  %v384_v29 = vld [vmem:[%s5945_s30 + $0x2e8] sm:$0xff]  ;;  %v386_v30 = vld [vmem:[%s5945_s30 + $0x2f0] sm:$0xff] }
  0x40   : > { %383 = vst [vmem:[%s5950_s5 + $0x2e0] sm:$0xff] %v382_v28  ;;  %v388_v31 = vld [vmem:[%s5945_s30 + $0x2f8] sm:$0xff]  ;;  %385 = vst [vmem:[%s5950_s5 + $0x2e8] sm:$0xff] %v384_v29  ;;  %v390_v32 = vld [vmem:[%s5945_s30 + $0x300] sm:$0xff] }
  0x41   : > { %387 = vst [vmem:[%s5950_s5 + $0x2f0] sm:$0xff] %v386_v30  ;;  %389 = vst [vmem:[%s5950_s5 + $0x2f8] sm:$0xff] %v388_v31  ;;  %v392_v33 = vld [vmem:[%s5945_s30 + $0x308] sm:$0xff]  ;;  %v394_v34 = vld [vmem:[%s5945_s30 + $0x310] sm:$0xff] }
  0x42   : > { %391 = vst [vmem:[%s5950_s5 + $0x300] sm:$0xff] %v390_v32  ;;  %393 = vst [vmem:[%s5950_s5 + $0x308] sm:$0xff] %v392_v33  ;;  %v396_v35 = vld [vmem:[%s5945_s30 + $0x318] sm:$0xff]  ;;  %v398_v36 = vld [vmem:[%s5945_s30 + $0x320] sm:$0xff] }
  0x43   : > { %395 = vst [vmem:[%s5950_s5 + $0x310] sm:$0xff] %v394_v34  ;;  %v400_v37 = vld [vmem:[%s5945_s30 + $0x328] sm:$0xff]  ;;  %397 = vst [vmem:[%s5950_s5 + $0x318] sm:$0xff] %v396_v35  ;;  %v402_v38 = vld [vmem:[%s5945_s30 + $0x330] sm:$0xff] }
  0x44   : > { %399 = vst [vmem:[%s5950_s5 + $0x320] sm:$0xff] %v398_v36  ;;  %401 = vst [vmem:[%s5950_s5 + $0x328] sm:$0xff] %v400_v37  ;;  %v404_v39 = vld [vmem:[%s5945_s30 + $0x338] sm:$0xff]  ;;  %v406_v40 = vld [vmem:[%s5945_s30 + $0x340] sm:$0xff] }
  0x45   : > { %403 = vst [vmem:[%s5950_s5 + $0x330] sm:$0xff] %v402_v38  ;;  %405 = vst [vmem:[%s5950_s5 + $0x338] sm:$0xff] %v404_v39  ;;  %v408_v41 = vld [vmem:[%s5945_s30 + $0x348] sm:$0xff]  ;;  %v410_v42 = vld [vmem:[%s5945_s30 + $0x350] sm:$0xff] }
  0x46   : > { %407 = vst [vmem:[%s5950_s5 + $0x340] sm:$0xff] %v406_v40  ;;  %v412_v43 = vld [vmem:[%s5945_s30 + $0x358] sm:$0xff]  ;;  %409 = vst [vmem:[%s5950_s5 + $0x348] sm:$0xff] %v408_v41  ;;  %v414_v44 = vld [vmem:[%s5945_s30 + $0x360] sm:$0xff] }
  0x47   : > { %411 = vst [vmem:[%s5950_s5 + $0x350] sm:$0xff] %v410_v42  ;;  %413 = vst [vmem:[%s5950_s5 + $0x358] sm:$0xff] %v412_v43  ;;  %v416_v45 = vld [vmem:[%s5945_s30 + $0x368] sm:$0xff]  ;;  %v418_v46 = vld [vmem:[%s5945_s30 + $0x370] sm:$0xff] }
  0x48   : > { %415 = vst [vmem:[%s5950_s5 + $0x360] sm:$0xff] %v414_v44  ;;  %417 = vst [vmem:[%s5950_s5 + $0x368] sm:$0xff] %v416_v45  ;;  %v420_v47 = vld [vmem:[%s5945_s30 + $0x378] sm:$0xff]  ;;  %v422_v48 = vld [vmem:[%s5945_s30 + $0x380] sm:$0xff] }
  0x49   : > { %419 = vst [vmem:[%s5950_s5 + $0x370] sm:$0xff] %v418_v46  ;;  %v424_v49 = vld [vmem:[%s5945_s30 + $0x388] sm:$0xff]  ;;  %421 = vst [vmem:[%s5950_s5 + $0x378] sm:$0xff] %v420_v47  ;;  %v426_v50 = vld [vmem:[%s5945_s30 + $0x390] sm:$0xff] }
  0x4a   : > { %423 = vst [vmem:[%s5950_s5 + $0x380] sm:$0xff] %v422_v48  ;;  %425 = vst [vmem:[%s5950_s5 + $0x388] sm:$0xff] %v424_v49  ;;  %v428_v51 = vld [vmem:[%s5945_s30 + $0x398] sm:$0xff]  ;;  %v430_v52 = vld [vmem:[%s5945_s30 + $0x3a0] sm:$0xff] }
  0x4b   : > { %427 = vst [vmem:[%s5950_s5 + $0x390] sm:$0xff] %v426_v50  ;;  %429 = vst [vmem:[%s5950_s5 + $0x398] sm:$0xff] %v428_v51  ;;  %v432_v53 = vld [vmem:[%s5945_s30 + $0x3a8] sm:$0xff]  ;;  %v434_v54 = vld [vmem:[%s5945_s30 + $0x3b0] sm:$0xff] }
  0x4c   : > { %431 = vst [vmem:[%s5950_s5 + $0x3a0] sm:$0xff] %v430_v52  ;;  %v436_v55 = vld [vmem:[%s5945_s30 + $0x3b8] sm:$0xff]  ;;  %433 = vst [vmem:[%s5950_s5 + $0x3a8] sm:$0xff] %v432_v53  ;;  %v438_v56 = vld [vmem:[%s5945_s30 + $0x3c0] sm:$0xff] }
  0x4d   : > { %435 = vst [vmem:[%s5950_s5 + $0x3b0] sm:$0xff] %v434_v54  ;;  %437 = vst [vmem:[%s5950_s5 + $0x3b8] sm:$0xff] %v436_v55  ;;  %v440_v57 = vld [vmem:[%s5945_s30 + $0x3c8] sm:$0xff]  ;;  %v442_v58 = vld [vmem:[%s5945_s30 + $0x3d0] sm:$0xff] }
  0x4e   : > { %439 = vst [vmem:[%s5950_s5 + $0x3c0] sm:$0xff] %v438_v56  ;;  %441 = vst [vmem:[%s5950_s5 + $0x3c8] sm:$0xff] %v440_v57  ;;  %v444_v59 = vld [vmem:[%s5945_s30 + $0x3d8] sm:$0xff]  ;;  %v446_v60 = vld [vmem:[%s5945_s30 + $0x3e0] sm:$0xff] }
  0x4f   : > { %443 = vst [vmem:[%s5950_s5 + $0x3d0] sm:$0xff] %v442_v58  ;;  %v448_v61 = vld [vmem:[%s5945_s30 + $0x3e8] sm:$0xff]  ;;  %445 = vst [vmem:[%s5950_s5 + $0x3d8] sm:$0xff] %v444_v59  ;;  %v450_v62 = vld [vmem:[%s5945_s30 + $0x3f0] sm:$0xff] }
  0x50   : > { %447 = vst [vmem:[%s5950_s5 + $0x3e0] sm:$0xff] %v446_v60  ;;  %449 = vst [vmem:[%s5950_s5 + $0x3e8] sm:$0xff] %v448_v61  ;;  %v452_v63 = vld [vmem:[%s5945_s30 + $0x3f8] sm:$0xff]  ;;  %v454_v0 = vld [vmem:[%s5945_s30 + $0x800] sm:$0xff] }
  0x51   : > { %451 = vst [vmem:[%s5950_s5 + $0x3f0] sm:$0xff] %v450_v62  ;;  %453 = vst [vmem:[%s5950_s5 + $0x3f8] sm:$0xff] %v452_v63  ;;  %v456_v1 = vld [vmem:[%s5945_s30 + $0x808] sm:$0xff]  ;;  %v458_v2 = vld [vmem:[%s5945_s30 + $0x810] sm:$0xff] }
  0x52   : > { %455 = vst [vmem:[%s5950_s5 + $0x400] sm:$0xff] %v454_v0  ;;  %v460_v3 = vld [vmem:[%s5945_s30 + $0x818] sm:$0xff]  ;;  %457 = vst [vmem:[%s5950_s5 + $0x408] sm:$0xff] %v456_v1  ;;  %v462_v4 = vld [vmem:[%s5945_s30 + $0x820] sm:$0xff] }
  0x53   : > { %459 = vst [vmem:[%s5950_s5 + $0x410] sm:$0xff] %v458_v2  ;;  %461 = vst [vmem:[%s5950_s5 + $0x418] sm:$0xff] %v460_v3  ;;  %v464_v5 = vld [vmem:[%s5945_s30 + $0x828] sm:$0xff]  ;;  %v466_v6 = vld [vmem:[%s5945_s30 + $0x830] sm:$0xff] }
  0x54   : > { %463 = vst [vmem:[%s5950_s5 + $0x420] sm:$0xff] %v462_v4  ;;  %465 = vst [vmem:[%s5950_s5 + $0x428] sm:$0xff] %v464_v5  ;;  %v468_v7 = vld [vmem:[%s5945_s30 + $0x838] sm:$0xff]  ;;  %v470_v8 = vld [vmem:[%s5945_s30 + $0x840] sm:$0xff] }
  0x55   : > { %467 = vst [vmem:[%s5950_s5 + $0x430] sm:$0xff] %v466_v6  ;;  %v472_v9 = vld [vmem:[%s5945_s30 + $0x848] sm:$0xff]  ;;  %469 = vst [vmem:[%s5950_s5 + $0x438] sm:$0xff] %v468_v7  ;;  %v474_v10 = vld [vmem:[%s5945_s30 + $0x850] sm:$0xff] }
  0x56   : > { %471 = vst [vmem:[%s5950_s5 + $0x440] sm:$0xff] %v470_v8  ;;  %473 = vst [vmem:[%s5950_s5 + $0x448] sm:$0xff] %v472_v9  ;;  %v476_v11 = vld [vmem:[%s5945_s30 + $0x858] sm:$0xff]  ;;  %v478_v12 = vld [vmem:[%s5945_s30 + $0x860] sm:$0xff] }
  0x57   : > { %475 = vst [vmem:[%s5950_s5 + $0x450] sm:$0xff] %v474_v10  ;;  %477 = vst [vmem:[%s5950_s5 + $0x458] sm:$0xff] %v476_v11  ;;  %v480_v13 = vld [vmem:[%s5945_s30 + $0x868] sm:$0xff]  ;;  %v482_v14 = vld [vmem:[%s5945_s30 + $0x870] sm:$0xff] }
  0x58   : > { %479 = vst [vmem:[%s5950_s5 + $0x460] sm:$0xff] %v478_v12  ;;  %v484_v15 = vld [vmem:[%s5945_s30 + $0x878] sm:$0xff]  ;;  %481 = vst [vmem:[%s5950_s5 + $0x468] sm:$0xff] %v480_v13  ;;  %v486_v16 = vld [vmem:[%s5945_s30 + $0x880] sm:$0xff] }
  0x59   : > { %483 = vst [vmem:[%s5950_s5 + $0x470] sm:$0xff] %v482_v14  ;;  %485 = vst [vmem:[%s5950_s5 + $0x478] sm:$0xff] %v484_v15  ;;  %v488_v17 = vld [vmem:[%s5945_s30 + $0x888] sm:$0xff]  ;;  %v490_v18 = vld [vmem:[%s5945_s30 + $0x890] sm:$0xff] }
  0x5a   : > { %487 = vst [vmem:[%s5950_s5 + $0x480] sm:$0xff] %v486_v16  ;;  %489 = vst [vmem:[%s5950_s5 + $0x488] sm:$0xff] %v488_v17  ;;  %v492_v19 = vld [vmem:[%s5945_s30 + $0x898] sm:$0xff]  ;;  %v494_v20 = vld [vmem:[%s5945_s30 + $0x8a0] sm:$0xff] }
  0x5b   : > { %491 = vst [vmem:[%s5950_s5 + $0x490] sm:$0xff] %v490_v18  ;;  %v496_v21 = vld [vmem:[%s5945_s30 + $0x8a8] sm:$0xff]  ;;  %493 = vst [vmem:[%s5950_s5 + $0x498] sm:$0xff] %v492_v19  ;;  %v498_v22 = vld [vmem:[%s5945_s30 + $0x8b0] sm:$0xff] }
  0x5c   : > { %495 = vst [vmem:[%s5950_s5 + $0x4a0] sm:$0xff] %v494_v20  ;;  %497 = vst [vmem:[%s5950_s5 + $0x4a8] sm:$0xff] %v496_v21  ;;  %v500_v23 = vld [vmem:[%s5945_s30 + $0x8b8] sm:$0xff]  ;;  %v502_v24 = vld [vmem:[%s5945_s30 + $0x8c0] sm:$0xff] }
  0x5d   : > { %499 = vst [vmem:[%s5950_s5 + $0x4b0] sm:$0xff] %v498_v22  ;;  %501 = vst [vmem:[%s5950_s5 + $0x4b8] sm:$0xff] %v500_v23  ;;  %v504_v25 = vld [vmem:[%s5945_s30 + $0x8c8] sm:$0xff]  ;;  %v506_v26 = vld [vmem:[%s5945_s30 + $0x8d0] sm:$0xff] }
  0x5e   : > { %503 = vst [vmem:[%s5950_s5 + $0x4c0] sm:$0xff] %v502_v24  ;;  %v508_v27 = vld [vmem:[%s5945_s30 + $0x8d8] sm:$0xff]  ;;  %505 = vst [vmem:[%s5950_s5 + $0x4c8] sm:$0xff] %v504_v25  ;;  %v510_v28 = vld [vmem:[%s5945_s30 + $0x8e0] sm:$0xff] }
  0x5f   : > { %507 = vst [vmem:[%s5950_s5 + $0x4d0] sm:$0xff] %v506_v26  ;;  %509 = vst [vmem:[%s5950_s5 + $0x4d8] sm:$0xff] %v508_v27  ;;  %v512_v29 = vld [vmem:[%s5945_s30 + $0x8e8] sm:$0xff]  ;;  %v514_v30 = vld [vmem:[%s5945_s30 + $0x8f0] sm:$0xff] }
  0x60   : > { %511 = vst [vmem:[%s5950_s5 + $0x4e0] sm:$0xff] %v510_v28  ;;  %513 = vst [vmem:[%s5950_s5 + $0x4e8] sm:$0xff] %v512_v29  ;;  %v516_v31 = vld [vmem:[%s5945_s30 + $0x8f8] sm:$0xff]  ;;  %v518_v32 = vld [vmem:[%s5945_s30 + $0x900] sm:$0xff] }
  0x61   : > { %515 = vst [vmem:[%s5950_s5 + $0x4f0] sm:$0xff] %v514_v30  ;;  %v520_v33 = vld [vmem:[%s5945_s30 + $0x908] sm:$0xff]  ;;  %517 = vst [vmem:[%s5950_s5 + $0x4f8] sm:$0xff] %v516_v31  ;;  %v522_v34 = vld [vmem:[%s5945_s30 + $0x910] sm:$0xff] }
  0x62   : > { %519 = vst [vmem:[%s5950_s5 + $0x500] sm:$0xff] %v518_v32  ;;  %521 = vst [vmem:[%s5950_s5 + $0x508] sm:$0xff] %v520_v33  ;;  %v524_v35 = vld [vmem:[%s5945_s30 + $0x918] sm:$0xff]  ;;  %v526_v36 = vld [vmem:[%s5945_s30 + $0x920] sm:$0xff] }
  0x63   : > { %523 = vst [vmem:[%s5950_s5 + $0x510] sm:$0xff] %v522_v34  ;;  %525 = vst [vmem:[%s5950_s5 + $0x518] sm:$0xff] %v524_v35  ;;  %v528_v37 = vld [vmem:[%s5945_s30 + $0x928] sm:$0xff]  ;;  %v530_v38 = vld [vmem:[%s5945_s30 + $0x930] sm:$0xff] }
  0x64   : > { %527 = vst [vmem:[%s5950_s5 + $0x520] sm:$0xff] %v526_v36  ;;  %v532_v39 = vld [vmem:[%s5945_s30 + $0x938] sm:$0xff]  ;;  %529 = vst [vmem:[%s5950_s5 + $0x528] sm:$0xff] %v528_v37  ;;  %v534_v40 = vld [vmem:[%s5945_s30 + $0x940] sm:$0xff] }
  0x65   : > { %531 = vst [vmem:[%s5950_s5 + $0x530] sm:$0xff] %v530_v38  ;;  %533 = vst [vmem:[%s5950_s5 + $0x538] sm:$0xff] %v532_v39  ;;  %v536_v41 = vld [vmem:[%s5945_s30 + $0x948] sm:$0xff]  ;;  %v538_v42 = vld [vmem:[%s5945_s30 + $0x950] sm:$0xff] }
  0x66   : > { %535 = vst [vmem:[%s5950_s5 + $0x540] sm:$0xff] %v534_v40  ;;  %537 = vst [vmem:[%s5950_s5 + $0x548] sm:$0xff] %v536_v41  ;;  %v540_v43 = vld [vmem:[%s5945_s30 + $0x958] sm:$0xff]  ;;  %v542_v44 = vld [vmem:[%s5945_s30 + $0x960] sm:$0xff] }
  0x67   : > { %539 = vst [vmem:[%s5950_s5 + $0x550] sm:$0xff] %v538_v42  ;;  %v544_v45 = vld [vmem:[%s5945_s30 + $0x968] sm:$0xff]  ;;  %541 = vst [vmem:[%s5950_s5 + $0x558] sm:$0xff] %v540_v43  ;;  %v546_v46 = vld [vmem:[%s5945_s30 + $0x970] sm:$0xff] }
  0x68   : > { %543 = vst [vmem:[%s5950_s5 + $0x560] sm:$0xff] %v542_v44  ;;  %545 = vst [vmem:[%s5950_s5 + $0x568] sm:$0xff] %v544_v45  ;;  %v548_v47 = vld [vmem:[%s5945_s30 + $0x978] sm:$0xff]  ;;  %v550_v48 = vld [vmem:[%s5945_s30 + $0x980] sm:$0xff] }
  0x69   : > { %547 = vst [vmem:[%s5950_s5 + $0x570] sm:$0xff] %v546_v46  ;;  %549 = vst [vmem:[%s5950_s5 + $0x578] sm:$0xff] %v548_v47  ;;  %v552_v49 = vld [vmem:[%s5945_s30 + $0x988] sm:$0xff]  ;;  %v554_v50 = vld [vmem:[%s5945_s30 + $0x990] sm:$0xff] }
  0x6a   : > { %551 = vst [vmem:[%s5950_s5 + $0x580] sm:$0xff] %v550_v48  ;;  %v556_v51 = vld [vmem:[%s5945_s30 + $0x998] sm:$0xff]  ;;  %553 = vst [vmem:[%s5950_s5 + $0x588] sm:$0xff] %v552_v49  ;;  %v558_v52 = vld [vmem:[%s5945_s30 + $0x9a0] sm:$0xff] }
  0x6b   : > { %555 = vst [vmem:[%s5950_s5 + $0x590] sm:$0xff] %v554_v50  ;;  %557 = vst [vmem:[%s5950_s5 + $0x598] sm:$0xff] %v556_v51  ;;  %v560_v53 = vld [vmem:[%s5945_s30 + $0x9a8] sm:$0xff]  ;;  %v562_v54 = vld [vmem:[%s5945_s30 + $0x9b0] sm:$0xff] }
  0x6c   : > { %559 = vst [vmem:[%s5950_s5 + $0x5a0] sm:$0xff] %v558_v52  ;;  %561 = vst [vmem:[%s5950_s5 + $0x5a8] sm:$0xff] %v560_v53  ;;  %v564_v55 = vld [vmem:[%s5945_s30 + $0x9b8] sm:$0xff]  ;;  %v566_v56 = vld [vmem:[%s5945_s30 + $0x9c0] sm:$0xff] }
  0x6d   : > { %563 = vst [vmem:[%s5950_s5 + $0x5b0] sm:$0xff] %v562_v54  ;;  %v568_v57 = vld [vmem:[%s5945_s30 + $0x9c8] sm:$0xff]  ;;  %565 = vst [vmem:[%s5950_s5 + $0x5b8] sm:$0xff] %v564_v55  ;;  %v570_v58 = vld [vmem:[%s5945_s30 + $0x9d0] sm:$0xff] }
  0x6e   : > { %567 = vst [vmem:[%s5950_s5 + $0x5c0] sm:$0xff] %v566_v56  ;;  %569 = vst [vmem:[%s5950_s5 + $0x5c8] sm:$0xff] %v568_v57  ;;  %v572_v59 = vld [vmem:[%s5945_s30 + $0x9d8] sm:$0xff]  ;;  %v574_v60 = vld [vmem:[%s5945_s30 + $0x9e0] sm:$0xff] }
  0x6f   : > { %571 = vst [vmem:[%s5950_s5 + $0x5d0] sm:$0xff] %v570_v58  ;;  %573 = vst [vmem:[%s5950_s5 + $0x5d8] sm:$0xff] %v572_v59  ;;  %v576_v61 = vld [vmem:[%s5945_s30 + $0x9e8] sm:$0xff]  ;;  %v578_v62 = vld [vmem:[%s5945_s30 + $0x9f0] sm:$0xff] }
  0x70   : > { %575 = vst [vmem:[%s5950_s5 + $0x5e0] sm:$0xff] %v574_v60  ;;  %v580_v63 = vld [vmem:[%s5945_s30 + $0x9f8] sm:$0xff]  ;;  %577 = vst [vmem:[%s5950_s5 + $0x5e8] sm:$0xff] %v576_v61  ;;  %v582_v0 = vld [vmem:[%s5945_s30 + $0xa00] sm:$0xff] }
  0x71   : > { %579 = vst [vmem:[%s5950_s5 + $0x5f0] sm:$0xff] %v578_v62  ;;  %581 = vst [vmem:[%s5950_s5 + $0x5f8] sm:$0xff] %v580_v63  ;;  %v584_v1 = vld [vmem:[%s5945_s30 + $0xa08] sm:$0xff]  ;;  %v586_v2 = vld [vmem:[%s5945_s30 + $0xa10] sm:$0xff] }
  0x72   : > { %583 = vst [vmem:[%s5950_s5 + $0x600] sm:$0xff] %v582_v0  ;;  %585 = vst [vmem:[%s5950_s5 + $0x608] sm:$0xff] %v584_v1  ;;  %v588_v3 = vld [vmem:[%s5945_s30 + $0xa18] sm:$0xff]  ;;  %v590_v4 = vld [vmem:[%s5945_s30 + $0xa20] sm:$0xff] }
  0x73   : > { %587 = vst [vmem:[%s5950_s5 + $0x610] sm:$0xff] %v586_v2  ;;  %v592_v5 = vld [vmem:[%s5945_s30 + $0xa28] sm:$0xff]  ;;  %589 = vst [vmem:[%s5950_s5 + $0x618] sm:$0xff] %v588_v3  ;;  %v594_v6 = vld [vmem:[%s5945_s30 + $0xa30] sm:$0xff] }
  0x74   : > { %591 = vst [vmem:[%s5950_s5 + $0x620] sm:$0xff] %v590_v4  ;;  %593 = vst [vmem:[%s5950_s5 + $0x628] sm:$0xff] %v592_v5  ;;  %v596_v7 = vld [vmem:[%s5945_s30 + $0xa38] sm:$0xff]  ;;  %v598_v8 = vld [vmem:[%s5945_s30 + $0xa40] sm:$0xff] }
  0x75   : > { %595 = vst [vmem:[%s5950_s5 + $0x630] sm:$0xff] %v594_v6  ;;  %597 = vst [vmem:[%s5950_s5 + $0x638] sm:$0xff] %v596_v7  ;;  %v600_v9 = vld [vmem:[%s5945_s30 + $0xa48] sm:$0xff]  ;;  %v602_v10 = vld [vmem:[%s5945_s30 + $0xa50] sm:$0xff] }
  0x76   : > { %599 = vst [vmem:[%s5950_s5 + $0x640] sm:$0xff] %v598_v8  ;;  %v604_v11 = vld [vmem:[%s5945_s30 + $0xa58] sm:$0xff]  ;;  %601 = vst [vmem:[%s5950_s5 + $0x648] sm:$0xff] %v600_v9  ;;  %v606_v12 = vld [vmem:[%s5945_s30 + $0xa60] sm:$0xff] }
  0x77   : > { %603 = vst [vmem:[%s5950_s5 + $0x650] sm:$0xff] %v602_v10  ;;  %605 = vst [vmem:[%s5950_s5 + $0x658] sm:$0xff] %v604_v11  ;;  %v608_v13 = vld [vmem:[%s5945_s30 + $0xa68] sm:$0xff]  ;;  %v610_v14 = vld [vmem:[%s5945_s30 + $0xa70] sm:$0xff] }
  0x78   : > { %607 = vst [vmem:[%s5950_s5 + $0x660] sm:$0xff] %v606_v12  ;;  %609 = vst [vmem:[%s5950_s5 + $0x668] sm:$0xff] %v608_v13  ;;  %v612_v15 = vld [vmem:[%s5945_s30 + $0xa78] sm:$0xff]  ;;  %v614_v16 = vld [vmem:[%s5945_s30 + $0xa80] sm:$0xff] }
  0x79   : > { %611 = vst [vmem:[%s5950_s5 + $0x670] sm:$0xff] %v610_v14  ;;  %v616_v17 = vld [vmem:[%s5945_s30 + $0xa88] sm:$0xff]  ;;  %613 = vst [vmem:[%s5950_s5 + $0x678] sm:$0xff] %v612_v15  ;;  %v618_v18 = vld [vmem:[%s5945_s30 + $0xa90] sm:$0xff] }
  0x7a   : > { %615 = vst [vmem:[%s5950_s5 + $0x680] sm:$0xff] %v614_v16  ;;  %617 = vst [vmem:[%s5950_s5 + $0x688] sm:$0xff] %v616_v17  ;;  %v620_v19 = vld [vmem:[%s5945_s30 + $0xa98] sm:$0xff]  ;;  %v622_v20 = vld [vmem:[%s5945_s30 + $0xaa0] sm:$0xff] }
  0x7b   : > { %619 = vst [vmem:[%s5950_s5 + $0x690] sm:$0xff] %v618_v18  ;;  %621 = vst [vmem:[%s5950_s5 + $0x698] sm:$0xff] %v620_v19  ;;  %v624_v21 = vld [vmem:[%s5945_s30 + $0xaa8] sm:$0xff]  ;;  %v626_v22 = vld [vmem:[%s5945_s30 + $0xab0] sm:$0xff] }
  0x7c   : > { %623 = vst [vmem:[%s5950_s5 + $0x6a0] sm:$0xff] %v622_v20  ;;  %v628_v23 = vld [vmem:[%s5945_s30 + $0xab8] sm:$0xff]  ;;  %625 = vst [vmem:[%s5950_s5 + $0x6a8] sm:$0xff] %v624_v21  ;;  %v630_v24 = vld [vmem:[%s5945_s30 + $0xac0] sm:$0xff] }
  0x7d   : > { %627 = vst [vmem:[%s5950_s5 + $0x6b0] sm:$0xff] %v626_v22  ;;  %629 = vst [vmem:[%s5950_s5 + $0x6b8] sm:$0xff] %v628_v23  ;;  %v632_v25 = vld [vmem:[%s5945_s30 + $0xac8] sm:$0xff]  ;;  %v634_v26 = vld [vmem:[%s5945_s30 + $0xad0] sm:$0xff] }
  0x7e   : > { %631 = vst [vmem:[%s5950_s5 + $0x6c0] sm:$0xff] %v630_v24  ;;  %633 = vst [vmem:[%s5950_s5 + $0x6c8] sm:$0xff] %v632_v25  ;;  %v636_v27 = vld [vmem:[%s5945_s30 + $0xad8] sm:$0xff]  ;;  %v638_v28 = vld [vmem:[%s5945_s30 + $0xae0] sm:$0xff] }
  0x7f   : > { %635 = vst [vmem:[%s5950_s5 + $0x6d0] sm:$0xff] %v634_v26  ;;  %v640_v29 = vld [vmem:[%s5945_s30 + $0xae8] sm:$0xff]  ;;  %637 = vst [vmem:[%s5950_s5 + $0x6d8] sm:$0xff] %v636_v27  ;;  %v642_v30 = vld [vmem:[%s5945_s30 + $0xaf0] sm:$0xff] }
  0x80   : > { %639 = vst [vmem:[%s5950_s5 + $0x6e0] sm:$0xff] %v638_v28  ;;  %641 = vst [vmem:[%s5950_s5 + $0x6e8] sm:$0xff] %v640_v29  ;;  %v644_v31 = vld [vmem:[%s5945_s30 + $0xaf8] sm:$0xff]  ;;  %v646_v32 = vld [vmem:[%s5945_s30 + $0xb00] sm:$0xff] }
  0x81   : > { %643 = vst [vmem:[%s5950_s5 + $0x6f0] sm:$0xff] %v642_v30  ;;  %645 = vst [vmem:[%s5950_s5 + $0x6f8] sm:$0xff] %v644_v31  ;;  %v648_v33 = vld [vmem:[%s5945_s30 + $0xb08] sm:$0xff]  ;;  %v650_v34 = vld [vmem:[%s5945_s30 + $0xb10] sm:$0xff] }
  0x82   : > { %647 = vst [vmem:[%s5950_s5 + $0x700] sm:$0xff] %v646_v32  ;;  %v652_v35 = vld [vmem:[%s5945_s30 + $0xb18] sm:$0xff]  ;;  %649 = vst [vmem:[%s5950_s5 + $0x708] sm:$0xff] %v648_v33  ;;  %v654_v36 = vld [vmem:[%s5945_s30 + $0xb20] sm:$0xff] }
  0x83   : > { %651 = vst [vmem:[%s5950_s5 + $0x710] sm:$0xff] %v650_v34  ;;  %653 = vst [vmem:[%s5950_s5 + $0x718] sm:$0xff] %v652_v35  ;;  %v656_v37 = vld [vmem:[%s5945_s30 + $0xb28] sm:$0xff]  ;;  %v658_v38 = vld [vmem:[%s5945_s30 + $0xb30] sm:$0xff] }
  0x84   : > { %655 = vst [vmem:[%s5950_s5 + $0x720] sm:$0xff] %v654_v36  ;;  %657 = vst [vmem:[%s5950_s5 + $0x728] sm:$0xff] %v656_v37  ;;  %v660_v39 = vld [vmem:[%s5945_s30 + $0xb38] sm:$0xff]  ;;  %v662_v40 = vld [vmem:[%s5945_s30 + $0xb40] sm:$0xff] }
  0x85   : > { %659 = vst [vmem:[%s5950_s5 + $0x730] sm:$0xff] %v658_v38  ;;  %v664_v41 = vld [vmem:[%s5945_s30 + $0xb48] sm:$0xff]  ;;  %661 = vst [vmem:[%s5950_s5 + $0x738] sm:$0xff] %v660_v39  ;;  %v666_v42 = vld [vmem:[%s5945_s30 + $0xb50] sm:$0xff] }
  0x86   : > { %663 = vst [vmem:[%s5950_s5 + $0x740] sm:$0xff] %v662_v40  ;;  %665 = vst [vmem:[%s5950_s5 + $0x748] sm:$0xff] %v664_v41  ;;  %v668_v43 = vld [vmem:[%s5945_s30 + $0xb58] sm:$0xff]  ;;  %v670_v44 = vld [vmem:[%s5945_s30 + $0xb60] sm:$0xff] }
  0x87   : > { %667 = vst [vmem:[%s5950_s5 + $0x750] sm:$0xff] %v666_v42  ;;  %669 = vst [vmem:[%s5950_s5 + $0x758] sm:$0xff] %v668_v43  ;;  %v672_v45 = vld [vmem:[%s5945_s30 + $0xb68] sm:$0xff]  ;;  %v674_v46 = vld [vmem:[%s5945_s30 + $0xb70] sm:$0xff] }
  0x88   : > { %671 = vst [vmem:[%s5950_s5 + $0x760] sm:$0xff] %v670_v44  ;;  %v676_v47 = vld [vmem:[%s5945_s30 + $0xb78] sm:$0xff]  ;;  %673 = vst [vmem:[%s5950_s5 + $0x768] sm:$0xff] %v672_v45  ;;  %v678_v48 = vld [vmem:[%s5945_s30 + $0xb80] sm:$0xff] }
  0x89   : > { %675 = vst [vmem:[%s5950_s5 + $0x770] sm:$0xff] %v674_v46  ;;  %677 = vst [vmem:[%s5950_s5 + $0x778] sm:$0xff] %v676_v47  ;;  %v680_v49 = vld [vmem:[%s5945_s30 + $0xb88] sm:$0xff]  ;;  %v682_v50 = vld [vmem:[%s5945_s30 + $0xb90] sm:$0xff] }
  0x8a   : > { %679 = vst [vmem:[%s5950_s5 + $0x780] sm:$0xff] %v678_v48  ;;  %681 = vst [vmem:[%s5950_s5 + $0x788] sm:$0xff] %v680_v49  ;;  %v684_v51 = vld [vmem:[%s5945_s30 + $0xb98] sm:$0xff]  ;;  %v686_v52 = vld [vmem:[%s5945_s30 + $0xba0] sm:$0xff] }
  0x8b   : > { %683 = vst [vmem:[%s5950_s5 + $0x790] sm:$0xff] %v682_v50  ;;  %v688_v53 = vld [vmem:[%s5945_s30 + $0xba8] sm:$0xff]  ;;  %685 = vst [vmem:[%s5950_s5 + $0x798] sm:$0xff] %v684_v51  ;;  %v690_v54 = vld [vmem:[%s5945_s30 + $0xbb0] sm:$0xff] }
  0x8c   : > { %687 = vst [vmem:[%s5950_s5 + $0x7a0] sm:$0xff] %v686_v52  ;;  %689 = vst [vmem:[%s5950_s5 + $0x7a8] sm:$0xff] %v688_v53  ;;  %v692_v55 = vld [vmem:[%s5945_s30 + $0xbb8] sm:$0xff]  ;;  %v694_v56 = vld [vmem:[%s5945_s30 + $0xbc0] sm:$0xff] }
  0x8d   : > { %691 = vst [vmem:[%s5950_s5 + $0x7b0] sm:$0xff] %v690_v54  ;;  %693 = vst [vmem:[%s5950_s5 + $0x7b8] sm:$0xff] %v692_v55  ;;  %v696_v57 = vld [vmem:[%s5945_s30 + $0xbc8] sm:$0xff]  ;;  %v698_v58 = vld [vmem:[%s5945_s30 + $0xbd0] sm:$0xff] }
  0x8e   : > { %695 = vst [vmem:[%s5950_s5 + $0x7c0] sm:$0xff] %v694_v56  ;;  %v700_v59 = vld [vmem:[%s5945_s30 + $0xbd8] sm:$0xff]  ;;  %697 = vst [vmem:[%s5950_s5 + $0x7c8] sm:$0xff] %v696_v57  ;;  %v702_v60 = vld [vmem:[%s5945_s30 + $0xbe0] sm:$0xff] }
  0x8f   : > { %699 = vst [vmem:[%s5950_s5 + $0x7d0] sm:$0xff] %v698_v58  ;;  %701 = vst [vmem:[%s5950_s5 + $0x7d8] sm:$0xff] %v700_v59  ;;  %v704_v61 = vld [vmem:[%s5945_s30 + $0xbe8] sm:$0xff]  ;;  %v706_v62 = vld [vmem:[%s5945_s30 + $0xbf0] sm:$0xff] }
  0x90   : > { %703 = vst [vmem:[%s5950_s5 + $0x7e0] sm:$0xff] %v702_v60  ;;  %705 = vst [vmem:[%s5950_s5 + $0x7e8] sm:$0xff] %v704_v61  ;;  %v708_v63 = vld [vmem:[%s5945_s30 + $0xbf8] sm:$0xff]  ;;  %v710_v0 = vld [vmem:[%s5945_s30 + $0x1000] sm:$0xff] }
  0x91   : > { %707 = vst [vmem:[%s5950_s5 + $0x7f0] sm:$0xff] %v706_v62  ;;  %v712_v1 = vld [vmem:[%s5945_s30 + $0x1008] sm:$0xff]  ;;  %709 = vst [vmem:[%s5950_s5 + $0x7f8] sm:$0xff] %v708_v63  ;;  %v714_v2 = vld [vmem:[%s5945_s30 + $0x1010] sm:$0xff] }
  0x92   : > { %711 = vst [vmem:[%s5950_s5 + $0x800] sm:$0xff] %v710_v0  ;;  %713 = vst [vmem:[%s5950_s5 + $0x808] sm:$0xff] %v712_v1  ;;  %v716_v3 = vld [vmem:[%s5945_s30 + $0x1018] sm:$0xff]  ;;  %v718_v4 = vld [vmem:[%s5945_s30 + $0x1020] sm:$0xff] }
  0x93   : > { %715 = vst [vmem:[%s5950_s5 + $0x810] sm:$0xff] %v714_v2  ;;  %717 = vst [vmem:[%s5950_s5 + $0x818] sm:$0xff] %v716_v3  ;;  %v720_v5 = vld [vmem:[%s5945_s30 + $0x1028] sm:$0xff]  ;;  %v722_v6 = vld [vmem:[%s5945_s30 + $0x1030] sm:$0xff] }
  0x94   : > { %719 = vst [vmem:[%s5950_s5 + $0x820] sm:$0xff] %v718_v4  ;;  %v724_v7 = vld [vmem:[%s5945_s30 + $0x1038] sm:$0xff]  ;;  %721 = vst [vmem:[%s5950_s5 + $0x828] sm:$0xff] %v720_v5  ;;  %v726_v8 = vld [vmem:[%s5945_s30 + $0x1040] sm:$0xff] }
  0x95   : > { %723 = vst [vmem:[%s5950_s5 + $0x830] sm:$0xff] %v722_v6  ;;  %725 = vst [vmem:[%s5950_s5 + $0x838] sm:$0xff] %v724_v7  ;;  %v728_v9 = vld [vmem:[%s5945_s30 + $0x1048] sm:$0xff]  ;;  %v730_v10 = vld [vmem:[%s5945_s30 + $0x1050] sm:$0xff] }
  0x96   : > { %727 = vst [vmem:[%s5950_s5 + $0x840] sm:$0xff] %v726_v8  ;;  %729 = vst [vmem:[%s5950_s5 + $0x848] sm:$0xff] %v728_v9  ;;  %v732_v11 = vld [vmem:[%s5945_s30 + $0x1058] sm:$0xff]  ;;  %v734_v12 = vld [vmem:[%s5945_s30 + $0x1060] sm:$0xff] }
  0x97   : > { %731 = vst [vmem:[%s5950_s5 + $0x850] sm:$0xff] %v730_v10  ;;  %v736_v13 = vld [vmem:[%s5945_s30 + $0x1068] sm:$0xff]  ;;  %733 = vst [vmem:[%s5950_s5 + $0x858] sm:$0xff] %v732_v11  ;;  %v738_v14 = vld [vmem:[%s5945_s30 + $0x1070] sm:$0xff] }
  0x98   : > { %735 = vst [vmem:[%s5950_s5 + $0x860] sm:$0xff] %v734_v12  ;;  %737 = vst [vmem:[%s5950_s5 + $0x868] sm:$0xff] %v736_v13  ;;  %v740_v15 = vld [vmem:[%s5945_s30 + $0x1078] sm:$0xff]  ;;  %v742_v16 = vld [vmem:[%s5945_s30 + $0x1080] sm:$0xff] }
  0x99   : > { %739 = vst [vmem:[%s5950_s5 + $0x870] sm:$0xff] %v738_v14  ;;  %741 = vst [vmem:[%s5950_s5 + $0x878] sm:$0xff] %v740_v15  ;;  %v744_v17 = vld [vmem:[%s5945_s30 + $0x1088] sm:$0xff]  ;;  %v746_v18 = vld [vmem:[%s5945_s30 + $0x1090] sm:$0xff] }
  0x9a   : > { %743 = vst [vmem:[%s5950_s5 + $0x880] sm:$0xff] %v742_v16  ;;  %v748_v19 = vld [vmem:[%s5945_s30 + $0x1098] sm:$0xff]  ;;  %745 = vst [vmem:[%s5950_s5 + $0x888] sm:$0xff] %v744_v17  ;;  %v750_v20 = vld [vmem:[%s5945_s30 + $0x10a0] sm:$0xff] }
  0x9b   : > { %747 = vst [vmem:[%s5950_s5 + $0x890] sm:$0xff] %v746_v18  ;;  %749 = vst [vmem:[%s5950_s5 + $0x898] sm:$0xff] %v748_v19  ;;  %v752_v21 = vld [vmem:[%s5945_s30 + $0x10a8] sm:$0xff]  ;;  %v754_v22 = vld [vmem:[%s5945_s30 + $0x10b0] sm:$0xff] }
  0x9c   : > { %751 = vst [vmem:[%s5950_s5 + $0x8a0] sm:$0xff] %v750_v20  ;;  %753 = vst [vmem:[%s5950_s5 + $0x8a8] sm:$0xff] %v752_v21  ;;  %v756_v23 = vld [vmem:[%s5945_s30 + $0x10b8] sm:$0xff]  ;;  %v758_v24 = vld [vmem:[%s5945_s30 + $0x10c0] sm:$0xff] }
  0x9d   : > { %755 = vst [vmem:[%s5950_s5 + $0x8b0] sm:$0xff] %v754_v22  ;;  %v760_v25 = vld [vmem:[%s5945_s30 + $0x10c8] sm:$0xff]  ;;  %757 = vst [vmem:[%s5950_s5 + $0x8b8] sm:$0xff] %v756_v23  ;;  %v762_v26 = vld [vmem:[%s5945_s30 + $0x10d0] sm:$0xff] }
  0x9e   : > { %759 = vst [vmem:[%s5950_s5 + $0x8c0] sm:$0xff] %v758_v24  ;;  %761 = vst [vmem:[%s5950_s5 + $0x8c8] sm:$0xff] %v760_v25  ;;  %v764_v27 = vld [vmem:[%s5945_s30 + $0x10d8] sm:$0xff]  ;;  %v766_v28 = vld [vmem:[%s5945_s30 + $0x10e0] sm:$0xff] }
  0x9f   : > { %763 = vst [vmem:[%s5950_s5 + $0x8d0] sm:$0xff] %v762_v26  ;;  %765 = vst [vmem:[%s5950_s5 + $0x8d8] sm:$0xff] %v764_v27  ;;  %v768_v29 = vld [vmem:[%s5945_s30 + $0x10e8] sm:$0xff]  ;;  %v770_v30 = vld [vmem:[%s5945_s30 + $0x10f0] sm:$0xff] }
  0xa0   : > { %767 = vst [vmem:[%s5950_s5 + $0x8e0] sm:$0xff] %v766_v28  ;;  %v772_v31 = vld [vmem:[%s5945_s30 + $0x10f8] sm:$0xff]  ;;  %769 = vst [vmem:[%s5950_s5 + $0x8e8] sm:$0xff] %v768_v29  ;;  %v774_v32 = vld [vmem:[%s5945_s30 + $0x1100] sm:$0xff] }
  0xa1   : > { %771 = vst [vmem:[%s5950_s5 + $0x8f0] sm:$0xff] %v770_v30  ;;  %773 = vst [vmem:[%s5950_s5 + $0x8f8] sm:$0xff] %v772_v31  ;;  %v776_v33 = vld [vmem:[%s5945_s30 + $0x1108] sm:$0xff]  ;;  %v778_v34 = vld [vmem:[%s5945_s30 + $0x1110] sm:$0xff] }
  0xa2   : > { %775 = vst [vmem:[%s5950_s5 + $0x900] sm:$0xff] %v774_v32  ;;  %777 = vst [vmem:[%s5950_s5 + $0x908] sm:$0xff] %v776_v33  ;;  %v780_v35 = vld [vmem:[%s5945_s30 + $0x1118] sm:$0xff]  ;;  %v782_v36 = vld [vmem:[%s5945_s30 + $0x1120] sm:$0xff] }
  0xa3   : > { %779 = vst [vmem:[%s5950_s5 + $0x910] sm:$0xff] %v778_v34  ;;  %v784_v37 = vld [vmem:[%s5945_s30 + $0x1128] sm:$0xff]  ;;  %781 = vst [vmem:[%s5950_s5 + $0x918] sm:$0xff] %v780_v35  ;;  %v786_v38 = vld [vmem:[%s5945_s30 + $0x1130] sm:$0xff] }
  0xa4   : > { %783 = vst [vmem:[%s5950_s5 + $0x920] sm:$0xff] %v782_v36  ;;  %785 = vst [vmem:[%s5950_s5 + $0x928] sm:$0xff] %v784_v37  ;;  %v788_v39 = vld [vmem:[%s5945_s30 + $0x1138] sm:$0xff]  ;;  %v790_v40 = vld [vmem:[%s5945_s30 + $0x1140] sm:$0xff] }
  0xa5   : > { %787 = vst [vmem:[%s5950_s5 + $0x930] sm:$0xff] %v786_v38  ;;  %789 = vst [vmem:[%s5950_s5 + $0x938] sm:$0xff] %v788_v39  ;;  %v792_v41 = vld [vmem:[%s5945_s30 + $0x1148] sm:$0xff]  ;;  %v794_v42 = vld [vmem:[%s5945_s30 + $0x1150] sm:$0xff] }
  0xa6   : > { %791 = vst [vmem:[%s5950_s5 + $0x940] sm:$0xff] %v790_v40  ;;  %v796_v43 = vld [vmem:[%s5945_s30 + $0x1158] sm:$0xff]  ;;  %793 = vst [vmem:[%s5950_s5 + $0x948] sm:$0xff] %v792_v41  ;;  %v798_v44 = vld [vmem:[%s5945_s30 + $0x1160] sm:$0xff] }
  0xa7   : > { %795 = vst [vmem:[%s5950_s5 + $0x950] sm:$0xff] %v794_v42  ;;  %797 = vst [vmem:[%s5950_s5 + $0x958] sm:$0xff] %v796_v43  ;;  %v800_v45 = vld [vmem:[%s5945_s30 + $0x1168] sm:$0xff]  ;;  %v802_v46 = vld [vmem:[%s5945_s30 + $0x1170] sm:$0xff] }
  0xa8   : > { %799 = vst [vmem:[%s5950_s5 + $0x960] sm:$0xff] %v798_v44  ;;  %801 = vst [vmem:[%s5950_s5 + $0x968] sm:$0xff] %v800_v45  ;;  %v804_v47 = vld [vmem:[%s5945_s30 + $0x1178] sm:$0xff]  ;;  %v806_v48 = vld [vmem:[%s5945_s30 + $0x1180] sm:$0xff] }
  0xa9   : > { %803 = vst [vmem:[%s5950_s5 + $0x970] sm:$0xff] %v802_v46  ;;  %v808_v49 = vld [vmem:[%s5945_s30 + $0x1188] sm:$0xff]  ;;  %805 = vst [vmem:[%s5950_s5 + $0x978] sm:$0xff] %v804_v47  ;;  %v810_v50 = vld [vmem:[%s5945_s30 + $0x1190] sm:$0xff] }
  0xaa   : > { %807 = vst [vmem:[%s5950_s5 + $0x980] sm:$0xff] %v806_v48  ;;  %809 = vst [vmem:[%s5950_s5 + $0x988] sm:$0xff] %v808_v49  ;;  %v812_v51 = vld [vmem:[%s5945_s30 + $0x1198] sm:$0xff]  ;;  %v814_v52 = vld [vmem:[%s5945_s30 + $0x11a0] sm:$0xff] }
  0xab   : > { %811 = vst [vmem:[%s5950_s5 + $0x990] sm:$0xff] %v810_v50  ;;  %813 = vst [vmem:[%s5950_s5 + $0x998] sm:$0xff] %v812_v51  ;;  %v816_v53 = vld [vmem:[%s5945_s30 + $0x11a8] sm:$0xff]  ;;  %v818_v54 = vld [vmem:[%s5945_s30 + $0x11b0] sm:$0xff] }
  0xac   : > { %815 = vst [vmem:[%s5950_s5 + $0x9a0] sm:$0xff] %v814_v52  ;;  %v820_v55 = vld [vmem:[%s5945_s30 + $0x11b8] sm:$0xff]  ;;  %817 = vst [vmem:[%s5950_s5 + $0x9a8] sm:$0xff] %v816_v53  ;;  %v822_v56 = vld [vmem:[%s5945_s30 + $0x11c0] sm:$0xff] }
  0xad   : > { %819 = vst [vmem:[%s5950_s5 + $0x9b0] sm:$0xff] %v818_v54  ;;  %821 = vst [vmem:[%s5950_s5 + $0x9b8] sm:$0xff] %v820_v55  ;;  %v824_v57 = vld [vmem:[%s5945_s30 + $0x11c8] sm:$0xff]  ;;  %v826_v58 = vld [vmem:[%s5945_s30 + $0x11d0] sm:$0xff] }
  0xae   : > { %823 = vst [vmem:[%s5950_s5 + $0x9c0] sm:$0xff] %v822_v56  ;;  %825 = vst [vmem:[%s5950_s5 + $0x9c8] sm:$0xff] %v824_v57  ;;  %v828_v59 = vld [vmem:[%s5945_s30 + $0x11d8] sm:$0xff]  ;;  %v830_v60 = vld [vmem:[%s5945_s30 + $0x11e0] sm:$0xff] }
  0xaf   : > { %827 = vst [vmem:[%s5950_s5 + $0x9d0] sm:$0xff] %v826_v58  ;;  %v832_v61 = vld [vmem:[%s5945_s30 + $0x11e8] sm:$0xff]  ;;  %829 = vst [vmem:[%s5950_s5 + $0x9d8] sm:$0xff] %v828_v59  ;;  %v834_v62 = vld [vmem:[%s5945_s30 + $0x11f0] sm:$0xff] }
  0xb0   : > { %831 = vst [vmem:[%s5950_s5 + $0x9e0] sm:$0xff] %v830_v60  ;;  %833 = vst [vmem:[%s5950_s5 + $0x9e8] sm:$0xff] %v832_v61  ;;  %v836_v63 = vld [vmem:[%s5945_s30 + $0x11f8] sm:$0xff]  ;;  %v838_v0 = vld [vmem:[%s5945_s30 + $0x1200] sm:$0xff] }
  0xb1   : > { %835 = vst [vmem:[%s5950_s5 + $0x9f0] sm:$0xff] %v834_v62  ;;  %837 = vst [vmem:[%s5950_s5 + $0x9f8] sm:$0xff] %v836_v63  ;;  %v840_v1 = vld [vmem:[%s5945_s30 + $0x1208] sm:$0xff]  ;;  %v842_v2 = vld [vmem:[%s5945_s30 + $0x1210] sm:$0xff] }
  0xb2   : > { %839 = vst [vmem:[%s5950_s5 + $0xa00] sm:$0xff] %v838_v0  ;;  %v844_v3 = vld [vmem:[%s5945_s30 + $0x1218] sm:$0xff]  ;;  %841 = vst [vmem:[%s5950_s5 + $0xa08] sm:$0xff] %v840_v1  ;;  %v846_v4 = vld [vmem:[%s5945_s30 + $0x1220] sm:$0xff] }
  0xb3   : > { %843 = vst [vmem:[%s5950_s5 + $0xa10] sm:$0xff] %v842_v2  ;;  %845 = vst [vmem:[%s5950_s5 + $0xa18] sm:$0xff] %v844_v3  ;;  %v848_v5 = vld [vmem:[%s5945_s30 + $0x1228] sm:$0xff]  ;;  %v850_v6 = vld [vmem:[%s5945_s30 + $0x1230] sm:$0xff] }
  0xb4   : > { %847 = vst [vmem:[%s5950_s5 + $0xa20] sm:$0xff] %v846_v4  ;;  %849 = vst [vmem:[%s5950_s5 + $0xa28] sm:$0xff] %v848_v5  ;;  %v852_v7 = vld [vmem:[%s5945_s30 + $0x1238] sm:$0xff]  ;;  %v854_v8 = vld [vmem:[%s5945_s30 + $0x1240] sm:$0xff] }
  0xb5   : > { %851 = vst [vmem:[%s5950_s5 + $0xa30] sm:$0xff] %v850_v6  ;;  %v856_v9 = vld [vmem:[%s5945_s30 + $0x1248] sm:$0xff]  ;;  %853 = vst [vmem:[%s5950_s5 + $0xa38] sm:$0xff] %v852_v7  ;;  %v858_v10 = vld [vmem:[%s5945_s30 + $0x1250] sm:$0xff] }
  0xb6   : > { %855 = vst [vmem:[%s5950_s5 + $0xa40] sm:$0xff] %v854_v8  ;;  %857 = vst [vmem:[%s5950_s5 + $0xa48] sm:$0xff] %v856_v9  ;;  %v860_v11 = vld [vmem:[%s5945_s30 + $0x1258] sm:$0xff]  ;;  %v862_v12 = vld [vmem:[%s5945_s30 + $0x1260] sm:$0xff] }
  0xb7   : > { %859 = vst [vmem:[%s5950_s5 + $0xa50] sm:$0xff] %v858_v10  ;;  %861 = vst [vmem:[%s5950_s5 + $0xa58] sm:$0xff] %v860_v11  ;;  %v864_v13 = vld [vmem:[%s5945_s30 + $0x1268] sm:$0xff]  ;;  %v866_v14 = vld [vmem:[%s5945_s30 + $0x1270] sm:$0xff] }
  0xb8   : > { %863 = vst [vmem:[%s5950_s5 + $0xa60] sm:$0xff] %v862_v12  ;;  %v868_v15 = vld [vmem:[%s5945_s30 + $0x1278] sm:$0xff]  ;;  %865 = vst [vmem:[%s5950_s5 + $0xa68] sm:$0xff] %v864_v13  ;;  %v870_v16 = vld [vmem:[%s5945_s30 + $0x1280] sm:$0xff] }
  0xb9   : > { %867 = vst [vmem:[%s5950_s5 + $0xa70] sm:$0xff] %v866_v14  ;;  %869 = vst [vmem:[%s5950_s5 + $0xa78] sm:$0xff] %v868_v15  ;;  %v872_v17 = vld [vmem:[%s5945_s30 + $0x1288] sm:$0xff]  ;;  %v874_v18 = vld [vmem:[%s5945_s30 + $0x1290] sm:$0xff] }
  0xba   : > { %871 = vst [vmem:[%s5950_s5 + $0xa80] sm:$0xff] %v870_v16  ;;  %873 = vst [vmem:[%s5950_s5 + $0xa88] sm:$0xff] %v872_v17  ;;  %v876_v19 = vld [vmem:[%s5945_s30 + $0x1298] sm:$0xff]  ;;  %v878_v20 = vld [vmem:[%s5945_s30 + $0x12a0] sm:$0xff] }
  0xbb   : > { %875 = vst [vmem:[%s5950_s5 + $0xa90] sm:$0xff] %v874_v18  ;;  %v880_v21 = vld [vmem:[%s5945_s30 + $0x12a8] sm:$0xff]  ;;  %877 = vst [vmem:[%s5950_s5 + $0xa98] sm:$0xff] %v876_v19  ;;  %v882_v22 = vld [vmem:[%s5945_s30 + $0x12b0] sm:$0xff] }
  0xbc   : > { %879 = vst [vmem:[%s5950_s5 + $0xaa0] sm:$0xff] %v878_v20  ;;  %881 = vst [vmem:[%s5950_s5 + $0xaa8] sm:$0xff] %v880_v21  ;;  %v884_v23 = vld [vmem:[%s5945_s30 + $0x12b8] sm:$0xff]  ;;  %v886_v24 = vld [vmem:[%s5945_s30 + $0x12c0] sm:$0xff] }
  0xbd   : > { %883 = vst [vmem:[%s5950_s5 + $0xab0] sm:$0xff] %v882_v22  ;;  %885 = vst [vmem:[%s5950_s5 + $0xab8] sm:$0xff] %v884_v23  ;;  %v888_v25 = vld [vmem:[%s5945_s30 + $0x12c8] sm:$0xff]  ;;  %v890_v26 = vld [vmem:[%s5945_s30 + $0x12d0] sm:$0xff] }
  0xbe   : > { %887 = vst [vmem:[%s5950_s5 + $0xac0] sm:$0xff] %v886_v24  ;;  %v892_v27 = vld [vmem:[%s5945_s30 + $0x12d8] sm:$0xff]  ;;  %889 = vst [vmem:[%s5950_s5 + $0xac8] sm:$0xff] %v888_v25  ;;  %v894_v28 = vld [vmem:[%s5945_s30 + $0x12e0] sm:$0xff] }
  0xbf   : > { %891 = vst [vmem:[%s5950_s5 + $0xad0] sm:$0xff] %v890_v26  ;;  %893 = vst [vmem:[%s5950_s5 + $0xad8] sm:$0xff] %v892_v27  ;;  %v896_v29 = vld [vmem:[%s5945_s30 + $0x12e8] sm:$0xff]  ;;  %v898_v30 = vld [vmem:[%s5945_s30 + $0x12f0] sm:$0xff] }
  0xc0   : > { %895 = vst [vmem:[%s5950_s5 + $0xae0] sm:$0xff] %v894_v28  ;;  %897 = vst [vmem:[%s5950_s5 + $0xae8] sm:$0xff] %v896_v29  ;;  %v900_v31 = vld [vmem:[%s5945_s30 + $0x12f8] sm:$0xff]  ;;  %v902_v32 = vld [vmem:[%s5945_s30 + $0x1300] sm:$0xff] }
  0xc1   : > { %899 = vst [vmem:[%s5950_s5 + $0xaf0] sm:$0xff] %v898_v30  ;;  %v904_v33 = vld [vmem:[%s5945_s30 + $0x1308] sm:$0xff]  ;;  %901 = vst [vmem:[%s5950_s5 + $0xaf8] sm:$0xff] %v900_v31  ;;  %v906_v34 = vld [vmem:[%s5945_s30 + $0x1310] sm:$0xff] }
  0xc2   : > { %903 = vst [vmem:[%s5950_s5 + $0xb00] sm:$0xff] %v902_v32  ;;  %905 = vst [vmem:[%s5950_s5 + $0xb08] sm:$0xff] %v904_v33  ;;  %v908_v35 = vld [vmem:[%s5945_s30 + $0x1318] sm:$0xff]  ;;  %v910_v36 = vld [vmem:[%s5945_s30 + $0x1320] sm:$0xff] }
  0xc3   : > { %907 = vst [vmem:[%s5950_s5 + $0xb10] sm:$0xff] %v906_v34  ;;  %909 = vst [vmem:[%s5950_s5 + $0xb18] sm:$0xff] %v908_v35  ;;  %v912_v37 = vld [vmem:[%s5945_s30 + $0x1328] sm:$0xff]  ;;  %v914_v38 = vld [vmem:[%s5945_s30 + $0x1330] sm:$0xff] }
  0xc4   : > { %911 = vst [vmem:[%s5950_s5 + $0xb20] sm:$0xff] %v910_v36  ;;  %v916_v39 = vld [vmem:[%s5945_s30 + $0x1338] sm:$0xff]  ;;  %913 = vst [vmem:[%s5950_s5 + $0xb28] sm:$0xff] %v912_v37  ;;  %v918_v40 = vld [vmem:[%s5945_s30 + $0x1340] sm:$0xff] }
  0xc5   : > { %915 = vst [vmem:[%s5950_s5 + $0xb30] sm:$0xff] %v914_v38  ;;  %917 = vst [vmem:[%s5950_s5 + $0xb38] sm:$0xff] %v916_v39  ;;  %v920_v41 = vld [vmem:[%s5945_s30 + $0x1348] sm:$0xff]  ;;  %v922_v42 = vld [vmem:[%s5945_s30 + $0x1350] sm:$0xff] }
  0xc6   : > { %919 = vst [vmem:[%s5950_s5 + $0xb40] sm:$0xff] %v918_v40  ;;  %921 = vst [vmem:[%s5950_s5 + $0xb48] sm:$0xff] %v920_v41  ;;  %v924_v43 = vld [vmem:[%s5945_s30 + $0x1358] sm:$0xff]  ;;  %v926_v44 = vld [vmem:[%s5945_s30 + $0x1360] sm:$0xff] }
  0xc7   : > { %923 = vst [vmem:[%s5950_s5 + $0xb50] sm:$0xff] %v922_v42  ;;  %v928_v45 = vld [vmem:[%s5945_s30 + $0x1368] sm:$0xff]  ;;  %925 = vst [vmem:[%s5950_s5 + $0xb58] sm:$0xff] %v924_v43  ;;  %v930_v46 = vld [vmem:[%s5945_s30 + $0x1370] sm:$0xff] }
  0xc8   : > { %927 = vst [vmem:[%s5950_s5 + $0xb60] sm:$0xff] %v926_v44  ;;  %929 = vst [vmem:[%s5950_s5 + $0xb68] sm:$0xff] %v928_v45  ;;  %v932_v47 = vld [vmem:[%s5945_s30 + $0x1378] sm:$0xff]  ;;  %v934_v48 = vld [vmem:[%s5945_s30 + $0x1380] sm:$0xff] }
  0xc9   : > { %931 = vst [vmem:[%s5950_s5 + $0xb70] sm:$0xff] %v930_v46  ;;  %933 = vst [vmem:[%s5950_s5 + $0xb78] sm:$0xff] %v932_v47  ;;  %v936_v49 = vld [vmem:[%s5945_s30 + $0x1388] sm:$0xff]  ;;  %v938_v50 = vld [vmem:[%s5945_s30 + $0x1390] sm:$0xff] }
  0xca   : > { %935 = vst [vmem:[%s5950_s5 + $0xb80] sm:$0xff] %v934_v48  ;;  %v940_v51 = vld [vmem:[%s5945_s30 + $0x1398] sm:$0xff]  ;;  %937 = vst [vmem:[%s5950_s5 + $0xb88] sm:$0xff] %v936_v49  ;;  %v942_v52 = vld [vmem:[%s5945_s30 + $0x13a0] sm:$0xff] }
  0xcb   : > { %939 = vst [vmem:[%s5950_s5 + $0xb90] sm:$0xff] %v938_v50  ;;  %941 = vst [vmem:[%s5950_s5 + $0xb98] sm:$0xff] %v940_v51  ;;  %v944_v53 = vld [vmem:[%s5945_s30 + $0x13a8] sm:$0xff]  ;;  %v946_v54 = vld [vmem:[%s5945_s30 + $0x13b0] sm:$0xff] }
  0xcc   : > { %943 = vst [vmem:[%s5950_s5 + $0xba0] sm:$0xff] %v942_v52  ;;  %945 = vst [vmem:[%s5950_s5 + $0xba8] sm:$0xff] %v944_v53  ;;  %v948_v55 = vld [vmem:[%s5945_s30 + $0x13b8] sm:$0xff]  ;;  %v950_v56 = vld [vmem:[%s5945_s30 + $0x13c0] sm:$0xff] }
  0xcd   : > { %947 = vst [vmem:[%s5950_s5 + $0xbb0] sm:$0xff] %v946_v54  ;;  %v952_v57 = vld [vmem:[%s5945_s30 + $0x13c8] sm:$0xff]  ;;  %949 = vst [vmem:[%s5950_s5 + $0xbb8] sm:$0xff] %v948_v55  ;;  %v954_v58 = vld [vmem:[%s5945_s30 + $0x13d0] sm:$0xff] }
  0xce   : > { %951 = vst [vmem:[%s5950_s5 + $0xbc0] sm:$0xff] %v950_v56  ;;  %953 = vst [vmem:[%s5950_s5 + $0xbc8] sm:$0xff] %v952_v57  ;;  %v956_v59 = vld [vmem:[%s5945_s30 + $0x13d8] sm:$0xff]  ;;  %v958_v60 = vld [vmem:[%s5945_s30 + $0x13e0] sm:$0xff] }
  0xcf   : > { %955 = vst [vmem:[%s5950_s5 + $0xbd0] sm:$0xff] %v954_v58  ;;  %957 = vst [vmem:[%s5950_s5 + $0xbd8] sm:$0xff] %v956_v59  ;;  %v960_v61 = vld [vmem:[%s5945_s30 + $0x13e8] sm:$0xff]  ;;  %v962_v62 = vld [vmem:[%s5945_s30 + $0x13f0] sm:$0xff] }
  0xd0   : > { %959 = vst [vmem:[%s5950_s5 + $0xbe0] sm:$0xff] %v958_v60  ;;  %v964_v63 = vld [vmem:[%s5945_s30 + $0x13f8] sm:$0xff]  ;;  %961 = vst [vmem:[%s5950_s5 + $0xbe8] sm:$0xff] %v960_v61  ;;  %v966_v0 = vld [vmem:[%s5945_s30 + $0x1800] sm:$0xff] }
  0xd1   : > { %963 = vst [vmem:[%s5950_s5 + $0xbf0] sm:$0xff] %v962_v62  ;;  %965 = vst [vmem:[%s5950_s5 + $0xbf8] sm:$0xff] %v964_v63  ;;  %v968_v1 = vld [vmem:[%s5945_s30 + $0x1808] sm:$0xff]  ;;  %v970_v2 = vld [vmem:[%s5945_s30 + $0x1810] sm:$0xff] }
  0xd2   : > { %967 = vst [vmem:[%s5950_s5 + $0xc00] sm:$0xff] %v966_v0  ;;  %969 = vst [vmem:[%s5950_s5 + $0xc08] sm:$0xff] %v968_v1  ;;  %v972_v3 = vld [vmem:[%s5945_s30 + $0x1818] sm:$0xff]  ;;  %v974_v4 = vld [vmem:[%s5945_s30 + $0x1820] sm:$0xff] }
  0xd3   : > { %971 = vst [vmem:[%s5950_s5 + $0xc10] sm:$0xff] %v970_v2  ;;  %v976_v5 = vld [vmem:[%s5945_s30 + $0x1828] sm:$0xff]  ;;  %973 = vst [vmem:[%s5950_s5 + $0xc18] sm:$0xff] %v972_v3  ;;  %v978_v6 = vld [vmem:[%s5945_s30 + $0x1830] sm:$0xff] }
  0xd4   : > { %975 = vst [vmem:[%s5950_s5 + $0xc20] sm:$0xff] %v974_v4  ;;  %977 = vst [vmem:[%s5950_s5 + $0xc28] sm:$0xff] %v976_v5  ;;  %v980_v7 = vld [vmem:[%s5945_s30 + $0x1838] sm:$0xff]  ;;  %v982_v8 = vld [vmem:[%s5945_s30 + $0x1840] sm:$0xff] }
  0xd5   : > { %979 = vst [vmem:[%s5950_s5 + $0xc30] sm:$0xff] %v978_v6  ;;  %981 = vst [vmem:[%s5950_s5 + $0xc38] sm:$0xff] %v980_v7  ;;  %v984_v9 = vld [vmem:[%s5945_s30 + $0x1848] sm:$0xff]  ;;  %v986_v10 = vld [vmem:[%s5945_s30 + $0x1850] sm:$0xff] }
  0xd6   : > { %983 = vst [vmem:[%s5950_s5 + $0xc40] sm:$0xff] %v982_v8  ;;  %v988_v11 = vld [vmem:[%s5945_s30 + $0x1858] sm:$0xff]  ;;  %985 = vst [vmem:[%s5950_s5 + $0xc48] sm:$0xff] %v984_v9  ;;  %v990_v12 = vld [vmem:[%s5945_s30 + $0x1860] sm:$0xff] }
  0xd7   : > { %987 = vst [vmem:[%s5950_s5 + $0xc50] sm:$0xff] %v986_v10  ;;  %989 = vst [vmem:[%s5950_s5 + $0xc58] sm:$0xff] %v988_v11  ;;  %v992_v13 = vld [vmem:[%s5945_s30 + $0x1868] sm:$0xff]  ;;  %v994_v14 = vld [vmem:[%s5945_s30 + $0x1870] sm:$0xff] }
  0xd8   : > { %991 = vst [vmem:[%s5950_s5 + $0xc60] sm:$0xff] %v990_v12  ;;  %993 = vst [vmem:[%s5950_s5 + $0xc68] sm:$0xff] %v992_v13  ;;  %v996_v15 = vld [vmem:[%s5945_s30 + $0x1878] sm:$0xff]  ;;  %v998_v16 = vld [vmem:[%s5945_s30 + $0x1880] sm:$0xff] }
  0xd9   : > { %995 = vst [vmem:[%s5950_s5 + $0xc70] sm:$0xff] %v994_v14  ;;  %v1000_v17 = vld [vmem:[%s5945_s30 + $0x1888] sm:$0xff]  ;;  %997 = vst [vmem:[%s5950_s5 + $0xc78] sm:$0xff] %v996_v15  ;;  %v1002_v18 = vld [vmem:[%s5945_s30 + $0x1890] sm:$0xff] }
  0xda   : > { %999 = vst [vmem:[%s5950_s5 + $0xc80] sm:$0xff] %v998_v16  ;;  %1001 = vst [vmem:[%s5950_s5 + $0xc88] sm:$0xff] %v1000_v17  ;;  %v1004_v19 = vld [vmem:[%s5945_s30 + $0x1898] sm:$0xff]  ;;  %v1006_v20 = vld [vmem:[%s5945_s30 + $0x18a0] sm:$0xff] }
  0xdb   : > { %1003 = vst [vmem:[%s5950_s5 + $0xc90] sm:$0xff] %v1002_v18  ;;  %1005 = vst [vmem:[%s5950_s5 + $0xc98] sm:$0xff] %v1004_v19  ;;  %v1008_v21 = vld [vmem:[%s5945_s30 + $0x18a8] sm:$0xff]  ;;  %v1010_v22 = vld [vmem:[%s5945_s30 + $0x18b0] sm:$0xff] }
  0xdc   : > { %1007 = vst [vmem:[%s5950_s5 + $0xca0] sm:$0xff] %v1006_v20  ;;  %v1012_v23 = vld [vmem:[%s5945_s30 + $0x18b8] sm:$0xff]  ;;  %1009 = vst [vmem:[%s5950_s5 + $0xca8] sm:$0xff] %v1008_v21  ;;  %v1014_v24 = vld [vmem:[%s5945_s30 + $0x18c0] sm:$0xff] }
  0xdd   : > { %1011 = vst [vmem:[%s5950_s5 + $0xcb0] sm:$0xff] %v1010_v22  ;;  %1013 = vst [vmem:[%s5950_s5 + $0xcb8] sm:$0xff] %v1012_v23  ;;  %v1016_v25 = vld [vmem:[%s5945_s30 + $0x18c8] sm:$0xff]  ;;  %v1018_v26 = vld [vmem:[%s5945_s30 + $0x18d0] sm:$0xff] }
  0xde   : > { %1015 = vst [vmem:[%s5950_s5 + $0xcc0] sm:$0xff] %v1014_v24  ;;  %1017 = vst [vmem:[%s5950_s5 + $0xcc8] sm:$0xff] %v1016_v25  ;;  %v1020_v27 = vld [vmem:[%s5945_s30 + $0x18d8] sm:$0xff]  ;;  %v1022_v28 = vld [vmem:[%s5945_s30 + $0x18e0] sm:$0xff] }
  0xdf   : > { %1019 = vst [vmem:[%s5950_s5 + $0xcd0] sm:$0xff] %v1018_v26  ;;  %v1024_v29 = vld [vmem:[%s5945_s30 + $0x18e8] sm:$0xff]  ;;  %1021 = vst [vmem:[%s5950_s5 + $0xcd8] sm:$0xff] %v1020_v27  ;;  %v1026_v30 = vld [vmem:[%s5945_s30 + $0x18f0] sm:$0xff] }
  0xe0   : > { %1023 = vst [vmem:[%s5950_s5 + $0xce0] sm:$0xff] %v1022_v28  ;;  %1025 = vst [vmem:[%s5950_s5 + $0xce8] sm:$0xff] %v1024_v29  ;;  %v1028_v31 = vld [vmem:[%s5945_s30 + $0x18f8] sm:$0xff]  ;;  %v1030_v32 = vld [vmem:[%s5945_s30 + $0x1900] sm:$0xff] }
  0xe1   : > { %1027 = vst [vmem:[%s5950_s5 + $0xcf0] sm:$0xff] %v1026_v30  ;;  %1029 = vst [vmem:[%s5950_s5 + $0xcf8] sm:$0xff] %v1028_v31  ;;  %v1032_v33 = vld [vmem:[%s5945_s30 + $0x1908] sm:$0xff]  ;;  %v1034_v34 = vld [vmem:[%s5945_s30 + $0x1910] sm:$0xff] }
  0xe2   : > { %1031 = vst [vmem:[%s5950_s5 + $0xd00] sm:$0xff] %v1030_v32  ;;  %v1036_v35 = vld [vmem:[%s5945_s30 + $0x1918] sm:$0xff]  ;;  %1033 = vst [vmem:[%s5950_s5 + $0xd08] sm:$0xff] %v1032_v33  ;;  %v1038_v36 = vld [vmem:[%s5945_s30 + $0x1920] sm:$0xff] }
  0xe3   : > { %1035 = vst [vmem:[%s5950_s5 + $0xd10] sm:$0xff] %v1034_v34  ;;  %1037 = vst [vmem:[%s5950_s5 + $0xd18] sm:$0xff] %v1036_v35  ;;  %v1040_v37 = vld [vmem:[%s5945_s30 + $0x1928] sm:$0xff]  ;;  %v1042_v38 = vld [vmem:[%s5945_s30 + $0x1930] sm:$0xff] }
  0xe4   : > { %1039 = vst [vmem:[%s5950_s5 + $0xd20] sm:$0xff] %v1038_v36  ;;  %1041 = vst [vmem:[%s5950_s5 + $0xd28] sm:$0xff] %v1040_v37  ;;  %v1044_v39 = vld [vmem:[%s5945_s30 + $0x1938] sm:$0xff]  ;;  %v1046_v40 = vld [vmem:[%s5945_s30 + $0x1940] sm:$0xff] }
  0xe5   : > { %1043 = vst [vmem:[%s5950_s5 + $0xd30] sm:$0xff] %v1042_v38  ;;  %v1048_v41 = vld [vmem:[%s5945_s30 + $0x1948] sm:$0xff]  ;;  %1045 = vst [vmem:[%s5950_s5 + $0xd38] sm:$0xff] %v1044_v39  ;;  %v1050_v42 = vld [vmem:[%s5945_s30 + $0x1950] sm:$0xff] }
  0xe6   : > { %1047 = vst [vmem:[%s5950_s5 + $0xd40] sm:$0xff] %v1046_v40  ;;  %1049 = vst [vmem:[%s5950_s5 + $0xd48] sm:$0xff] %v1048_v41  ;;  %v1052_v43 = vld [vmem:[%s5945_s30 + $0x1958] sm:$0xff]  ;;  %v1054_v44 = vld [vmem:[%s5945_s30 + $0x1960] sm:$0xff] }
  0xe7   : > { %1051 = vst [vmem:[%s5950_s5 + $0xd50] sm:$0xff] %v1050_v42  ;;  %1053 = vst [vmem:[%s5950_s5 + $0xd58] sm:$0xff] %v1052_v43  ;;  %v1056_v45 = vld [vmem:[%s5945_s30 + $0x1968] sm:$0xff]  ;;  %v1058_v46 = vld [vmem:[%s5945_s30 + $0x1970] sm:$0xff] }
  0xe8   : > { %1055 = vst [vmem:[%s5950_s5 + $0xd60] sm:$0xff] %v1054_v44  ;;  %v1060_v47 = vld [vmem:[%s5945_s30 + $0x1978] sm:$0xff]  ;;  %1057 = vst [vmem:[%s5950_s5 + $0xd68] sm:$0xff] %v1056_v45  ;;  %v1062_v48 = vld [vmem:[%s5945_s30 + $0x1980] sm:$0xff] }
  0xe9   : > { %1059 = vst [vmem:[%s5950_s5 + $0xd70] sm:$0xff] %v1058_v46  ;;  %1061 = vst [vmem:[%s5950_s5 + $0xd78] sm:$0xff] %v1060_v47  ;;  %v1064_v49 = vld [vmem:[%s5945_s30 + $0x1988] sm:$0xff]  ;;  %v1066_v50 = vld [vmem:[%s5945_s30 + $0x1990] sm:$0xff] }
  0xea   : > { %1063 = vst [vmem:[%s5950_s5 + $0xd80] sm:$0xff] %v1062_v48  ;;  %1065 = vst [vmem:[%s5950_s5 + $0xd88] sm:$0xff] %v1064_v49  ;;  %v1068_v51 = vld [vmem:[%s5945_s30 + $0x1998] sm:$0xff]  ;;  %v1070_v52 = vld [vmem:[%s5945_s30 + $0x19a0] sm:$0xff] }
  0xeb   : > { %1067 = vst [vmem:[%s5950_s5 + $0xd90] sm:$0xff] %v1066_v50  ;;  %v1072_v53 = vld [vmem:[%s5945_s30 + $0x19a8] sm:$0xff]  ;;  %1069 = vst [vmem:[%s5950_s5 + $0xd98] sm:$0xff] %v1068_v51  ;;  %v1074_v54 = vld [vmem:[%s5945_s30 + $0x19b0] sm:$0xff] }
  0xec   : > { %1071 = vst [vmem:[%s5950_s5 + $0xda0] sm:$0xff] %v1070_v52  ;;  %1073 = vst [vmem:[%s5950_s5 + $0xda8] sm:$0xff] %v1072_v53  ;;  %v1076_v55 = vld [vmem:[%s5945_s30 + $0x19b8] sm:$0xff]  ;;  %v1078_v56 = vld [vmem:[%s5945_s30 + $0x19c0] sm:$0xff] }
  0xed   : > { %1075 = vst [vmem:[%s5950_s5 + $0xdb0] sm:$0xff] %v1074_v54  ;;  %1077 = vst [vmem:[%s5950_s5 + $0xdb8] sm:$0xff] %v1076_v55  ;;  %v1080_v57 = vld [vmem:[%s5945_s30 + $0x19c8] sm:$0xff]  ;;  %v1082_v58 = vld [vmem:[%s5945_s30 + $0x19d0] sm:$0xff] }
  0xee   : > { %1079 = vst [vmem:[%s5950_s5 + $0xdc0] sm:$0xff] %v1078_v56  ;;  %v1084_v59 = vld [vmem:[%s5945_s30 + $0x19d8] sm:$0xff]  ;;  %1081 = vst [vmem:[%s5950_s5 + $0xdc8] sm:$0xff] %v1080_v57  ;;  %v1086_v60 = vld [vmem:[%s5945_s30 + $0x19e0] sm:$0xff] }
  0xef   : > { %1083 = vst [vmem:[%s5950_s5 + $0xdd0] sm:$0xff] %v1082_v58  ;;  %1085 = vst [vmem:[%s5950_s5 + $0xdd8] sm:$0xff] %v1084_v59  ;;  %v1088_v61 = vld [vmem:[%s5945_s30 + $0x19e8] sm:$0xff]  ;;  %v1090_v62 = vld [vmem:[%s5945_s30 + $0x19f0] sm:$0xff] }
  0xf0   : > { %1087 = vst [vmem:[%s5950_s5 + $0xde0] sm:$0xff] %v1086_v60  ;;  %1089 = vst [vmem:[%s5950_s5 + $0xde8] sm:$0xff] %v1088_v61  ;;  %v1092_v63 = vld [vmem:[%s5945_s30 + $0x19f8] sm:$0xff]  ;;  %v1094_v0 = vld [vmem:[%s5945_s30 + $0x1a00] sm:$0xff] }
  0xf1   : > { %1091 = vst [vmem:[%s5950_s5 + $0xdf0] sm:$0xff] %v1090_v62  ;;  %v1096_v1 = vld [vmem:[%s5945_s30 + $0x1a08] sm:$0xff]  ;;  %1093 = vst [vmem:[%s5950_s5 + $0xdf8] sm:$0xff] %v1092_v63  ;;  %v1098_v2 = vld [vmem:[%s5945_s30 + $0x1a10] sm:$0xff] }
  0xf2   : > { %1095 = vst [vmem:[%s5950_s5 + $0xe00] sm:$0xff] %v1094_v0  ;;  %1097 = vst [vmem:[%s5950_s5 + $0xe08] sm:$0xff] %v1096_v1  ;;  %v1100_v3 = vld [vmem:[%s5945_s30 + $0x1a18] sm:$0xff]  ;;  %v1102_v4 = vld [vmem:[%s5945_s30 + $0x1a20] sm:$0xff] }
  0xf3   : > { %1099 = vst [vmem:[%s5950_s5 + $0xe10] sm:$0xff] %v1098_v2  ;;  %1101 = vst [vmem:[%s5950_s5 + $0xe18] sm:$0xff] %v1100_v3  ;;  %v1104_v5 = vld [vmem:[%s5945_s30 + $0x1a28] sm:$0xff]  ;;  %v1106_v6 = vld [vmem:[%s5945_s30 + $0x1a30] sm:$0xff] }
  0xf4   : > { %1103 = vst [vmem:[%s5950_s5 + $0xe20] sm:$0xff] %v1102_v4  ;;  %v1108_v7 = vld [vmem:[%s5945_s30 + $0x1a38] sm:$0xff]  ;;  %1105 = vst [vmem:[%s5950_s5 + $0xe28] sm:$0xff] %v1104_v5  ;;  %v1110_v8 = vld [vmem:[%s5945_s30 + $0x1a40] sm:$0xff] }
  0xf5   : > { %1107 = vst [vmem:[%s5950_s5 + $0xe30] sm:$0xff] %v1106_v6  ;;  %1109 = vst [vmem:[%s5950_s5 + $0xe38] sm:$0xff] %v1108_v7  ;;  %v1112_v9 = vld [vmem:[%s5945_s30 + $0x1a48] sm:$0xff]  ;;  %v1114_v10 = vld [vmem:[%s5945_s30 + $0x1a50] sm:$0xff] }
  0xf6   : > { %1111 = vst [vmem:[%s5950_s5 + $0xe40] sm:$0xff] %v1110_v8  ;;  %1113 = vst [vmem:[%s5950_s5 + $0xe48] sm:$0xff] %v1112_v9  ;;  %v1116_v11 = vld [vmem:[%s5945_s30 + $0x1a58] sm:$0xff]  ;;  %v1118_v12 = vld [vmem:[%s5945_s30 + $0x1a60] sm:$0xff] }
  0xf7   : > { %1115 = vst [vmem:[%s5950_s5 + $0xe50] sm:$0xff] %v1114_v10  ;;  %v1120_v13 = vld [vmem:[%s5945_s30 + $0x1a68] sm:$0xff]  ;;  %1117 = vst [vmem:[%s5950_s5 + $0xe58] sm:$0xff] %v1116_v11  ;;  %v1122_v14 = vld [vmem:[%s5945_s30 + $0x1a70] sm:$0xff] }
  0xf8   : > { %1119 = vst [vmem:[%s5950_s5 + $0xe60] sm:$0xff] %v1118_v12  ;;  %1121 = vst [vmem:[%s5950_s5 + $0xe68] sm:$0xff] %v1120_v13  ;;  %v1124_v15 = vld [vmem:[%s5945_s30 + $0x1a78] sm:$0xff]  ;;  %v1126_v16 = vld [vmem:[%s5945_s30 + $0x1a80] sm:$0xff] }
  0xf9   : > { %1123 = vst [vmem:[%s5950_s5 + $0xe70] sm:$0xff] %v1122_v14  ;;  %1125 = vst [vmem:[%s5950_s5 + $0xe78] sm:$0xff] %v1124_v15  ;;  %v1128_v17 = vld [vmem:[%s5945_s30 + $0x1a88] sm:$0xff]  ;;  %v1130_v18 = vld [vmem:[%s5945_s30 + $0x1a90] sm:$0xff] }
  0xfa   : > { %1127 = vst [vmem:[%s5950_s5 + $0xe80] sm:$0xff] %v1126_v16  ;;  %v1132_v19 = vld [vmem:[%s5945_s30 + $0x1a98] sm:$0xff]  ;;  %1129 = vst [vmem:[%s5950_s5 + $0xe88] sm:$0xff] %v1128_v17  ;;  %v1134_v20 = vld [vmem:[%s5945_s30 + $0x1aa0] sm:$0xff] }
  0xfb   : > { %1131 = vst [vmem:[%s5950_s5 + $0xe90] sm:$0xff] %v1130_v18  ;;  %1133 = vst [vmem:[%s5950_s5 + $0xe98] sm:$0xff] %v1132_v19  ;;  %v1136_v21 = vld [vmem:[%s5945_s30 + $0x1aa8] sm:$0xff]  ;;  %v1138_v22 = vld [vmem:[%s5945_s30 + $0x1ab0] sm:$0xff] }
  0xfc   : > { %1135 = vst [vmem:[%s5950_s5 + $0xea0] sm:$0xff] %v1134_v20  ;;  %1137 = vst [vmem:[%s5950_s5 + $0xea8] sm:$0xff] %v1136_v21  ;;  %v1140_v23 = vld [vmem:[%s5945_s30 + $0x1ab8] sm:$0xff]  ;;  %v1142_v24 = vld [vmem:[%s5945_s30 + $0x1ac0] sm:$0xff] }
  0xfd   : > { %1139 = vst [vmem:[%s5950_s5 + $0xeb0] sm:$0xff] %v1138_v22  ;;  %v1144_v25 = vld [vmem:[%s5945_s30 + $0x1ac8] sm:$0xff]  ;;  %1141 = vst [vmem:[%s5950_s5 + $0xeb8] sm:$0xff] %v1140_v23  ;;  %v1146_v26 = vld [vmem:[%s5945_s30 + $0x1ad0] sm:$0xff] }
  0xfe   : > { %1143 = vst [vmem:[%s5950_s5 + $0xec0] sm:$0xff] %v1142_v24  ;;  %1145 = vst [vmem:[%s5950_s5 + $0xec8] sm:$0xff] %v1144_v25  ;;  %v1148_v27 = vld [vmem:[%s5945_s30 + $0x1ad8] sm:$0xff]  ;;  %v1150_v28 = vld [vmem:[%s5945_s30 + $0x1ae0] sm:$0xff] }
  0xff   : > { %1147 = vst [vmem:[%s5950_s5 + $0xed0] sm:$0xff] %v1146_v26  ;;  %1149 = vst [vmem:[%s5950_s5 + $0xed8] sm:$0xff] %v1148_v27  ;;  %v1152_v29 = vld [vmem:[%s5945_s30 + $0x1ae8] sm:$0xff]  ;;  %v1154_v30 = vld [vmem:[%s5945_s30 + $0x1af0] sm:$0xff] }
 0x100   : > { %1151 = vst [vmem:[%s5950_s5 + $0xee0] sm:$0xff] %v1150_v28  ;;  %v1156_v31 = vld [vmem:[%s5945_s30 + $0x1af8] sm:$0xff]  ;;  %1153 = vst [vmem:[%s5950_s5 + $0xee8] sm:$0xff] %v1152_v29  ;;  %v1158_v32 = vld [vmem:[%s5945_s30 + $0x1b00] sm:$0xff] }
 0x101   : > { %1155 = vst [vmem:[%s5950_s5 + $0xef0] sm:$0xff] %v1154_v30  ;;  %1157 = vst [vmem:[%s5950_s5 + $0xef8] sm:$0xff] %v1156_v31  ;;  %v1160_v33 = vld [vmem:[%s5945_s30 + $0x1b08] sm:$0xff]  ;;  %v1162_v34 = vld [vmem:[%s5945_s30 + $0x1b10] sm:$0xff] }
 0x102   : > { %1159 = vst [vmem:[%s5950_s5 + $0xf00] sm:$0xff] %v1158_v32  ;;  %1161 = vst [vmem:[%s5950_s5 + $0xf08] sm:$0xff] %v1160_v33  ;;  %v1164_v35 = vld [vmem:[%s5945_s30 + $0x1b18] sm:$0xff]  ;;  %v1166_v36 = vld [vmem:[%s5945_s30 + $0x1b20] sm:$0xff] }
 0x103   : > { %1163 = vst [vmem:[%s5950_s5 + $0xf10] sm:$0xff] %v1162_v34  ;;  %v1168_v37 = vld [vmem:[%s5945_s30 + $0x1b28] sm:$0xff]  ;;  %1165 = vst [vmem:[%s5950_s5 + $0xf18] sm:$0xff] %v1164_v35  ;;  %v1170_v38 = vld [vmem:[%s5945_s30 + $0x1b30] sm:$0xff] }
 0x104   : > { %1167 = vst [vmem:[%s5950_s5 + $0xf20] sm:$0xff] %v1166_v36  ;;  %1169 = vst [vmem:[%s5950_s5 + $0xf28] sm:$0xff] %v1168_v37  ;;  %v1172_v39 = vld [vmem:[%s5945_s30 + $0x1b38] sm:$0xff]  ;;  %v1174_v40 = vld [vmem:[%s5945_s30 + $0x1b40] sm:$0xff] }
 0x105   : > { %1171 = vst [vmem:[%s5950_s5 + $0xf30] sm:$0xff] %v1170_v38  ;;  %1173 = vst [vmem:[%s5950_s5 + $0xf38] sm:$0xff] %v1172_v39  ;;  %v1176_v41 = vld [vmem:[%s5945_s30 + $0x1b48] sm:$0xff]  ;;  %v1178_v42 = vld [vmem:[%s5945_s30 + $0x1b50] sm:$0xff] }
 0x106   : > { %1175 = vst [vmem:[%s5950_s5 + $0xf40] sm:$0xff] %v1174_v40  ;;  %v1180_v43 = vld [vmem:[%s5945_s30 + $0x1b58] sm:$0xff]  ;;  %1177 = vst [vmem:[%s5950_s5 + $0xf48] sm:$0xff] %v1176_v41  ;;  %v1182_v44 = vld [vmem:[%s5945_s30 + $0x1b60] sm:$0xff] }
 0x107   : > { %1179 = vst [vmem:[%s5950_s5 + $0xf50] sm:$0xff] %v1178_v42  ;;  %1181 = vst [vmem:[%s5950_s5 + $0xf58] sm:$0xff] %v1180_v43  ;;  %v1184_v45 = vld [vmem:[%s5945_s30 + $0x1b68] sm:$0xff]  ;;  %v1186_v46 = vld [vmem:[%s5945_s30 + $0x1b70] sm:$0xff] }
 0x108   : > { %1183 = vst [vmem:[%s5950_s5 + $0xf60] sm:$0xff] %v1182_v44  ;;  %1185 = vst [vmem:[%s5950_s5 + $0xf68] sm:$0xff] %v1184_v45  ;;  %v1188_v47 = vld [vmem:[%s5945_s30 + $0x1b78] sm:$0xff]  ;;  %v1190_v48 = vld [vmem:[%s5945_s30 + $0x1b80] sm:$0xff] }
 0x109   : > { %1187 = vst [vmem:[%s5950_s5 + $0xf70] sm:$0xff] %v1186_v46  ;;  %v1192_v49 = vld [vmem:[%s5945_s30 + $0x1b88] sm:$0xff]  ;;  %1189 = vst [vmem:[%s5950_s5 + $0xf78] sm:$0xff] %v1188_v47  ;;  %v1194_v50 = vld [vmem:[%s5945_s30 + $0x1b90] sm:$0xff] }
 0x10a   : > { %1191 = vst [vmem:[%s5950_s5 + $0xf80] sm:$0xff] %v1190_v48  ;;  %1193 = vst [vmem:[%s5950_s5 + $0xf88] sm:$0xff] %v1192_v49  ;;  %v1196_v51 = vld [vmem:[%s5945_s30 + $0x1b98] sm:$0xff]  ;;  %v1198_v52 = vld [vmem:[%s5945_s30 + $0x1ba0] sm:$0xff] }
 0x10b   : > { %1195 = vst [vmem:[%s5950_s5 + $0xf90] sm:$0xff] %v1194_v50  ;;  %1197 = vst [vmem:[%s5950_s5 + $0xf98] sm:$0xff] %v1196_v51  ;;  %v1200_v53 = vld [vmem:[%s5945_s30 + $0x1ba8] sm:$0xff]  ;;  %v1202_v54 = vld [vmem:[%s5945_s30 + $0x1bb0] sm:$0xff] }
 0x10c   : > { %1199 = vst [vmem:[%s5950_s5 + $0xfa0] sm:$0xff] %v1198_v52  ;;  %v1204_v55 = vld [vmem:[%s5945_s30 + $0x1bb8] sm:$0xff]  ;;  %1201 = vst [vmem:[%s5950_s5 + $0xfa8] sm:$0xff] %v1200_v53  ;;  %v1206_v56 = vld [vmem:[%s5945_s30 + $0x1bc0] sm:$0xff] }
 0x10d   : > { %1203 = vst [vmem:[%s5950_s5 + $0xfb0] sm:$0xff] %v1202_v54  ;;  %1205 = vst [vmem:[%s5950_s5 + $0xfb8] sm:$0xff] %v1204_v55  ;;  %v1208_v57 = vld [vmem:[%s5945_s30 + $0x1bc8] sm:$0xff]  ;;  %v1210_v58 = vld [vmem:[%s5945_s30 + $0x1bd0] sm:$0xff] }
 0x10e   : > { %1207 = vst [vmem:[%s5950_s5 + $0xfc0] sm:$0xff] %v1206_v56  ;;  %1209 = vst [vmem:[%s5950_s5 + $0xfc8] sm:$0xff] %v1208_v57  ;;  %v1212_v59 = vld [vmem:[%s5945_s30 + $0x1bd8] sm:$0xff]  ;;  %v1214_v60 = vld [vmem:[%s5945_s30 + $0x1be0] sm:$0xff] }
 0x10f   : > { %1211 = vst [vmem:[%s5950_s5 + $0xfd0] sm:$0xff] %v1210_v58  ;;  %v1216_v61 = vld [vmem:[%s5945_s30 + $0x1be8] sm:$0xff]  ;;  %1213 = vst [vmem:[%s5950_s5 + $0xfd8] sm:$0xff] %v1212_v59  ;;  %v1218_v62 = vld [vmem:[%s5945_s30 + $0x1bf0] sm:$0xff] }
 0x110   : > { %1215 = vst [vmem:[%s5950_s5 + $0xfe0] sm:$0xff] %v1214_v60  ;;  %1217 = vst [vmem:[%s5950_s5 + $0xfe8] sm:$0xff] %v1216_v61  ;;  %v1220_v63 = vld [vmem:[%s5945_s30 + $0x1bf8] sm:$0xff] }
 0x111   : > { %1219 = vst [vmem:[%s5950_s5 + $0xff0] sm:$0xff] %v1218_v62  ;;  %1221 = vst [vmem:[%s5950_s5 + $0xff8] sm:$0xff] %v1220_v63 }
 0x112 PF: > { %p5413_p6 = scmp.ge.s32.totalorder %s5870_s19, 1  ;;  %p1226_p7 = scmp.lt.s32.totalorder %s5870_s19, 3 }
 0x114   : > { %p1227_p8 = pnand %p5413_p6, %p1226_p7 }
 0x116   : > { %1230 = sbr.rel (%p1227_p8) target bundleno = 1452 (0x5ac), region = 51 }
 0x11b   : > { %s1233_s6 = sand.u32 1, %s5854_s15   ;;  %p5415_p9 = scmp.ne.s32.totalorder %s5862_s17, 0 }
 0x11c   : > { %s5414_s7 = sshll.u32 %s1233_s6, 12 }
 0x11d   : > { %s6976_s8 = scalar_lea.vmem [#allocation3], %s5414_s7  ;;  %1258 = sbr.rel (%p5415_p9) target bundleno = 295 (0x127), region = 59 }
 0x122   : > { %v5872_v0 = vmov -inf  }
 0x123   : > { %1259 = vst [vmem:[#allocation2 + $0x30] sm:$0xff] %v5872_v0  ;;  %1260 = vst [vmem:[#allocation2] sm:$0xff] %v5872_v0 }
 0x124   : > { %1261 = vst [vmem:[#allocation2 + $0x18] sm:$0xff] %v5872_v0  ;;  %1262 = vst [vmem:[#allocation2 + $0x10] sm:$0xff] %v5872_v0 }
 0x125   : > { %1263 = vst [vmem:[#allocation2 + $0x8] sm:$0xff] %v5872_v0  ;;  %1264 = vst [vmem:[#allocation2 + $0x20] sm:$0xff] %v5872_v0 }
 0x126   : > { %1265 = vst [vmem:[#allocation2 + $0x28] sm:$0xff] %v5872_v0  ;;  %1266 = vst [vmem:[#allocation2 + $0x38] sm:$0xff] %v5872_v0 }
 0x127 PF: > { %v1283_v1 = vld [vmem:[%s6976_s8 + $0x80] sm:$0xff]  ;;  %v1284_v2 = vld [vmem:[%s6976_s8 + $0x88] sm:$0xff]  ;;  %v1285_v3 = vld [vmem:[%s6976_s8 + $0x90] sm:$0xff]  ;;  %vm4252_vm0 = vcmask 1041409   ;;  %vm4254_vm1 = vcmask 1045509   ;;  %vm4257_vm2 = vcmask 1042434  }
 0x128   : > { %v1286_v4 = vld [vmem:[%s6976_s8 + $0x98] sm:$0xff]  ;;  %v1287_v5 = vld [vmem:[%s6976_s8 + $0xa0] sm:$0xff]  ;;  %v1288_v6 = vld [vmem:[%s6976_s8 + $0xa8] sm:$0xff]  ;;  %v1811_v9 = vunpack.c.l.bf16 %v1283_v1  ;;  %v1812_v10 = vunpack.c.h.bf16 %v1283_v1  ;;  %v1813_v11 = vunpack.c.l.bf16 %v1284_v2  ;;  %v1814_v12 = vunpack.c.h.bf16 %v1284_v2  ;;  %p5416_p10 = scmp.ne.s32.totalorder %s5862_s17, 1 }
 0x129   : > { %v1289_v7 = vld [vmem:[%s6976_s8 + $0xb0] sm:$0xff]  ;;  %v1290_v8 = vld [vmem:[%s6976_s8 + $0xb8] sm:$0xff]  ;;  %v1291_v13 = vld [vmem:[%s6976_s8 + $0xc0] sm:$0xff]  ;;  %v1815_v15 = vunpack.c.l.bf16 %v1285_v3  ;;  %v1816_v16 = vunpack.c.h.bf16 %v1285_v3  ;;  %v1817_v17 = vunpack.c.l.bf16 %v1286_v4  ;;  %v1818_v18 = vunpack.c.h.bf16 %v1286_v4 }
 0x12a   : > { %v1292_v14 = vld [vmem:[%s6976_s8 + $0xc8] sm:$0xff]  ;;  %v1293_v19 = vld [vmem:[%s6976_s8 + $0xd0] sm:$0xff]  ;;  %v1294_v20 = vld [vmem:[%s6976_s8 + $0xd8] sm:$0xff]  ;;  %v1819_v21 = vunpack.c.l.bf16 %v1287_v5  ;;  %v1820_v22 = vunpack.c.h.bf16 %v1287_v5  ;;  %v1821_v23 = vunpack.c.l.bf16 %v1288_v6  ;;  %v1822_v24 = vunpack.c.h.bf16 %v1288_v6 }
 0x12b   : > { %v1823_v25 = vunpack.c.l.bf16 %v1289_v7  ;;  %v1824_v26 = vunpack.c.h.bf16 %v1289_v7  ;;  %v1825_v27 = vunpack.c.l.bf16 %v1290_v8  ;;  %v1826_v28 = vunpack.c.h.bf16 %v1290_v8  ;;  %v1295_v33 = vld [vmem:[%s6976_s8 + $0xe0] sm:$0xff]  ;;  %v1296_v34 = vld [vmem:[%s6976_s8 + $0xe8] sm:$0xff]  ;;  %v1297_v39 = vld [vmem:[%s6976_s8 + $0xf0] sm:$0xff] }
 0x12c   : > { %v1827_v29 = vunpack.c.l.bf16 %v1291_v13  ;;  %v1828_v30 = vunpack.c.h.bf16 %v1291_v13  ;;  %v1829_v31 = vunpack.c.l.bf16 %v1292_v14  ;;  %v1830_v32 = vunpack.c.h.bf16 %v1292_v14  ;;  %v1298_v40 = vld [vmem:[%s6976_s8 + $0xf8] sm:$0xff]  ;;  %v1299_v53 = vld [vmem:[%s6976_s8 + $0x100] sm:$0xff]  ;;  %v1300_v54 = vld [vmem:[%s6976_s8 + $0x108] sm:$0xff] }
 0x12d   : > { %v1831_v35 = vunpack.c.l.bf16 %v1293_v19  ;;  %v1832_v36 = vunpack.c.h.bf16 %v1293_v19  ;;  %v1833_v37 = vunpack.c.l.bf16 %v1294_v20  ;;  %v1834_v38 = vunpack.c.h.bf16 %v1294_v20  ;;  %v1301_v59 = vld [vmem:[%s6976_s8 + $0x110] sm:$0xff]  ;;  %v1302_v60 = vld [vmem:[%s6976_s8 + $0x118] sm:$0xff] }
 0x12e   : > { %v2812_v41 = vmax.f32 %v1827_v29, %v1811_v9  ;;  %v2833_v42 = vmax.f32 %v1828_v30, %v1812_v10  ;;  %v2854_v43 = vmax.f32 %v1829_v31, %v1813_v11  ;;  %v2875_v44 = vmax.f32 %v1830_v32, %v1814_v12  ;;  %v1303_v9 = vld [vmem:[%s6976_s8 + $0x120] sm:$0xff]  ;;  %v1304_v10 = vld [vmem:[%s6976_s8 + $0x128] sm:$0xff] }
 0x12f   : > { %v2896_v45 = vmax.f32 %v1831_v35, %v1815_v15  ;;  %v2917_v46 = vmax.f32 %v1832_v36, %v1816_v16  ;;  %v2938_v47 = vmax.f32 %v1833_v37, %v1817_v17  ;;  %v2959_v48 = vmax.f32 %v1834_v38, %v1818_v18  ;;  %v1305_v15 = vld [vmem:[%s6976_s8 + $0x130] sm:$0xff]  ;;  %v1306_v16 = vld [vmem:[%s6976_s8 + $0x138] sm:$0xff]  ;;  %v1307_v29 = vld [vmem:[%s6976_s8 + $0x140] sm:$0xff] }
 0x130   : > { %v1835_v49 = vunpack.c.l.bf16 %v1295_v33  ;;  %v1836_v50 = vunpack.c.h.bf16 %v1295_v33  ;;  %v1837_v51 = vunpack.c.l.bf16 %v1296_v34  ;;  %v1838_v52 = vunpack.c.h.bf16 %v1296_v34  ;;  %v1308_v30 = vld [vmem:[%s6976_s8 + $0x148] sm:$0xff]  ;;  %v1309_v35 = vld [vmem:[%s6976_s8 + $0x150] sm:$0xff]  ;;  %v1310_v36 = vld [vmem:[%s6976_s8 + $0x158] sm:$0xff] }
 0x131   : > { %v1839_v55 = vunpack.c.l.bf16 %v1297_v39  ;;  %v1840_v56 = vunpack.c.h.bf16 %v1297_v39  ;;  %v1841_v57 = vunpack.c.l.bf16 %v1298_v40  ;;  %v1842_v58 = vunpack.c.h.bf16 %v1298_v40 }
 0x132   : > { %v2980_v61 = vmax.f32 %v1835_v49, %v1819_v21  ;;  %v3001_v62 = vmax.f32 %v1836_v50, %v1820_v22  ;;  %v3022_v63 = vmax.f32 %v1837_v51, %v1821_v23  ;;  %v3043_v0 = vmax.f32 %v1838_v52, %v1822_v24  ;;  %v7024_v49 = vld [vmem:[%s6976_s8] sm:$0xff]  ;;  %v7027_v50 = vld [vmem:[%s6976_s8 + $0x8] sm:$0xff] }
 0x133   : > { %v3064_v1 = vmax.f32 %v1839_v55, %v1823_v25  ;;  %v3085_v2 = vmax.f32 %v1840_v56, %v1824_v26  ;;  %v3106_v3 = vmax.f32 %v1841_v57, %v1825_v27  ;;  %v3127_v4 = vmax.f32 %v1842_v58, %v1826_v28  ;;  %v7030_v55 = vld [vmem:[%s6976_s8 + $0x10] sm:$0xff]  ;;  %v7033_v56 = vld [vmem:[%s6976_s8 + $0x18] sm:$0xff] }
 0x134   : > { %v1843_v5 = vunpack.c.l.bf16 %v1299_v53  ;;  %v1844_v6 = vunpack.c.h.bf16 %v1299_v53  ;;  %v1845_v7 = vunpack.c.l.bf16 %v1300_v54  ;;  %v1846_v8 = vunpack.c.h.bf16 %v1300_v54 }
 0x135   : > { %v1847_v11 = vunpack.c.l.bf16 %v1301_v59  ;;  %v1848_v12 = vunpack.c.h.bf16 %v1301_v59  ;;  %v1849_v13 = vunpack.c.l.bf16 %v1302_v60  ;;  %v1850_v14 = vunpack.c.h.bf16 %v1302_v60 }
 0x136   : > { %v2813_v17 = vmax.f32 %v2812_v41, %v1843_v5  ;;  %v2834_v18 = vmax.f32 %v2833_v42, %v1844_v6  ;;  %v2855_v19 = vmax.f32 %v2854_v43, %v1845_v7  ;;  %v2876_v20 = vmax.f32 %v2875_v44, %v1846_v8  ;;  %v1328_v7 = vld [vmem:[%s6976_s8 + $0x1e8] sm:$0xff] }
 0x137   : > { %v2897_v21 = vmax.f32 %v2896_v45, %v1847_v11  ;;  %v2918_v22 = vmax.f32 %v2917_v46, %v1848_v12  ;;  %v2939_v23 = vmax.f32 %v2938_v47, %v1849_v13  ;;  %v2960_v24 = vmax.f32 %v2959_v48, %v1850_v14  ;;  %v1317_v13 = vld [vmem:[%s6976_s8 + $0x190] sm:$0xff] }
 0x138   : > { %v1851_v25 = vunpack.c.l.bf16 %v1303_v9  ;;  %v1852_v26 = vunpack.c.h.bf16 %v1303_v9  ;;  %v1853_v27 = vunpack.c.l.bf16 %v1304_v10  ;;  %v1854_v28 = vunpack.c.h.bf16 %v1304_v10  ;;  %v7068_v9 = vld [vmem:[%s6976_s8 + $0x40] sm:$0xff]  ;;  %v7071_v10 = vld [vmem:[%s6976_s8 + $0x48] sm:$0xff] }
 0x139   : > { %v1855_v31 = vunpack.c.l.bf16 %v1305_v15  ;;  %v1856_v32 = vunpack.c.h.bf16 %v1305_v15  ;;  %v1857_v33 = vunpack.c.l.bf16 %v1306_v16  ;;  %v1858_v34 = vunpack.c.h.bf16 %v1306_v16  ;;  %v7078_v15 = vld [vmem:[%s6976_s8 + $0x50] sm:$0xff]  ;;  %v7081_v16 = vld [vmem:[%s6976_s8 + $0x58] sm:$0xff] }
 0x13a   : > { %v7007_v37 = vmax.f32 %v2980_v61, %v1851_v25  ;;  %v7009_v38 = vmax.f32 %v3001_v62, %v1852_v26  ;;  %v7011_v39 = vmax.f32 %v3022_v63, %v1853_v27  ;;  %v7013_v40 = vmax.f32 %v3043_v0, %v1854_v28  ;;  %v7044_v61 = vld [vmem:[%s6976_s8 + $0x20] sm:$0xff]  ;;  %v7047_v62 = vld [vmem:[%s6976_s8 + $0x28] sm:$0xff]  ;;  %v7098_v27 = vld [vmem:[%s6976_s8 + $0x70] sm:$0xff] }
 0x13b   : > { %v7015_v41 = vmax.f32 %v3064_v1, %v1855_v31  ;;  %v7017_v42 = vmax.f32 %v3085_v2, %v1856_v32  ;;  %v7019_v43 = vmax.f32 %v3106_v3, %v1857_v33  ;;  %v7021_v44 = vmax.f32 %v3127_v4, %v1858_v34  ;;  %9542 = vst [vmem:[#allocation10_spill] sm:$0xff] %v7047_v62  ;;  %v7058_v3 = vld [vmem:[%s6976_s8 + $0x30] sm:$0xff]  ;;  %v7061_v4 = vld [vmem:[%s6976_s8 + $0x38] sm:$0xff]  ;;  %v1311_v33 = vld [vmem:[%s6976_s8 + $0x160] sm:$0xff] }
 0x13c   : > { %v1859_v45 = vunpack.c.l.bf16 %v1307_v29  ;;  %v1860_v46 = vunpack.c.h.bf16 %v1307_v29  ;;  %v1861_v47 = vunpack.c.l.bf16 %v1308_v30  ;;  %v1862_v48 = vunpack.c.h.bf16 %v1308_v30  ;;  %9543 = vst [vmem:[#allocation11_spill] sm:$0xff] %v7058_v3  ;;  %9544 = vst [vmem:[#allocation12_spill] sm:$0xff] %v7061_v4  ;;  %v7101_v28 = vld [vmem:[%s6976_s8 + $0x78] sm:$0xff]  ;;  %v1312_v34 = vld [vmem:[%s6976_s8 + $0x168] sm:$0xff] }
 0x13d   : > { %v1863_v51 = vunpack.c.l.bf16 %v1309_v35  ;;  %v1864_v52 = vunpack.c.h.bf16 %v1309_v35  ;;  %v1865_v53 = vunpack.c.l.bf16 %v1310_v36  ;;  %v1866_v54 = vunpack.c.h.bf16 %v1310_v36  ;;  %9546 = vst [vmem:[#allocation14_spill] sm:$0xff] %v7098_v27  ;;  %9547 = vst [vmem:[#allocation15_spill] sm:$0xff] %v7101_v28  ;;  %v1318_v26 = vld [vmem:[%s6976_s8 + $0x198] sm:$0xff]  ;;  %v1327_v32 = vld [vmem:[%s6976_s8 + $0x1e0] sm:$0xff] }
 0x13e   : > { %v7035_v57 = vmax.f32 %v2813_v17, %v1859_v45  ;;  %v7037_v58 = vmax.f32 %v2834_v18, %v1860_v46  ;;  %v7039_v59 = vmax.f32 %v2855_v19, %v1861_v47  ;;  %v7041_v60 = vmax.f32 %v2876_v20, %v1862_v48  ;;  %v1313_v47 = vld [vmem:[%s6976_s8 + $0x170] sm:$0xff]  ;;  %v1314_v48 = vld [vmem:[%s6976_s8 + $0x178] sm:$0xff]  ;;  %v1427_v28 = vld [vmem:[%s6976_s8 + $0x500] sm:$0xff] }
 0x13f   : > { %v7049_v63 = vmax.f32 %v2897_v21, %v1863_v51  ;;  %v7051_v0 = vmax.f32 %v2918_v22, %v1864_v52  ;;  %v7053_v1 = vmax.f32 %v2939_v23, %v1865_v53  ;;  %v7055_v2 = vmax.f32 %v2960_v24, %v1866_v54  ;;  %v7088_v21 = vld [vmem:[%s6976_s8 + $0x60] sm:$0xff]  ;;  %v7091_v22 = vld [vmem:[%s6976_s8 + $0x68] sm:$0xff]  ;;  %v1417_v30 = vld [vmem:[%s6976_s8 + $0x4b0] sm:$0xff] }
 0x140   : > { %9545 = vst [vmem:[#allocation13_spill] sm:$0xff] %v7091_v22  ;;  %v1867_v20 = vunpack.c.l.bf16 %v1311_v33  ;;  %v1868_v19 = vunpack.c.h.bf16 %v1311_v33  ;;  %v1869_v18 = vunpack.c.l.bf16 %v1312_v34  ;;  %v1870_v17 = vunpack.c.h.bf16 %v1312_v34  ;;  %v1315_v51 = vld [vmem:[%s6976_s8 + $0x180] sm:$0xff]  ;;  %v1316_v52 = vld [vmem:[%s6976_s8 + $0x188] sm:$0xff] }
 0x141   : > { %v1871_v14 = vunpack.c.l.bf16 %v1313_v47  ;;  %v1872_v53 = vunpack.c.h.bf16 %v1313_v47  ;;  %v1873_v46 = vunpack.c.l.bf16 %v1314_v48  ;;  %v1874_v54 = vunpack.c.h.bf16 %v1314_v48  ;;  %v1428_v3 = vld [vmem:[%s6976_s8 + $0x508] sm:$0xff] }
 0x142   : > { %v2982_v25 = vmax.f32 %v7007_v37, %v1867_v20  ;;  %v3003_v24 = vmax.f32 %v7009_v38, %v1868_v19  ;;  %v3024_v23 = vmax.f32 %v7011_v39, %v1869_v18  ;;  %v3045_v33 = vmax.f32 %v7013_v40, %v1870_v17  ;;  %v1319_v20 = vld [vmem:[%s6976_s8 + $0x1a0] sm:$0xff]  ;;  %v1320_v38 = vld [vmem:[%s6976_s8 + $0x1a8] sm:$0xff]  ;;  %v1321_v17 = vld [vmem:[%s6976_s8 + $0x1b0] sm:$0xff] }
 0x143   : > { %v3066_v34 = vmax.f32 %v7015_v41, %v1871_v14  ;;  %v3087_v47 = vmax.f32 %v7017_v42, %v1872_v53  ;;  %v3108_v45 = vmax.f32 %v7019_v43, %v1873_v46  ;;  %v3129_v48 = vmax.f32 %v7021_v44, %v1874_v54  ;;  %v1322_v41 = vld [vmem:[%s6976_s8 + $0x1b8] sm:$0xff] }
 0x144   : > { %v1875_v12 = vunpack.c.l.bf16 %v1315_v51  ;;  %v1876_v36 = vunpack.c.h.bf16 %v1315_v51  ;;  %v1877_v11 = vunpack.c.l.bf16 %v1316_v52  ;;  %v1878_v37 = vunpack.c.h.bf16 %v1316_v52 }
 0x145   : > { %v1879_v19 = vunpack.c.l.bf16 %v1317_v13  ;;  %v1880_v39 = vunpack.c.h.bf16 %v1317_v13  ;;  %v1881_v18 = vunpack.c.l.bf16 %v1318_v26  ;;  %v1882_v40 = vunpack.c.h.bf16 %v1318_v26 }
 0x146   : > { %v2815_v42 = vmax.f32 %v7035_v57, %v1875_v12  ;;  %v2836_v43 = vmax.f32 %v7037_v58, %v1876_v36  ;;  %v2857_v44 = vmax.f32 %v7039_v59, %v1877_v11  ;;  %v2878_v14 = vmax.f32 %v7041_v60, %v1878_v37  ;;  %v1323_v12 = vld [vmem:[%s6976_s8 + $0x1c0] sm:$0xff]  ;;  %v1324_v58 = vld [vmem:[%s6976_s8 + $0x1c8] sm:$0xff]  ;;  %v1325_v37 = vld [vmem:[%s6976_s8 + $0x1d0] sm:$0xff] }
 0x147   : > { %v2899_v46 = vmax.f32 %v7049_v63, %v1879_v19  ;;  %v2920_v13 = vmax.f32 %v7051_v0, %v1880_v39  ;;  %v2941_v51 = vmax.f32 %v7053_v1, %v1881_v18  ;;  %v2962_v26 = vmax.f32 %v7055_v2, %v1882_v40  ;;  %v1326_v63 = vld [vmem:[%s6976_s8 + $0x1d8] sm:$0xff] }
 0x148   : > { %v1883_v52 = vunpack.c.l.bf16 %v1319_v20  ;;  %v1884_v53 = vunpack.c.h.bf16 %v1319_v20  ;;  %v1885_v54 = vunpack.c.l.bf16 %v1320_v38  ;;  %v1886_v57 = vunpack.c.h.bf16 %v1320_v38 }
 0x149   : > { %v1887_v36 = vunpack.c.l.bf16 %v1321_v17  ;;  %v1888_v59 = vunpack.c.h.bf16 %v1321_v17  ;;  %v1889_v11 = vunpack.c.l.bf16 %v1322_v41  ;;  %v1890_v60 = vunpack.c.h.bf16 %v1322_v41 }
 0x14a   : > { %v2983_v19 = vmax.f32 %v2982_v25, %v1883_v52  ;;  %v3004_v0 = vmax.f32 %v3003_v24, %v1884_v53  ;;  %v3025_v39 = vmax.f32 %v3024_v23, %v1885_v54  ;;  %v3046_v1 = vmax.f32 %v3045_v33, %v1886_v57  ;;  %v1329_v23 = vld [vmem:[%s6976_s8 + $0x1f0] sm:$0xff]  ;;  %v1330_v24 = vld [vmem:[%s6976_s8 + $0x1f8] sm:$0xff] }
 0x14b   : > { %v3067_v2 = vmax.f32 %v3066_v34, %v1887_v36  ;;  %v3088_v20 = vmax.f32 %v3087_v47, %v1888_v59  ;;  %v3109_v18 = vmax.f32 %v3108_v45, %v1889_v11  ;;  %v3130_v38 = vmax.f32 %v3129_v48, %v1890_v60  ;;  %v1331_v59 = vld [vmem:[%s6976_s8 + $0x200] sm:$0xff]  ;;  %v1332_v11 = vld [vmem:[%s6976_s8 + $0x208] sm:$0xff] }
 0x14c   : > { %v1891_v40 = vunpack.c.l.bf16 %v1323_v12  ;;  %v1892_v35 = vunpack.c.h.bf16 %v1323_v12  ;;  %v1893_v8 = vunpack.c.l.bf16 %v1324_v58  ;;  %v1894_v17 = vunpack.c.h.bf16 %v1324_v58 }
 0x14d   : > { %v1895_v41 = vunpack.c.l.bf16 %v1325_v37  ;;  %v1896_v31 = vunpack.c.h.bf16 %v1325_v37  ;;  %v1897_v6 = vunpack.c.l.bf16 %v1326_v63  ;;  %v1898_v25 = vunpack.c.h.bf16 %v1326_v63 }
 0x14e   : > { %v2816_v33 = vmax.f32 %v2815_v42, %v1891_v40  ;;  %v2837_v52 = vmax.f32 %v2836_v43, %v1892_v35  ;;  %v2858_v34 = vmax.f32 %v2857_v44, %v1893_v8  ;;  %v2879_v45 = vmax.f32 %v2878_v14, %v1894_v17  ;;  %v1333_v8 = vld [vmem:[%s6976_s8 + $0x210] sm:$0xff]  ;;  %v1334_v35 = vld [vmem:[%s6976_s8 + $0x218] sm:$0xff]  ;;  %v1335_v17 = vld [vmem:[%s6976_s8 + $0x220] sm:$0xff] }
 0x14f   : > { %v2900_v47 = vmax.f32 %v2899_v46, %v1895_v41  ;;  %v2921_v48 = vmax.f32 %v2920_v13, %v1896_v31  ;;  %v2942_v53 = vmax.f32 %v2941_v51, %v1897_v6  ;;  %v2963_v54 = vmax.f32 %v2962_v26, %v1898_v25  ;;  %v1336_v41 = vld [vmem:[%s6976_s8 + $0x228] sm:$0xff] }
 0x150   : > { %v1899_v57 = vunpack.c.l.bf16 %v1327_v32  ;;  %v1900_v12 = vunpack.c.h.bf16 %v1327_v32  ;;  %v1901_v58 = vunpack.c.l.bf16 %v1328_v7  ;;  %v1902_v36 = vunpack.c.h.bf16 %v1328_v7 }
 0x151   : > { %v1903_v60 = vunpack.c.l.bf16 %v1329_v23  ;;  %v1904_v37 = vunpack.c.h.bf16 %v1329_v23  ;;  %v1905_v63 = vunpack.c.l.bf16 %v1330_v24  ;;  %v1906_v42 = vunpack.c.h.bf16 %v1330_v24 }
 0x152   : > { %v2984_v43 = vmax.f32 %v2983_v19, %v1899_v57  ;;  %v3005_v44 = vmax.f32 %v3004_v0, %v1900_v12  ;;  %v3026_v14 = vmax.f32 %v3025_v39, %v1901_v58  ;;  %v3047_v6 = vmax.f32 %v3046_v1, %v1902_v36  ;;  %v1337_v0 = vld [vmem:[%s6976_s8 + $0x230] sm:$0xff]  ;;  %v1338_v39 = vld [vmem:[%s6976_s8 + $0x238] sm:$0xff] }
 0x153   : > { %v3068_v31 = vmax.f32 %v3067_v2, %v1903_v60  ;;  %v3089_v32 = vmax.f32 %v3088_v20, %v1904_v37  ;;  %v3110_v46 = vmax.f32 %v3109_v18, %v1905_v63  ;;  %v3131_v7 = vmax.f32 %v3130_v38, %v1906_v42  ;;  %v1339_v37 = vld [vmem:[%s6976_s8 + $0x240] sm:$0xff]  ;;  %v1340_v63 = vld [vmem:[%s6976_s8 + $0x248] sm:$0xff] }
 0x154   : > { %v1907_v13 = vunpack.c.l.bf16 %v1331_v59  ;;  %v1908_v51 = vunpack.c.h.bf16 %v1331_v59  ;;  %v1909_v26 = vunpack.c.l.bf16 %v1332_v11  ;;  %v1910_v40 = vunpack.c.h.bf16 %v1332_v11 }
 0x155   : > { %v1911_v25 = vunpack.c.l.bf16 %v1333_v8  ;;  %v1912_v23 = vunpack.c.h.bf16 %v1333_v8  ;;  %v1913_v24 = vunpack.c.l.bf16 %v1334_v35  ;;  %v1914_v19 = vunpack.c.h.bf16 %v1334_v35 }
 0x156   : > { %v2817_v1 = vmax.f32 %v2816_v33, %v1907_v13  ;;  %v2838_v57 = vmax.f32 %v2837_v52, %v1908_v51  ;;  %v2859_v2 = vmax.f32 %v2858_v34, %v1909_v26  ;;  %v2880_v20 = vmax.f32 %v2879_v45, %v1910_v40  ;;  %v1341_v52 = vld [vmem:[%s6976_s8 + $0x250] sm:$0xff]  ;;  %v1342_v34 = vld [vmem:[%s6976_s8 + $0x258] sm:$0xff] }
 0x157   : > { %v2901_v18 = vmax.f32 %v2900_v47, %v1911_v25  ;;  %v2922_v38 = vmax.f32 %v2921_v48, %v1912_v23  ;;  %v2943_v12 = vmax.f32 %v2942_v53, %v1913_v24  ;;  %v2964_v58 = vmax.f32 %v2963_v54, %v1914_v19  ;;  %v1343_v23 = vld [vmem:[%s6976_s8 + $0x260] sm:$0xff]  ;;  %v1344_v24 = vld [vmem:[%s6976_s8 + $0x268] sm:$0xff] }
 0x158   : > { %v1915_v36 = vunpack.c.l.bf16 %v1335_v17  ;;  %v1916_v59 = vunpack.c.h.bf16 %v1335_v17  ;;  %v1917_v11 = vunpack.c.l.bf16 %v1336_v41  ;;  %v1918_v60 = vunpack.c.h.bf16 %v1336_v41 }
 0x159   : > { %v1919_v42 = vunpack.c.l.bf16 %v1337_v0  ;;  %v1920_v8 = vunpack.c.h.bf16 %v1337_v0  ;;  %v1921_v35 = vunpack.c.l.bf16 %v1338_v39  ;;  %v1922_v33 = vunpack.c.h.bf16 %v1338_v39 }
 0x15a   : > { %v2985_v45 = vmax.f32 %v2984_v43, %v1915_v36  ;;  %v3006_v13 = vmax.f32 %v3005_v44, %v1916_v59  ;;  %v3027_v47 = vmax.f32 %v3026_v14, %v1917_v11  ;;  %v3048_v48 = vmax.f32 %v3047_v6, %v1918_v60  ;;  %v1345_v44 = vld [vmem:[%s6976_s8 + $0x270] sm:$0xff]  ;;  %v1346_v14 = vld [vmem:[%s6976_s8 + $0x278] sm:$0xff] }
 0x15b   : > { %v3069_v53 = vmax.f32 %v3068_v31, %v1919_v42  ;;  %v3090_v54 = vmax.f32 %v3089_v32, %v1920_v8  ;;  %v3111_v51 = vmax.f32 %v3110_v46, %v1921_v35  ;;  %v3132_v26 = vmax.f32 %v3131_v7, %v1922_v33  ;;  %v1347_v8 = vld [vmem:[%s6976_s8 + $0x280] sm:$0xff]  ;;  %v1348_v35 = vld [vmem:[%s6976_s8 + $0x288] sm:$0xff] }
 0x15c   : > { %v1923_v40 = vunpack.c.l.bf16 %v1339_v37  ;;  %v1924_v17 = vunpack.c.h.bf16 %v1339_v37  ;;  %v1925_v41 = vunpack.c.l.bf16 %v1340_v63  ;;  %v1926_v25 = vunpack.c.h.bf16 %v1340_v63 }
 0x15d   : > { %v1927_v19 = vunpack.c.l.bf16 %v1341_v52  ;;  %v1928_v0 = vunpack.c.h.bf16 %v1341_v52  ;;  %v1929_v39 = vunpack.c.l.bf16 %v1342_v34  ;;  %v1930_v43 = vunpack.c.h.bf16 %v1342_v34 }
 0x15e   : > { %v2818_v6 = vmax.f32 %v2817_v1, %v1923_v40  ;;  %v2839_v36 = vmax.f32 %v2838_v57, %v1924_v17  ;;  %v2860_v31 = vmax.f32 %v2859_v2, %v1925_v41  ;;  %v2881_v32 = vmax.f32 %v2880_v20, %v1926_v25  ;;  %v1349_v57 = vld [vmem:[%s6976_s8 + $0x290] sm:$0xff]  ;;  %v1350_v2 = vld [vmem:[%s6976_s8 + $0x298] sm:$0xff] }
 0x15f   : > { %v2902_v46 = vmax.f32 %v2901_v18, %v1927_v19  ;;  %v2923_v7 = vmax.f32 %v2922_v38, %v1928_v0  ;;  %v2944_v59 = vmax.f32 %v2943_v12, %v1929_v39  ;;  %v2965_v11 = vmax.f32 %v2964_v58, %v1930_v43  ;;  %v1351_v0 = vld [vmem:[%s6976_s8 + $0x2a0] sm:$0xff]  ;;  %v1352_v39 = vld [vmem:[%s6976_s8 + $0x2a8] sm:$0xff] }
 0x160   : > { %v1931_v60 = vunpack.c.l.bf16 %v1343_v23  ;;  %v1932_v37 = vunpack.c.h.bf16 %v1343_v23  ;;  %v1933_v63 = vunpack.c.l.bf16 %v1344_v24  ;;  %v1934_v42 = vunpack.c.h.bf16 %v1344_v24 }
 0x161   : > { %v1935_v33 = vunpack.c.l.bf16 %v1345_v44  ;;  %v1936_v52 = vunpack.c.h.bf16 %v1345_v44  ;;  %v1937_v34 = vunpack.c.l.bf16 %v1346_v14  ;;  %v1938_v1 = vunpack.c.h.bf16 %v1346_v14 }
 0x162   : > { %v2986_v20 = vmax.f32 %v2985_v45, %v1931_v60  ;;  %v3007_v40 = vmax.f32 %v3006_v13, %v1932_v37  ;;  %v3028_v18 = vmax.f32 %v3027_v47, %v1933_v63  ;;  %v3049_v38 = vmax.f32 %v3048_v48, %v1934_v42  ;;  %v1353_v13 = vld [vmem:[%s6976_s8 + $0x2b0] sm:$0xff]  ;;  %v1354_v47 = vld [vmem:[%s6976_s8 + $0x2b8] sm:$0xff] }
 0x163   : > { %v3070_v12 = vmax.f32 %v3069_v53, %v1935_v33  ;;  %v3091_v58 = vmax.f32 %v3090_v54, %v1936_v52  ;;  %v3112_v17 = vmax.f32 %v3111_v51, %v1937_v34  ;;  %v3133_v41 = vmax.f32 %v3132_v26, %v1938_v1  ;;  %v1355_v52 = vld [vmem:[%s6976_s8 + $0x2c0] sm:$0xff]  ;;  %v1356_v34 = vld [vmem:[%s6976_s8 + $0x2c8] sm:$0xff] }
 0x164   : > { %v1939_v25 = vunpack.c.l.bf16 %v1347_v8  ;;  %v1940_v23 = vunpack.c.h.bf16 %v1347_v8  ;;  %v1941_v24 = vunpack.c.l.bf16 %v1348_v35  ;;  %v1942_v19 = vunpack.c.h.bf16 %v1348_v35 }
 0x165   : > { %v1943_v43 = vunpack.c.l.bf16 %v1349_v57  ;;  %v1944_v44 = vunpack.c.h.bf16 %v1349_v57  ;;  %v1945_v14 = vunpack.c.l.bf16 %v1350_v2  ;;  %v1946_v45 = vunpack.c.h.bf16 %v1350_v2 }
 0x166   : > { %v2819_v48 = vmax.f32 %v2818_v6, %v1939_v25  ;;  %v2840_v60 = vmax.f32 %v2839_v36, %v1940_v23  ;;  %v2861_v53 = vmax.f32 %v2860_v31, %v1941_v24  ;;  %v2882_v54 = vmax.f32 %v2881_v32, %v1942_v19  ;;  %v1357_v36 = vld [vmem:[%s6976_s8 + $0x2d0] sm:$0xff]  ;;  %v1358_v31 = vld [vmem:[%s6976_s8 + $0x2d8] sm:$0xff] }
 0x167   : > { %v2903_v51 = vmax.f32 %v2902_v46, %v1943_v43  ;;  %v2924_v26 = vmax.f32 %v2923_v7, %v1944_v44  ;;  %v2945_v37 = vmax.f32 %v2944_v59, %v1945_v14  ;;  %v2966_v63 = vmax.f32 %v2965_v11, %v1946_v45  ;;  %v1359_v44 = vld [vmem:[%s6976_s8 + $0x2e0] sm:$0xff]  ;;  %v1360_v14 = vld [vmem:[%s6976_s8 + $0x2e8] sm:$0xff] }
 0x168   : > { %v1947_v42 = vunpack.c.l.bf16 %v1351_v0  ;;  %v1948_v8 = vunpack.c.h.bf16 %v1351_v0  ;;  %v1949_v35 = vunpack.c.l.bf16 %v1352_v39  ;;  %v1950_v33 = vunpack.c.h.bf16 %v1352_v39 }
 0x169   : > { %v1951_v1 = vunpack.c.l.bf16 %v1353_v13  ;;  %v1952_v57 = vunpack.c.h.bf16 %v1353_v13  ;;  %v1953_v2 = vunpack.c.l.bf16 %v1354_v47  ;;  %v1954_v6 = vunpack.c.h.bf16 %v1354_v47 }
 0x16a   : > { %v2987_v32 = vmax.f32 %v2986_v20, %v1947_v42  ;;  %v3008_v25 = vmax.f32 %v3007_v40, %v1948_v8  ;;  %v3029_v46 = vmax.f32 %v3028_v18, %v1949_v35  ;;  %v3050_v7 = vmax.f32 %v3049_v38, %v1950_v33  ;;  %v1361_v40 = vld [vmem:[%s6976_s8 + $0x2f0] sm:$0xff]  ;;  %v1362_v18 = vld [vmem:[%s6976_s8 + $0x2f8] sm:$0xff] }
 0x16b   : > { %v3071_v59 = vmax.f32 %v3070_v12, %v1951_v1  ;;  %v3092_v11 = vmax.f32 %v3091_v58, %v1952_v57  ;;  %v3113_v23 = vmax.f32 %v3112_v17, %v1953_v2  ;;  %v3134_v24 = vmax.f32 %v3133_v41, %v1954_v6  ;;  %v1363_v57 = vld [vmem:[%s6976_s8 + $0x300] sm:$0xff]  ;;  %v1364_v2 = vld [vmem:[%s6976_s8 + $0x308] sm:$0xff] }
 0x16c   : > { %v1955_v19 = vunpack.c.l.bf16 %v1355_v52  ;;  %v1956_v0 = vunpack.c.h.bf16 %v1355_v52  ;;  %v1957_v39 = vunpack.c.l.bf16 %v1356_v34  ;;  %v1958_v43 = vunpack.c.h.bf16 %v1356_v34 }
 0x16d   : > { %v1959_v45 = vunpack.c.l.bf16 %v1357_v36  ;;  %v1960_v13 = vunpack.c.h.bf16 %v1357_v36  ;;  %v1961_v47 = vunpack.c.l.bf16 %v1358_v31  ;;  %v1962_v20 = vunpack.c.h.bf16 %v1358_v31 }
 0x16e   : > { %v2820_v38 = vmax.f32 %v2819_v48, %v1955_v19  ;;  %v2841_v42 = vmax.f32 %v2840_v60, %v1956_v0  ;;  %v2862_v12 = vmax.f32 %v2861_v53, %v1957_v39  ;;  %v2883_v58 = vmax.f32 %v2882_v54, %v1958_v43  ;;  %v1365_v60 = vld [vmem:[%s6976_s8 + $0x310] sm:$0xff]  ;;  %v1366_v53 = vld [vmem:[%s6976_s8 + $0x318] sm:$0xff] }
 0x16f   : > { %v2904_v17 = vmax.f32 %v2903_v51, %v1959_v45  ;;  %v2925_v41 = vmax.f32 %v2924_v26, %v1960_v13  ;;  %v2946_v8 = vmax.f32 %v2945_v37, %v1961_v47  ;;  %v2967_v35 = vmax.f32 %v2966_v63, %v1962_v20  ;;  %v1367_v13 = vld [vmem:[%s6976_s8 + $0x320] sm:$0xff]  ;;  %v1368_v47 = vld [vmem:[%s6976_s8 + $0x328] sm:$0xff] }
 0x170   : > { %v1963_v33 = vunpack.c.l.bf16 %v1359_v44  ;;  %v1964_v52 = vunpack.c.h.bf16 %v1359_v44  ;;  %v1965_v34 = vunpack.c.l.bf16 %v1360_v14  ;;  %v1966_v1 = vunpack.c.h.bf16 %v1360_v14 }
 0x171   : > { %v1967_v6 = vunpack.c.l.bf16 %v1361_v40  ;;  %v1968_v36 = vunpack.c.h.bf16 %v1361_v40  ;;  %v1969_v31 = vunpack.c.l.bf16 %v1362_v18  ;;  %v1970_v48 = vunpack.c.h.bf16 %v1362_v18 }
 0x172   : > { %v2988_v54 = vmax.f32 %v2987_v32, %v1963_v33  ;;  %v3009_v19 = vmax.f32 %v3008_v25, %v1964_v52  ;;  %v3030_v51 = vmax.f32 %v3029_v46, %v1965_v34  ;;  %v3051_v26 = vmax.f32 %v3050_v7, %v1966_v1  ;;  %v1369_v25 = vld [vmem:[%s6976_s8 + $0x330] sm:$0xff]  ;;  %v1370_v46 = vld [vmem:[%s6976_s8 + $0x338] sm:$0xff] }
 0x173   : > { %v3072_v37 = vmax.f32 %v3071_v59, %v1967_v6  ;;  %v3093_v63 = vmax.f32 %v3092_v11, %v1968_v36  ;;  %v3114_v0 = vmax.f32 %v3113_v23, %v1969_v31  ;;  %v3135_v39 = vmax.f32 %v3134_v24, %v1970_v48  ;;  %v1371_v36 = vld [vmem:[%s6976_s8 + $0x340] sm:$0xff]  ;;  %v1372_v31 = vld [vmem:[%s6976_s8 + $0x348] sm:$0xff] }
 0x174   : > { %v1971_v43 = vunpack.c.l.bf16 %v1363_v57  ;;  %v1972_v44 = vunpack.c.h.bf16 %v1363_v57  ;;  %v1973_v14 = vunpack.c.l.bf16 %v1364_v2  ;;  %v1974_v45 = vunpack.c.h.bf16 %v1364_v2 }
 0x175   : > { %v1975_v20 = vunpack.c.l.bf16 %v1365_v60  ;;  %v1976_v40 = vunpack.c.h.bf16 %v1365_v60  ;;  %v1977_v18 = vunpack.c.l.bf16 %v1366_v53  ;;  %v1978_v32 = vunpack.c.h.bf16 %v1366_v53 }
 0x176   : > { %v2821_v7 = vmax.f32 %v2820_v38, %v1971_v43  ;;  %v2842_v33 = vmax.f32 %v2841_v42, %v1972_v44  ;;  %v2863_v59 = vmax.f32 %v2862_v12, %v1973_v14  ;;  %v2884_v11 = vmax.f32 %v2883_v58, %v1974_v45  ;;  %v1373_v42 = vld [vmem:[%s6976_s8 + $0x350] sm:$0xff]  ;;  %v1374_v12 = vld [vmem:[%s6976_s8 + $0x358] sm:$0xff] }
 0x177   : > { %v2905_v23 = vmax.f32 %v2904_v17, %v1975_v20  ;;  %v2926_v24 = vmax.f32 %v2925_v41, %v1976_v40  ;;  %v2947_v52 = vmax.f32 %v2946_v8, %v1977_v18  ;;  %v2968_v34 = vmax.f32 %v2967_v35, %v1978_v32  ;;  %v1375_v40 = vld [vmem:[%s6976_s8 + $0x360] sm:$0xff]  ;;  %v1376_v18 = vld [vmem:[%s6976_s8 + $0x368] sm:$0xff] }
 0x178   : > { %v1979_v1 = vunpack.c.l.bf16 %v1367_v13  ;;  %v1980_v57 = vunpack.c.h.bf16 %v1367_v13  ;;  %v1981_v2 = vunpack.c.l.bf16 %v1368_v47  ;;  %v1982_v6 = vunpack.c.h.bf16 %v1368_v47 }
 0x179   : > { %v1983_v48 = vunpack.c.l.bf16 %v1369_v25  ;;  %v1984_v60 = vunpack.c.h.bf16 %v1369_v25  ;;  %v1985_v53 = vunpack.c.l.bf16 %v1370_v46  ;;  %v1986_v38 = vunpack.c.h.bf16 %v1370_v46 }
 0x17a   : > { %v2989_v58 = vmax.f32 %v2988_v54, %v1979_v1  ;;  %v3010_v43 = vmax.f32 %v3009_v19, %v1980_v57  ;;  %v3031_v17 = vmax.f32 %v3030_v51, %v1981_v2  ;;  %v3052_v41 = vmax.f32 %v3051_v26, %v1982_v6  ;;  %v1377_v19 = vld [vmem:[%s6976_s8 + $0x370] sm:$0xff]  ;;  %v1378_v51 = vld [vmem:[%s6976_s8 + $0x378] sm:$0xff] }
 0x17b   : > { %v3073_v8 = vmax.f32 %v3072_v37, %v1983_v48  ;;  %v3094_v35 = vmax.f32 %v3093_v63, %v1984_v60  ;;  %v3115_v44 = vmax.f32 %v3114_v0, %v1985_v53  ;;  %v3136_v14 = vmax.f32 %v3135_v39, %v1986_v38  ;;  %v1379_v60 = vld [vmem:[%s6976_s8 + $0x380] sm:$0xff]  ;;  %v1380_v53 = vld [vmem:[%s6976_s8 + $0x388] sm:$0xff] }
 0x17c   : > { %v1987_v45 = vunpack.c.l.bf16 %v1371_v36  ;;  %v1988_v13 = vunpack.c.h.bf16 %v1371_v36  ;;  %v1989_v47 = vunpack.c.l.bf16 %v1372_v31  ;;  %v1990_v20 = vunpack.c.h.bf16 %v1372_v31 }
 0x17d   : > { %v1991_v32 = vunpack.c.l.bf16 %v1373_v42  ;;  %v1992_v25 = vunpack.c.h.bf16 %v1373_v42  ;;  %v1993_v46 = vunpack.c.l.bf16 %v1374_v12  ;;  %v1994_v54 = vunpack.c.h.bf16 %v1374_v12 }
 0x17e   : > { %v2822_v26 = vmax.f32 %v2821_v7, %v1987_v45  ;;  %v2843_v1 = vmax.f32 %v2842_v33, %v1988_v13  ;;  %v2864_v37 = vmax.f32 %v2863_v59, %v1989_v47  ;;  %v2885_v63 = vmax.f32 %v2884_v11, %v1990_v20  ;;  %v1381_v33 = vld [vmem:[%s6976_s8 + $0x390] sm:$0xff]  ;;  %v1382_v59 = vld [vmem:[%s6976_s8 + $0x398] sm:$0xff] }
 0x17f   : > { %v2906_v0 = vmax.f32 %v2905_v23, %v1991_v32  ;;  %v2927_v39 = vmax.f32 %v2926_v24, %v1992_v25  ;;  %v2948_v57 = vmax.f32 %v2947_v52, %v1993_v46  ;;  %v2969_v2 = vmax.f32 %v2968_v34, %v1994_v54  ;;  %v1383_v25 = vld [vmem:[%s6976_s8 + $0x3a0] sm:$0xff]  ;;  %v1384_v46 = vld [vmem:[%s6976_s8 + $0x3a8] sm:$0xff] }
 0x180   : > { %v1995_v6 = vunpack.c.l.bf16 %v1375_v40  ;;  %v1996_v36 = vunpack.c.h.bf16 %v1375_v40  ;;  %v1997_v31 = vunpack.c.l.bf16 %v1376_v18  ;;  %v1998_v48 = vunpack.c.h.bf16 %v1376_v18 }
 0x181   : > { %v1999_v38 = vunpack.c.l.bf16 %v1377_v19  ;;  %v2000_v42 = vunpack.c.h.bf16 %v1377_v19  ;;  %v2001_v12 = vunpack.c.l.bf16 %v1378_v51  ;;  %v2002_v7 = vunpack.c.h.bf16 %v1378_v51 }
 0x182   : > { %v2990_v11 = vmax.f32 %v2989_v58, %v1995_v6  ;;  %v3011_v45 = vmax.f32 %v3010_v43, %v1996_v36  ;;  %v3032_v23 = vmax.f32 %v3031_v17, %v1997_v31  ;;  %v3053_v24 = vmax.f32 %v3052_v41, %v1998_v48  ;;  %v1385_v43 = vld [vmem:[%s6976_s8 + $0x3b0] sm:$0xff]  ;;  %v1386_v17 = vld [vmem:[%s6976_s8 + $0x3b8] sm:$0xff] }
 0x183   : > { %v3074_v52 = vmax.f32 %v3073_v8, %v1999_v38  ;;  %v3095_v34 = vmax.f32 %v3094_v35, %v2000_v42  ;;  %v3116_v13 = vmax.f32 %v3115_v44, %v2001_v12  ;;  %v3137_v47 = vmax.f32 %v3136_v14, %v2002_v7  ;;  %v1387_v42 = vld [vmem:[%s6976_s8 + $0x3c0] sm:$0xff]  ;;  %v1388_v12 = vld [vmem:[%s6976_s8 + $0x3c8] sm:$0xff] }
 0x184   : > { %v2003_v20 = vunpack.c.l.bf16 %v1379_v60  ;;  %v2004_v40 = vunpack.c.h.bf16 %v1379_v60  ;;  %v2005_v18 = vunpack.c.l.bf16 %v1380_v53  ;;  %v2006_v32 = vunpack.c.h.bf16 %v1380_v53 }
 0x185   : > { %v2007_v54 = vunpack.c.l.bf16 %v1381_v33  ;;  %v2008_v19 = vunpack.c.h.bf16 %v1381_v33  ;;  %v2009_v51 = vunpack.c.l.bf16 %v1382_v59  ;;  %v2010_v58 = vunpack.c.h.bf16 %v1382_v59 }
 0x186   : > { %v2823_v41 = vmax.f32 %v2822_v26, %v2003_v20  ;;  %v2844_v6 = vmax.f32 %v2843_v1, %v2004_v40  ;;  %v2865_v8 = vmax.f32 %v2864_v37, %v2005_v18  ;;  %v2886_v35 = vmax.f32 %v2885_v63, %v2006_v32  ;;  %v1389_v1 = vld [vmem:[%s6976_s8 + $0x3d0] sm:$0xff]  ;;  %v1390_v37 = vld [vmem:[%s6976_s8 + $0x3d8] sm:$0xff] }
 0x187   : > { %v2907_v44 = vmax.f32 %v2906_v0, %v2007_v54  ;;  %v2928_v14 = vmax.f32 %v2927_v39, %v2008_v19  ;;  %v2949_v36 = vmax.f32 %v2948_v57, %v2009_v51  ;;  %v2970_v31 = vmax.f32 %v2969_v2, %v2010_v58  ;;  %v1391_v19 = vld [vmem:[%s6976_s8 + $0x3e0] sm:$0xff]  ;;  %v1392_v51 = vld [vmem:[%s6976_s8 + $0x3e8] sm:$0xff] }
 0x188   : > { %v2011_v48 = vunpack.c.l.bf16 %v1383_v25  ;;  %v2012_v60 = vunpack.c.h.bf16 %v1383_v25  ;;  %v2013_v53 = vunpack.c.l.bf16 %v1384_v46  ;;  %v2014_v38 = vunpack.c.h.bf16 %v1384_v46 }
 0x189   : > { %v2015_v7 = vunpack.c.l.bf16 %v1385_v43  ;;  %v2016_v33 = vunpack.c.h.bf16 %v1385_v43  ;;  %v2017_v59 = vunpack.c.l.bf16 %v1386_v17  ;;  %v2018_v26 = vunpack.c.h.bf16 %v1386_v17 }
 0x18a   : > { %v2991_v63 = vmax.f32 %v2990_v11, %v2011_v48  ;;  %v3012_v20 = vmax.f32 %v3011_v45, %v2012_v60  ;;  %v3033_v0 = vmax.f32 %v3032_v23, %v2013_v53  ;;  %v3054_v39 = vmax.f32 %v3053_v24, %v2014_v38  ;;  %v1393_v45 = vld [vmem:[%s6976_s8 + $0x3f0] sm:$0xff]  ;;  %v1394_v23 = vld [vmem:[%s6976_s8 + $0x3f8] sm:$0xff] }
 0x18b   : > { %v3075_v57 = vmax.f32 %v3074_v52, %v2015_v7  ;;  %v3096_v2 = vmax.f32 %v3095_v34, %v2016_v33  ;;  %v3117_v40 = vmax.f32 %v3116_v13, %v2017_v59  ;;  %v3138_v18 = vmax.f32 %v3137_v47, %v2018_v26 }
 0x18c   : > { %v2019_v32 = vunpack.c.l.bf16 %v1387_v42  ;;  %v2020_v25 = vunpack.c.h.bf16 %v1387_v42  ;;  %v2021_v46 = vunpack.c.l.bf16 %v1388_v12  ;;  %v2022_v54 = vunpack.c.h.bf16 %v1388_v12  ;;  %v7239_v12 = vld [vmem:[%s6976_s8 + $0x408] sm:$0xff] }
 0x18d   : > { %v2023_v58 = vunpack.c.l.bf16 %v1389_v1  ;;  %v2024_v43 = vunpack.c.h.bf16 %v1389_v1  ;;  %v2025_v17 = vunpack.c.l.bf16 %v1390_v37  ;;  %v2026_v11 = vunpack.c.h.bf16 %v1390_v37  ;;  %9549 = vst [vmem:[#allocation17_spill] sm:$0xff] %v7239_v12  ;;  %v7256_v37 = vld [vmem:[%s6976_s8 + $0x420] sm:$0xff] }
 0x18e   : > { %v7219_v24 = vmax.f32 %v2823_v41, %v2019_v32  ;;  %v7221_v52 = vmax.f32 %v2844_v6, %v2020_v25  ;;  %v7223_v34 = vmax.f32 %v2865_v8, %v2021_v46  ;;  %v7225_v13 = vmax.f32 %v2886_v35, %v2022_v54  ;;  %v7236_v8 = vld [vmem:[%s6976_s8 + $0x400] sm:$0xff]  ;;  %9556 = vst [vmem:[#allocation24_spill] sm:$0xff] %v7256_v37  ;;  %v7259_v32 = vld [vmem:[%s6976_s8 + $0x428] sm:$0xff] }
 0x18f   : > { %v7227_v47 = vmax.f32 %v2907_v44, %v2023_v58  ;;  %v7229_v48 = vmax.f32 %v2928_v14, %v2024_v43  ;;  %v7231_v60 = vmax.f32 %v2949_v36, %v2025_v17  ;;  %v7233_v53 = vmax.f32 %v2970_v31, %v2026_v11  ;;  %9548 = vst [vmem:[#allocation16_spill] sm:$0xff] %v7236_v8  ;;  %v7242_v36 = vld [vmem:[%s6976_s8 + $0x410] sm:$0xff]  ;;  %v7245_v31 = vld [vmem:[%s6976_s8 + $0x418] sm:$0xff]  ;;  %v1412_v58 = vld [vmem:[%s6976_s8 + $0x488] sm:$0xff] }
 0x190   : > { %v2027_v38 = vunpack.c.l.bf16 %v1391_v19  ;;  %v2028_v41 = vunpack.c.h.bf16 %v1391_v19  ;;  %v2029_v6 = vunpack.c.l.bf16 %v1392_v51  ;;  %v2030_v42 = vunpack.c.h.bf16 %v1392_v51  ;;  %9550 = vst [vmem:[#allocation18_spill] sm:$0xff] %v7242_v36  ;;  %9551 = vst [vmem:[#allocation19_spill] sm:$0xff] %v7245_v31  ;;  %v7280_v51 = vld [vmem:[%s6976_s8 + $0x440] sm:$0xff]  ;;  %v7290_v11 = vld [vmem:[%s6976_s8 + $0x450] sm:$0xff] }
 0x191   : > { %v2031_v35 = vunpack.c.l.bf16 %v1393_v45  ;;  %v2032_v44 = vunpack.c.h.bf16 %v1393_v45  ;;  %v2033_v14 = vunpack.c.l.bf16 %v1394_v23  ;;  %v2034_v7 = vunpack.c.h.bf16 %v1394_v23  ;;  %9557 = vst [vmem:[#allocation25_spill] sm:$0xff] %v7259_v32  ;;  %9564 = vst [vmem:[#allocation32_spill] sm:$0xff] %v7280_v51  ;;  %v7293_v45 = vld [vmem:[%s6976_s8 + $0x458] sm:$0xff] }
 0x192   : > { %v7247_v33 = vmax.f32 %v2991_v63, %v2027_v38  ;;  %v7249_v59 = vmax.f32 %v3012_v20, %v2028_v41  ;;  %v7251_v26 = vmax.f32 %v3033_v0, %v2029_v6  ;;  %v7253_v1 = vmax.f32 %v3054_v39, %v2030_v42  ;;  %v7270_v20 = vld [vmem:[%s6976_s8 + $0x430] sm:$0xff]  ;;  %v7273_v0 = vld [vmem:[%s6976_s8 + $0x438] sm:$0xff]  ;;  %9566 = vst [vmem:[#allocation34_spill] sm:$0xff] %v7290_v11  ;;  %v7300_v42 = vld [vmem:[%s6976_s8 + $0x460] sm:$0xff] }
 0x193   : > { %v7261_v25 = vmax.f32 %v3075_v57, %v2031_v35  ;;  %v7263_v46 = vmax.f32 %v3096_v2, %v2032_v44  ;;  %v7265_v63 = vmax.f32 %v3117_v40, %v2033_v14  ;;  %v7267_v54 = vmax.f32 %v3138_v18, %v2034_v7  ;;  %9562 = vst [vmem:[#allocation30_spill] sm:$0xff] %v7270_v20  ;;  %v7283_v40 = vld [vmem:[%s6976_s8 + $0x448] sm:$0xff]  ;;  %v7310_v38 = vld [vmem:[%s6976_s8 + $0x470] sm:$0xff]  ;;  %v7313_v17 = vld [vmem:[%s6976_s8 + $0x478] sm:$0xff] }
 0x194   : > { %9552 = vst [vmem:[#allocation20_spill] sm:$0xff] %v7247_v33  ;;  %9553 = vst [vmem:[#allocation21_spill] sm:$0xff] %v7249_v59  ;;  %v7303_v35 = vld [vmem:[%s6976_s8 + $0x468] sm:$0xff]  ;;  %v1411_v14 = vld [vmem:[%s6976_s8 + $0x480] sm:$0xff]  ;;  %v2069_v43 = vunpack.c.l.bf16 %v1412_v58  ;;  %vm4259_vm3 = vcmask 1046534   ;;  %vm4262_vm4 = vcmask 1043459  }
 0x195   : > { %9554 = vst [vmem:[#allocation22_spill] sm:$0xff] %v7251_v26  ;;  %9555 = vst [vmem:[#allocation23_spill] sm:$0xff] %v7253_v1  ;;  %v1413_v57 = vld [vmem:[%s6976_s8 + $0x490] sm:$0xff]  ;;  %v1414_v19 = vld [vmem:[%s6976_s8 + $0x498] sm:$0xff]  ;;  %v2067_v5 = vunpack.c.l.bf16 %v1411_v14  ;;  %v2068_v29 = vunpack.c.h.bf16 %v1411_v14  ;;  %v2079_v14 = vunpack.c.l.bf16 %v1417_v30  ;;  %vm4264_vm5 = vcmask 1047559  }
 0x196   : > { %9558 = vst [vmem:[#allocation26_spill] sm:$0xff] %v7261_v25  ;;  %9559 = vst [vmem:[#allocation27_spill] sm:$0xff] %v7263_v46  ;;  %v1415_v39 = vld [vmem:[%s6976_s8 + $0x4a0] sm:$0xff]  ;;  %v7333_v6 = vld [vmem:[%s6976_s8 + $0x4a8] sm:$0xff]  ;;  %v2071_v32 = vunpack.c.l.bf16 %v1413_v57  ;;  %v2073_v37 = vunpack.c.l.bf16 %v1414_v19  ;;  %v2074_v23 = vunpack.c.h.bf16 %v1414_v19 }
 0x197   : > { %9560 = vst [vmem:[#allocation28_spill] sm:$0xff] %v7265_v63  ;;  %9561 = vst [vmem:[#allocation29_spill] sm:$0xff] %v7267_v54  ;;  %v1418_v44 = vld [vmem:[%s6976_s8 + $0x4b8] sm:$0xff]  ;;  %v1419_v7 = vld [vmem:[%s6976_s8 + $0x4c0] sm:$0xff]  ;;  %v2076_v18 = vunpack.c.h.bf16 %v1415_v39  ;;  %v2077_v41 = vunpack.c.l.bf16 %v7333_v6 }
 0x198   : > { %9563 = vst [vmem:[#allocation31_spill] sm:$0xff] %v7273_v0  ;;  %9565 = vst [vmem:[#allocation33_spill] sm:$0xff] %v7283_v40  ;;  %v2070_v0 = vunpack.c.h.bf16 %v1412_v58  ;;  %v1420_v20 = vld [vmem:[%s6976_s8 + $0x4c8] sm:$0xff]  ;;  %v1421_v2 = vld [vmem:[%s6976_s8 + $0x4d0] sm:$0xff]  ;;  %v2080_v58 = vunpack.c.h.bf16 %v1417_v30  ;;  %v2081_v31 = vunpack.c.l.bf16 %v1418_v44  ;;  %v2083_v36 = vunpack.c.l.bf16 %v1419_v7 }
 0x199   : > { %9567 = vst [vmem:[#allocation35_spill] sm:$0xff] %v7293_v45  ;;  %9568 = vst [vmem:[#allocation36_spill] sm:$0xff] %v7300_v42  ;;  %v2075_v42 = vunpack.c.l.bf16 %v1415_v39  ;;  %v2082_v45 = vunpack.c.h.bf16 %v1418_v44  ;;  %v2085_v11 = vunpack.c.l.bf16 %v1420_v20  ;;  %v2086_v12 = vunpack.c.h.bf16 %v1420_v20  ;;  %v1423_v19 = vld [vmem:[%s6976_s8 + $0x4e0] sm:$0xff]  ;;  %v1424_v40 = vld [vmem:[%s6976_s8 + $0x4e8] sm:$0xff] }
 0x19a   : > { %9569 = vst [vmem:[#allocation37_spill] sm:$0xff] %v7303_v35  ;;  %9570 = vst [vmem:[#allocation38_spill] sm:$0xff] %v7310_v38  ;;  %v2072_v35 = vunpack.c.h.bf16 %v1413_v57  ;;  %v1422_v38 = vld [vmem:[%s6976_s8 + $0x4d8] sm:$0xff]  ;;  %v2084_v57 = vunpack.c.h.bf16 %v1419_v7  ;;  %v2087_v8 = vunpack.c.l.bf16 %v1421_v2  ;;  %v2088_v51 = vunpack.c.h.bf16 %v1421_v2  ;;  %v1425_v63 = vld [vmem:[%s6976_s8 + $0x4f0] sm:$0xff] }
 0x19b   : > { %9571 = vst [vmem:[#allocation39_spill] sm:$0xff] %v7313_v17  ;;  %v2078_v17 = vunpack.c.h.bf16 %v7333_v6  ;;  %v2089_v54 = vunpack.c.l.bf16 %v1422_v38  ;;  %v2090_v39 = vunpack.c.h.bf16 %v1422_v38  ;;  %v1426_v46 = vld [vmem:[%s6976_s8 + $0x4f8] sm:$0xff]  ;;  %v3148_v6 = vmax.f32 %v2083_v36, %v2067_v5 }
 0x19c   : > { %v3169_v25 = vmax.f32 %v2084_v57, %v2068_v29  ;;  %v3190_v1 = vmax.f32 %v2085_v11, %v2069_v43  ;;  %v3211_v30 = vmax.f32 %v2086_v12, %v2070_v0  ;;  %v3232_v44 = vmax.f32 %v2087_v8, %v2071_v32  ;;  %v1429_v29 = vld [vmem:[%s6976_s8 + $0x510] sm:$0xff]  ;;  %v1430_v36 = vld [vmem:[%s6976_s8 + $0x518] sm:$0xff]  ;;  %v1432_v57 = vld [vmem:[%s6976_s8 + $0x528] sm:$0xff] }
 0x19d   : > { %v3253_v7 = vmax.f32 %v2088_v51, %v2072_v35  ;;  %v3274_v26 = vmax.f32 %v2089_v54, %v2073_v37  ;;  %v3295_v20 = vmax.f32 %v2090_v39, %v2074_v23  ;;  %v2091_v59 = vunpack.c.l.bf16 %v1423_v19  ;;  %v1431_v35 = vld [vmem:[%s6976_s8 + $0x520] sm:$0xff] }
 0x19e   : > { %v2092_v33 = vunpack.c.h.bf16 %v1423_v19  ;;  %v2093_v4 = vunpack.c.l.bf16 %v1424_v40  ;;  %v2094_v2 = vunpack.c.h.bf16 %v1424_v40  ;;  %v2095_v38 = vunpack.c.l.bf16 %v1425_v63 }
 0x19f   : > { %v2096_v27 = vunpack.c.h.bf16 %v1425_v63  ;;  %v2097_v62 = vunpack.c.l.bf16 %v1426_v46  ;;  %v2098_v5 = vunpack.c.h.bf16 %v1426_v46  ;;  %v3316_v12 = vmax.f32 %v2091_v59, %v2075_v42 }
 0x1a0   : > { %v3337_v0 = vmax.f32 %v2092_v33, %v2076_v18  ;;  %v3358_v8 = vmax.f32 %v2093_v4, %v2077_v41  ;;  %v3379_v37 = vmax.f32 %v2094_v2, %v2078_v17  ;;  %v3400_v32 = vmax.f32 %v2095_v38, %v2079_v14  ;;  %v1433_v4 = vld [vmem:[%s6976_s8 + $0x530] sm:$0xff]  ;;  %v1434_v33 = vld [vmem:[%s6976_s8 + $0x538] sm:$0xff]  ;;  %v1435_v2 = vld [vmem:[%s6976_s8 + $0x540] sm:$0xff] }
 0x1a1   : > { %v3421_v54 = vmax.f32 %v2096_v27, %v2080_v58  ;;  %v3442_v51 = vmax.f32 %v2097_v62, %v2081_v31  ;;  %v3463_v40 = vmax.f32 %v2098_v5, %v2082_v45  ;;  %v2099_v43 = vunpack.c.l.bf16 %v1427_v28  ;;  %v1436_v38 = vld [vmem:[%s6976_s8 + $0x548] sm:$0xff] }
 0x1a2   : > { %v2100_v11 = vunpack.c.h.bf16 %v1427_v28  ;;  %v2101_v23 = vunpack.c.l.bf16 %v1428_v3  ;;  %v2102_v63 = vunpack.c.h.bf16 %v1428_v3  ;;  %v2103_v46 = vunpack.c.l.bf16 %v1429_v29 }
 0x1a3   : > { %v2104_v19 = vunpack.c.h.bf16 %v1429_v29  ;;  %v2105_v39 = vunpack.c.l.bf16 %v1430_v36  ;;  %v2106_v59 = vunpack.c.h.bf16 %v1430_v36  ;;  %v3149_v18 = vmax.f32 %v3148_v6, %v2099_v43 }
 0x1a4   : > { %v3170_v17 = vmax.f32 %v3169_v25, %v2100_v11  ;;  %v3191_v41 = vmax.f32 %v3190_v1, %v2101_v23  ;;  %v3212_v62 = vmax.f32 %v3211_v30, %v2102_v63  ;;  %v3233_v27 = vmax.f32 %v3232_v44, %v2103_v46  ;;  %v1437_v1 = vld [vmem:[%s6976_s8 + $0x550] sm:$0xff]  ;;  %v1438_v25 = vld [vmem:[%s6976_s8 + $0x558] sm:$0xff] }
 0x1a5   : > { %v3254_v28 = vmax.f32 %v3253_v7, %v2104_v19  ;;  %v3275_v31 = vmax.f32 %v3274_v26, %v2105_v39  ;;  %v3296_v3 = vmax.f32 %v3295_v20, %v2106_v59  ;;  %v2107_v45 = vunpack.c.l.bf16 %v1431_v35  ;;  %v1439_v19 = vld [vmem:[%s6976_s8 + $0x560] sm:$0xff]  ;;  %v1440_v39 = vld [vmem:[%s6976_s8 + $0x568] sm:$0xff] }
 0x1a6   : > { %v2108_v42 = vunpack.c.h.bf16 %v1431_v35  ;;  %v2109_v14 = vunpack.c.l.bf16 %v1432_v57  ;;  %v2110_v58 = vunpack.c.h.bf16 %v1432_v57  ;;  %v2111_v5 = vunpack.c.l.bf16 %v1433_v4 }
 0x1a7   : > { %v2112_v29 = vunpack.c.h.bf16 %v1433_v4  ;;  %v2113_v36 = vunpack.c.l.bf16 %v1434_v33  ;;  %v2114_v6 = vunpack.c.h.bf16 %v1434_v33  ;;  %v3317_v30 = vmax.f32 %v3316_v12, %v2107_v45 }
 0x1a8   : > { %v3338_v43 = vmax.f32 %v3337_v0, %v2108_v42  ;;  %v3359_v44 = vmax.f32 %v3358_v8, %v2109_v14  ;;  %v3380_v26 = vmax.f32 %v3379_v37, %v2110_v58  ;;  %v3401_v7 = vmax.f32 %v3400_v32, %v2111_v5  ;;  %v1441_v0 = vld [vmem:[%s6976_s8 + $0x570] sm:$0xff]  ;;  %v1442_v8 = vld [vmem:[%s6976_s8 + $0x578] sm:$0xff] }
 0x1a9   : > { %v3422_v20 = vmax.f32 %v3421_v54, %v2112_v29  ;;  %v3443_v11 = vmax.f32 %v3442_v51, %v2113_v36  ;;  %v3464_v23 = vmax.f32 %v3463_v40, %v2114_v6  ;;  %v2115_v63 = vunpack.c.l.bf16 %v1435_v2  ;;  %v1443_v29 = vld [vmem:[%s6976_s8 + $0x580] sm:$0xff]  ;;  %v1444_v36 = vld [vmem:[%s6976_s8 + $0x588] sm:$0xff] }
 0x1aa   : > { %v2116_v35 = vunpack.c.h.bf16 %v1435_v2  ;;  %v2117_v57 = vunpack.c.l.bf16 %v1436_v38  ;;  %v2118_v46 = vunpack.c.h.bf16 %v1436_v38  ;;  %v2119_v59 = vunpack.c.l.bf16 %v1437_v1 }
 0x1ab   : > { %v2120_v4 = vunpack.c.h.bf16 %v1437_v1  ;;  %v2121_v33 = vunpack.c.l.bf16 %v1438_v25  ;;  %v2122_v12 = vunpack.c.h.bf16 %v1438_v25  ;;  %v3150_v37 = vmax.f32 %v3149_v18, %v2115_v63 }
 0x1ac   : > { %v3171_v45 = vmax.f32 %v3170_v17, %v2116_v35  ;;  %v3192_v32 = vmax.f32 %v3191_v41, %v2117_v57  ;;  %v3213_v54 = vmax.f32 %v3212_v62, %v2118_v46  ;;  %v3234_v51 = vmax.f32 %v3233_v27, %v2119_v59  ;;  %v1445_v17 = vld [vmem:[%s6976_s8 + $0x590] sm:$0xff]  ;;  %v1446_v41 = vld [vmem:[%s6976_s8 + $0x598] sm:$0xff] }
 0x1ad   : > { %v3255_v40 = vmax.f32 %v3254_v28, %v2120_v4  ;;  %v3276_v42 = vmax.f32 %v3275_v31, %v2121_v33  ;;  %v3297_v14 = vmax.f32 %v3296_v3, %v2122_v12  ;;  %v2123_v58 = vunpack.c.l.bf16 %v1439_v19  ;;  %v1447_v4 = vld [vmem:[%s6976_s8 + $0x5a0] sm:$0xff]  ;;  %v1448_v33 = vld [vmem:[%s6976_s8 + $0x5a8] sm:$0xff] }
 0x1ae   : > { %v2124_v2 = vunpack.c.h.bf16 %v1439_v19  ;;  %v2125_v38 = vunpack.c.l.bf16 %v1440_v39  ;;  %v2126_v5 = vunpack.c.h.bf16 %v1440_v39  ;;  %v2127_v6 = vunpack.c.l.bf16 %v1441_v0 }
 0x1af   : > { %v2128_v1 = vunpack.c.h.bf16 %v1441_v0  ;;  %v2129_v25 = vunpack.c.l.bf16 %v1442_v8  ;;  %v2130_v18 = vunpack.c.h.bf16 %v1442_v8  ;;  %v3318_v62 = vmax.f32 %v3317_v30, %v2123_v58 }
 0x1b0   : > { %v3339_v63 = vmax.f32 %v3338_v43, %v2124_v2  ;;  %v3360_v27 = vmax.f32 %v3359_v44, %v2125_v38  ;;  %v3381_v28 = vmax.f32 %v3380_v26, %v2126_v5  ;;  %v3402_v31 = vmax.f32 %v3401_v7, %v2127_v6  ;;  %v1449_v43 = vld [vmem:[%s6976_s8 + $0x5b0] sm:$0xff]  ;;  %v1450_v44 = vld [vmem:[%s6976_s8 + $0x5b8] sm:$0xff] }
 0x1b1   : > { %v3423_v3 = vmax.f32 %v3422_v20, %v2128_v1  ;;  %v3444_v35 = vmax.f32 %v3443_v11, %v2129_v25  ;;  %v3465_v57 = vmax.f32 %v3464_v23, %v2130_v18  ;;  %v2131_v46 = vunpack.c.l.bf16 %v1443_v29  ;;  %v1451_v1 = vld [vmem:[%s6976_s8 + $0x5c0] sm:$0xff]  ;;  %v1452_v25 = vld [vmem:[%s6976_s8 + $0x5c8] sm:$0xff] }
 0x1b2   : > { %v2132_v19 = vunpack.c.h.bf16 %v1443_v29  ;;  %v2133_v39 = vunpack.c.l.bf16 %v1444_v36  ;;  %v2134_v59 = vunpack.c.h.bf16 %v1444_v36  ;;  %v2135_v12 = vunpack.c.l.bf16 %v1445_v17 }
 0x1b3   : > { %v2136_v0 = vunpack.c.h.bf16 %v1445_v17  ;;  %v2137_v8 = vunpack.c.l.bf16 %v1446_v41  ;;  %v2138_v30 = vunpack.c.h.bf16 %v1446_v41  ;;  %v3151_v26 = vmax.f32 %v3150_v37, %v2131_v46 }
 0x1b4   : > { %v3172_v58 = vmax.f32 %v3171_v45, %v2132_v19  ;;  %v3193_v7 = vmax.f32 %v3192_v32, %v2133_v39  ;;  %v3214_v20 = vmax.f32 %v3213_v54, %v2134_v59  ;;  %v3235_v11 = vmax.f32 %v3234_v51, %v2135_v12  ;;  %v1453_v45 = vld [vmem:[%s6976_s8 + $0x5d0] sm:$0xff]  ;;  %v1454_v32 = vld [vmem:[%s6976_s8 + $0x5d8] sm:$0xff] }
 0x1b5   : > { %v3256_v23 = vmax.f32 %v3255_v40, %v2136_v0  ;;  %v3277_v2 = vmax.f32 %v3276_v42, %v2137_v8  ;;  %v3298_v38 = vmax.f32 %v3297_v14, %v2138_v30  ;;  %v2139_v5 = vunpack.c.l.bf16 %v1447_v4  ;;  %v1455_v0 = vld [vmem:[%s6976_s8 + $0x5e0] sm:$0xff]  ;;  %v1456_v8 = vld [vmem:[%s6976_s8 + $0x5e8] sm:$0xff] }
 0x1b6   : > { %v2140_v29 = vunpack.c.h.bf16 %v1447_v4  ;;  %v2141_v36 = vunpack.c.l.bf16 %v1448_v33  ;;  %v2142_v6 = vunpack.c.h.bf16 %v1448_v33  ;;  %v2143_v18 = vunpack.c.l.bf16 %v1449_v43 }
 0x1b7   : > { %v2144_v17 = vunpack.c.h.bf16 %v1449_v43  ;;  %v2145_v41 = vunpack.c.l.bf16 %v1450_v44  ;;  %v2146_v37 = vunpack.c.h.bf16 %v1450_v44  ;;  %v3319_v54 = vmax.f32 %v3318_v62, %v2139_v5 }
 0x1b8   : > { %v3340_v46 = vmax.f32 %v3339_v63, %v2140_v29  ;;  %v3361_v51 = vmax.f32 %v3360_v27, %v2141_v36  ;;  %v3382_v40 = vmax.f32 %v3381_v28, %v2142_v6  ;;  %v3403_v42 = vmax.f32 %v3402_v31, %v2143_v18  ;;  %v1457_v63 = vld [vmem:[%s6976_s8 + $0x5f0] sm:$0xff]  ;;  %v1458_v27 = vld [vmem:[%s6976_s8 + $0x5f8] sm:$0xff] }
 0x1b9   : > { %v3424_v14 = vmax.f32 %v3423_v3, %v2144_v17  ;;  %v3445_v19 = vmax.f32 %v3444_v35, %v2145_v41  ;;  %v3466_v39 = vmax.f32 %v3465_v57, %v2146_v37  ;;  %v2147_v59 = vunpack.c.l.bf16 %v1451_v1  ;;  %v1459_v17 = vld [vmem:[%s6976_s8 + $0x600] sm:$0xff]  ;;  %v1460_v41 = vld [vmem:[%s6976_s8 + $0x608] sm:$0xff] }
 0x1ba   : > { %v2148_v4 = vunpack.c.h.bf16 %v1451_v1  ;;  %v2149_v33 = vunpack.c.l.bf16 %v1452_v25  ;;  %v2150_v12 = vunpack.c.h.bf16 %v1452_v25  ;;  %v2151_v30 = vunpack.c.l.bf16 %v1453_v45 }
 0x1bb   : > { %v2152_v43 = vunpack.c.h.bf16 %v1453_v45  ;;  %v2153_v44 = vunpack.c.l.bf16 %v1454_v32  ;;  %v2154_v62 = vunpack.c.h.bf16 %v1454_v32  ;;  %v3152_v28 = vmax.f32 %v3151_v26, %v2147_v59 }
 0x1bc   : > { %v3173_v5 = vmax.f32 %v3172_v58, %v2148_v4  ;;  %v3194_v31 = vmax.f32 %v3193_v7, %v2149_v33  ;;  %v3215_v3 = vmax.f32 %v3214_v20, %v2150_v12  ;;  %v3236_v35 = vmax.f32 %v3235_v11, %v2151_v30  ;;  %v1461_v58 = vld [vmem:[%s6976_s8 + $0x610] sm:$0xff]  ;;  %v1462_v7 = vld [vmem:[%s6976_s8 + $0x618] sm:$0xff] }
 0x1bd   : > { %v3257_v57 = vmax.f32 %v3256_v23, %v2152_v43  ;;  %v3278_v29 = vmax.f32 %v3277_v2, %v2153_v44  ;;  %v3299_v36 = vmax.f32 %v3298_v38, %v2154_v62  ;;  %v2155_v6 = vunpack.c.l.bf16 %v1455_v0  ;;  %v1463_v43 = vld [vmem:[%s6976_s8 + $0x620] sm:$0xff]  ;;  %v1464_v44 = vld [vmem:[%s6976_s8 + $0x628] sm:$0xff] }
 0x1be   : > { %v2156_v1 = vunpack.c.h.bf16 %v1455_v0  ;;  %v2157_v25 = vunpack.c.l.bf16 %v1456_v8  ;;  %v2158_v18 = vunpack.c.h.bf16 %v1456_v8  ;;  %v2159_v37 = vunpack.c.l.bf16 %v1457_v63 }
 0x1bf   : > { %v2160_v45 = vunpack.c.h.bf16 %v1457_v63  ;;  %v2161_v32 = vunpack.c.l.bf16 %v1458_v27  ;;  %v2162_v26 = vunpack.c.h.bf16 %v1458_v27  ;;  %v3320_v20 = vmax.f32 %v3319_v54, %v2155_v6 }
 0x1c0   : > { %v3341_v59 = vmax.f32 %v3340_v46, %v2156_v1  ;;  %v3362_v11 = vmax.f32 %v3361_v51, %v2157_v25  ;;  %v3383_v23 = vmax.f32 %v3382_v40, %v2158_v18  ;;  %v3404_v2 = vmax.f32 %v3403_v42, %v2159_v37  ;;  %v1465_v46 = vld [vmem:[%s6976_s8 + $0x630] sm:$0xff]  ;;  %v1466_v51 = vld [vmem:[%s6976_s8 + $0x638] sm:$0xff] }
 0x1c1   : > { %v3425_v38 = vmax.f32 %v3424_v14, %v2160_v45  ;;  %v3446_v4 = vmax.f32 %v3445_v19, %v2161_v32  ;;  %v3467_v33 = vmax.f32 %v3466_v39, %v2162_v26  ;;  %v2163_v12 = vunpack.c.l.bf16 %v1459_v17  ;;  %v1467_v45 = vld [vmem:[%s6976_s8 + $0x640] sm:$0xff]  ;;  %v1468_v32 = vld [vmem:[%s6976_s8 + $0x648] sm:$0xff] }
 0x1c2   : > { %v2164_v0 = vunpack.c.h.bf16 %v1459_v17  ;;  %v2165_v8 = vunpack.c.l.bf16 %v1460_v41  ;;  %v2166_v30 = vunpack.c.h.bf16 %v1460_v41  ;;  %v2167_v62 = vunpack.c.l.bf16 %v1461_v58 }
 0x1c3   : > { %v2168_v63 = vunpack.c.h.bf16 %v1461_v58  ;;  %v2169_v27 = vunpack.c.l.bf16 %v1462_v7  ;;  %v2170_v54 = vunpack.c.h.bf16 %v1462_v7  ;;  %v3153_v40 = vmax.f32 %v3152_v28, %v2163_v12 }
 0x1c4   : > { %v3174_v6 = vmax.f32 %v3173_v5, %v2164_v0  ;;  %v3195_v42 = vmax.f32 %v3194_v31, %v2165_v8  ;;  %v3216_v14 = vmax.f32 %v3215_v3, %v2166_v30  ;;  %v3237_v19 = vmax.f32 %v3236_v35, %v2167_v62  ;;  %v1469_v5 = vld [vmem:[%s6976_s8 + $0x650] sm:$0xff]  ;;  %v1470_v31 = vld [vmem:[%s6976_s8 + $0x658] sm:$0xff] }
 0x1c5   : > { %v3258_v39 = vmax.f32 %v3257_v57, %v2168_v63  ;;  %v3279_v1 = vmax.f32 %v3278_v29, %v2169_v27  ;;  %v3300_v25 = vmax.f32 %v3299_v36, %v2170_v54  ;;  %v2171_v18 = vunpack.c.l.bf16 %v1463_v43  ;;  %v1471_v63 = vld [vmem:[%s6976_s8 + $0x660] sm:$0xff]  ;;  %v1472_v27 = vld [vmem:[%s6976_s8 + $0x668] sm:$0xff] }
 0x1c6   : > { %v2172_v17 = vunpack.c.h.bf16 %v1463_v43  ;;  %v2173_v41 = vunpack.c.l.bf16 %v1464_v44  ;;  %v2174_v37 = vunpack.c.h.bf16 %v1464_v44  ;;  %v2175_v26 = vunpack.c.l.bf16 %v1465_v46 }
 0x1c7   : > { %v2176_v58 = vunpack.c.h.bf16 %v1465_v46  ;;  %v2177_v7 = vunpack.c.l.bf16 %v1466_v51  ;;  %v2178_v28 = vunpack.c.h.bf16 %v1466_v51  ;;  %v3321_v3 = vmax.f32 %v3320_v20, %v2171_v18 }
 0x1c8   : > { %v3342_v12 = vmax.f32 %v3341_v59, %v2172_v17  ;;  %v3363_v35 = vmax.f32 %v3362_v11, %v2173_v41  ;;  %v3384_v57 = vmax.f32 %v3383_v23, %v2174_v37  ;;  %v3405_v29 = vmax.f32 %v3404_v2, %v2175_v26  ;;  %v1473_v59 = vld [vmem:[%s6976_s8 + $0x670] sm:$0xff]  ;;  %v1474_v11 = vld [vmem:[%s6976_s8 + $0x678] sm:$0xff] }
 0x1c9   : > { %v3426_v36 = vmax.f32 %v3425_v38, %v2176_v58  ;;  %v3447_v0 = vmax.f32 %v3446_v4, %v2177_v7  ;;  %v3468_v8 = vmax.f32 %v3467_v33, %v2178_v28  ;;  %v2179_v30 = vunpack.c.l.bf16 %v1467_v45  ;;  %v1475_v58 = vld [vmem:[%s6976_s8 + $0x680] sm:$0xff]  ;;  %v1476_v7 = vld [vmem:[%s6976_s8 + $0x688] sm:$0xff] }
 0x1ca   : > { %v2180_v43 = vunpack.c.h.bf16 %v1467_v45  ;;  %v2181_v44 = vunpack.c.l.bf16 %v1468_v32  ;;  %v2182_v62 = vunpack.c.h.bf16 %v1468_v32  ;;  %v2183_v54 = vunpack.c.l.bf16 %v1469_v5 }
 0x1cb   : > { %v2184_v46 = vunpack.c.h.bf16 %v1469_v5  ;;  %v2185_v51 = vunpack.c.l.bf16 %v1470_v31  ;;  %v2186_v20 = vunpack.c.h.bf16 %v1470_v31  ;;  %v3154_v23 = vmax.f32 %v3153_v40, %v2179_v30 }
 0x1cc   : > { %v3175_v18 = vmax.f32 %v3174_v6, %v2180_v43  ;;  %v3196_v2 = vmax.f32 %v3195_v42, %v2181_v44  ;;  %v3217_v38 = vmax.f32 %v3216_v14, %v2182_v62  ;;  %v3238_v4 = vmax.f32 %v3237_v19, %v2183_v54  ;;  %v1477_v6 = vld [vmem:[%s6976_s8 + $0x690] sm:$0xff]  ;;  %v1478_v42 = vld [vmem:[%s6976_s8 + $0x698] sm:$0xff] }
 0x1cd   : > { %v3259_v33 = vmax.f32 %v3258_v39, %v2184_v46  ;;  %v3280_v17 = vmax.f32 %v3279_v1, %v2185_v51  ;;  %v3301_v41 = vmax.f32 %v3300_v25, %v2186_v20  ;;  %v2187_v37 = vunpack.c.l.bf16 %v1471_v63  ;;  %v1479_v46 = vld [vmem:[%s6976_s8 + $0x6a0] sm:$0xff]  ;;  %v1480_v51 = vld [vmem:[%s6976_s8 + $0x6a8] sm:$0xff] }
 0x1ce   : > { %v2188_v45 = vunpack.c.h.bf16 %v1471_v63  ;;  %v2189_v32 = vunpack.c.l.bf16 %v1472_v27  ;;  %v2190_v26 = vunpack.c.h.bf16 %v1472_v27  ;;  %v2191_v28 = vunpack.c.l.bf16 %v1473_v59 }
 0x1cf   : > { %v2192_v5 = vunpack.c.h.bf16 %v1473_v59  ;;  %v2193_v31 = vunpack.c.l.bf16 %v1474_v11  ;;  %v2194_v40 = vunpack.c.h.bf16 %v1474_v11  ;;  %v3322_v14 = vmax.f32 %v3321_v3, %v2187_v37 }
 0x1d0   : > { %v3343_v30 = vmax.f32 %v3342_v12, %v2188_v45  ;;  %v3364_v19 = vmax.f32 %v3363_v35, %v2189_v32  ;;  %v3385_v39 = vmax.f32 %v3384_v57, %v2190_v26  ;;  %v3406_v1 = vmax.f32 %v3405_v29, %v2191_v28  ;;  %v1481_v12 = vld [vmem:[%s6976_s8 + $0x6b0] sm:$0xff]  ;;  %v1482_v35 = vld [vmem:[%s6976_s8 + $0x6b8] sm:$0xff] }
 0x1d1   : > { %v3427_v25 = vmax.f32 %v3426_v36, %v2192_v5  ;;  %v3448_v43 = vmax.f32 %v3447_v0, %v2193_v31  ;;  %v3469_v44 = vmax.f32 %v3468_v8, %v2194_v40  ;;  %v2195_v62 = vunpack.c.l.bf16 %v1475_v58  ;;  %v1483_v5 = vld [vmem:[%s6976_s8 + $0x6c0] sm:$0xff]  ;;  %v1484_v31 = vld [vmem:[%s6976_s8 + $0x6c8] sm:$0xff] }
 0x1d2   : > { %v2196_v63 = vunpack.c.h.bf16 %v1475_v58  ;;  %v2197_v27 = vunpack.c.l.bf16 %v1476_v7  ;;  %v2198_v54 = vunpack.c.h.bf16 %v1476_v7  ;;  %v2199_v20 = vunpack.c.l.bf16 %v1477_v6 }
 0x1d3   : > { %v2200_v59 = vunpack.c.h.bf16 %v1477_v6  ;;  %v2201_v11 = vunpack.c.l.bf16 %v1478_v42  ;;  %v2202_v3 = vunpack.c.h.bf16 %v1478_v42  ;;  %v3155_v57 = vmax.f32 %v3154_v23, %v2195_v62 }
 0x1d4   : > { %v3176_v37 = vmax.f32 %v3175_v18, %v2196_v63  ;;  %v3197_v29 = vmax.f32 %v3196_v2, %v2197_v27  ;;  %v3218_v36 = vmax.f32 %v3217_v38, %v2198_v54  ;;  %v3239_v0 = vmax.f32 %v3238_v4, %v2199_v20  ;;  %v1485_v18 = vld [vmem:[%s6976_s8 + $0x6d0] sm:$0xff]  ;;  %v1486_v2 = vld [vmem:[%s6976_s8 + $0x6d8] sm:$0xff] }
 0x1d5   : > { %v3260_v8 = vmax.f32 %v3259_v33, %v2200_v59  ;;  %v3281_v45 = vmax.f32 %v3280_v17, %v2201_v11  ;;  %v3302_v32 = vmax.f32 %v3301_v41, %v2202_v3  ;;  %v2203_v26 = vunpack.c.l.bf16 %v1479_v46  ;;  %v1487_v59 = vld [vmem:[%s6976_s8 + $0x6e0] sm:$0xff]  ;;  %v1488_v11 = vld [vmem:[%s6976_s8 + $0x6e8] sm:$0xff] }
 0x1d6   : > { %v2204_v58 = vunpack.c.h.bf16 %v1479_v46  ;;  %v2205_v7 = vunpack.c.l.bf16 %v1480_v51  ;;  %v2206_v28 = vunpack.c.h.bf16 %v1480_v51  ;;  %v2207_v40 = vunpack.c.l.bf16 %v1481_v12 }
 0x1d7   : > { %v2208_v6 = vunpack.c.h.bf16 %v1481_v12  ;;  %v2209_v42 = vunpack.c.l.bf16 %v1482_v35  ;;  %v2210_v23 = vunpack.c.h.bf16 %v1482_v35  ;;  %v3323_v38 = vmax.f32 %v3322_v14, %v2203_v26 }
 0x1d8   : > { %v3344_v62 = vmax.f32 %v3343_v30, %v2204_v58  ;;  %v3365_v4 = vmax.f32 %v3364_v19, %v2205_v7  ;;  %v3386_v33 = vmax.f32 %v3385_v39, %v2206_v28  ;;  %v3407_v17 = vmax.f32 %v3406_v1, %v2207_v40  ;;  %v1489_v30 = vld [vmem:[%s6976_s8 + $0x6f0] sm:$0xff]  ;;  %v1490_v19 = vld [vmem:[%s6976_s8 + $0x6f8] sm:$0xff] }
 0x1d9   : > { %v3428_v41 = vmax.f32 %v3427_v25, %v2208_v6  ;;  %v3449_v63 = vmax.f32 %v3448_v43, %v2209_v42  ;;  %v3470_v27 = vmax.f32 %v3469_v44, %v2210_v23  ;;  %v2211_v54 = vunpack.c.l.bf16 %v1483_v5  ;;  %v1491_v6 = vld [vmem:[%s6976_s8 + $0x700] sm:$0xff]  ;;  %v1492_v42 = vld [vmem:[%s6976_s8 + $0x708] sm:$0xff] }
 0x1da   : > { %v2212_v46 = vunpack.c.h.bf16 %v1483_v5  ;;  %v2213_v51 = vunpack.c.l.bf16 %v1484_v31  ;;  %v2214_v20 = vunpack.c.h.bf16 %v1484_v31  ;;  %v2215_v3 = vunpack.c.l.bf16 %v1485_v18 }
 0x1db   : > { %v2216_v12 = vunpack.c.h.bf16 %v1485_v18  ;;  %v2217_v35 = vunpack.c.l.bf16 %v1486_v2  ;;  %v2218_v14 = vunpack.c.h.bf16 %v1486_v2  ;;  %v3156_v39 = vmax.f32 %v3155_v57, %v2211_v54 }
 0x1dc   : > { %v3177_v26 = vmax.f32 %v3176_v37, %v2212_v46  ;;  %v3198_v1 = vmax.f32 %v3197_v29, %v2213_v51  ;;  %v3219_v25 = vmax.f32 %v3218_v36, %v2214_v20  ;;  %v3240_v43 = vmax.f32 %v3239_v0, %v2215_v3  ;;  %v1493_v37 = vld [vmem:[%s6976_s8 + $0x710] sm:$0xff]  ;;  %v1494_v29 = vld [vmem:[%s6976_s8 + $0x718] sm:$0xff] }
 0x1dd   : > { %v3261_v44 = vmax.f32 %v3260_v8, %v2216_v12  ;;  %v3282_v58 = vmax.f32 %v3281_v45, %v2217_v35  ;;  %v3303_v7 = vmax.f32 %v3302_v32, %v2218_v14  ;;  %v2219_v28 = vunpack.c.l.bf16 %v1487_v59  ;;  %v1495_v12 = vld [vmem:[%s6976_s8 + $0x720] sm:$0xff]  ;;  %v1496_v35 = vld [vmem:[%s6976_s8 + $0x728] sm:$0xff] }
 0x1de   : > { %v2220_v5 = vunpack.c.h.bf16 %v1487_v59  ;;  %v2221_v31 = vunpack.c.l.bf16 %v1488_v11  ;;  %v2222_v40 = vunpack.c.h.bf16 %v1488_v11  ;;  %v2223_v23 = vunpack.c.l.bf16 %v1489_v30 }
 0x1df   : > { %v2224_v18 = vunpack.c.h.bf16 %v1489_v30  ;;  %v2225_v2 = vunpack.c.l.bf16 %v1490_v19  ;;  %v2226_v57 = vunpack.c.h.bf16 %v1490_v19  ;;  %v3324_v36 = vmax.f32 %v3323_v38, %v2219_v28 }
 0x1e0   : > { %v3345_v54 = vmax.f32 %v3344_v62, %v2220_v5  ;;  %v3366_v0 = vmax.f32 %v3365_v4, %v2221_v31  ;;  %v3387_v8 = vmax.f32 %v3386_v33, %v2222_v40  ;;  %v3408_v45 = vmax.f32 %v3407_v17, %v2223_v23  ;;  %v1497_v62 = vld [vmem:[%s6976_s8 + $0x730] sm:$0xff]  ;;  %v1498_v4 = vld [vmem:[%s6976_s8 + $0x738] sm:$0xff] }
 0x1e1   : > { %v3429_v32 = vmax.f32 %v3428_v41, %v2224_v18  ;;  %v3450_v46 = vmax.f32 %v3449_v63, %v2225_v2  ;;  %v3471_v51 = vmax.f32 %v3470_v27, %v2226_v57  ;;  %v2227_v20 = vunpack.c.l.bf16 %v1491_v6  ;;  %v1499_v18 = vld [vmem:[%s6976_s8 + $0x740] sm:$0xff]  ;;  %v1500_v2 = vld [vmem:[%s6976_s8 + $0x748] sm:$0xff] }
 0x1e2   : > { %v2228_v59 = vunpack.c.h.bf16 %v1491_v6  ;;  %v2229_v11 = vunpack.c.l.bf16 %v1492_v42  ;;  %v2230_v3 = vunpack.c.h.bf16 %v1492_v42  ;;  %v2231_v14 = vunpack.c.l.bf16 %v1493_v37 }
 0x1e3   : > { %v2232_v30 = vunpack.c.h.bf16 %v1493_v37  ;;  %v2233_v19 = vunpack.c.l.bf16 %v1494_v29  ;;  %v2234_v38 = vunpack.c.h.bf16 %v1494_v29  ;;  %v3157_v33 = vmax.f32 %v3156_v39, %v2227_v20 }
 0x1e4   : > { %v3178_v28 = vmax.f32 %v3177_v26, %v2228_v59  ;;  %v3199_v17 = vmax.f32 %v3198_v1, %v2229_v11  ;;  %v3220_v41 = vmax.f32 %v3219_v25, %v2230_v3  ;;  %v3241_v63 = vmax.f32 %v3240_v43, %v2231_v14  ;;  %v1501_v26 = vld [vmem:[%s6976_s8 + $0x750] sm:$0xff]  ;;  %v1502_v1 = vld [vmem:[%s6976_s8 + $0x758] sm:$0xff] }
 0x1e5   : > { %v3262_v27 = vmax.f32 %v3261_v44, %v2232_v30  ;;  %v3283_v5 = vmax.f32 %v3282_v58, %v2233_v19  ;;  %v3304_v31 = vmax.f32 %v3303_v7, %v2234_v38  ;;  %v2235_v40 = vunpack.c.l.bf16 %v1495_v12  ;;  %v1503_v30 = vld [vmem:[%s6976_s8 + $0x760] sm:$0xff]  ;;  %v1504_v19 = vld [vmem:[%s6976_s8 + $0x768] sm:$0xff] }
 0x1e6   : > { %v2236_v6 = vunpack.c.h.bf16 %v1495_v12  ;;  %v2237_v42 = vunpack.c.l.bf16 %v1496_v35  ;;  %v2238_v23 = vunpack.c.h.bf16 %v1496_v35  ;;  %v2239_v57 = vunpack.c.l.bf16 %v1497_v62 }
 0x1e7   : > { %v2240_v37 = vunpack.c.h.bf16 %v1497_v62  ;;  %v2241_v29 = vunpack.c.l.bf16 %v1498_v4  ;;  %v2242_v39 = vunpack.c.h.bf16 %v1498_v4  ;;  %v3325_v25 = vmax.f32 %v3324_v36, %v2235_v40 }
 0x1e8   : > { %v3346_v20 = vmax.f32 %v3345_v54, %v2236_v6  ;;  %v3367_v43 = vmax.f32 %v3366_v0, %v2237_v42  ;;  %v3388_v44 = vmax.f32 %v3387_v8, %v2238_v23  ;;  %v3409_v58 = vmax.f32 %v3408_v45, %v2239_v57  ;;  %v1505_v54 = vld [vmem:[%s6976_s8 + $0x770] sm:$0xff]  ;;  %v1506_v0 = vld [vmem:[%s6976_s8 + $0x778] sm:$0xff] }
 0x1e9   : > { %v3430_v7 = vmax.f32 %v3429_v32, %v2240_v37  ;;  %v3451_v59 = vmax.f32 %v3450_v46, %v2241_v29  ;;  %v3472_v11 = vmax.f32 %v3471_v51, %v2242_v39  ;;  %v2243_v3 = vunpack.c.l.bf16 %v1499_v18  ;;  %v1507_v37 = vld [vmem:[%s6976_s8 + $0x780] sm:$0xff]  ;;  %v1508_v29 = vld [vmem:[%s6976_s8 + $0x788] sm:$0xff] }
 0x1ea   : > { %v2244_v12 = vunpack.c.h.bf16 %v1499_v18  ;;  %v2245_v35 = vunpack.c.l.bf16 %v1500_v2  ;;  %v2246_v14 = vunpack.c.h.bf16 %v1500_v2  ;;  %v2247_v38 = vunpack.c.l.bf16 %v1501_v26 }
 0x1eb   : > { %v2248_v62 = vunpack.c.h.bf16 %v1501_v26  ;;  %v2249_v4 = vunpack.c.l.bf16 %v1502_v1  ;;  %v2250_v36 = vunpack.c.h.bf16 %v1502_v1  ;;  %v3158_v8 = vmax.f32 %v3157_v33, %v2243_v3 }
 0x1ec   : > { %v3179_v40 = vmax.f32 %v3178_v28, %v2244_v12  ;;  %v3200_v45 = vmax.f32 %v3199_v17, %v2245_v35  ;;  %v3221_v32 = vmax.f32 %v3220_v41, %v2246_v14  ;;  %v3242_v46 = vmax.f32 %v3241_v63, %v2247_v38  ;;  %v1509_v28 = vld [vmem:[%s6976_s8 + $0x790] sm:$0xff]  ;;  %v1510_v17 = vld [vmem:[%s6976_s8 + $0x798] sm:$0xff] }
 0x1ed   : > { %v3263_v51 = vmax.f32 %v3262_v27, %v2248_v62  ;;  %v3284_v6 = vmax.f32 %v3283_v5, %v2249_v4  ;;  %v3305_v42 = vmax.f32 %v3304_v31, %v2250_v36  ;;  %v2251_v23 = vunpack.c.l.bf16 %v1503_v30  ;;  %v1511_v62 = vld [vmem:[%s6976_s8 + $0x7a0] sm:$0xff]  ;;  %v1512_v4 = vld [vmem:[%s6976_s8 + $0x7a8] sm:$0xff] }
 0x1ee   : > { %v2252_v18 = vunpack.c.h.bf16 %v1503_v30  ;;  %v2253_v2 = vunpack.c.l.bf16 %v1504_v19  ;;  %v2254_v57 = vunpack.c.h.bf16 %v1504_v19  ;;  %v2255_v39 = vunpack.c.l.bf16 %v1505_v54 }
 0x1ef   : > { %v2256_v26 = vunpack.c.h.bf16 %v1505_v54  ;;  %v2257_v1 = vunpack.c.l.bf16 %v1506_v0  ;;  %v2258_v33 = vunpack.c.h.bf16 %v1506_v0  ;;  %v3326_v41 = vmax.f32 %v3325_v25, %v2251_v23 }
 0x1f0   : > { %v3347_v3 = vmax.f32 %v3346_v20, %v2252_v18  ;;  %v3368_v63 = vmax.f32 %v3367_v43, %v2253_v2  ;;  %v3389_v27 = vmax.f32 %v3388_v44, %v2254_v57  ;;  %v3410_v5 = vmax.f32 %v3409_v58, %v2255_v39  ;;  %v1513_v20 = vld [vmem:[%s6976_s8 + $0x7b0] sm:$0xff]  ;;  %v1514_v43 = vld [vmem:[%s6976_s8 + $0x7b8] sm:$0xff] }
 0x1f1   : > { %v3431_v31 = vmax.f32 %v3430_v7, %v2256_v26  ;;  %v3452_v12 = vmax.f32 %v3451_v59, %v2257_v1  ;;  %v3473_v35 = vmax.f32 %v3472_v11, %v2258_v33  ;;  %v2259_v14 = vunpack.c.l.bf16 %v1507_v37  ;;  %v1515_v26 = vld [vmem:[%s6976_s8 + $0x7c0] sm:$0xff]  ;;  %v1516_v1 = vld [vmem:[%s6976_s8 + $0x7c8] sm:$0xff] }
 0x1f2   : > { %v2260_v30 = vunpack.c.h.bf16 %v1507_v37  ;;  %v2261_v19 = vunpack.c.l.bf16 %v1508_v29  ;;  %v2262_v38 = vunpack.c.h.bf16 %v1508_v29  ;;  %v2263_v36 = vunpack.c.l.bf16 %v1509_v28 }
 0x1f3   : > { %v2264_v54 = vunpack.c.h.bf16 %v1509_v28  ;;  %v2265_v0 = vunpack.c.l.bf16 %v1510_v17  ;;  %v2266_v25 = vunpack.c.h.bf16 %v1510_v17  ;;  %v3159_v44 = vmax.f32 %v3158_v8, %v2259_v14 }
 0x1f4   : > { %v3180_v23 = vmax.f32 %v3179_v40, %v2260_v30  ;;  %v3201_v58 = vmax.f32 %v3200_v45, %v2261_v19  ;;  %v3222_v7 = vmax.f32 %v3221_v32, %v2262_v38  ;;  %v3243_v59 = vmax.f32 %v3242_v46, %v2263_v36  ;;  %v1517_v40 = vld [vmem:[%s6976_s8 + $0x7d0] sm:$0xff]  ;;  %v1518_v45 = vld [vmem:[%s6976_s8 + $0x7d8] sm:$0xff] }
 0x1f5   : > { %v3264_v11 = vmax.f32 %v3263_v51, %v2264_v54  ;;  %v3285_v18 = vmax.f32 %v3284_v6, %v2265_v0  ;;  %v3306_v2 = vmax.f32 %v3305_v42, %v2266_v25  ;;  %v2267_v57 = vunpack.c.l.bf16 %v1511_v62  ;;  %v1519_v54 = vld [vmem:[%s6976_s8 + $0x7e0] sm:$0xff]  ;;  %v1520_v0 = vld [vmem:[%s6976_s8 + $0x7e8] sm:$0xff] }
 0x1f6   : > { %v2268_v37 = vunpack.c.h.bf16 %v1511_v62  ;;  %v2269_v29 = vunpack.c.l.bf16 %v1512_v4  ;;  %v2270_v39 = vunpack.c.h.bf16 %v1512_v4  ;;  %v2271_v33 = vunpack.c.l.bf16 %v1513_v20 }
 0x1f7   : > { %v2272_v28 = vunpack.c.h.bf16 %v1513_v20  ;;  %v2273_v17 = vunpack.c.l.bf16 %v1514_v43  ;;  %v2274_v8 = vunpack.c.h.bf16 %v1514_v43  ;;  %v3327_v32 = vmax.f32 %v3326_v41, %v2267_v57 }
 0x1f8   : > { %v3348_v14 = vmax.f32 %v3347_v3, %v2268_v37  ;;  %v3369_v46 = vmax.f32 %v3368_v63, %v2269_v29  ;;  %v3390_v51 = vmax.f32 %v3389_v27, %v2270_v39  ;;  %v3411_v6 = vmax.f32 %v3410_v5, %v2271_v33  ;;  %v1521_v3 = vld [vmem:[%s6976_s8 + $0x7f0] sm:$0xff]  ;;  %v1522_v63 = vld [vmem:[%s6976_s8 + $0x7f8] sm:$0xff] }
 0x1f9   : > { %v3432_v42 = vmax.f32 %v3431_v31, %v2272_v28  ;;  %v3453_v30 = vmax.f32 %v3452_v12, %v2273_v17  ;;  %v3474_v19 = vmax.f32 %v3473_v35, %v2274_v8  ;;  %v2275_v38 = vunpack.c.l.bf16 %v1515_v26 }
 0x1fa   : > { %v2276_v62 = vunpack.c.h.bf16 %v1515_v26  ;;  %v2277_v4 = vunpack.c.l.bf16 %v1516_v1  ;;  %v2278_v36 = vunpack.c.h.bf16 %v1516_v1  ;;  %v2279_v25 = vunpack.c.l.bf16 %v1517_v40  ;;  %v7467_v1 = vld [vmem:[%s6976_s8 + $0x808] sm:$0xff] }
 0x1fb   : > { %v2280_v20 = vunpack.c.h.bf16 %v1517_v40  ;;  %v2281_v43 = vunpack.c.l.bf16 %v1518_v45  ;;  %v2282_v41 = vunpack.c.h.bf16 %v1518_v45  ;;  %v7447_v27 = vmax.f32 %v3159_v44, %v2275_v38  ;;  %9581 = vst [vmem:[#allocation49_spill] sm:$0xff] %v7467_v1  ;;  %v7484_v45 = vld [vmem:[%s6976_s8 + $0x820] sm:$0xff]  ;;  %v7487_v38 = vld [vmem:[%s6976_s8 + $0x828] sm:$0xff] }
 0x1fc   : > { %v7449_v5 = vmax.f32 %v3180_v23, %v2276_v62  ;;  %v7451_v31 = vmax.f32 %v3201_v58, %v2277_v4  ;;  %v7453_v12 = vmax.f32 %v3222_v7, %v2278_v36  ;;  %v7455_v35 = vmax.f32 %v3243_v59, %v2279_v25  ;;  %v7464_v58 = vld [vmem:[%s6976_s8 + $0x800] sm:$0xff]  ;;  %9588 = vst [vmem:[#allocation56_spill] sm:$0xff] %v7484_v45  ;;  %v1540_v25 = vld [vmem:[%s6976_s8 + $0x888] sm:$0xff] }
 0x1fd   : > { %9572 = vst [vmem:[#allocation40_spill] sm:$0xff] %v7447_v27  ;;  %v7457_v57 = vmax.f32 %v3264_v11, %v2280_v20  ;;  %v7459_v37 = vmax.f32 %v3285_v18, %v2281_v43  ;;  %v7461_v29 = vmax.f32 %v3306_v2, %v2282_v41  ;;  %v2283_v39 = vunpack.c.l.bf16 %v1519_v54  ;;  %9580 = vst [vmem:[#allocation48_spill] sm:$0xff] %v7464_v58  ;;  %v7470_v18 = vld [vmem:[%s6976_s8 + $0x810] sm:$0xff]  ;;  %v7473_v2 = vld [vmem:[%s6976_s8 + $0x818] sm:$0xff] }
 0x1fe   : > { %9573 = vst [vmem:[#allocation41_spill] sm:$0xff] %v7449_v5  ;;  %9574 = vst [vmem:[#allocation42_spill] sm:$0xff] %v7451_v31  ;;  %v2284_v44 = vunpack.c.h.bf16 %v1519_v54  ;;  %v2285_v23 = vunpack.c.l.bf16 %v1520_v0  ;;  %v2286_v26 = vunpack.c.h.bf16 %v1520_v0  ;;  %v2287_v7 = vunpack.c.l.bf16 %v1521_v3  ;;  %v7508_v0 = vld [vmem:[%s6976_s8 + $0x840] sm:$0xff]  ;;  %v7518_v41 = vld [vmem:[%s6976_s8 + $0x850] sm:$0xff] }
 0x1ff   : > { %9575 = vst [vmem:[#allocation43_spill] sm:$0xff] %v7453_v12  ;;  %9576 = vst [vmem:[#allocation44_spill] sm:$0xff] %v7455_v35  ;;  %v2288_v59 = vunpack.c.h.bf16 %v1521_v3  ;;  %v2289_v11 = vunpack.c.l.bf16 %v1522_v63  ;;  %v2290_v33 = vunpack.c.h.bf16 %v1522_v63  ;;  %v7475_v28 = vmax.f32 %v3327_v32, %v2283_v39  ;;  %v7521_v3 = vld [vmem:[%s6976_s8 + $0x858] sm:$0xff]  ;;  %v7538_v39 = vld [vmem:[%s6976_s8 + $0x870] sm:$0xff] }
 0x200   : > { %9577 = vst [vmem:[#allocation45_spill] sm:$0xff] %v7457_v57  ;;  %9578 = vst [vmem:[#allocation46_spill] sm:$0xff] %v7459_v37  ;;  %v7477_v17 = vmax.f32 %v3348_v14, %v2284_v44  ;;  %v7479_v8 = vmax.f32 %v3369_v46, %v2285_v23  ;;  %v7481_v40 = vmax.f32 %v3390_v51, %v2286_v26  ;;  %v7498_v14 = vld [vmem:[%s6976_s8 + $0x830] sm:$0xff]  ;;  %v7501_v46 = vld [vmem:[%s6976_s8 + $0x838] sm:$0xff]  ;;  %v2325_v20 = vunpack.c.l.bf16 %v1540_v25 }
 0x201   : > { %9579 = vst [vmem:[#allocation47_spill] sm:$0xff] %v7461_v29  ;;  %9582 = vst [vmem:[#allocation50_spill] sm:$0xff] %v7470_v18  ;;  %v7489_v62 = vmax.f32 %v3411_v6, %v2287_v7  ;;  %v7491_v4 = vmax.f32 %v3432_v42, %v2288_v59  ;;  %v7493_v32 = vmax.f32 %v3453_v30, %v2289_v11  ;;  %v7511_v30 = vld [vmem:[%s6976_s8 + $0x848] sm:$0xff]  ;;  %v7528_v26 = vld [vmem:[%s6976_s8 + $0x860] sm:$0xff]  ;;  %v2326_v45 = vunpack.c.h.bf16 %v1540_v25 }
 0x202   : > { %9583 = vst [vmem:[#allocation51_spill] sm:$0xff] %v7473_v2  ;;  %9584 = vst [vmem:[#allocation52_spill] sm:$0xff] %v7475_v28  ;;  %v7495_v36 = vmax.f32 %v3474_v19, %v2290_v33  ;;  %v7531_v7 = vld [vmem:[%s6976_s8 + $0x868] sm:$0xff]  ;;  %v7541_v43 = vld [vmem:[%s6976_s8 + $0x878] sm:$0xff] }
 0x203   : > { %9585 = vst [vmem:[#allocation53_spill] sm:$0xff] %v7477_v17  ;;  %9586 = vst [vmem:[#allocation54_spill] sm:$0xff] %v7479_v8  ;;  %v1539_v11 = vld [vmem:[%s6976_s8 + $0x880] sm:$0xff]  ;;  %v1541_v6 = vld [vmem:[%s6976_s8 + $0x890] sm:$0xff] }
 0x204   : > { %9587 = vst [vmem:[#allocation55_spill] sm:$0xff] %v7481_v40  ;;  %9589 = vst [vmem:[#allocation57_spill] sm:$0xff] %v7487_v38  ;;  %v1542_v54 = vld [vmem:[%s6976_s8 + $0x898] sm:$0xff]  ;;  %v1543_v51 = vld [vmem:[%s6976_s8 + $0x8a0] sm:$0xff]  ;;  %v2324_v38 = vunpack.c.h.bf16 %v1539_v11  ;;  %v2328_v2 = vunpack.c.h.bf16 %v1541_v6 }
 0x205   : > { %9590 = vst [vmem:[#allocation58_spill] sm:$0xff] %v7489_v62  ;;  %9591 = vst [vmem:[#allocation59_spill] sm:$0xff] %v7491_v4  ;;  %v7561_v23 = vld [vmem:[%s6976_s8 + $0x8a8] sm:$0xff]  ;;  %v1546_v59 = vld [vmem:[%s6976_s8 + $0x8b8] sm:$0xff]  ;;  %v2330_v63 = vunpack.c.h.bf16 %v1542_v54  ;;  %v2331_v18 = vunpack.c.l.bf16 %v1543_v51  ;;  %v2332_v19 = vunpack.c.h.bf16 %v1543_v51 }
 0x206   : > { %9592 = vst [vmem:[#allocation60_spill] sm:$0xff] %v7493_v32  ;;  %9593 = vst [vmem:[#allocation61_spill] sm:$0xff] %v7495_v36  ;;  %v1547_v33 = vld [vmem:[%s6976_s8 + $0x8c0] sm:$0xff]  ;;  %v1549_v42 = vld [vmem:[%s6976_s8 + $0x8d0] sm:$0xff]  ;;  %v2333_v44 = vunpack.c.l.bf16 %v7561_v23  ;;  %v2338_v1 = vunpack.c.h.bf16 %v1546_v59 }
 0x207   : > { %9594 = vst [vmem:[#allocation62_spill] sm:$0xff] %v7498_v14  ;;  %9595 = vst [vmem:[#allocation63_spill] sm:$0xff] %v7501_v46  ;;  %v1545_v46 = vld [vmem:[%s6976_s8 + $0x8b0] sm:$0xff]  ;;  %v2323_v14 = vunpack.c.l.bf16 %v1539_v11  ;;  %v1552_v36 = vld [vmem:[%s6976_s8 + $0x8e8] sm:$0xff]  ;;  %v2343_v32 = vunpack.c.l.bf16 %v1549_v42  ;;  %v2344_v4 = vunpack.c.h.bf16 %v1549_v42 }
 0x208   : > { %9596 = vst [vmem:[#allocation64_spill] sm:$0xff] %v7508_v0  ;;  %9597 = vst [vmem:[#allocation65_spill] sm:$0xff] %v7511_v30  ;;  %v2335_v11 = vunpack.c.l.bf16 %v1545_v46  ;;  %v2336_v25 = vunpack.c.h.bf16 %v1545_v46  ;;  %v2339_v30 = vunpack.c.l.bf16 %v1547_v33  ;;  %v1553_v40 = vld [vmem:[%s6976_s8 + $0x8f0] sm:$0xff]  ;;  %v1554_v8 = vld [vmem:[%s6976_s8 + $0x8f8] sm:$0xff]  ;;  %v2349_v35 = vunpack.c.l.bf16 %v1552_v36 }
 0x209   : > { %9598 = vst [vmem:[#allocation66_spill] sm:$0xff] %v7518_v41  ;;  %9599 = vst [vmem:[#allocation67_spill] sm:$0xff] %v7521_v3  ;;  %v2329_v3 = vunpack.c.l.bf16 %v1542_v54  ;;  %v2337_v41 = vunpack.c.l.bf16 %v1546_v59  ;;  %v1551_v54 = vld [vmem:[%s6976_s8 + $0x8e0] sm:$0xff]  ;;  %v2350_v42 = vunpack.c.h.bf16 %v1552_v36  ;;  %v1556_v31 = vld [vmem:[%s6976_s8 + $0x908] sm:$0xff]  ;;  %v2352_v5 = vunpack.c.h.bf16 %v1553_v40 }
 0x20a   : > { %9600 = vst [vmem:[#allocation68_spill] sm:$0xff] %v7528_v26  ;;  %9601 = vst [vmem:[#allocation69_spill] sm:$0xff] %v7531_v7  ;;  %v1548_v7 = vld [vmem:[%s6976_s8 + $0x8c8] sm:$0xff]  ;;  %v2327_v26 = vunpack.c.l.bf16 %v1541_v6  ;;  %v2340_v6 = vunpack.c.h.bf16 %v1547_v33  ;;  %v3589_v33 = vmax.f32 %v2344_v4, %v2328_v2  ;;  %v2347_v37 = vunpack.c.l.bf16 %v1551_v54  ;;  %v1555_v12 = vld [vmem:[%s6976_s8 + $0x900] sm:$0xff] }
 0x20b   : > { %9602 = vst [vmem:[#allocation70_spill] sm:$0xff] %v7538_v39  ;;  %9603 = vst [vmem:[#allocation71_spill] sm:$0xff] %v7541_v43  ;;  %v1550_v39 = vld [vmem:[%s6976_s8 + $0x8d8] sm:$0xff]  ;;  %v2334_v43 = vunpack.c.h.bf16 %v7561_v23  ;;  %v2341_v58 = vunpack.c.l.bf16 %v1548_v7  ;;  %v2342_v0 = vunpack.c.h.bf16 %v1548_v7  ;;  %v3484_v23 = vmax.f32 %v2339_v30, %v2323_v14 }
 0x20c   : > { %v2345_v62 = vunpack.c.l.bf16 %v1550_v39  ;;  %v2346_v51 = vunpack.c.h.bf16 %v1550_v39  ;;  %v3505_v17 = vmax.f32 %v2340_v6, %v2324_v38  ;;  %v3568_v59 = vmax.f32 %v2343_v32, %v2327_v26  ;;  %v1558_v38 = vld [vmem:[%s6976_s8 + $0x918] sm:$0xff]  ;;  %v1559_v26 = vld [vmem:[%s6976_s8 + $0x920] sm:$0xff]  ;;  %v1560_v6 = vld [vmem:[%s6976_s8 + $0x928] sm:$0xff] }
 0x20d   : > { %v3526_v28 = vmax.f32 %v2341_v58, %v2325_v20  ;;  %v3547_v46 = vmax.f32 %v2342_v0, %v2326_v45  ;;  %v2348_v57 = vunpack.c.h.bf16 %v1551_v54  ;;  %v2351_v39 = vunpack.c.l.bf16 %v1553_v40  ;;  %v1557_v58 = vld [vmem:[%s6976_s8 + $0x910] sm:$0xff] }
 0x20e   : > { %v3610_v29 = vmax.f32 %v2345_v62, %v2329_v3  ;;  %v3631_v7 = vmax.f32 %v2346_v51, %v2330_v63  ;;  %v2353_v27 = vunpack.c.l.bf16 %v1554_v8  ;;  %v2354_v14 = vunpack.c.h.bf16 %v1554_v8 }
 0x20f   : > { %v3652_v45 = vmax.f32 %v2347_v37, %v2331_v18  ;;  %v3673_v0 = vmax.f32 %v2348_v57, %v2332_v19  ;;  %v3694_v32 = vmax.f32 %v2349_v35, %v2333_v44  ;;  %v3715_v2 = vmax.f32 %v2350_v42, %v2334_v43  ;;  %v1561_v35 = vld [vmem:[%s6976_s8 + $0x930] sm:$0xff]  ;;  %v1562_v57 = vld [vmem:[%s6976_s8 + $0x938] sm:$0xff]  ;;  %v1563_v42 = vld [vmem:[%s6976_s8 + $0x940] sm:$0xff] }
 0x210   : > { %v3736_v62 = vmax.f32 %v2351_v39, %v2335_v11  ;;  %v3757_v4 = vmax.f32 %v2352_v5, %v2336_v25  ;;  %v3778_v30 = vmax.f32 %v2353_v27, %v2337_v41  ;;  %v3799_v36 = vmax.f32 %v2354_v14, %v2338_v1  ;;  %v1564_v39 = vld [vmem:[%s6976_s8 + $0x948] sm:$0xff] }
 0x211   : > { %v2355_v20 = vunpack.c.l.bf16 %v1555_v12  ;;  %v2356_v3 = vunpack.c.h.bf16 %v1555_v12  ;;  %v2357_v63 = vunpack.c.l.bf16 %v1556_v31  ;;  %v2358_v40 = vunpack.c.h.bf16 %v1556_v31 }
 0x212   : > { %v2359_v8 = vunpack.c.l.bf16 %v1557_v58  ;;  %v2360_v54 = vunpack.c.h.bf16 %v1557_v58  ;;  %v2361_v51 = vunpack.c.l.bf16 %v1558_v38  ;;  %v2362_v37 = vunpack.c.h.bf16 %v1558_v38 }
 0x213   : > { %v3485_v18 = vmax.f32 %v3484_v23, %v2355_v20  ;;  %v3506_v19 = vmax.f32 %v3505_v17, %v2356_v3  ;;  %v3527_v43 = vmax.f32 %v3526_v28, %v2357_v63  ;;  %v3548_v27 = vmax.f32 %v3547_v46, %v2358_v40  ;;  %v1565_v28 = vld [vmem:[%s6976_s8 + $0x950] sm:$0xff]  ;;  %v1566_v17 = vld [vmem:[%s6976_s8 + $0x958] sm:$0xff] }
 0x214   : > { %v3569_v5 = vmax.f32 %v3568_v59, %v2359_v8  ;;  %v3590_v12 = vmax.f32 %v3589_v33, %v2360_v54  ;;  %v3611_v1 = vmax.f32 %v3610_v29, %v2361_v51  ;;  %v3632_v31 = vmax.f32 %v3631_v7, %v2362_v37  ;;  %v1567_v54 = vld [vmem:[%s6976_s8 + $0x960] sm:$0xff]  ;;  %v1568_v51 = vld [vmem:[%s6976_s8 + $0x968] sm:$0xff] }
 0x215   : > { %v2363_v41 = vunpack.c.l.bf16 %v1559_v26  ;;  %v2364_v44 = vunpack.c.h.bf16 %v1559_v26  ;;  %v2365_v11 = vunpack.c.l.bf16 %v1560_v6  ;;  %v2366_v25 = vunpack.c.h.bf16 %v1560_v6 }
 0x216   : > { %v2367_v14 = vunpack.c.l.bf16 %v1561_v35  ;;  %v2368_v58 = vunpack.c.h.bf16 %v1561_v35  ;;  %v2369_v38 = vunpack.c.l.bf16 %v1562_v57  ;;  %v2370_v23 = vunpack.c.h.bf16 %v1562_v57 }
 0x217   : > { %v3653_v46 = vmax.f32 %v3652_v45, %v2363_v41  ;;  %v3674_v20 = vmax.f32 %v3673_v0, %v2364_v44  ;;  %v3695_v59 = vmax.f32 %v3694_v32, %v2365_v11  ;;  %v3716_v29 = vmax.f32 %v3715_v2, %v2366_v25  ;;  %v1569_v0 = vld [vmem:[%s6976_s8 + $0x970] sm:$0xff]  ;;  %v1570_v32 = vld [vmem:[%s6976_s8 + $0x978] sm:$0xff] }
 0x218   : > { %v3737_v33 = vmax.f32 %v3736_v62, %v2367_v14  ;;  %v3758_v7 = vmax.f32 %v3757_v4, %v2368_v58  ;;  %v3779_v3 = vmax.f32 %v3778_v30, %v2369_v38  ;;  %v3800_v63 = vmax.f32 %v3799_v36, %v2370_v23  ;;  %v1571_v58 = vld [vmem:[%s6976_s8 + $0x980] sm:$0xff]  ;;  %v1572_v38 = vld [vmem:[%s6976_s8 + $0x988] sm:$0xff] }
 0x219   : > { %v2371_v40 = vunpack.c.l.bf16 %v1563_v42  ;;  %v2372_v26 = vunpack.c.h.bf16 %v1563_v42  ;;  %v2373_v6 = vunpack.c.l.bf16 %v1564_v39  ;;  %v2374_v8 = vunpack.c.h.bf16 %v1564_v39 }
 0x21a   : > { %v2375_v37 = vunpack.c.l.bf16 %v1565_v28  ;;  %v2376_v35 = vunpack.c.h.bf16 %v1565_v28  ;;  %v2377_v57 = vunpack.c.l.bf16 %v1566_v17  ;;  %v2378_v45 = vunpack.c.h.bf16 %v1566_v17 }
 0x21b   : > { %v3486_v2 = vmax.f32 %v3485_v18, %v2371_v40  ;;  %v3507_v41 = vmax.f32 %v3506_v19, %v2372_v26  ;;  %v3528_v62 = vmax.f32 %v3527_v43, %v2373_v6  ;;  %v3549_v4 = vmax.f32 %v3548_v27, %v2374_v8  ;;  %v1573_v19 = vld [vmem:[%s6976_s8 + $0x990] sm:$0xff]  ;;  %v1574_v43 = vld [vmem:[%s6976_s8 + $0x998] sm:$0xff] }
 0x21c   : > { %v3570_v30 = vmax.f32 %v3569_v5, %v2375_v37  ;;  %v3591_v36 = vmax.f32 %v3590_v12, %v2376_v35  ;;  %v3612_v44 = vmax.f32 %v3611_v1, %v2377_v57  ;;  %v3633_v11 = vmax.f32 %v3632_v31, %v2378_v45  ;;  %v1575_v35 = vld [vmem:[%s6976_s8 + $0x9a0] sm:$0xff]  ;;  %v1576_v57 = vld [vmem:[%s6976_s8 + $0x9a8] sm:$0xff] }
 0x21d   : > { %v2379_v25 = vunpack.c.l.bf16 %v1567_v54  ;;  %v2380_v42 = vunpack.c.h.bf16 %v1567_v54  ;;  %v2381_v39 = vunpack.c.l.bf16 %v1568_v51  ;;  %v2382_v14 = vunpack.c.h.bf16 %v1568_v51 }
 0x21e   : > { %v2383_v23 = vunpack.c.l.bf16 %v1569_v0  ;;  %v2384_v28 = vunpack.c.h.bf16 %v1569_v0  ;;  %v2385_v17 = vunpack.c.l.bf16 %v1570_v32  ;;  %v2386_v18 = vunpack.c.h.bf16 %v1570_v32 }
 0x21f   : > { %v3654_v27 = vmax.f32 %v3653_v46, %v2379_v25  ;;  %v3675_v40 = vmax.f32 %v3674_v20, %v2380_v42  ;;  %v3696_v5 = vmax.f32 %v3695_v59, %v2381_v39  ;;  %v3717_v12 = vmax.f32 %v3716_v29, %v2382_v14  ;;  %v1577_v20 = vld [vmem:[%s6976_s8 + $0x9b0] sm:$0xff]  ;;  %v1578_v59 = vld [vmem:[%s6976_s8 + $0x9b8] sm:$0xff] }
 0x220   : > { %v3738_v1 = vmax.f32 %v3737_v33, %v2383_v23  ;;  %v3759_v31 = vmax.f32 %v3758_v7, %v2384_v28  ;;  %v3780_v26 = vmax.f32 %v3779_v3, %v2385_v17  ;;  %v3801_v6 = vmax.f32 %v3800_v63, %v2386_v18  ;;  %v1579_v28 = vld [vmem:[%s6976_s8 + $0x9c0] sm:$0xff]  ;;  %v1580_v17 = vld [vmem:[%s6976_s8 + $0x9c8] sm:$0xff] }
 0x221   : > { %v2387_v8 = vunpack.c.l.bf16 %v1571_v58  ;;  %v2388_v54 = vunpack.c.h.bf16 %v1571_v58  ;;  %v2389_v51 = vunpack.c.l.bf16 %v1572_v38  ;;  %v2390_v37 = vunpack.c.h.bf16 %v1572_v38 }
 0x222   : > { %v2391_v45 = vunpack.c.l.bf16 %v1573_v19  ;;  %v2392_v0 = vunpack.c.h.bf16 %v1573_v19  ;;  %v2393_v32 = vunpack.c.l.bf16 %v1574_v43  ;;  %v2394_v46 = vunpack.c.h.bf16 %v1574_v43 }
 0x223   : > { %v3487_v29 = vmax.f32 %v3486_v2, %v2387_v8  ;;  %v3508_v25 = vmax.f32 %v3507_v41, %v2388_v54  ;;  %v3529_v33 = vmax.f32 %v3528_v62, %v2389_v51  ;;  %v3550_v7 = vmax.f32 %v3549_v4, %v2390_v37  ;;  %v1581_v41 = vld [vmem:[%s6976_s8 + $0x9d0] sm:$0xff]  ;;  %v1582_v62 = vld [vmem:[%s6976_s8 + $0x9d8] sm:$0xff] }
 0x224   : > { %v3571_v3 = vmax.f32 %v3570_v30, %v2391_v45  ;;  %v3592_v63 = vmax.f32 %v3591_v36, %v2392_v0  ;;  %v3613_v42 = vmax.f32 %v3612_v44, %v2393_v32  ;;  %v3634_v39 = vmax.f32 %v3633_v11, %v2394_v46  ;;  %v1583_v0 = vld [vmem:[%s6976_s8 + $0x9e0] sm:$0xff]  ;;  %v1584_v32 = vld [vmem:[%s6976_s8 + $0x9e8] sm:$0xff] }
 0x225   : > { %v2395_v14 = vunpack.c.l.bf16 %v1575_v35  ;;  %v2396_v58 = vunpack.c.h.bf16 %v1575_v35  ;;  %v2397_v38 = vunpack.c.l.bf16 %v1576_v57  ;;  %v2398_v23 = vunpack.c.h.bf16 %v1576_v57 }
 0x226   : > { %v2399_v18 = vunpack.c.l.bf16 %v1577_v20  ;;  %v2400_v19 = vunpack.c.h.bf16 %v1577_v20  ;;  %v2401_v43 = vunpack.c.l.bf16 %v1578_v59  ;;  %v2402_v2 = vunpack.c.h.bf16 %v1578_v59 }
 0x227   : > { %v3655_v4 = vmax.f32 %v3654_v27, %v2395_v14  ;;  %v3676_v8 = vmax.f32 %v3675_v40, %v2396_v58  ;;  %v3697_v30 = vmax.f32 %v3696_v5, %v2397_v38  ;;  %v3718_v36 = vmax.f32 %v3717_v12, %v2398_v23  ;;  %v1585_v40 = vld [vmem:[%s6976_s8 + $0x9f0] sm:$0xff]  ;;  %v1586_v5 = vld [vmem:[%s6976_s8 + $0x9f8] sm:$0xff] }
 0x228   : > { %v3739_v44 = vmax.f32 %v3738_v1, %v2399_v18  ;;  %v3760_v11 = vmax.f32 %v3759_v31, %v2400_v19  ;;  %v3781_v54 = vmax.f32 %v3780_v26, %v2401_v43  ;;  %v3802_v51 = vmax.f32 %v3801_v6, %v2402_v2  ;;  %v1587_v19 = vld [vmem:[%s6976_s8 + $0xa00] sm:$0xff]  ;;  %v1588_v43 = vld [vmem:[%s6976_s8 + $0xa08] sm:$0xff] }
 0x229   : > { %v2403_v37 = vunpack.c.l.bf16 %v1579_v28  ;;  %v2404_v35 = vunpack.c.h.bf16 %v1579_v28  ;;  %v2405_v57 = vunpack.c.l.bf16 %v1580_v17  ;;  %v2406_v45 = vunpack.c.h.bf16 %v1580_v17 }
 0x22a   : > { %v2407_v46 = vunpack.c.l.bf16 %v1581_v41  ;;  %v2408_v20 = vunpack.c.h.bf16 %v1581_v41  ;;  %v2409_v59 = vunpack.c.l.bf16 %v1582_v62  ;;  %v2410_v27 = vunpack.c.h.bf16 %v1582_v62 }
 0x22b   : > { %v3488_v12 = vmax.f32 %v3487_v29, %v2403_v37  ;;  %v3509_v14 = vmax.f32 %v3508_v25, %v2404_v35  ;;  %v3530_v1 = vmax.f32 %v3529_v33, %v2405_v57  ;;  %v3551_v31 = vmax.f32 %v3550_v7, %v2406_v45  ;;  %v1589_v25 = vld [vmem:[%s6976_s8 + $0xa10] sm:$0xff]  ;;  %v1590_v33 = vld [vmem:[%s6976_s8 + $0xa18] sm:$0xff] }
 0x22c   : > { %v3572_v26 = vmax.f32 %v3571_v3, %v2407_v46  ;;  %v3593_v6 = vmax.f32 %v3592_v63, %v2408_v20  ;;  %v3614_v58 = vmax.f32 %v3613_v42, %v2409_v59  ;;  %v3635_v38 = vmax.f32 %v3634_v39, %v2410_v27  ;;  %v1591_v20 = vld [vmem:[%s6976_s8 + $0xa20] sm:$0xff]  ;;  %v1592_v59 = vld [vmem:[%s6976_s8 + $0xa28] sm:$0xff] }
 0x22d   : > { %v2411_v23 = vunpack.c.l.bf16 %v1583_v0  ;;  %v2412_v28 = vunpack.c.h.bf16 %v1583_v0  ;;  %v2413_v17 = vunpack.c.l.bf16 %v1584_v32  ;;  %v2414_v18 = vunpack.c.h.bf16 %v1584_v32 }
 0x22e   : > { %v2415_v2 = vunpack.c.l.bf16 %v1585_v40  ;;  %v2416_v41 = vunpack.c.h.bf16 %v1585_v40  ;;  %v2417_v62 = vunpack.c.l.bf16 %v1586_v5  ;;  %v2418_v29 = vunpack.c.h.bf16 %v1586_v5 }
 0x22f   : > { %v3656_v7 = vmax.f32 %v3655_v4, %v2411_v23  ;;  %v3677_v37 = vmax.f32 %v3676_v8, %v2412_v28  ;;  %v3698_v3 = vmax.f32 %v3697_v30, %v2413_v17  ;;  %v3719_v63 = vmax.f32 %v3718_v36, %v2414_v18  ;;  %v1593_v8 = vld [vmem:[%s6976_s8 + $0xa30] sm:$0xff]  ;;  %v1594_v30 = vld [vmem:[%s6976_s8 + $0xa38] sm:$0xff] }
 0x230   : > { %v3740_v42 = vmax.f32 %v3739_v44, %v2415_v2  ;;  %v3761_v39 = vmax.f32 %v3760_v11, %v2416_v41  ;;  %v3782_v35 = vmax.f32 %v3781_v54, %v2417_v62  ;;  %v3803_v57 = vmax.f32 %v3802_v51, %v2418_v29  ;;  %v1595_v41 = vld [vmem:[%s6976_s8 + $0xa40] sm:$0xff]  ;;  %v1596_v62 = vld [vmem:[%s6976_s8 + $0xa48] sm:$0xff] }
 0x231   : > { %v2419_v45 = vunpack.c.l.bf16 %v1587_v19  ;;  %v2420_v0 = vunpack.c.h.bf16 %v1587_v19  ;;  %v2421_v32 = vunpack.c.l.bf16 %v1588_v43  ;;  %v2422_v46 = vunpack.c.h.bf16 %v1588_v43 }
 0x232   : > { %v2423_v27 = vunpack.c.l.bf16 %v1589_v25  ;;  %v2424_v40 = vunpack.c.h.bf16 %v1589_v25  ;;  %v2425_v5 = vunpack.c.l.bf16 %v1590_v33  ;;  %v2426_v4 = vunpack.c.h.bf16 %v1590_v33 }
 0x233   : > { %v3489_v36 = vmax.f32 %v3488_v12, %v2419_v45  ;;  %v3510_v23 = vmax.f32 %v3509_v14, %v2420_v0  ;;  %v3531_v44 = vmax.f32 %v3530_v1, %v2421_v32  ;;  %v3552_v11 = vmax.f32 %v3551_v31, %v2422_v46  ;;  %v1597_v14 = vld [vmem:[%s6976_s8 + $0xa50] sm:$0xff]  ;;  %v1598_v1 = vld [vmem:[%s6976_s8 + $0xa58] sm:$0xff] }
 0x234   : > { %v3573_v54 = vmax.f32 %v3572_v26, %v2423_v27  ;;  %v3594_v51 = vmax.f32 %v3593_v6, %v2424_v40  ;;  %v3615_v28 = vmax.f32 %v3614_v58, %v2425_v5  ;;  %v3636_v17 = vmax.f32 %v3635_v38, %v2426_v4  ;;  %v1599_v40 = vld [vmem:[%s6976_s8 + $0xa60] sm:$0xff]  ;;  %v1600_v5 = vld [vmem:[%s6976_s8 + $0xa68] sm:$0xff] }
 0x235   : > { %v2427_v18 = vunpack.c.l.bf16 %v1591_v20  ;;  %v2428_v19 = vunpack.c.h.bf16 %v1591_v20  ;;  %v2429_v43 = vunpack.c.l.bf16 %v1592_v59  ;;  %v2430_v2 = vunpack.c.h.bf16 %v1592_v59 }
 0x236   : > { %v2431_v29 = vunpack.c.l.bf16 %v1593_v8  ;;  %v2432_v25 = vunpack.c.h.bf16 %v1593_v8  ;;  %v2433_v33 = vunpack.c.l.bf16 %v1594_v30  ;;  %v2434_v12 = vunpack.c.h.bf16 %v1594_v30 }
 0x237   : > { %v3657_v31 = vmax.f32 %v3656_v7, %v2427_v18  ;;  %v3678_v45 = vmax.f32 %v3677_v37, %v2428_v19  ;;  %v3699_v26 = vmax.f32 %v3698_v3, %v2429_v43  ;;  %v3720_v6 = vmax.f32 %v3719_v63, %v2430_v2  ;;  %v1601_v37 = vld [vmem:[%s6976_s8 + $0xa70] sm:$0xff]  ;;  %v1602_v3 = vld [vmem:[%s6976_s8 + $0xa78] sm:$0xff] }
 0x238   : > { %v3741_v58 = vmax.f32 %v3740_v42, %v2431_v29  ;;  %v3762_v38 = vmax.f32 %v3761_v39, %v2432_v25  ;;  %v3783_v0 = vmax.f32 %v3782_v35, %v2433_v33  ;;  %v3804_v32 = vmax.f32 %v3803_v57, %v2434_v12  ;;  %v1603_v25 = vld [vmem:[%s6976_s8 + $0xa80] sm:$0xff]  ;;  %v1604_v33 = vld [vmem:[%s6976_s8 + $0xa88] sm:$0xff] }
 0x239   : > { %v2435_v46 = vunpack.c.l.bf16 %v1595_v41  ;;  %v2436_v20 = vunpack.c.h.bf16 %v1595_v41  ;;  %v2437_v59 = vunpack.c.l.bf16 %v1596_v62  ;;  %v2438_v27 = vunpack.c.h.bf16 %v1596_v62 }
 0x23a   : > { %v2439_v4 = vunpack.c.l.bf16 %v1597_v14  ;;  %v2440_v8 = vunpack.c.h.bf16 %v1597_v14  ;;  %v2441_v30 = vunpack.c.l.bf16 %v1598_v1  ;;  %v2442_v7 = vunpack.c.h.bf16 %v1598_v1 }
 0x23b   : > { %v3490_v63 = vmax.f32 %v3489_v36, %v2435_v46  ;;  %v3511_v18 = vmax.f32 %v3510_v23, %v2436_v20  ;;  %v3532_v42 = vmax.f32 %v3531_v44, %v2437_v59  ;;  %v3553_v39 = vmax.f32 %v3552_v11, %v2438_v27  ;;  %v1605_v23 = vld [vmem:[%s6976_s8 + $0xa90] sm:$0xff]  ;;  %v1606_v44 = vld [vmem:[%s6976_s8 + $0xa98] sm:$0xff] }
 0x23c   : > { %v3574_v35 = vmax.f32 %v3573_v54, %v2439_v4  ;;  %v3595_v57 = vmax.f32 %v3594_v51, %v2440_v8  ;;  %v3616_v19 = vmax.f32 %v3615_v28, %v2441_v30  ;;  %v3637_v43 = vmax.f32 %v3636_v17, %v2442_v7  ;;  %v1607_v8 = vld [vmem:[%s6976_s8 + $0xaa0] sm:$0xff]  ;;  %v1608_v30 = vld [vmem:[%s6976_s8 + $0xaa8] sm:$0xff] }
 0x23d   : > { %v2443_v2 = vunpack.c.l.bf16 %v1599_v40  ;;  %v2444_v41 = vunpack.c.h.bf16 %v1599_v40  ;;  %v2445_v62 = vunpack.c.l.bf16 %v1600_v5  ;;  %v2446_v29 = vunpack.c.h.bf16 %v1600_v5 }
 0x23e   : > { %v2447_v12 = vunpack.c.l.bf16 %v1601_v37  ;;  %v2448_v14 = vunpack.c.h.bf16 %v1601_v37  ;;  %v2449_v1 = vunpack.c.l.bf16 %v1602_v3  ;;  %v2450_v36 = vunpack.c.h.bf16 %v1602_v3 }
 0x23f   : > { %v3658_v11 = vmax.f32 %v3657_v31, %v2443_v2  ;;  %v3679_v46 = vmax.f32 %v3678_v45, %v2444_v41  ;;  %v3700_v54 = vmax.f32 %v3699_v26, %v2445_v62  ;;  %v3721_v51 = vmax.f32 %v3720_v6, %v2446_v29  ;;  %v1609_v45 = vld [vmem:[%s6976_s8 + $0xab0] sm:$0xff]  ;;  %v1610_v26 = vld [vmem:[%s6976_s8 + $0xab8] sm:$0xff] }
 0x240   : > { %v3742_v28 = vmax.f32 %v3741_v58, %v2447_v12  ;;  %v3763_v17 = vmax.f32 %v3762_v38, %v2448_v14  ;;  %v3784_v20 = vmax.f32 %v3783_v0, %v2449_v1  ;;  %v3805_v59 = vmax.f32 %v3804_v32, %v2450_v36  ;;  %v1611_v14 = vld [vmem:[%s6976_s8 + $0xac0] sm:$0xff]  ;;  %v1612_v1 = vld [vmem:[%s6976_s8 + $0xac8] sm:$0xff] }
 0x241   : > { %v2451_v27 = vunpack.c.l.bf16 %v1603_v25  ;;  %v2452_v40 = vunpack.c.h.bf16 %v1603_v25  ;;  %v2453_v5 = vunpack.c.l.bf16 %v1604_v33  ;;  %v2454_v4 = vunpack.c.h.bf16 %v1604_v33 }
 0x242   : > { %v2455_v7 = vunpack.c.l.bf16 %v1605_v23  ;;  %v2456_v37 = vunpack.c.h.bf16 %v1605_v23  ;;  %v2457_v3 = vunpack.c.l.bf16 %v1606_v44  ;;  %v2458_v31 = vunpack.c.h.bf16 %v1606_v44 }
 0x243   : > { %v3491_v6 = vmax.f32 %v3490_v63, %v2451_v27  ;;  %v3512_v2 = vmax.f32 %v3511_v18, %v2452_v40  ;;  %v3533_v58 = vmax.f32 %v3532_v42, %v2453_v5  ;;  %v3554_v38 = vmax.f32 %v3553_v39, %v2454_v4  ;;  %v1613_v18 = vld [vmem:[%s6976_s8 + $0xad0] sm:$0xff]  ;;  %v1614_v42 = vld [vmem:[%s6976_s8 + $0xad8] sm:$0xff] }
 0x244   : > { %v3575_v0 = vmax.f32 %v3574_v35, %v2455_v7  ;;  %v3596_v32 = vmax.f32 %v3595_v57, %v2456_v37  ;;  %v3617_v41 = vmax.f32 %v3616_v19, %v2457_v3  ;;  %v3638_v62 = vmax.f32 %v3637_v43, %v2458_v31  ;;  %v1615_v37 = vld [vmem:[%s6976_s8 + $0xae0] sm:$0xff]  ;;  %v1616_v3 = vld [vmem:[%s6976_s8 + $0xae8] sm:$0xff] }
 0x245   : > { %v2459_v29 = vunpack.c.l.bf16 %v1607_v8  ;;  %v2460_v25 = vunpack.c.h.bf16 %v1607_v8  ;;  %v2461_v33 = vunpack.c.l.bf16 %v1608_v30  ;;  %v2462_v12 = vunpack.c.h.bf16 %v1608_v30 }
 0x246   : > { %v2463_v36 = vunpack.c.l.bf16 %v1609_v45  ;;  %v2464_v23 = vunpack.c.h.bf16 %v1609_v45  ;;  %v2465_v44 = vunpack.c.l.bf16 %v1610_v26  ;;  %v2466_v63 = vunpack.c.h.bf16 %v1610_v26 }
 0x247   : > { %v3659_v39 = vmax.f32 %v3658_v11, %v2459_v29  ;;  %v3680_v27 = vmax.f32 %v3679_v46, %v2460_v25  ;;  %v3701_v35 = vmax.f32 %v3700_v54, %v2461_v33  ;;  %v3722_v57 = vmax.f32 %v3721_v51, %v2462_v12  ;;  %v1617_v46 = vld [vmem:[%s6976_s8 + $0xaf0] sm:$0xff]  ;;  %v1618_v54 = vld [vmem:[%s6976_s8 + $0xaf8] sm:$0xff] }
 0x248   : > { %v3743_v19 = vmax.f32 %v3742_v28, %v2463_v36  ;;  %v3764_v43 = vmax.f32 %v3763_v17, %v2464_v23  ;;  %v3785_v40 = vmax.f32 %v3784_v20, %v2465_v44  ;;  %v3806_v5 = vmax.f32 %v3805_v59, %v2466_v63  ;;  %v1619_v23 = vld [vmem:[%s6976_s8 + $0xb00] sm:$0xff]  ;;  %v1620_v44 = vld [vmem:[%s6976_s8 + $0xb08] sm:$0xff] }
 0x249   : > { %v2467_v4 = vunpack.c.l.bf16 %v1611_v14  ;;  %v2468_v8 = vunpack.c.h.bf16 %v1611_v14  ;;  %v2469_v30 = vunpack.c.l.bf16 %v1612_v1  ;;  %v2470_v7 = vunpack.c.h.bf16 %v1612_v1 }
 0x24a   : > { %v2471_v31 = vunpack.c.l.bf16 %v1613_v18  ;;  %v2472_v45 = vunpack.c.h.bf16 %v1613_v18  ;;  %v2473_v26 = vunpack.c.l.bf16 %v1614_v42  ;;  %v2474_v11 = vunpack.c.h.bf16 %v1614_v42 }
 0x24b   : > { %v3492_v51 = vmax.f32 %v3491_v6, %v2467_v4  ;;  %v3513_v29 = vmax.f32 %v3512_v2, %v2468_v8  ;;  %v3534_v28 = vmax.f32 %v3533_v58, %v2469_v30  ;;  %v3555_v17 = vmax.f32 %v3554_v38, %v2470_v7  ;;  %v1621_v2 = vld [vmem:[%s6976_s8 + $0xb10] sm:$0xff]  ;;  %v1622_v58 = vld [vmem:[%s6976_s8 + $0xb18] sm:$0xff] }
 0x24c   : > { %v3576_v20 = vmax.f32 %v3575_v0, %v2471_v31  ;;  %v3597_v59 = vmax.f32 %v3596_v32, %v2472_v45  ;;  %v3618_v25 = vmax.f32 %v3617_v41, %v2473_v26  ;;  %v3639_v33 = vmax.f32 %v3638_v62, %v2474_v11  ;;  %v1623_v45 = vld [vmem:[%s6976_s8 + $0xb20] sm:$0xff]  ;;  %v1624_v26 = vld [vmem:[%s6976_s8 + $0xb28] sm:$0xff] }
 0x24d   : > { %v2475_v12 = vunpack.c.l.bf16 %v1615_v37  ;;  %v2476_v14 = vunpack.c.h.bf16 %v1615_v37  ;;  %v2477_v1 = vunpack.c.l.bf16 %v1616_v3  ;;  %v2478_v36 = vunpack.c.h.bf16 %v1616_v3 }
 0x24e   : > { %v2479_v63 = vunpack.c.l.bf16 %v1617_v46  ;;  %v2480_v18 = vunpack.c.h.bf16 %v1617_v46  ;;  %v2481_v42 = vunpack.c.l.bf16 %v1618_v54  ;;  %v2482_v6 = vunpack.c.h.bf16 %v1618_v54 }
 0x24f   : > { %v3660_v38 = vmax.f32 %v3659_v39, %v2475_v12  ;;  %v3681_v4 = vmax.f32 %v3680_v27, %v2476_v14  ;;  %v3702_v0 = vmax.f32 %v3701_v35, %v2477_v1  ;;  %v3723_v32 = vmax.f32 %v3722_v57, %v2478_v36  ;;  %v1625_v27 = vld [vmem:[%s6976_s8 + $0xb30] sm:$0xff]  ;;  %v1626_v35 = vld [vmem:[%s6976_s8 + $0xb38] sm:$0xff] }
 0x250   : > { %v3744_v41 = vmax.f32 %v3743_v19, %v2479_v63  ;;  %v3765_v62 = vmax.f32 %v3764_v43, %v2480_v18  ;;  %v3786_v8 = vmax.f32 %v3785_v40, %v2481_v42  ;;  %v3807_v30 = vmax.f32 %v3806_v5, %v2482_v6  ;;  %v1627_v18 = vld [vmem:[%s6976_s8 + $0xb40] sm:$0xff]  ;;  %v1628_v42 = vld [vmem:[%s6976_s8 + $0xb48] sm:$0xff] }
 0x251   : > { %v2483_v7 = vunpack.c.l.bf16 %v1619_v23  ;;  %v2484_v37 = vunpack.c.h.bf16 %v1619_v23  ;;  %v2485_v3 = vunpack.c.l.bf16 %v1620_v44  ;;  %v2486_v31 = vunpack.c.h.bf16 %v1620_v44 }
 0x252   : > { %v2487_v11 = vunpack.c.l.bf16 %v1621_v2  ;;  %v2488_v46 = vunpack.c.h.bf16 %v1621_v2  ;;  %v2489_v54 = vunpack.c.l.bf16 %v1622_v58  ;;  %v2490_v39 = vunpack.c.h.bf16 %v1622_v58 }
 0x253   : > { %v3493_v57 = vmax.f32 %v3492_v51, %v2483_v7  ;;  %v3514_v12 = vmax.f32 %v3513_v29, %v2484_v37  ;;  %v3535_v19 = vmax.f32 %v3534_v28, %v2485_v3  ;;  %v3556_v43 = vmax.f32 %v3555_v17, %v2486_v31  ;;  %v1629_v29 = vld [vmem:[%s6976_s8 + $0xb50] sm:$0xff]  ;;  %v1630_v28 = vld [vmem:[%s6976_s8 + $0xb58] sm:$0xff] }
 0x254   : > { %v3577_v40 = vmax.f32 %v3576_v20, %v2487_v11  ;;  %v3598_v5 = vmax.f32 %v3597_v59, %v2488_v46  ;;  %v3619_v14 = vmax.f32 %v3618_v25, %v2489_v54  ;;  %v3640_v1 = vmax.f32 %v3639_v33, %v2490_v39  ;;  %v1631_v46 = vld [vmem:[%s6976_s8 + $0xb60] sm:$0xff]  ;;  %v1632_v54 = vld [vmem:[%s6976_s8 + $0xb68] sm:$0xff] }
 0x255   : > { %v2491_v36 = vunpack.c.l.bf16 %v1623_v45  ;;  %v2492_v23 = vunpack.c.h.bf16 %v1623_v45  ;;  %v2493_v44 = vunpack.c.l.bf16 %v1624_v26  ;;  %v2494_v63 = vunpack.c.h.bf16 %v1624_v26 }
 0x256   : > { %v2495_v6 = vunpack.c.l.bf16 %v1625_v27  ;;  %v2496_v2 = vunpack.c.h.bf16 %v1625_v27  ;;  %v2497_v58 = vunpack.c.l.bf16 %v1626_v35  ;;  %v2498_v51 = vunpack.c.h.bf16 %v1626_v35 }
 0x257   : > { %v3661_v17 = vmax.f32 %v3660_v38, %v2491_v36  ;;  %v3682_v7 = vmax.f32 %v3681_v4, %v2492_v23  ;;  %v3703_v20 = vmax.f32 %v3702_v0, %v2493_v44  ;;  %v3724_v59 = vmax.f32 %v3723_v32, %v2494_v63  ;;  %v1633_v4 = vld [vmem:[%s6976_s8 + $0xb70] sm:$0xff]  ;;  %v1634_v0 = vld [vmem:[%s6976_s8 + $0xb78] sm:$0xff] }
 0x258   : > { %v3745_v25 = vmax.f32 %v3744_v41, %v2495_v6  ;;  %v3766_v33 = vmax.f32 %v3765_v62, %v2496_v2  ;;  %v3787_v37 = vmax.f32 %v3786_v8, %v2497_v58  ;;  %v3808_v3 = vmax.f32 %v3807_v30, %v2498_v51  ;;  %v1635_v2 = vld [vmem:[%s6976_s8 + $0xb80] sm:$0xff]  ;;  %v1636_v58 = vld [vmem:[%s6976_s8 + $0xb88] sm:$0xff] }
 0x259   : > { %v2499_v31 = vunpack.c.l.bf16 %v1627_v18  ;;  %v2500_v45 = vunpack.c.h.bf16 %v1627_v18  ;;  %v2501_v26 = vunpack.c.l.bf16 %v1628_v42  ;;  %v2502_v11 = vunpack.c.h.bf16 %v1628_v42 }
 0x25a   : > { %v2503_v39 = vunpack.c.l.bf16 %v1629_v29  ;;  %v2504_v27 = vunpack.c.h.bf16 %v1629_v29  ;;  %v2505_v35 = vunpack.c.l.bf16 %v1630_v28  ;;  %v2506_v38 = vunpack.c.h.bf16 %v1630_v28 }
 0x25b   : > { %v3494_v32 = vmax.f32 %v3493_v57, %v2499_v31  ;;  %v3515_v36 = vmax.f32 %v3514_v12, %v2500_v45  ;;  %v3536_v41 = vmax.f32 %v3535_v19, %v2501_v26  ;;  %v3557_v62 = vmax.f32 %v3556_v43, %v2502_v11  ;;  %v1637_v12 = vld [vmem:[%s6976_s8 + $0xb90] sm:$0xff]  ;;  %v1638_v19 = vld [vmem:[%s6976_s8 + $0xb98] sm:$0xff] }
 0x25c   : > { %v3578_v8 = vmax.f32 %v3577_v40, %v2503_v39  ;;  %v3599_v30 = vmax.f32 %v3598_v5, %v2504_v27  ;;  %v3620_v23 = vmax.f32 %v3619_v14, %v2505_v35  ;;  %v3641_v44 = vmax.f32 %v3640_v1, %v2506_v38  ;;  %v1639_v27 = vld [vmem:[%s6976_s8 + $0xba0] sm:$0xff]  ;;  %v1640_v35 = vld [vmem:[%s6976_s8 + $0xba8] sm:$0xff] }
 0x25d   : > { %v2507_v63 = vunpack.c.l.bf16 %v1631_v46  ;;  %v2508_v18 = vunpack.c.h.bf16 %v1631_v46  ;;  %v2509_v42 = vunpack.c.l.bf16 %v1632_v54  ;;  %v2510_v6 = vunpack.c.h.bf16 %v1632_v54 }
 0x25e   : > { %v2511_v51 = vunpack.c.l.bf16 %v1633_v4  ;;  %v2512_v29 = vunpack.c.h.bf16 %v1633_v4  ;;  %v2513_v28 = vunpack.c.l.bf16 %v1634_v0  ;;  %v2514_v57 = vunpack.c.h.bf16 %v1634_v0 }
 0x25f   : > { %v3662_v43 = vmax.f32 %v3661_v17, %v2507_v63  ;;  %v3683_v31 = vmax.f32 %v3682_v7, %v2508_v18  ;;  %v3704_v40 = vmax.f32 %v3703_v20, %v2509_v42  ;;  %v3725_v5 = vmax.f32 %v3724_v59, %v2510_v6  ;;  %v1641_v7 = vld [vmem:[%s6976_s8 + $0xbb0] sm:$0xff]  ;;  %v1642_v20 = vld [vmem:[%s6976_s8 + $0xbb8] sm:$0xff] }
 0x260   : > { %v3746_v14 = vmax.f32 %v3745_v25, %v2511_v51  ;;  %v3767_v1 = vmax.f32 %v3766_v33, %v2512_v29  ;;  %v3788_v45 = vmax.f32 %v3787_v37, %v2513_v28  ;;  %v3809_v26 = vmax.f32 %v3808_v3, %v2514_v57  ;;  %v1643_v29 = vld [vmem:[%s6976_s8 + $0xbc0] sm:$0xff]  ;;  %v1644_v28 = vld [vmem:[%s6976_s8 + $0xbc8] sm:$0xff] }
 0x261   : > { %v2515_v11 = vunpack.c.l.bf16 %v1635_v2  ;;  %v2516_v46 = vunpack.c.h.bf16 %v1635_v2  ;;  %v2517_v54 = vunpack.c.l.bf16 %v1636_v58  ;;  %v2518_v39 = vunpack.c.h.bf16 %v1636_v58 }
 0x262   : > { %v2519_v38 = vunpack.c.l.bf16 %v1637_v12  ;;  %v2520_v4 = vunpack.c.h.bf16 %v1637_v12  ;;  %v2521_v0 = vunpack.c.l.bf16 %v1638_v19  ;;  %v2522_v17 = vunpack.c.h.bf16 %v1638_v19 }
 0x263   : > { %v3495_v59 = vmax.f32 %v3494_v32, %v2515_v11  ;;  %v3516_v63 = vmax.f32 %v3515_v36, %v2516_v46  ;;  %v3537_v25 = vmax.f32 %v3536_v41, %v2517_v54  ;;  %v3558_v33 = vmax.f32 %v3557_v62, %v2518_v39  ;;  %v1645_v36 = vld [vmem:[%s6976_s8 + $0xbd0] sm:$0xff]  ;;  %v1646_v41 = vld [vmem:[%s6976_s8 + $0xbd8] sm:$0xff] }
 0x264   : > { %v3579_v37 = vmax.f32 %v3578_v8, %v2519_v38  ;;  %v3600_v3 = vmax.f32 %v3599_v30, %v2520_v4  ;;  %v3621_v18 = vmax.f32 %v3620_v23, %v2521_v0  ;;  %v3642_v42 = vmax.f32 %v3641_v44, %v2522_v17  ;;  %v1647_v4 = vld [vmem:[%s6976_s8 + $0xbe0] sm:$0xff]  ;;  %v1648_v0 = vld [vmem:[%s6976_s8 + $0xbe8] sm:$0xff] }
 0x265   : > { %v2523_v6 = vunpack.c.l.bf16 %v1639_v27  ;;  %v2524_v2 = vunpack.c.h.bf16 %v1639_v27  ;;  %v2525_v58 = vunpack.c.l.bf16 %v1640_v35  ;;  %v2526_v51 = vunpack.c.h.bf16 %v1640_v35 }
 0x266   : > { %v2527_v57 = vunpack.c.l.bf16 %v1641_v7  ;;  %v2528_v12 = vunpack.c.h.bf16 %v1641_v7  ;;  %v2529_v19 = vunpack.c.l.bf16 %v1642_v20  ;;  %v2530_v32 = vunpack.c.h.bf16 %v1642_v20 }
 0x267   : > { %v3663_v62 = vmax.f32 %v3662_v43, %v2523_v6  ;;  %v3684_v11 = vmax.f32 %v3683_v31, %v2524_v2  ;;  %v3705_v8 = vmax.f32 %v3704_v40, %v2525_v58  ;;  %v3726_v30 = vmax.f32 %v3725_v5, %v2526_v51  ;;  %v1649_v31 = vld [vmem:[%s6976_s8 + $0xbf0] sm:$0xff]  ;;  %v1650_v40 = vld [vmem:[%s6976_s8 + $0xbf8] sm:$0xff] }
 0x268   : > { %v3747_v23 = vmax.f32 %v3746_v14, %v2527_v57  ;;  %v3768_v44 = vmax.f32 %v3767_v1, %v2528_v12  ;;  %v3789_v46 = vmax.f32 %v3788_v45, %v2529_v19  ;;  %v3810_v54 = vmax.f32 %v3809_v26, %v2530_v32 }
 0x269   : > { %v2531_v39 = vunpack.c.l.bf16 %v1643_v29  ;;  %v2532_v27 = vunpack.c.h.bf16 %v1643_v29  ;;  %v2533_v35 = vunpack.c.l.bf16 %v1644_v28  ;;  %v2534_v38 = vunpack.c.h.bf16 %v1644_v28  ;;  %v7695_v28 = vld [vmem:[%s6976_s8 + $0xc08] sm:$0xff] }
 0x26a   : > { %v2535_v17 = vunpack.c.l.bf16 %v1645_v36  ;;  %v2536_v7 = vunpack.c.h.bf16 %v1645_v36  ;;  %v2537_v20 = vunpack.c.l.bf16 %v1646_v41  ;;  %v2538_v43 = vunpack.c.h.bf16 %v1646_v41  ;;  %9613 = vst [vmem:[#allocation81_spill] sm:$0xff] %v7695_v28  ;;  %v7712_v41 = vld [vmem:[%s6976_s8 + $0xc20] sm:$0xff] }
 0x26b   : > { %v7675_v5 = vmax.f32 %v3495_v59, %v2531_v39  ;;  %v7677_v14 = vmax.f32 %v3516_v63, %v2532_v27  ;;  %v7679_v1 = vmax.f32 %v3537_v25, %v2533_v35  ;;  %v7681_v45 = vmax.f32 %v3558_v33, %v2534_v38  ;;  %v7692_v25 = vld [vmem:[%s6976_s8 + $0xc00] sm:$0xff]  ;;  %9620 = vst [vmem:[#allocation88_spill] sm:$0xff] %v7712_v41  ;;  %v7715_v39 = vld [vmem:[%s6976_s8 + $0xc28] sm:$0xff] }
 0x26c   : > { %v7683_v26 = vmax.f32 %v3579_v37, %v2535_v17  ;;  %v7685_v6 = vmax.f32 %v3600_v3, %v2536_v7  ;;  %v7687_v2 = vmax.f32 %v3621_v18, %v2537_v20  ;;  %v7689_v58 = vmax.f32 %v3642_v42, %v2538_v43  ;;  %9612 = vst [vmem:[#allocation80_spill] sm:$0xff] %v7692_v25  ;;  %v7698_v18 = vld [vmem:[%s6976_s8 + $0xc10] sm:$0xff]  ;;  %v7701_v42 = vld [vmem:[%s6976_s8 + $0xc18] sm:$0xff]  ;;  %v1668_v17 = vld [vmem:[%s6976_s8 + $0xc88] sm:$0xff] }
 0x26d   : > { %9604 = vst [vmem:[#allocation72_spill] sm:$0xff] %v7675_v5  ;;  %9605 = vst [vmem:[#allocation73_spill] sm:$0xff] %v7677_v14  ;;  %v2539_v51 = vunpack.c.l.bf16 %v1647_v4  ;;  %v2540_v59 = vunpack.c.h.bf16 %v1647_v4  ;;  %v2541_v63 = vunpack.c.l.bf16 %v1648_v0  ;;  %v2542_v29 = vunpack.c.h.bf16 %v1648_v0  ;;  %v7736_v0 = vld [vmem:[%s6976_s8 + $0xc40] sm:$0xff]  ;;  %v7746_v43 = vld [vmem:[%s6976_s8 + $0xc50] sm:$0xff] }
 0x26e   : > { %9606 = vst [vmem:[#allocation74_spill] sm:$0xff] %v7679_v1  ;;  %9607 = vst [vmem:[#allocation75_spill] sm:$0xff] %v7681_v45  ;;  %v2543_v33 = vunpack.c.l.bf16 %v1649_v31  ;;  %v2544_v37 = vunpack.c.h.bf16 %v1649_v31  ;;  %v2545_v3 = vunpack.c.l.bf16 %v1650_v40  ;;  %v2546_v57 = vunpack.c.h.bf16 %v1650_v40  ;;  %v7749_v31 = vld [vmem:[%s6976_s8 + $0xc58] sm:$0xff]  ;;  %v1683_v45 = vld [vmem:[%s6976_s8 + $0xd00] sm:$0xff] }
 0x26f   : > { %9608 = vst [vmem:[#allocation76_spill] sm:$0xff] %v7683_v26  ;;  %9609 = vst [vmem:[#allocation77_spill] sm:$0xff] %v7685_v6  ;;  %v7703_v12 = vmax.f32 %v3663_v62, %v2539_v51  ;;  %v7705_v19 = vmax.f32 %v3684_v11, %v2540_v59  ;;  %v7707_v32 = vmax.f32 %v3705_v8, %v2541_v63  ;;  %v7726_v11 = vld [vmem:[%s6976_s8 + $0xc30] sm:$0xff]  ;;  %v7729_v8 = vld [vmem:[%s6976_s8 + $0xc38] sm:$0xff]  ;;  %v2581_v7 = vunpack.c.l.bf16 %v1668_v17 }
 0x270   : > { %9610 = vst [vmem:[#allocation78_spill] sm:$0xff] %v7687_v2  ;;  %9611 = vst [vmem:[#allocation79_spill] sm:$0xff] %v7689_v58  ;;  %v7709_v36 = vmax.f32 %v3726_v30, %v2542_v29  ;;  %v7717_v27 = vmax.f32 %v3747_v23, %v2543_v33  ;;  %v7719_v35 = vmax.f32 %v3768_v44, %v2544_v37  ;;  %v7756_v29 = vld [vmem:[%s6976_s8 + $0xc60] sm:$0xff]  ;;  %v7759_v33 = vld [vmem:[%s6976_s8 + $0xc68] sm:$0xff]  ;;  %v2582_v41 = vunpack.c.h.bf16 %v1668_v17 }
 0x271   : > { %9614 = vst [vmem:[#allocation82_spill] sm:$0xff] %v7698_v18  ;;  %9615 = vst [vmem:[#allocation83_spill] sm:$0xff] %v7701_v42  ;;  %v7721_v62 = vmax.f32 %v3789_v46, %v2545_v3  ;;  %v7723_v38 = vmax.f32 %v3810_v54, %v2546_v57  ;;  %v7739_v46 = vld [vmem:[%s6976_s8 + $0xc48] sm:$0xff]  ;;  %v7766_v51 = vld [vmem:[%s6976_s8 + $0xc70] sm:$0xff] }
 0x272   : > { %9616 = vst [vmem:[#allocation84_spill] sm:$0xff] %v7703_v12  ;;  %9617 = vst [vmem:[#allocation85_spill] sm:$0xff] %v7705_v19  ;;  %v7769_v20 = vld [vmem:[%s6976_s8 + $0xc78] sm:$0xff]  ;;  %v1667_v3 = vld [vmem:[%s6976_s8 + $0xc80] sm:$0xff] }
 0x273   : > { %9618 = vst [vmem:[#allocation86_spill] sm:$0xff] %v7707_v32  ;;  %9619 = vst [vmem:[#allocation87_spill] sm:$0xff] %v7709_v36  ;;  %v1669_v23 = vld [vmem:[%s6976_s8 + $0xc90] sm:$0xff]  ;;  %v1670_v4 = vld [vmem:[%s6976_s8 + $0xc98] sm:$0xff] }
 0x274   : > { %9621 = vst [vmem:[#allocation89_spill] sm:$0xff] %v7715_v39  ;;  %9622 = vst [vmem:[#allocation90_spill] sm:$0xff] %v7717_v27  ;;  %v1671_v30 = vld [vmem:[%s6976_s8 + $0xca0] sm:$0xff]  ;;  %v7789_v63 = vld [vmem:[%s6976_s8 + $0xca8] sm:$0xff]  ;;  %v2580_v39 = vunpack.c.h.bf16 %v1667_v3  ;;  %v2584_v42 = vunpack.c.h.bf16 %v1669_v23  ;;  %v2586_v40 = vunpack.c.h.bf16 %v1670_v4 }
 0x275   : > { %9623 = vst [vmem:[#allocation91_spill] sm:$0xff] %v7719_v35  ;;  %9624 = vst [vmem:[#allocation92_spill] sm:$0xff] %v7721_v62  ;;  %v1674_v37 = vld [vmem:[%s6976_s8 + $0xcb8] sm:$0xff]  ;;  %v1675_v57 = vld [vmem:[%s6976_s8 + $0xcc0] sm:$0xff]  ;;  %v2587_v18 = vunpack.c.l.bf16 %v1671_v30  ;;  %v2588_v54 = vunpack.c.h.bf16 %v1671_v30  ;;  %v2589_v59 = vunpack.c.l.bf16 %v7789_v63 }
 0x276   : > { %9625 = vst [vmem:[#allocation93_spill] sm:$0xff] %v7723_v38  ;;  %9626 = vst [vmem:[#allocation94_spill] sm:$0xff] %v7726_v11  ;;  %v2579_v11 = vunpack.c.l.bf16 %v1667_v3  ;;  %v1677_v44 = vld [vmem:[%s6976_s8 + $0xcd0] sm:$0xff]  ;;  %v2594_v28 = vunpack.c.h.bf16 %v1674_v37  ;;  %v1680_v38 = vld [vmem:[%s6976_s8 + $0xce8] sm:$0xff] }
 0x277   : > { %9627 = vst [vmem:[#allocation95_spill] sm:$0xff] %v7729_v8  ;;  %9628 = vst [vmem:[#allocation96_spill] sm:$0xff] %v7736_v0  ;;  %v1673_v8 = vld [vmem:[%s6976_s8 + $0xcb0] sm:$0xff]  ;;  %v2599_v62 = vunpack.c.l.bf16 %v1677_v44  ;;  %v2600_v35 = vunpack.c.h.bf16 %v1677_v44  ;;  %v1682_v32 = vld [vmem:[%s6976_s8 + $0xcf8] sm:$0xff]  ;;  %v2605_v26 = vunpack.c.l.bf16 %v1680_v38  ;;  %v2606_v44 = vunpack.c.h.bf16 %v1680_v38 }
 0x278   : > { %9629 = vst [vmem:[#allocation97_spill] sm:$0xff] %v7739_v46  ;;  %9630 = vst [vmem:[#allocation98_spill] sm:$0xff] %v7746_v43  ;;  %v2591_v3 = vunpack.c.l.bf16 %v1673_v8  ;;  %v2592_v17 = vunpack.c.h.bf16 %v1673_v8  ;;  %v2593_v43 = vunpack.c.l.bf16 %v1674_v37  ;;  %v2595_v46 = vunpack.c.l.bf16 %v1675_v57  ;;  %v1681_v36 = vld [vmem:[%s6976_s8 + $0xcf0] sm:$0xff]  ;;  %v1684_v1 = vld [vmem:[%s6976_s8 + $0xd08] sm:$0xff] }
 0x279   : > { %9631 = vst [vmem:[#allocation99_spill] sm:$0xff] %v7749_v31  ;;  %9632 = vst [vmem:[#allocation100_spill] sm:$0xff] %v7756_v29  ;;  %v2583_v29 = vunpack.c.l.bf16 %v1669_v23  ;;  %v2585_v31 = vunpack.c.l.bf16 %v1670_v4  ;;  %v2596_v23 = vunpack.c.h.bf16 %v1675_v57  ;;  %v1679_v4 = vld [vmem:[%s6976_s8 + $0xce0] sm:$0xff]  ;;  %v3925_v57 = vmax.f32 %v2600_v35, %v2584_v42 }
 0x27a   : > { %9633 = vst [vmem:[#allocation101_spill] sm:$0xff] %v7759_v33  ;;  %9634 = vst [vmem:[#allocation102_spill] sm:$0xff] %v7766_v51  ;;  %v1676_v33 = vld [vmem:[%s6976_s8 + $0xcc8] sm:$0xff]  ;;  %v1678_v51 = vld [vmem:[%s6976_s8 + $0xcd8] sm:$0xff]  ;;  %v2603_v2 = vunpack.c.l.bf16 %v1679_v4  ;;  %v2604_v6 = vunpack.c.h.bf16 %v1679_v4  ;;  %v2608_v14 = vunpack.c.h.bf16 %v1681_v36  ;;  %v2609_v5 = vunpack.c.l.bf16 %v1682_v32 }
 0x27b   : > { %9635 = vst [vmem:[#allocation103_spill] sm:$0xff] %v7769_v20  ;;  %v2590_v20 = vunpack.c.h.bf16 %v7789_v63  ;;  %v2597_v25 = vunpack.c.l.bf16 %v1676_v33  ;;  %v2598_v0 = vunpack.c.h.bf16 %v1676_v33  ;;  %v2601_v27 = vunpack.c.l.bf16 %v1678_v51 }
 0x27c   : > { %v2602_v30 = vunpack.c.h.bf16 %v1678_v51  ;;  %v3820_v63 = vmax.f32 %v2595_v46, %v2579_v11  ;;  %v3841_v19 = vmax.f32 %v2596_v23, %v2580_v39  ;;  %v3904_v37 = vmax.f32 %v2599_v62, %v2583_v29  ;;  %v1686_v39 = vld [vmem:[%s6976_s8 + $0xd18] sm:$0xff]  ;;  %v1687_v29 = vld [vmem:[%s6976_s8 + $0xd20] sm:$0xff]  ;;  %v1688_v23 = vld [vmem:[%s6976_s8 + $0xd28] sm:$0xff] }
 0x27d   : > { %v3862_v12 = vmax.f32 %v2597_v25, %v2581_v7  ;;  %v3883_v8 = vmax.f32 %v2598_v0, %v2582_v41  ;;  %v3946_v58 = vmax.f32 %v2601_v27, %v2585_v31  ;;  %v2607_v51 = vunpack.c.l.bf16 %v1681_v36  ;;  %v1685_v25 = vld [vmem:[%s6976_s8 + $0xd10] sm:$0xff] }
 0x27e   : > { %v3967_v33 = vmax.f32 %v2602_v30, %v2586_v40  ;;  %v2610_v11 = vunpack.c.h.bf16 %v1682_v32  ;;  %v3988_v41 = vmax.f32 %v2603_v2, %v2587_v18  ;;  %v4009_v0 = vmax.f32 %v2604_v6, %v2588_v54  ;;  %v1690_v6 = vld [vmem:[%s6976_s8 + $0xd38] sm:$0xff] }
 0x27f   : > { %v4030_v62 = vmax.f32 %v2605_v26, %v2589_v59  ;;  %v4051_v42 = vmax.f32 %v2606_v44, %v2590_v20  ;;  %v4072_v27 = vmax.f32 %v2607_v51, %v2591_v3  ;;  %v4093_v35 = vmax.f32 %v2608_v14, %v2592_v17  ;;  %v1689_v26 = vld [vmem:[%s6976_s8 + $0xd30] sm:$0xff]  ;;  %v1691_v44 = vld [vmem:[%s6976_s8 + $0xd40] sm:$0xff]  ;;  %v1692_v51 = vld [vmem:[%s6976_s8 + $0xd48] sm:$0xff] }
 0x280   : > { %v4114_v46 = vmax.f32 %v2609_v5, %v2593_v43  ;;  %v4135_v38 = vmax.f32 %v2610_v11, %v2594_v28  ;;  %v2611_v7 = vunpack.c.l.bf16 %v1683_v45  ;;  %v2612_v31 = vunpack.c.h.bf16 %v1683_v45 }
 0x281   : > { %v2613_v40 = vunpack.c.l.bf16 %v1684_v1  ;;  %v2614_v36 = vunpack.c.h.bf16 %v1684_v1  ;;  %v2615_v32 = vunpack.c.l.bf16 %v1685_v25  ;;  %v2616_v4 = vunpack.c.h.bf16 %v1685_v25 }
 0x282   : > { %v2617_v30 = vunpack.c.l.bf16 %v1686_v39  ;;  %v2618_v2 = vunpack.c.h.bf16 %v1686_v39  ;;  %v3821_v18 = vmax.f32 %v3820_v63, %v2611_v7  ;;  %v3842_v54 = vmax.f32 %v3841_v19, %v2612_v31  ;;  %v1694_v19 = vld [vmem:[%s6976_s8 + $0xd58] sm:$0xff] }
 0x283   : > { %v3863_v20 = vmax.f32 %v3862_v12, %v2613_v40  ;;  %v3884_v5 = vmax.f32 %v3883_v8, %v2614_v36  ;;  %v3905_v14 = vmax.f32 %v3904_v37, %v2615_v32  ;;  %v3926_v45 = vmax.f32 %v3925_v57, %v2616_v4  ;;  %v1693_v12 = vld [vmem:[%s6976_s8 + $0xd50] sm:$0xff]  ;;  %v1695_v4 = vld [vmem:[%s6976_s8 + $0xd60] sm:$0xff] }
 0x284   : > { %v3947_v28 = vmax.f32 %v3946_v58, %v2617_v30  ;;  %v3968_v1 = vmax.f32 %v3967_v33, %v2618_v2  ;;  %v2619_v43 = vunpack.c.l.bf16 %v1687_v29  ;;  %v2620_v59 = vunpack.c.h.bf16 %v1687_v29  ;;  %v1696_v30 = vld [vmem:[%s6976_s8 + $0xd68] sm:$0xff] }
 0x285   : > { %v2621_v3 = vunpack.c.l.bf16 %v1688_v23  ;;  %v2622_v17 = vunpack.c.h.bf16 %v1688_v23  ;;  %v2623_v11 = vunpack.c.l.bf16 %v1689_v26  ;;  %v2624_v25 = vunpack.c.h.bf16 %v1689_v26 }
 0x286   : > { %v2625_v39 = vunpack.c.l.bf16 %v1690_v6  ;;  %v2626_v63 = vunpack.c.h.bf16 %v1690_v6  ;;  %v3989_v8 = vmax.f32 %v3988_v41, %v2619_v43  ;;  %v4010_v7 = vmax.f32 %v4009_v0, %v2620_v59  ;;  %v1697_v0 = vld [vmem:[%s6976_s8 + $0xd70] sm:$0xff] }
 0x287   : > { %v4031_v37 = vmax.f32 %v4030_v62, %v2621_v3  ;;  %v4052_v58 = vmax.f32 %v4051_v42, %v2622_v17  ;;  %v4073_v57 = vmax.f32 %v4072_v27, %v2623_v11  ;;  %v4094_v33 = vmax.f32 %v4093_v35, %v2624_v25  ;;  %v1698_v62 = vld [vmem:[%s6976_s8 + $0xd78] sm:$0xff]  ;;  %v1699_v25 = vld [vmem:[%s6976_s8 + $0xd80] sm:$0xff] }
 0x288   : > { %v4115_v31 = vmax.f32 %v4114_v46, %v2625_v39  ;;  %v4136_v40 = vmax.f32 %v4135_v38, %v2626_v63  ;;  %v2627_v36 = vunpack.c.l.bf16 %v1691_v44  ;;  %v2628_v29 = vunpack.c.h.bf16 %v1691_v44  ;;  %v1700_v39 = vld [vmem:[%s6976_s8 + $0xd88] sm:$0xff] }
 0x289   : > { %v2629_v23 = vunpack.c.l.bf16 %v1692_v51  ;;  %v2630_v32 = vunpack.c.h.bf16 %v1692_v51  ;;  %v2631_v2 = vunpack.c.l.bf16 %v1693_v12  ;;  %v2632_v26 = vunpack.c.h.bf16 %v1693_v12 }
 0x28a   : > { %v2633_v6 = vunpack.c.l.bf16 %v1694_v19  ;;  %v2634_v41 = vunpack.c.h.bf16 %v1694_v19  ;;  %v3822_v42 = vmax.f32 %v3821_v18, %v2627_v36  ;;  %v3843_v43 = vmax.f32 %v3842_v54, %v2628_v29  ;;  %v1701_v54 = vld [vmem:[%s6976_s8 + $0xd90] sm:$0xff] }
 0x28b   : > { %v3864_v27 = vmax.f32 %v3863_v20, %v2629_v23  ;;  %v3885_v35 = vmax.f32 %v3884_v5, %v2630_v32  ;;  %v3906_v46 = vmax.f32 %v3905_v14, %v2631_v2  ;;  %v3927_v38 = vmax.f32 %v3926_v45, %v2632_v26  ;;  %v1702_v20 = vld [vmem:[%s6976_s8 + $0xd98] sm:$0xff]  ;;  %v1703_v26 = vld [vmem:[%s6976_s8 + $0xda0] sm:$0xff] }
 0x28c   : > { %v3948_v59 = vmax.f32 %v3947_v28, %v2633_v6  ;;  %v3969_v3 = vmax.f32 %v3968_v1, %v2634_v41  ;;  %v2635_v17 = vunpack.c.l.bf16 %v1695_v4  ;;  %v2636_v44 = vunpack.c.h.bf16 %v1695_v4  ;;  %v1704_v6 = vld [vmem:[%s6976_s8 + $0xda8] sm:$0xff] }
 0x28d   : > { %v2637_v51 = vunpack.c.l.bf16 %v1696_v30  ;;  %v2638_v11 = vunpack.c.h.bf16 %v1696_v30  ;;  %v2639_v63 = vunpack.c.l.bf16 %v1697_v0  ;;  %v2640_v12 = vunpack.c.h.bf16 %v1697_v0 }
 0x28e   : > { %v2641_v19 = vunpack.c.l.bf16 %v1698_v62  ;;  %v2642_v18 = vunpack.c.h.bf16 %v1698_v62  ;;  %v3990_v5 = vmax.f32 %v3989_v8, %v2635_v17  ;;  %v4011_v36 = vmax.f32 %v4010_v7, %v2636_v44  ;;  %v1705_v7 = vld [vmem:[%s6976_s8 + $0xdb0] sm:$0xff] }
 0x28f   : > { %v4032_v14 = vmax.f32 %v4031_v37, %v2637_v51  ;;  %v4053_v45 = vmax.f32 %v4052_v58, %v2638_v11  ;;  %v4074_v28 = vmax.f32 %v4073_v57, %v2639_v63  ;;  %v4095_v1 = vmax.f32 %v4094_v33, %v2640_v12  ;;  %v1706_v37 = vld [vmem:[%s6976_s8 + $0xdb8] sm:$0xff]  ;;  %v1707_v12 = vld [vmem:[%s6976_s8 + $0xdc0] sm:$0xff] }
 0x290   : > { %v4116_v29 = vmax.f32 %v4115_v31, %v2641_v19  ;;  %v4137_v23 = vmax.f32 %v4136_v40, %v2642_v18  ;;  %v2643_v32 = vunpack.c.l.bf16 %v1699_v25  ;;  %v2644_v4 = vunpack.c.h.bf16 %v1699_v25  ;;  %v1708_v19 = vld [vmem:[%s6976_s8 + $0xdc8] sm:$0xff] }
 0x291   : > { %v2645_v30 = vunpack.c.l.bf16 %v1700_v39  ;;  %v2646_v2 = vunpack.c.h.bf16 %v1700_v39  ;;  %v2647_v41 = vunpack.c.l.bf16 %v1701_v54  ;;  %v2648_v0 = vunpack.c.h.bf16 %v1701_v54 }
 0x292   : > { %v2649_v62 = vunpack.c.l.bf16 %v1702_v20  ;;  %v2650_v8 = vunpack.c.h.bf16 %v1702_v20  ;;  %v3823_v58 = vmax.f32 %v3822_v42, %v2643_v32  ;;  %v3844_v17 = vmax.f32 %v3843_v43, %v2644_v4  ;;  %v1709_v43 = vld [vmem:[%s6976_s8 + $0xdd0] sm:$0xff] }
 0x293   : > { %v3865_v57 = vmax.f32 %v3864_v27, %v2645_v30  ;;  %v3886_v33 = vmax.f32 %v3885_v35, %v2646_v2  ;;  %v3907_v31 = vmax.f32 %v3906_v46, %v2647_v41  ;;  %v3928_v40 = vmax.f32 %v3927_v38, %v2648_v0  ;;  %v1710_v27 = vld [vmem:[%s6976_s8 + $0xdd8] sm:$0xff]  ;;  %v1711_v0 = vld [vmem:[%s6976_s8 + $0xde0] sm:$0xff] }
 0x294   : > { %v3949_v44 = vmax.f32 %v3948_v59, %v2649_v62  ;;  %v3970_v51 = vmax.f32 %v3969_v3, %v2650_v8  ;;  %v2651_v11 = vunpack.c.l.bf16 %v1703_v26  ;;  %v2652_v25 = vunpack.c.h.bf16 %v1703_v26  ;;  %v1712_v62 = vld [vmem:[%s6976_s8 + $0xde8] sm:$0xff] }
 0x295   : > { %v2653_v39 = vunpack.c.l.bf16 %v1704_v6  ;;  %v2654_v63 = vunpack.c.h.bf16 %v1704_v6  ;;  %v2655_v18 = vunpack.c.l.bf16 %v1705_v7  ;;  %v2656_v54 = vunpack.c.h.bf16 %v1705_v7 }
 0x296   : > { %v2657_v20 = vunpack.c.l.bf16 %v1706_v37  ;;  %v2658_v42 = vunpack.c.h.bf16 %v1706_v37  ;;  %v3991_v35 = vmax.f32 %v3990_v5, %v2651_v11  ;;  %v4012_v32 = vmax.f32 %v4011_v36, %v2652_v25  ;;  %v1713_v36 = vld [vmem:[%s6976_s8 + $0xdf0] sm:$0xff] }
 0x297   : > { %v4033_v46 = vmax.f32 %v4032_v14, %v2653_v39  ;;  %v4054_v38 = vmax.f32 %v4053_v45, %v2654_v63  ;;  %v4075_v59 = vmax.f32 %v4074_v28, %v2655_v18  ;;  %v4096_v3 = vmax.f32 %v4095_v1, %v2656_v54  ;;  %v1714_v14 = vld [vmem:[%s6976_s8 + $0xdf8] sm:$0xff]  ;;  %v1715_v54 = vld [vmem:[%s6976_s8 + $0xe00] sm:$0xff] }
 0x298   : > { %v4117_v4 = vmax.f32 %v4116_v29, %v2657_v20  ;;  %v4138_v30 = vmax.f32 %v4137_v23, %v2658_v42  ;;  %v2659_v2 = vunpack.c.l.bf16 %v1707_v12  ;;  %v2660_v26 = vunpack.c.h.bf16 %v1707_v12  ;;  %v1716_v20 = vld [vmem:[%s6976_s8 + $0xe08] sm:$0xff] }
 0x299   : > { %v2661_v6 = vunpack.c.l.bf16 %v1708_v19  ;;  %v2662_v41 = vunpack.c.h.bf16 %v1708_v19  ;;  %v2663_v8 = vunpack.c.l.bf16 %v1709_v43  ;;  %v2664_v7 = vunpack.c.h.bf16 %v1709_v43 }
 0x29a   : > { %v2665_v37 = vunpack.c.l.bf16 %v1710_v27  ;;  %v2666_v5 = vunpack.c.h.bf16 %v1710_v27  ;;  %v3824_v45 = vmax.f32 %v3823_v58, %v2659_v2  ;;  %v3845_v11 = vmax.f32 %v3844_v17, %v2660_v26  ;;  %v1717_v17 = vld [vmem:[%s6976_s8 + $0xe10] sm:$0xff] }
 0x29b   : > { %v3866_v28 = vmax.f32 %v3865_v57, %v2661_v6  ;;  %v3887_v1 = vmax.f32 %v3886_v33, %v2662_v41  ;;  %v3908_v29 = vmax.f32 %v3907_v31, %v2663_v8  ;;  %v3929_v23 = vmax.f32 %v3928_v40, %v2664_v7  ;;  %v1718_v57 = vld [vmem:[%s6976_s8 + $0xe18] sm:$0xff]  ;;  %v1719_v7 = vld [vmem:[%s6976_s8 + $0xe20] sm:$0xff] }
 0x29c   : > { %v3950_v25 = vmax.f32 %v3949_v44, %v2665_v37  ;;  %v3971_v39 = vmax.f32 %v3970_v51, %v2666_v5  ;;  %v2667_v63 = vunpack.c.l.bf16 %v1711_v0  ;;  %v2668_v12 = vunpack.c.h.bf16 %v1711_v0  ;;  %v1720_v37 = vld [vmem:[%s6976_s8 + $0xe28] sm:$0xff] }
 0x29d   : > { %v2669_v19 = vunpack.c.l.bf16 %v1712_v62  ;;  %v2670_v18 = vunpack.c.h.bf16 %v1712_v62  ;;  %v2671_v42 = vunpack.c.l.bf16 %v1713_v36  ;;  %v2672_v43 = vunpack.c.h.bf16 %v1713_v36 }
 0x29e   : > { %v2673_v27 = vunpack.c.l.bf16 %v1714_v14  ;;  %v2674_v58 = vunpack.c.h.bf16 %v1714_v14  ;;  %v3992_v33 = vmax.f32 %v3991_v35, %v2667_v63  ;;  %v4013_v2 = vmax.f32 %v4012_v32, %v2668_v12  ;;  %v1721_v32 = vld [vmem:[%s6976_s8 + $0xe30] sm:$0xff] }
 0x29f   : > { %v4034_v31 = vmax.f32 %v4033_v46, %v2669_v19  ;;  %v4055_v40 = vmax.f32 %v4054_v38, %v2670_v18  ;;  %v4076_v44 = vmax.f32 %v4075_v59, %v2671_v42  ;;  %v4097_v51 = vmax.f32 %v4096_v3, %v2672_v43  ;;  %v1722_v46 = vld [vmem:[%s6976_s8 + $0xe38] sm:$0xff]  ;;  %v1723_v43 = vld [vmem:[%s6976_s8 + $0xe40] sm:$0xff] }
 0x2a0   : > { %v4118_v26 = vmax.f32 %v4117_v4, %v2673_v27  ;;  %v4139_v6 = vmax.f32 %v4138_v30, %v2674_v58  ;;  %v2675_v41 = vunpack.c.l.bf16 %v1715_v54  ;;  %v2676_v0 = vunpack.c.h.bf16 %v1715_v54  ;;  %v1724_v27 = vld [vmem:[%s6976_s8 + $0xe48] sm:$0xff] }
 0x2a1   : > { %v2677_v62 = vunpack.c.l.bf16 %v1716_v20  ;;  %v2678_v8 = vunpack.c.h.bf16 %v1716_v20  ;;  %v2679_v5 = vunpack.c.l.bf16 %v1717_v17  ;;  %v2680_v36 = vunpack.c.h.bf16 %v1717_v17 }
 0x2a2   : > { %v2681_v14 = vunpack.c.l.bf16 %v1718_v57  ;;  %v2682_v35 = vunpack.c.h.bf16 %v1718_v57  ;;  %v3825_v38 = vmax.f32 %v3824_v45, %v2675_v41  ;;  %v3846_v63 = vmax.f32 %v3845_v11, %v2676_v0  ;;  %v1725_v11 = vld [vmem:[%s6976_s8 + $0xe50] sm:$0xff] }
 0x2a3   : > { %v3867_v59 = vmax.f32 %v3866_v28, %v2677_v62  ;;  %v3888_v3 = vmax.f32 %v3887_v1, %v2678_v8  ;;  %v3909_v4 = vmax.f32 %v3908_v29, %v2679_v5  ;;  %v3930_v30 = vmax.f32 %v3929_v23, %v2680_v36  ;;  %v1726_v28 = vld [vmem:[%s6976_s8 + $0xe58] sm:$0xff]  ;;  %v1727_v36 = vld [vmem:[%s6976_s8 + $0xe60] sm:$0xff] }
 0x2a4   : > { %v3951_v12 = vmax.f32 %v3950_v25, %v2681_v14  ;;  %v3972_v19 = vmax.f32 %v3971_v39, %v2682_v35  ;;  %v2683_v18 = vunpack.c.l.bf16 %v1719_v7  ;;  %v2684_v54 = vunpack.c.h.bf16 %v1719_v7  ;;  %v1728_v14 = vld [vmem:[%s6976_s8 + $0xe68] sm:$0xff] }
 0x2a5   : > { %v2685_v20 = vunpack.c.l.bf16 %v1720_v37  ;;  %v2686_v42 = vunpack.c.h.bf16 %v1720_v37  ;;  %v2687_v58 = vunpack.c.l.bf16 %v1721_v32  ;;  %v2688_v17 = vunpack.c.h.bf16 %v1721_v32 }
 0x2a6   : > { %v2689_v57 = vunpack.c.l.bf16 %v1722_v46  ;;  %v2690_v45 = vunpack.c.h.bf16 %v1722_v46  ;;  %v3993_v1 = vmax.f32 %v3992_v33, %v2683_v18  ;;  %v4014_v41 = vmax.f32 %v4013_v2, %v2684_v54  ;;  %v1729_v2 = vld [vmem:[%s6976_s8 + $0xe70] sm:$0xff] }
 0x2a7   : > { %v4035_v29 = vmax.f32 %v4034_v31, %v2685_v20  ;;  %v4056_v23 = vmax.f32 %v4055_v40, %v2686_v42  ;;  %v4077_v25 = vmax.f32 %v4076_v44, %v2687_v58  ;;  %v4098_v39 = vmax.f32 %v4097_v51, %v2688_v17  ;;  %v1730_v31 = vld [vmem:[%s6976_s8 + $0xe78] sm:$0xff]  ;;  %v1731_v17 = vld [vmem:[%s6976_s8 + $0xe80] sm:$0xff] }
 0x2a8   : > { %v4119_v0 = vmax.f32 %v4118_v26, %v2689_v57  ;;  %v4140_v62 = vmax.f32 %v4139_v6, %v2690_v45  ;;  %v2691_v8 = vunpack.c.l.bf16 %v1723_v43  ;;  %v2692_v7 = vunpack.c.h.bf16 %v1723_v43  ;;  %v1732_v57 = vld [vmem:[%s6976_s8 + $0xe88] sm:$0xff] }
 0x2a9   : > { %v2693_v37 = vunpack.c.l.bf16 %v1724_v27  ;;  %v2694_v5 = vunpack.c.h.bf16 %v1724_v27  ;;  %v2695_v35 = vunpack.c.l.bf16 %v1725_v11  ;;  %v2696_v32 = vunpack.c.h.bf16 %v1725_v11 }
 0x2aa   : > { %v2697_v46 = vunpack.c.l.bf16 %v1726_v28  ;;  %v2698_v33 = vunpack.c.h.bf16 %v1726_v28  ;;  %v3826_v40 = vmax.f32 %v3825_v38, %v2691_v8  ;;  %v3847_v18 = vmax.f32 %v3846_v63, %v2692_v7  ;;  %v1733_v63 = vld [vmem:[%s6976_s8 + $0xe90] sm:$0xff] }
 0x2ab   : > { %v3868_v44 = vmax.f32 %v3867_v59, %v2693_v37  ;;  %v3889_v51 = vmax.f32 %v3888_v3, %v2694_v5  ;;  %v3910_v26 = vmax.f32 %v3909_v4, %v2695_v35  ;;  %v3931_v6 = vmax.f32 %v3930_v30, %v2696_v32  ;;  %v1734_v59 = vld [vmem:[%s6976_s8 + $0xe98] sm:$0xff]  ;;  %v1735_v32 = vld [vmem:[%s6976_s8 + $0xea0] sm:$0xff] }
 0x2ac   : > { %v3952_v54 = vmax.f32 %v3951_v12, %v2697_v46  ;;  %v3973_v20 = vmax.f32 %v3972_v19, %v2698_v33  ;;  %v2699_v42 = vunpack.c.l.bf16 %v1727_v36  ;;  %v2700_v43 = vunpack.c.h.bf16 %v1727_v36  ;;  %v1736_v46 = vld [vmem:[%s6976_s8 + $0xea8] sm:$0xff] }
 0x2ad   : > { %v2701_v27 = vunpack.c.l.bf16 %v1728_v14  ;;  %v2702_v58 = vunpack.c.h.bf16 %v1728_v14  ;;  %v2703_v45 = vunpack.c.l.bf16 %v1729_v2  ;;  %v2704_v11 = vunpack.c.h.bf16 %v1729_v2 }
 0x2ae   : > { %v2705_v28 = vunpack.c.l.bf16 %v1730_v31  ;;  %v2706_v38 = vunpack.c.h.bf16 %v1730_v31  ;;  %v3994_v3 = vmax.f32 %v3993_v1, %v2699_v42  ;;  %v4015_v8 = vmax.f32 %v4014_v41, %v2700_v43  ;;  %v1737_v41 = vld [vmem:[%s6976_s8 + $0xeb0] sm:$0xff] }
 0x2af   : > { %v4036_v4 = vmax.f32 %v4035_v29, %v2701_v27  ;;  %v4057_v30 = vmax.f32 %v4056_v23, %v2702_v58  ;;  %v4078_v12 = vmax.f32 %v4077_v25, %v2703_v45  ;;  %v4099_v19 = vmax.f32 %v4098_v39, %v2704_v11  ;;  %v1738_v29 = vld [vmem:[%s6976_s8 + $0xeb8] sm:$0xff]  ;;  %v1739_v11 = vld [vmem:[%s6976_s8 + $0xec0] sm:$0xff] }
 0x2b0   : > { %v4120_v7 = vmax.f32 %v4119_v0, %v2705_v28  ;;  %v4141_v37 = vmax.f32 %v4140_v62, %v2706_v38  ;;  %v2707_v5 = vunpack.c.l.bf16 %v1731_v17  ;;  %v2708_v36 = vunpack.c.h.bf16 %v1731_v17  ;;  %v1740_v28 = vld [vmem:[%s6976_s8 + $0xec8] sm:$0xff] }
 0x2b1   : > { %v2709_v14 = vunpack.c.l.bf16 %v1732_v57  ;;  %v2710_v35 = vunpack.c.h.bf16 %v1732_v57  ;;  %v2711_v33 = vunpack.c.l.bf16 %v1733_v63  ;;  %v2712_v2 = vunpack.c.h.bf16 %v1733_v63 }
 0x2b2   : > { %v2713_v31 = vunpack.c.l.bf16 %v1734_v59  ;;  %v2714_v1 = vunpack.c.h.bf16 %v1734_v59  ;;  %v3827_v23 = vmax.f32 %v3826_v40, %v2707_v5  ;;  %v3848_v42 = vmax.f32 %v3847_v18, %v2708_v36  ;;  %v1741_v18 = vld [vmem:[%s6976_s8 + $0xed0] sm:$0xff] }
 0x2b3   : > { %v3869_v25 = vmax.f32 %v3868_v44, %v2709_v14  ;;  %v3890_v39 = vmax.f32 %v3889_v51, %v2710_v35  ;;  %v3911_v0 = vmax.f32 %v3910_v26, %v2711_v33  ;;  %v3932_v62 = vmax.f32 %v3931_v6, %v2712_v2  ;;  %v1742_v44 = vld [vmem:[%s6976_s8 + $0xed8] sm:$0xff]  ;;  %v1743_v2 = vld [vmem:[%s6976_s8 + $0xee0] sm:$0xff] }
 0x2b4   : > { %v3953_v43 = vmax.f32 %v3952_v54, %v2713_v31  ;;  %v3974_v27 = vmax.f32 %v3973_v20, %v2714_v1  ;;  %v2715_v58 = vunpack.c.l.bf16 %v1735_v32  ;;  %v2716_v17 = vunpack.c.h.bf16 %v1735_v32  ;;  %v1744_v31 = vld [vmem:[%s6976_s8 + $0xee8] sm:$0xff] }
 0x2b5   : > { %v2717_v57 = vunpack.c.l.bf16 %v1736_v46  ;;  %v2718_v45 = vunpack.c.h.bf16 %v1736_v46  ;;  %v2719_v38 = vunpack.c.l.bf16 %v1737_v41  ;;  %v2720_v63 = vunpack.c.h.bf16 %v1737_v41 }
 0x2b6   : > { %v2721_v59 = vunpack.c.l.bf16 %v1738_v29  ;;  %v2722_v40 = vunpack.c.h.bf16 %v1738_v29  ;;  %v3995_v51 = vmax.f32 %v3994_v3, %v2715_v58  ;;  %v4016_v5 = vmax.f32 %v4015_v8, %v2716_v17  ;;  %v1745_v8 = vld [vmem:[%s6976_s8 + $0xef0] sm:$0xff] }
 0x2b7   : > { %v4037_v26 = vmax.f32 %v4036_v4, %v2717_v57  ;;  %v4058_v6 = vmax.f32 %v4057_v30, %v2718_v45  ;;  %v4079_v54 = vmax.f32 %v4078_v12, %v2719_v38  ;;  %v4100_v20 = vmax.f32 %v4099_v19, %v2720_v63  ;;  %v1746_v4 = vld [vmem:[%s6976_s8 + $0xef8] sm:$0xff]  ;;  %v1747_v63 = vld [vmem:[%s6976_s8 + $0xf00] sm:$0xff] }
 0x2b8   : > { %v4121_v36 = vmax.f32 %v4120_v7, %v2721_v59  ;;  %v4142_v14 = vmax.f32 %v4141_v37, %v2722_v40  ;;  %v2723_v35 = vunpack.c.l.bf16 %v1739_v11  ;;  %v2724_v32 = vunpack.c.h.bf16 %v1739_v11  ;;  %v1748_v59 = vld [vmem:[%s6976_s8 + $0xf08] sm:$0xff] }
 0x2b9   : > { %v2725_v46 = vunpack.c.l.bf16 %v1740_v28  ;;  %v2726_v33 = vunpack.c.h.bf16 %v1740_v28  ;;  %v2727_v1 = vunpack.c.l.bf16 %v1741_v18  ;;  %v2728_v41 = vunpack.c.h.bf16 %v1741_v18 }
 0x2ba   : > { %v2729_v29 = vunpack.c.l.bf16 %v1742_v44  ;;  %v2730_v3 = vunpack.c.h.bf16 %v1742_v44  ;;  %v3828_v30 = vmax.f32 %v3827_v23, %v2723_v35  ;;  %v3849_v58 = vmax.f32 %v3848_v42, %v2724_v32  ;;  %v1749_v42 = vld [vmem:[%s6976_s8 + $0xf10] sm:$0xff] }
 0x2bb   : > { %v3870_v12 = vmax.f32 %v3869_v25, %v2725_v46  ;;  %v3891_v19 = vmax.f32 %v3890_v39, %v2726_v33  ;;  %v3912_v7 = vmax.f32 %v3911_v0, %v2727_v1  ;;  %v3933_v37 = vmax.f32 %v3932_v62, %v2728_v41  ;;  %v1750_v25 = vld [vmem:[%s6976_s8 + $0xf18] sm:$0xff]  ;;  %v1751_v41 = vld [vmem:[%s6976_s8 + $0xf20] sm:$0xff] }
 0x2bc   : > { %v3954_v17 = vmax.f32 %v3953_v43, %v2729_v29  ;;  %v3975_v57 = vmax.f32 %v3974_v27, %v2730_v3  ;;  %v2731_v45 = vunpack.c.l.bf16 %v1743_v2  ;;  %v2732_v11 = vunpack.c.h.bf16 %v1743_v2  ;;  %v1752_v29 = vld [vmem:[%s6976_s8 + $0xf28] sm:$0xff] }
 0x2bd   : > { %v2733_v28 = vunpack.c.l.bf16 %v1744_v31  ;;  %v2734_v38 = vunpack.c.h.bf16 %v1744_v31  ;;  %v2735_v40 = vunpack.c.l.bf16 %v1745_v8  ;;  %v2736_v18 = vunpack.c.h.bf16 %v1745_v8 }
 0x2be   : > { %v2737_v44 = vunpack.c.l.bf16 %v1746_v4  ;;  %v2738_v23 = vunpack.c.h.bf16 %v1746_v4  ;;  %v3996_v39 = vmax.f32 %v3995_v51, %v2731_v45  ;;  %v4017_v35 = vmax.f32 %v4016_v5, %v2732_v11  ;;  %v1753_v5 = vld [vmem:[%s6976_s8 + $0xf30] sm:$0xff] }
 0x2bf   : > { %v4038_v0 = vmax.f32 %v4037_v26, %v2733_v28  ;;  %v4059_v62 = vmax.f32 %v4058_v6, %v2734_v38  ;;  %v4080_v43 = vmax.f32 %v4079_v54, %v2735_v40  ;;  %v4101_v27 = vmax.f32 %v4100_v20, %v2736_v18  ;;  %v1754_v26 = vld [vmem:[%s6976_s8 + $0xf38] sm:$0xff]  ;;  %v1755_v18 = vld [vmem:[%s6976_s8 + $0xf40] sm:$0xff] }
 0x2c0   : > { %v4122_v32 = vmax.f32 %v4121_v36, %v2737_v44  ;;  %v4143_v46 = vmax.f32 %v4142_v14, %v2738_v23  ;;  %v2739_v33 = vunpack.c.l.bf16 %v1747_v63  ;;  %v2740_v2 = vunpack.c.h.bf16 %v1747_v63  ;;  %v1756_v44 = vld [vmem:[%s6976_s8 + $0xf48] sm:$0xff] }
 0x2c1   : > { %v2741_v31 = vunpack.c.l.bf16 %v1748_v59  ;;  %v2742_v1 = vunpack.c.h.bf16 %v1748_v59  ;;  %v2743_v3 = vunpack.c.l.bf16 %v1749_v42  ;;  %v2744_v8 = vunpack.c.h.bf16 %v1749_v42 }
 0x2c2   : > { %v2745_v4 = vunpack.c.l.bf16 %v1750_v25  ;;  %v2746_v51 = vunpack.c.h.bf16 %v1750_v25  ;;  %v3829_v6 = vmax.f32 %v3828_v30, %v2739_v33  ;;  %v3850_v45 = vmax.f32 %v3849_v58, %v2740_v2  ;;  %v1757_v58 = vld [vmem:[%s6976_s8 + $0xf50] sm:$0xff] }
 0x2c3   : > { %v3871_v54 = vmax.f32 %v3870_v12, %v2741_v31  ;;  %v3892_v20 = vmax.f32 %v3891_v19, %v2742_v1  ;;  %v3913_v36 = vmax.f32 %v3912_v7, %v2743_v3  ;;  %v3934_v14 = vmax.f32 %v3933_v37, %v2744_v8  ;;  %v1758_v12 = vld [vmem:[%s6976_s8 + $0xf58] sm:$0xff]  ;;  %v1759_v8 = vld [vmem:[%s6976_s8 + $0xf60] sm:$0xff] }
 0x2c4   : > { %v3955_v11 = vmax.f32 %v3954_v17, %v2745_v4  ;;  %v3976_v28 = vmax.f32 %v3975_v57, %v2746_v51  ;;  %v2747_v38 = vunpack.c.l.bf16 %v1751_v41  ;;  %v2748_v63 = vunpack.c.h.bf16 %v1751_v41  ;;  %v1760_v4 = vld [vmem:[%s6976_s8 + $0xf68] sm:$0xff] }
 0x2c5   : > { %v2749_v59 = vunpack.c.l.bf16 %v1752_v29  ;;  %v2750_v40 = vunpack.c.h.bf16 %v1752_v29  ;;  %v2751_v23 = vunpack.c.l.bf16 %v1753_v5  ;;  %v2752_v42 = vunpack.c.h.bf16 %v1753_v5 }
 0x2c6   : > { %v2753_v25 = vunpack.c.l.bf16 %v1754_v26  ;;  %v2754_v30 = vunpack.c.h.bf16 %v1754_v26  ;;  %v3997_v19 = vmax.f32 %v3996_v39, %v2747_v38  ;;  %v4018_v33 = vmax.f32 %v4017_v35, %v2748_v63  ;;  %v1761_v35 = vld [vmem:[%s6976_s8 + $0xf70] sm:$0xff] }
 0x2c7   : > { %v4039_v7 = vmax.f32 %v4038_v0, %v2749_v59  ;;  %v4060_v37 = vmax.f32 %v4059_v62, %v2750_v40  ;;  %v4081_v17 = vmax.f32 %v4080_v43, %v2751_v23  ;;  %v4102_v57 = vmax.f32 %v4101_v27, %v2752_v42  ;;  %v1762_v0 = vld [vmem:[%s6976_s8 + $0xf78] sm:$0xff]  ;;  %v1763_v42 = vld [vmem:[%s6976_s8 + $0xf80] sm:$0xff] }
 0x2c8   : > { %v4123_v2 = vmax.f32 %v4122_v32, %v2753_v25  ;;  %v4144_v31 = vmax.f32 %v4143_v46, %v2754_v30  ;;  %v2755_v1 = vunpack.c.l.bf16 %v1755_v18  ;;  %v2756_v41 = vunpack.c.h.bf16 %v1755_v18  ;;  %v1764_v25 = vld [vmem:[%s6976_s8 + $0xf88] sm:$0xff] }
 0x2c9   : > { %v2757_v29 = vunpack.c.l.bf16 %v1756_v44  ;;  %v2758_v3 = vunpack.c.h.bf16 %v1756_v44  ;;  %v2759_v51 = vunpack.c.l.bf16 %v1757_v58  ;;  %v2760_v5 = vunpack.c.h.bf16 %v1757_v58 }
 0x2ca   : > { %v2761_v26 = vunpack.c.l.bf16 %v1758_v12  ;;  %v2762_v39 = vunpack.c.h.bf16 %v1758_v12  ;;  %v3830_v62 = vmax.f32 %v3829_v6, %v2755_v1  ;;  %v3851_v38 = vmax.f32 %v3850_v45, %v2756_v41  ;;  %v1765_v45 = vld [vmem:[%s6976_s8 + $0xf90] sm:$0xff] }
 0x2cb   : > { %v3872_v43 = vmax.f32 %v3871_v54, %v2757_v29  ;;  %v3893_v27 = vmax.f32 %v3892_v20, %v2758_v3  ;;  %v3914_v32 = vmax.f32 %v3913_v36, %v2759_v51  ;;  %v3935_v46 = vmax.f32 %v3934_v14, %v2760_v5  ;;  %v1766_v54 = vld [vmem:[%s6976_s8 + $0xf98] sm:$0xff]  ;;  %v1767_v5 = vld [vmem:[%s6976_s8 + $0xfa0] sm:$0xff] }
 0x2cc   : > { %v3956_v63 = vmax.f32 %v3955_v11, %v2761_v26  ;;  %v3977_v59 = vmax.f32 %v3976_v28, %v2762_v39  ;;  %v2763_v40 = vunpack.c.l.bf16 %v1759_v8  ;;  %v2764_v18 = vunpack.c.h.bf16 %v1759_v8  ;;  %v1768_v26 = vld [vmem:[%s6976_s8 + $0xfa8] sm:$0xff] }
 0x2cd   : > { %v2765_v44 = vunpack.c.l.bf16 %v1760_v4  ;;  %v2766_v23 = vunpack.c.h.bf16 %v1760_v4  ;;  %v2767_v30 = vunpack.c.l.bf16 %v1761_v35  ;;  %v2768_v58 = vunpack.c.h.bf16 %v1761_v35 }
 0x2ce   : > { %v2769_v12 = vunpack.c.l.bf16 %v1762_v0  ;;  %v2770_v6 = vunpack.c.h.bf16 %v1762_v0  ;;  %v3998_v20 = vmax.f32 %v3997_v19, %v2763_v40  ;;  %v4019_v1 = vmax.f32 %v4018_v33, %v2764_v18  ;;  %v1769_v33 = vld [vmem:[%s6976_s8 + $0xfb0] sm:$0xff] }
 0x2cf   : > { %v4040_v36 = vmax.f32 %v4039_v7, %v2765_v44  ;;  %v4061_v14 = vmax.f32 %v4060_v37, %v2766_v23  ;;  %v4082_v11 = vmax.f32 %v4081_v17, %v2767_v30  ;;  %v4103_v28 = vmax.f32 %v4102_v57, %v2768_v58  ;;  %v1770_v7 = vld [vmem:[%s6976_s8 + $0xfb8] sm:$0xff]  ;;  %v1771_v58 = vld [vmem:[%s6976_s8 + $0xfc0] sm:$0xff] }
 0x2d0   : > { %v4124_v41 = vmax.f32 %v4123_v2, %v2769_v12  ;;  %v4145_v29 = vmax.f32 %v4144_v31, %v2770_v6  ;;  %v2771_v3 = vunpack.c.l.bf16 %v1763_v42  ;;  %v2772_v8 = vunpack.c.h.bf16 %v1763_v42  ;;  %v1772_v12 = vld [vmem:[%s6976_s8 + $0xfc8] sm:$0xff] }
 0x2d1   : > { %v2773_v4 = vunpack.c.l.bf16 %v1764_v25  ;;  %v2774_v51 = vunpack.c.h.bf16 %v1764_v25  ;;  %v2775_v39 = vunpack.c.l.bf16 %v1765_v45  ;;  %v2776_v35 = vunpack.c.h.bf16 %v1765_v45 }
 0x2d2   : > { %v2777_v0 = vunpack.c.l.bf16 %v1766_v54  ;;  %v2778_v19 = vunpack.c.h.bf16 %v1766_v54  ;;  %v3831_v37 = vmax.f32 %v3830_v62, %v2771_v3  ;;  %v3852_v40 = vmax.f32 %v3851_v38, %v2772_v8  ;;  %v1773_v38 = vld [vmem:[%s6976_s8 + $0xfd0] sm:$0xff] }
 0x2d3   : > { %v3873_v17 = vmax.f32 %v3872_v43, %v2773_v4  ;;  %v3894_v57 = vmax.f32 %v3893_v27, %v2774_v51  ;;  %v3915_v2 = vmax.f32 %v3914_v32, %v2775_v39  ;;  %v3936_v31 = vmax.f32 %v3935_v46, %v2776_v35  ;;  %v1774_v43 = vld [vmem:[%s6976_s8 + $0xfd8] sm:$0xff]  ;;  %v1775_v35 = vld [vmem:[%s6976_s8 + $0xfe0] sm:$0xff] }
 0x2d4   : > { %v3957_v18 = vmax.f32 %v3956_v63, %v2777_v0  ;;  %v3978_v44 = vmax.f32 %v3977_v59, %v2778_v19  ;;  %v2779_v23 = vunpack.c.l.bf16 %v1767_v5  ;;  %v2780_v42 = vunpack.c.h.bf16 %v1767_v5  ;;  %v1776_v0 = vld [vmem:[%s6976_s8 + $0xfe8] sm:$0xff] }
 0x2d5   : > { %v2781_v25 = vunpack.c.l.bf16 %v1768_v26  ;;  %v2782_v30 = vunpack.c.h.bf16 %v1768_v26  ;;  %v2783_v6 = vunpack.c.l.bf16 %v1769_v33  ;;  %v2784_v45 = vunpack.c.h.bf16 %v1769_v33 }
 0x2d6   : > { %v2785_v54 = vunpack.c.l.bf16 %v1770_v7  ;;  %v2786_v62 = vunpack.c.h.bf16 %v1770_v7  ;;  %v3999_v27 = vmax.f32 %v3998_v20, %v2779_v23  ;;  %v4020_v3 = vmax.f32 %v4019_v1, %v2780_v42  ;;  %v1777_v20 = vld [vmem:[%s6976_s8 + $0xff0] sm:$0xff]  ;;  %v1778_v1 = vld [vmem:[%s6976_s8 + $0xff8] sm:$0xff] }
 0x2d7   : > { %v4041_v32 = vmax.f32 %v4040_v36, %v2781_v25  ;;  %v4062_v46 = vmax.f32 %v4061_v14, %v2782_v30  ;;  %v4083_v63 = vmax.f32 %v4082_v11, %v2783_v6  ;;  %v4104_v59 = vmax.f32 %v4103_v28, %v2784_v45 }
 0x2d8   : > { %v4125_v8 = vmax.f32 %v4124_v41, %v2785_v54  ;;  %v4146_v4 = vmax.f32 %v4145_v29, %v2786_v62  ;;  %v2787_v51 = vunpack.c.l.bf16 %v1771_v58  ;;  %v2788_v5 = vunpack.c.h.bf16 %v1771_v58 }
 0x2d9   : > { %v2789_v26 = vunpack.c.l.bf16 %v1772_v12  ;;  %v2790_v39 = vunpack.c.h.bf16 %v1772_v12  ;;  %v2791_v19 = vunpack.c.l.bf16 %v1773_v38  ;;  %v2792_v33 = vunpack.c.h.bf16 %v1773_v38 }
 0x2da   : > { %v2793_v7 = vunpack.c.l.bf16 %v1774_v43  ;;  %v2794_v22 = vunpack.c.h.bf16 %v1774_v43  ;;  %v7903_v36 = vmax.f32 %v3831_v37, %v2787_v51  ;;  %v7905_v14 = vmax.f32 %v3852_v40, %v2788_v5 }
 0x2db   : > { %v7907_v11 = vmax.f32 %v3873_v17, %v2789_v26  ;;  %v7909_v28 = vmax.f32 %v3894_v57, %v2790_v39  ;;  %v7911_v41 = vmax.f32 %v3915_v2, %v2791_v19  ;;  %v7913_v29 = vmax.f32 %v3936_v31, %v2792_v33 }
 0x2dc   : > { %v7915_v23 = vmax.f32 %v3957_v18, %v2793_v7  ;;  %v7917_v42 = vmax.f32 %v3978_v44, %v2794_v22  ;;  %v2795_v25 = vunpack.c.l.bf16 %v1775_v35  ;;  %v2796_v30 = vunpack.c.h.bf16 %v1775_v35 }
 0x2dd   : > { %v2797_v58 = vunpack.c.l.bf16 %v1776_v0  ;;  %v2798_v12 = vunpack.c.h.bf16 %v1776_v0  ;;  %v2799_v37 = vunpack.c.l.bf16 %v1777_v20  ;;  %v2800_v6 = vunpack.c.h.bf16 %v1777_v20 }
 0x2de   : > { %v2801_v40 = vunpack.c.l.bf16 %v1778_v1  ;;  %v2802_v45 = vunpack.c.h.bf16 %v1778_v1  ;;  %v7919_v17 = vmax.f32 %v3999_v27, %v2795_v25  ;;  %v7921_v57 = vmax.f32 %v4020_v3, %v2796_v30 }
 0x2df   : > { %v7923_v2 = vmax.f32 %v4041_v32, %v2797_v58  ;;  %v7925_v31 = vmax.f32 %v4062_v46, %v2798_v12  ;;  %v7927_v18 = vmax.f32 %v4083_v63, %v2799_v37  ;;  %v7929_v22 = vmax.f32 %v4104_v59, %v2800_v6 }
 0x2e0   : > { %v7931_v44 = vmax.f32 %v4125_v8, %v2801_v40  ;;  %v7933_v54 = vmax.f32 %v4146_v4, %v2802_v45  ;;  %v9636_v62 = vunpack.c.l.bf16 %v7068_v9  ;;  %v9637_v38 = vunpack.c.l.bf16 %v7024_v49 }
 0x2e1   : > { %v9638_v27 = vunpack.c.h.bf16 %v7068_v9  ;;  %v9639_v3 = vunpack.c.h.bf16 %v7024_v49  ;;  %v9640_v46 = vunpack.c.l.bf16 %v7071_v10  ;;  %v9641_v63 = vunpack.c.l.bf16 %v7027_v50 }
 0x2e2   : > { %v2811_v43 = vmax.f32 %v9637_v38, %v9636_v62  ;;  %v9642_v8 = vunpack.c.h.bf16 %v7071_v10  ;;  %v9643_v4 = vunpack.c.h.bf16 %v7027_v50  ;;  %v9644_v5 = vunpack.c.l.bf16 %v7078_v15 }
 0x2e3   : > { %v2832_v32 = vmax.f32 %v9639_v3, %v9638_v27  ;;  %v2853_v59 = vmax.f32 %v9641_v63, %v9640_v46  ;;  %v9645_v26 = vunpack.c.l.bf16 %v7030_v55  ;;  %v9646_v9 = vunpack.c.h.bf16 %v7078_v15 }
 0x2e4   : > { %v2874_v51 = vmax.f32 %v9643_v4, %v9642_v8  ;;  %v9647_v49 = vunpack.c.h.bf16 %v7030_v55  ;;  %v9648_v0 = vunpack.c.l.bf16 %v7081_v16  ;;  %v9649_v19 = vunpack.c.l.bf16 %v7033_v56 }
 0x2e5   : > { %v2895_v39 = vmax.f32 %v9645_v26, %v9644_v5  ;;  %v9650_v10 = vunpack.c.h.bf16 %v7081_v16  ;;  %v9651_v50 = vunpack.c.h.bf16 %v7033_v56  ;;  %v2825_v20 = vmax.f32 %v7219_v24, %v2811_v43 }
 0x2e6   : > { %v2916_v35 = vmax.f32 %v9647_v49, %v9646_v9  ;;  %v2937_v33 = vmax.f32 %v9649_v19, %v9648_v0  ;;  %v2846_v1 = vmax.f32 %v7221_v52, %v2832_v32  ;;  %v2867_v25 = vmax.f32 %v7223_v34, %v2853_v59 }
 0x2e7   : > { %v2958_v7 = vmax.f32 %v9651_v50, %v9650_v10  ;;  %v2888_v15 = vmax.f32 %v7225_v13, %v2874_v51  ;;  %v2909_v55 = vmax.f32 %v7227_v47, %v2895_v39  ;;  %v2826_v16 = vrot.slane %v2825_v20, 4 }
 0x2e8   : > { %v2930_v30 = vmax.f32 %v7229_v48, %v2916_v35  ;;  %v2951_v58 = vmax.f32 %v7231_v60, %v2937_v33  ;;  %v2847_v37 = vrot.slane %v2846_v1, 4  ;;  %v2868_v56 = vrot.slane %v2867_v25, 4 }
 0x2e9   : > { %v2972_v12 = vmax.f32 %v7233_v53, %v2958_v7  ;;  %v2889_v6 = vrot.slane %v2888_v15, 4  ;;  %v2910_v40 = vrot.slane %v2909_v55, 4  ;;  %v2827_v62 = vmax.f32 %v2825_v20, %v2826_v16 }
 0x2ea   : > { %v2931_v24 = vrot.slane %v2930_v30, 4  ;;  %v2952_v45 = vrot.slane %v2951_v58, 4  ;;  %v2848_v34 = vmax.f32 %v2846_v1, %v2847_v37  ;;  %v2869_v38 = vmax.f32 %v2867_v25, %v2868_v56 }
 0x2eb   : > { %v2973_v52 = vrot.slane %v2972_v12, 4  ;;  %v2890_v13 = vmax.f32 %v2888_v15, %v2889_v6  ;;  %v2911_v43 = vmax.f32 %v2909_v55, %v2910_v40  ;;  %v2828_v3 = vrot.slane %v2827_v62, 2 }
 0x2ec   : > { %v2932_v47 = vmax.f32 %v2930_v30, %v2931_v24  ;;  %v2953_v27 = vmax.f32 %v2951_v58, %v2952_v45  ;;  %v2849_v60 = vrot.slane %v2848_v34, 2  ;;  %v2870_v32 = vrot.slane %v2869_v38, 2 }
 0x2ed   : > { %v2974_v48 = vmax.f32 %v2972_v12, %v2973_v52  ;;  %v2891_v53 = vrot.slane %v2890_v13, 2  ;;  %v2912_v46 = vrot.slane %v2911_v43, 2  ;;  %v2829_v4 = vmax.f32 %v2827_v62, %v2828_v3  ;;  %v9656_v62 = vld [vmem:[#allocation13_spill] sm:$0xff]  ;;  %v9662_v3 = vld [vmem:[#allocation14_spill] sm:$0xff] }
 0x2ee   : > { %v2933_v63 = vrot.slane %v2932_v47, 2  ;;  %v2954_v59 = vrot.slane %v2953_v27, 2  ;;  %v2850_v51 = vmax.f32 %v2848_v34, %v2849_v60  ;;  %v2871_v5 = vmax.f32 %v2869_v38, %v2870_v32  ;;  %v9658_v38 = vld [vmem:[#allocation10_spill] sm:$0xff]  ;;  %v9664_v32 = vld [vmem:[#allocation11_spill] sm:$0xff] }
 0x2ef   : > { %v2975_v8 = vrot.slane %v2974_v48, 2  ;;  %v2892_v26 = vmax.f32 %v2890_v13, %v2891_v53  ;;  %v2913_v39 = vmax.f32 %v2911_v43, %v2912_v46  ;;  %v2830_v0 = vrot.slane %v2829_v4, 1 }
 0x2f0   : > { %v2934_v9 = vmax.f32 %v2932_v47, %v2933_v63  ;;  %v2955_v49 = vmax.f32 %v2953_v27, %v2954_v59  ;;  %v2851_v19 = vrot.slane %v2850_v51, 1  ;;  %v2872_v33 = vrot.slane %v2871_v5, 1  ;;  %v9668_v59 = vld [vmem:[#allocation15_spill] sm:$0xff] }
 0x2f1   : > { %v2976_v35 = vmax.f32 %v2974_v48, %v2975_v8  ;;  %v2893_v10 = vrot.slane %v2892_v26, 1  ;;  %v2914_v50 = vrot.slane %v2913_v39, 1  ;;  %v7975_v25 = vmax.f32 %v2829_v4, %v2830_v0  ;;  %v9670_v4 = vld [vmem:[#allocation12_spill] sm:$0xff]  ;;  %v9675_v0 = vld [vmem:[#allocation21_spill] sm:$0xff] }
 0x2f2   : > { %v2935_v7 = vrot.slane %v2934_v9, 1  ;;  %v2956_v20 = vrot.slane %v2955_v49, 1  ;;  %v7977_v15 = vmax.f32 %v2850_v51, %v2851_v19  ;;  %v7979_v55 = vmax.f32 %v2871_v5, %v2872_v33  ;;  %v9676_v33 = vld [vmem:[#allocation22_spill] sm:$0xff] }
 0x2f3   : > { %v2977_v1 = vrot.slane %v2976_v35, 1  ;;  %v7981_v30 = vmax.f32 %v2892_v26, %v2893_v10  ;;  %v7983_v58 = vmax.f32 %v2913_v39, %v2914_v50  ;;  %v9652_v56 = vunpack.c.l.bf16 %v7088_v21  ;;  %v9677_v50 = vld [vmem:[#allocation23_spill] sm:$0xff] }
 0x2f4   : > { %v7985_v12 = vmax.f32 %v2934_v9, %v2935_v7  ;;  %v7987_v16 = vmax.f32 %v2955_v49, %v2956_v20  ;;  %v9653_v6 = vunpack.c.l.bf16 %v7044_v61  ;;  %v9654_v24 = vunpack.c.h.bf16 %v7088_v21  ;;  %v9674_v49 = vld [vmem:[#allocation20_spill] sm:$0xff]  ;;  %v9678_v20 = vld [vmem:[#allocation26_spill] sm:$0xff] }
 0x2f5   : > { %v7989_v37 = vmax.f32 %v2976_v35, %v2977_v1  ;;  %v9655_v45 = vunpack.c.h.bf16 %v7044_v61  ;;  %v9657_v34 = vunpack.c.l.bf16 %v9656_v62  ;;  %v9659_v13 = vunpack.c.l.bf16 %v9658_v38 }
 0x2f6   : > { %v2979_v40 = vmax.f32 %v9653_v6, %v9652_v56  ;;  %v9660_v47 = vunpack.c.h.bf16 %v9656_v62  ;;  %v9661_v27 = vunpack.c.h.bf16 %v9658_v38  ;;  %v9663_v60 = vunpack.c.l.bf16 %v9662_v3  ;;  %v9679_v56 = vld [vmem:[#allocation27_spill] sm:$0xff]  ;;  %v9681_v62 = vld [vmem:[#allocation29_spill] sm:$0xff] }
 0x2f7   : > { %v3000_v52 = vmax.f32 %v9655_v45, %v9654_v24  ;;  %v3021_v43 = vmax.f32 %v9659_v13, %v9657_v34  ;;  %v9665_v53 = vunpack.c.l.bf16 %v9664_v32  ;;  %v9666_v21 = vunpack.c.h.bf16 %v9662_v3  ;;  %v9680_v24 = vld [vmem:[#allocation28_spill] sm:$0xff] }
 0x2f8   : > { %v3042_v48 = vmax.f32 %v9661_v27, %v9660_v47  ;;  %v9667_v61 = vunpack.c.h.bf16 %v9664_v32  ;;  %v9669_v8 = vunpack.c.l.bf16 %v9668_v59  ;;  %v9671_v51 = vunpack.c.l.bf16 %v9670_v4 }
 0x2f9   : > { %v3063_v46 = vmax.f32 %v9665_v53, %v9663_v60  ;;  %v9672_v26 = vunpack.c.h.bf16 %v9668_v59  ;;  %v9673_v39 = vunpack.c.h.bf16 %v9670_v4  ;;  %v2993_v35 = vmax.f32 %v9674_v49, %v2979_v40 }
 0x2fa   : > { %v3084_v63 = vmax.f32 %v9667_v61, %v9666_v21  ;;  %v3105_v5 = vmax.f32 %v9671_v51, %v9669_v8  ;;  %v3014_v19 = vmax.f32 %v9675_v0, %v3000_v52  ;;  %v3035_v10 = vmax.f32 %v9676_v33, %v3021_v43 }
 0x2fb   : > { %v3126_v9 = vmax.f32 %v9673_v39, %v9672_v26  ;;  %v3056_v7 = vmax.f32 %v9677_v50, %v3042_v48  ;;  %v3077_v1 = vmax.f32 %v9678_v20, %v3063_v46  ;;  %v2994_v38 = vrot.slane %v2993_v35, 4 }
 0x2fc   : > { %v3098_v6 = vmax.f32 %v9679_v56, %v3084_v63  ;;  %v3119_v45 = vmax.f32 %v9680_v24, %v3105_v5  ;;  %v3015_v13 = vrot.slane %v3014_v19, 4  ;;  %v3036_v47 = vrot.slane %v3035_v10, 4 }
 0x2fd   : > { %v3140_v34 = vmax.f32 %v9681_v62, %v3126_v9  ;;  %v3057_v27 = vrot.slane %v3056_v7, 4  ;;  %v3078_v3 = vrot.slane %v3077_v1, 4  ;;  %v2995_v32 = vmax.f32 %v2993_v35, %v2994_v38 }
 0x2fe   : > { %v3099_v40 = vrot.slane %v3098_v6, 4  ;;  %v3120_v60 = vrot.slane %v3119_v45, 4  ;;  %v3016_v43 = vmax.f32 %v3014_v19, %v3015_v13  ;;  %v3037_v53 = vmax.f32 %v3035_v10, %v3036_v47 }
 0x2ff   : > { %v3141_v52 = vrot.slane %v3140_v34, 4  ;;  %v3058_v48 = vmax.f32 %v3056_v7, %v3057_v27  ;;  %v3079_v21 = vmax.f32 %v3077_v1, %v3078_v3  ;;  %v2996_v59 = vrot.slane %v2995_v32, 2 }
 0x300   : > { %v3100_v46 = vmax.f32 %v3098_v6, %v3099_v40  ;;  %v3121_v61 = vmax.f32 %v3119_v45, %v3120_v60  ;;  %v3017_v8 = vrot.slane %v3016_v43, 2  ;;  %v3038_v4 = vrot.slane %v3037_v53, 2 }
 0x301   : > { %v3142_v63 = vmax.f32 %v3140_v34, %v3141_v52  ;;  %v3059_v51 = vrot.slane %v3058_v48, 2  ;;  %v3080_v5 = vrot.slane %v3079_v21, 2  ;;  %v2997_v49 = vmax.f32 %v2995_v32, %v2996_v59  ;;  %v9686_v32 = vld [vmem:[#allocation32_spill] sm:$0xff]  ;;  %v9692_v59 = vld [vmem:[#allocation33_spill] sm:$0xff] }
 0x302   : > { %v3101_v26 = vrot.slane %v3100_v46, 2  ;;  %v3122_v39 = vrot.slane %v3121_v61, 2  ;;  %v3018_v0 = vmax.f32 %v3016_v43, %v3017_v8  ;;  %v3039_v33 = vmax.f32 %v3037_v53, %v3038_v4  ;;  %v9688_v53 = vld [vmem:[#allocation16_spill] sm:$0xff]  ;;  %v9694_v4 = vld [vmem:[#allocation17_spill] sm:$0xff] }
 0x303   : > { %v3143_v9 = vrot.slane %v3142_v63, 2  ;;  %v3060_v50 = vmax.f32 %v3058_v48, %v3059_v51  ;;  %v3081_v35 = vmax.f32 %v3079_v21, %v3080_v5  ;;  %v2998_v20 = vrot.slane %v2997_v49, 1 }
 0x304   : > { %v3102_v19 = vmax.f32 %v3100_v46, %v3101_v26  ;;  %v3123_v10 = vmax.f32 %v3121_v61, %v3122_v39  ;;  %v3019_v1 = vrot.slane %v3018_v0, 1  ;;  %v3040_v56 = vrot.slane %v3039_v33, 1 }
 0x305   : > { %v3144_v7 = vmax.f32 %v3142_v63, %v3143_v9  ;;  %v3061_v6 = vrot.slane %v3060_v50, 1  ;;  %v3082_v24 = vrot.slane %v3081_v35, 1  ;;  %v8031_v38 = vmax.f32 %v2997_v49, %v2998_v20  ;;  %v9698_v49 = vld [vmem:[#allocation34_spill] sm:$0xff]  ;;  %v9704_v20 = vld [vmem:[#allocation35_spill] sm:$0xff] }
 0x306   : > { %v3103_v45 = vrot.slane %v3102_v19, 1  ;;  %v3124_v62 = vrot.slane %v3123_v10, 1  ;;  %v8033_v13 = vmax.f32 %v3018_v0, %v3019_v1  ;;  %v8035_v47 = vmax.f32 %v3039_v33, %v3040_v56  ;;  %v9700_v33 = vld [vmem:[#allocation18_spill] sm:$0xff]  ;;  %v9706_v56 = vld [vmem:[#allocation19_spill] sm:$0xff] }
 0x307   : > { %v3145_v34 = vrot.slane %v3144_v7, 1  ;;  %v8037_v27 = vmax.f32 %v3060_v50, %v3061_v6  ;;  %v8039_v3 = vmax.f32 %v3081_v35, %v3082_v24  ;;  %v9687_v43 = vunpack.c.l.bf16 %v9686_v32 }
 0x308   : > { %v8041_v40 = vmax.f32 %v3102_v19, %v3103_v45  ;;  %v8043_v60 = vmax.f32 %v3123_v10, %v3124_v62  ;;  %v9689_v48 = vunpack.c.l.bf16 %v9688_v53  ;;  %v9690_v46 = vunpack.c.h.bf16 %v9686_v32  ;;  %v9710_v32 = vld [vmem:[#allocation40_spill] sm:$0xff] }
 0x309   : > { %9682 = vst [vmem:[#allocation13_spill] sm:$0xff] %v8039_v3  ;;  %v8045_v52 = vmax.f32 %v3144_v7, %v3145_v34  ;;  %v9691_v61 = vunpack.c.h.bf16 %v9688_v53  ;;  %v9693_v8 = vunpack.c.l.bf16 %v9692_v59  ;;  %v9695_v51 = vunpack.c.l.bf16 %v9694_v4  ;;  %v9711_v53 = vld [vmem:[#allocation41_spill] sm:$0xff] }
 0x30a   : > { %9683 = vst [vmem:[#allocation10_spill] sm:$0xff] %v8041_v40  ;;  %9684 = vst [vmem:[#allocation14_spill] sm:$0xff] %v8043_v60  ;;  %v3147_v21 = vmax.f32 %v9689_v48, %v9687_v43  ;;  %v9696_v26 = vunpack.c.h.bf16 %v9692_v59  ;;  %v9697_v39 = vunpack.c.h.bf16 %v9694_v4  ;;  %v9699_v0 = vunpack.c.l.bf16 %v9698_v49  ;;  %v9713_v59 = vld [vmem:[#allocation43_spill] sm:$0xff]  ;;  %v9714_v4 = vld [vmem:[#allocation44_spill] sm:$0xff] }
 0x30b   : > { %9685 = vst [vmem:[#allocation11_spill] sm:$0xff] %v8045_v52  ;;  %v3168_v63 = vmax.f32 %v9691_v61, %v9690_v46  ;;  %v3189_v5 = vmax.f32 %v9695_v51, %v9693_v8  ;;  %v9701_v50 = vunpack.c.l.bf16 %v9700_v33  ;;  %v9702_v19 = vunpack.c.h.bf16 %v9698_v49  ;;  %v9712_v46 = vld [vmem:[#allocation42_spill] sm:$0xff] }
 0x30c   : > { %v3210_v9 = vmax.f32 %v9697_v39, %v9696_v26  ;;  %v9703_v10 = vunpack.c.h.bf16 %v9700_v33  ;;  %v9705_v1 = vunpack.c.l.bf16 %v9704_v20  ;;  %v9707_v6 = vunpack.c.l.bf16 %v9706_v56  ;;  %v9715_v26 = vld [vmem:[#allocation45_spill] sm:$0xff]  ;;  %v9716_v49 = vld [vmem:[#allocation46_spill] sm:$0xff]  ;;  %v9717_v33 = vld [vmem:[#allocation47_spill] sm:$0xff] }
 0x30d   : > { %v3231_v35 = vmax.f32 %v9701_v50, %v9699_v0  ;;  %v9708_v45 = vunpack.c.h.bf16 %v9704_v20  ;;  %v9709_v62 = vunpack.c.h.bf16 %v9706_v56  ;;  %v3161_v43 = vmax.f32 %v9710_v32, %v3147_v21 }
 0x30e   : > { %v3252_v7 = vmax.f32 %v9703_v10, %v9702_v19  ;;  %v3273_v24 = vmax.f32 %v9707_v6, %v9705_v1  ;;  %v3182_v48 = vmax.f32 %v9711_v53, %v3168_v63  ;;  %v3203_v61 = vmax.f32 %v9712_v46, %v3189_v5 }
 0x30f   : > { %v3294_v34 = vmax.f32 %v9709_v62, %v9708_v45  ;;  %v3224_v8 = vmax.f32 %v9713_v59, %v3210_v9  ;;  %v3245_v51 = vmax.f32 %v9714_v4, %v3231_v35  ;;  %v3162_v19 = vrot.slane %v3161_v43, 4 }
 0x310   : > { %v3266_v39 = vmax.f32 %v9715_v26, %v3252_v7  ;;  %v3287_v0 = vmax.f32 %v9716_v49, %v3273_v24  ;;  %v3183_v10 = vrot.slane %v3182_v48, 4  ;;  %v3204_v20 = vrot.slane %v3203_v61, 4 }
 0x311   : > { %v3308_v50 = vmax.f32 %v9717_v33, %v3294_v34  ;;  %v3225_v1 = vrot.slane %v3224_v8, 4  ;;  %v3246_v56 = vrot.slane %v3245_v51, 4  ;;  %v3163_v45 = vmax.f32 %v3161_v43, %v3162_v19 }
 0x312   : > { %v3267_v21 = vrot.slane %v3266_v39, 4  ;;  %v3288_v6 = vrot.slane %v3287_v0, 4  ;;  %v3184_v5 = vmax.f32 %v3182_v48, %v3183_v10  ;;  %v3205_v62 = vmax.f32 %v3203_v61, %v3204_v20 }
 0x313   : > { %v3309_v63 = vrot.slane %v3308_v50, 4  ;;  %v3226_v9 = vmax.f32 %v3224_v8, %v3225_v1  ;;  %v3247_v32 = vmax.f32 %v3245_v51, %v3246_v56  ;;  %v3164_v46 = vrot.slane %v3163_v45, 2 }
 0x314   : > { %v3268_v35 = vmax.f32 %v3266_v39, %v3267_v21  ;;  %v3289_v53 = vmax.f32 %v3287_v0, %v3288_v6  ;;  %v3185_v24 = vrot.slane %v3184_v5, 2  ;;  %v3206_v59 = vrot.slane %v3205_v62, 2 }
 0x315   : > { %v3310_v7 = vmax.f32 %v3308_v50, %v3309_v63  ;;  %v3227_v34 = vrot.slane %v3226_v9, 2  ;;  %v3248_v4 = vrot.slane %v3247_v32, 2  ;;  %v3165_v60 = vmax.f32 %v3163_v45, %v3164_v46 }
 0x316   : > { %v3269_v26 = vrot.slane %v3268_v35, 2  ;;  %v3290_v49 = vrot.slane %v3289_v53, 2  ;;  %v3186_v52 = vmax.f32 %v3184_v5, %v3185_v24  ;;  %v3207_v3 = vmax.f32 %v3205_v62, %v3206_v59  ;;  %v9734_v59 = vld [vmem:[#allocation25_spill] sm:$0xff] }
 0x317   : > { %v3311_v33 = vrot.slane %v3310_v7, 2  ;;  %v3228_v40 = vmax.f32 %v3226_v9, %v3227_v34  ;;  %v3249_v43 = vmax.f32 %v3247_v32, %v3248_v4  ;;  %v3166_v51 = vrot.slane %v3165_v60, 1  ;;  %v9726_v32 = vld [vmem:[#allocation36_spill] sm:$0xff] }
 0x318   : > { %v3270_v48 = vmax.f32 %v3268_v35, %v3269_v26  ;;  %v3291_v61 = vmax.f32 %v3289_v53, %v3290_v49  ;;  %v3187_v39 = vrot.slane %v3186_v52, 1  ;;  %v3208_v0 = vrot.slane %v3207_v3, 1  ;;  %v9728_v53 = vld [vmem:[#allocation24_spill] sm:$0xff] }
 0x319   : > { %v3312_v8 = vmax.f32 %v3310_v7, %v3311_v33  ;;  %v3229_v50 = vrot.slane %v3228_v40, 1  ;;  %v3250_v19 = vrot.slane %v3249_v43, 1  ;;  %v8087_v56 = vmax.f32 %v3165_v60, %v3166_v51 }
 0x31a   : > { %v3271_v10 = vrot.slane %v3270_v48, 1  ;;  %v3292_v20 = vrot.slane %v3291_v61, 1  ;;  %v8089_v21 = vmax.f32 %v3186_v52, %v3187_v39  ;;  %v8091_v6 = vmax.f32 %v3207_v3, %v3208_v0 }
 0x31b   : > { %v3313_v1 = vrot.slane %v3312_v8, 1  ;;  %9718 = vst [vmem:[#allocation15_spill] sm:$0xff] %v8087_v56  ;;  %v8093_v63 = vmax.f32 %v3228_v40, %v3229_v50  ;;  %v8095_v45 = vmax.f32 %v3249_v43, %v3250_v19  ;;  %v9727_v35 = vunpack.c.l.bf16 %v9726_v32  ;;  %v9732_v40 = vld [vmem:[#allocation37_spill] sm:$0xff]  ;;  %v9738_v43 = vld [vmem:[#allocation38_spill] sm:$0xff]  ;;  %v9744_v19 = vld [vmem:[#allocation39_spill] sm:$0xff] }
 0x31c   : > { %9719 = vst [vmem:[#allocation12_spill] sm:$0xff] %v8089_v21  ;;  %9720 = vst [vmem:[#allocation20_spill] sm:$0xff] %v8091_v6  ;;  %v8097_v5 = vmax.f32 %v3270_v48, %v3271_v10  ;;  %v8099_v62 = vmax.f32 %v3291_v61, %v3292_v20  ;;  %v9729_v7 = vunpack.c.l.bf16 %v9728_v53  ;;  %v9730_v52 = vunpack.c.h.bf16 %v9726_v32  ;;  %v9740_v61 = vld [vmem:[#allocation30_spill] sm:$0xff]  ;;  %v9746_v20 = vld [vmem:[#allocation31_spill] sm:$0xff] }
 0x31d   : > { %9721 = vst [vmem:[#allocation21_spill] sm:$0xff] %v8093_v63  ;;  %9722 = vst [vmem:[#allocation22_spill] sm:$0xff] %v8095_v45  ;;  %v8101_v9 = vmax.f32 %v3312_v8, %v3313_v1  ;;  %v9731_v3 = vunpack.c.h.bf16 %v9728_v53  ;;  %v9733_v24 = vunpack.c.l.bf16 %v9732_v40  ;;  %v9735_v34 = vunpack.c.l.bf16 %v9734_v59 }
 0x31e   : > { %9723 = vst [vmem:[#allocation23_spill] sm:$0xff] %v8097_v5  ;;  %9724 = vst [vmem:[#allocation26_spill] sm:$0xff] %v8099_v62  ;;  %v3315_v60 = vmax.f32 %v9729_v7, %v9727_v35  ;;  %v9736_v26 = vunpack.c.h.bf16 %v9732_v40  ;;  %v9737_v49 = vunpack.c.h.bf16 %v9734_v59  ;;  %v9739_v48 = vunpack.c.l.bf16 %v9738_v43  ;;  %v9751_v40 = vld [vmem:[#allocation53_spill] sm:$0xff]  ;;  %v9752_v59 = vld [vmem:[#allocation54_spill] sm:$0xff] }
 0x31f   : > { %9725 = vst [vmem:[#allocation27_spill] sm:$0xff] %v8101_v9  ;;  %v3336_v46 = vmax.f32 %v9731_v3, %v9730_v52  ;;  %v3357_v4 = vmax.f32 %v9735_v34, %v9733_v24  ;;  %v9741_v8 = vunpack.c.l.bf16 %v9740_v61  ;;  %v9742_v39 = vunpack.c.h.bf16 %v9738_v43  ;;  %v9750_v52 = vld [vmem:[#allocation52_spill] sm:$0xff]  ;;  %v9754_v43 = vld [vmem:[#allocation58_spill] sm:$0xff] }
 0x320   : > { %v3378_v33 = vmax.f32 %v9737_v49, %v9736_v26  ;;  %v9743_v0 = vunpack.c.h.bf16 %v9740_v61  ;;  %v9745_v10 = vunpack.c.l.bf16 %v9744_v19  ;;  %v9747_v1 = vunpack.c.l.bf16 %v9746_v20  ;;  %v9753_v26 = vld [vmem:[#allocation55_spill] sm:$0xff] }
 0x321   : > { %v3399_v51 = vmax.f32 %v9741_v8, %v9739_v48  ;;  %v9748_v35 = vunpack.c.h.bf16 %v9744_v19  ;;  %v9749_v53 = vunpack.c.h.bf16 %v9746_v20  ;;  %v3329_v3 = vmax.f32 %v9750_v52, %v3315_v60  ;;  %v9755_v61 = vld [vmem:[#allocation59_spill] sm:$0xff] }
 0x322   : > { %v3420_v50 = vmax.f32 %v9743_v0, %v9742_v39  ;;  %v3441_v32 = vmax.f32 %v9747_v1, %v9745_v10  ;;  %v3350_v24 = vmax.f32 %v9751_v40, %v3336_v46  ;;  %v3371_v34 = vmax.f32 %v9752_v59, %v3357_v4  ;;  %v9756_v39 = vld [vmem:[#allocation60_spill] sm:$0xff]  ;;  %v9757_v10 = vld [vmem:[#allocation61_spill] sm:$0xff] }
 0x323   : > { %v3462_v7 = vmax.f32 %v9749_v53, %v9748_v35  ;;  %v3392_v49 = vmax.f32 %v9753_v26, %v3378_v33  ;;  %v3413_v48 = vmax.f32 %v9754_v43, %v3399_v51  ;;  %v3330_v19 = vrot.slane %v3329_v3, 4 }
 0x324   : > { %v3434_v8 = vmax.f32 %v9755_v61, %v3420_v50  ;;  %v3455_v0 = vmax.f32 %v9756_v39, %v3441_v32  ;;  %v3351_v62 = vrot.slane %v3350_v24, 4  ;;  %v3372_v20 = vrot.slane %v3371_v34, 4 }
 0x325   : > { %v3476_v1 = vmax.f32 %v9757_v10, %v3462_v7  ;;  %v3393_v35 = vrot.slane %v3392_v49, 4  ;;  %v3414_v53 = vrot.slane %v3413_v48, 4  ;;  %v3331_v40 = vmax.f32 %v3329_v3, %v3330_v19 }
 0x326   : > { %v3435_v60 = vrot.slane %v3434_v8, 4  ;;  %v3456_v52 = vrot.slane %v3455_v0, 4  ;;  %v3352_v4 = vmax.f32 %v3350_v24, %v3351_v62  ;;  %v3373_v59 = vmax.f32 %v3371_v34, %v3372_v20 }
 0x327   : > { %v3477_v46 = vrot.slane %v3476_v1, 4  ;;  %v3394_v33 = vmax.f32 %v3392_v49, %v3393_v35  ;;  %v3415_v26 = vmax.f32 %v3413_v48, %v3414_v53  ;;  %v3332_v61 = vrot.slane %v3331_v40, 2 }
 0x328   : > { %v3436_v51 = vmax.f32 %v3434_v8, %v3435_v60  ;;  %v3457_v43 = vmax.f32 %v3455_v0, %v3456_v52  ;;  %v3353_v32 = vrot.slane %v3352_v4, 2  ;;  %v3374_v39 = vrot.slane %v3373_v59, 2 }
 0x329   : > { %v3478_v50 = vmax.f32 %v3476_v1, %v3477_v46  ;;  %v3395_v7 = vrot.slane %v3394_v33, 2  ;;  %v3416_v10 = vrot.slane %v3415_v26, 2  ;;  %v3333_v6 = vmax.f32 %v3331_v40, %v3332_v61 }
 0x32a   : > { %v3437_v9 = vrot.slane %v3436_v51, 2  ;;  %v3458_v45 = vrot.slane %v3457_v43, 2  ;;  %v3354_v63 = vmax.f32 %v3352_v4, %v3353_v32  ;;  %v3375_v56 = vmax.f32 %v3373_v59, %v3374_v39  ;;  %v9766_v4 = vld [vmem:[#allocation64_spill] sm:$0xff] }
 0x32b   : > { %v3479_v5 = vrot.slane %v3478_v50, 2  ;;  %v3396_v21 = vmax.f32 %v3394_v33, %v3395_v7  ;;  %v3417_v3 = vmax.f32 %v3415_v26, %v3416_v10  ;;  %v3334_v49 = vrot.slane %v3333_v6, 1  ;;  %v9768_v33 = vld [vmem:[#allocation48_spill] sm:$0xff] }
 0x32c   : > { %v3438_v62 = vmax.f32 %v3436_v51, %v3437_v9  ;;  %v3459_v24 = vmax.f32 %v3457_v43, %v3458_v45  ;;  %v3355_v48 = vrot.slane %v3354_v63, 1  ;;  %v3376_v8 = vrot.slane %v3375_v56, 1 }
 0x32d   : > { %v3480_v34 = vmax.f32 %v3478_v50, %v3479_v5  ;;  %v3397_v0 = vrot.slane %v3396_v21, 1  ;;  %v3418_v1 = vrot.slane %v3417_v3, 1  ;;  %v8143_v53 = vmax.f32 %v3333_v6, %v3334_v49  ;;  %v9774_v50 = vld [vmem:[#allocation49_spill] sm:$0xff] }
 0x32e   : > { %v3439_v19 = vrot.slane %v3438_v62, 1  ;;  %v3460_v20 = vrot.slane %v3459_v24, 1  ;;  %v8145_v60 = vmax.f32 %v3354_v63, %v3355_v48  ;;  %v8147_v52 = vmax.f32 %v3375_v56, %v3376_v8 }
 0x32f   : > { %v3481_v35 = vrot.slane %v3480_v34, 1  ;;  %9758 = vst [vmem:[#allocation28_spill] sm:$0xff] %v8143_v53  ;;  %v8149_v46 = vmax.f32 %v3396_v21, %v3397_v0  ;;  %v8151_v40 = vmax.f32 %v3417_v3, %v3418_v1  ;;  %v9767_v59 = vunpack.c.l.bf16 %v9766_v4  ;;  %v9772_v21 = vld [vmem:[#allocation65_spill] sm:$0xff]  ;;  %v9778_v3 = vld [vmem:[#allocation66_spill] sm:$0xff]  ;;  %v9784_v1 = vld [vmem:[#allocation67_spill] sm:$0xff] }
 0x330   : > { %9759 = vst [vmem:[#allocation29_spill] sm:$0xff] %v8145_v60  ;;  %9760 = vst [vmem:[#allocation32_spill] sm:$0xff] %v8147_v52  ;;  %v8153_v45 = vmax.f32 %v3438_v62, %v3439_v19  ;;  %v8155_v5 = vmax.f32 %v3459_v24, %v3460_v20  ;;  %v9769_v26 = vunpack.c.l.bf16 %v9768_v33  ;;  %v9770_v63 = vunpack.c.h.bf16 %v9766_v4  ;;  %v9780_v24 = vld [vmem:[#allocation50_spill] sm:$0xff]  ;;  %v9786_v20 = vld [vmem:[#allocation51_spill] sm:$0xff] }
 0x331   : > { %9761 = vst [vmem:[#allocation16_spill] sm:$0xff] %v8149_v46  ;;  %9762 = vst [vmem:[#allocation33_spill] sm:$0xff] %v8151_v40  ;;  %v8157_v9 = vmax.f32 %v3480_v34, %v3481_v35  ;;  %v9771_v56 = vunpack.c.h.bf16 %v9768_v33  ;;  %v9773_v43 = vunpack.c.l.bf16 %v9772_v21  ;;  %v9775_v61 = vunpack.c.l.bf16 %v9774_v50 }
 0x332   : > { %9763 = vst [vmem:[#allocation17_spill] sm:$0xff] %v8153_v45  ;;  %9764 = vst [vmem:[#allocation34_spill] sm:$0xff] %v8155_v5  ;;  %v3483_v6 = vmax.f32 %v9769_v26, %v9767_v59  ;;  %v9776_v39 = vunpack.c.h.bf16 %v9772_v21  ;;  %v9777_v7 = vunpack.c.h.bf16 %v9774_v50  ;;  %v9779_v62 = vunpack.c.l.bf16 %v9778_v3  ;;  %v9791_v21 = vld [vmem:[#allocation73_spill] sm:$0xff]  ;;  %v9792_v50 = vld [vmem:[#allocation74_spill] sm:$0xff] }
 0x333   : > { %9765 = vst [vmem:[#allocation18_spill] sm:$0xff] %v8157_v9  ;;  %v3504_v51 = vmax.f32 %v9771_v56, %v9770_v63  ;;  %v3525_v32 = vmax.f32 %v9775_v61, %v9773_v43  ;;  %v9781_v34 = vunpack.c.l.bf16 %v9780_v24  ;;  %v9782_v48 = vunpack.c.h.bf16 %v9778_v3  ;;  %v9790_v63 = vld [vmem:[#allocation72_spill] sm:$0xff] }
 0x334   : > { %v3546_v10 = vmax.f32 %v9777_v7, %v9776_v39  ;;  %v9783_v8 = vunpack.c.h.bf16 %v9780_v24  ;;  %v9785_v19 = vunpack.c.l.bf16 %v9784_v1  ;;  %v9787_v35 = vunpack.c.l.bf16 %v9786_v20  ;;  %v9793_v39 = vld [vmem:[#allocation75_spill] sm:$0xff]  ;;  %v9794_v3 = vld [vmem:[#allocation76_spill] sm:$0xff]  ;;  %v9795_v24 = vld [vmem:[#allocation77_spill] sm:$0xff] }
 0x335   : > { %v3567_v49 = vmax.f32 %v9781_v34, %v9779_v62  ;;  %v9788_v59 = vunpack.c.h.bf16 %v9784_v1  ;;  %v9789_v33 = vunpack.c.h.bf16 %v9786_v20  ;;  %v3497_v56 = vmax.f32 %v9790_v63, %v3483_v6 }
 0x336   : > { %v3588_v0 = vmax.f32 %v9783_v8, %v9782_v48  ;;  %v3609_v4 = vmax.f32 %v9787_v35, %v9785_v19  ;;  %v3518_v43 = vmax.f32 %v9791_v21, %v3504_v51  ;;  %v3539_v61 = vmax.f32 %v9792_v50, %v3525_v32  ;;  %v9796_v48 = vld [vmem:[#allocation78_spill] sm:$0xff]  ;;  %v9797_v19 = vld [vmem:[#allocation79_spill] sm:$0xff] }
 0x337   : > { %v3630_v26 = vmax.f32 %v9789_v33, %v9788_v59  ;;  %v3560_v7 = vmax.f32 %v9793_v39, %v3546_v10  ;;  %v3581_v62 = vmax.f32 %v9794_v3, %v3567_v49  ;;  %v3498_v1 = vrot.slane %v3497_v56, 4 }
 0x338   : > { %v3602_v34 = vmax.f32 %v9795_v24, %v3588_v0  ;;  %v3623_v8 = vmax.f32 %v9796_v48, %v3609_v4  ;;  %v3519_v5 = vrot.slane %v3518_v43, 4  ;;  %v3540_v20 = vrot.slane %v3539_v61, 4 }
 0x339   : > { %v3644_v35 = vmax.f32 %v9797_v19, %v3630_v26  ;;  %v3561_v59 = vrot.slane %v3560_v7, 4  ;;  %v3582_v33 = vrot.slane %v3581_v62, 4  ;;  %v3499_v21 = vmax.f32 %v3497_v56, %v3498_v1 }
 0x33a   : > { %v3603_v6 = vrot.slane %v3602_v34, 4  ;;  %v3624_v63 = vrot.slane %v3623_v8, 4  ;;  %v3520_v32 = vmax.f32 %v3518_v43, %v3519_v5  ;;  %v3541_v50 = vmax.f32 %v3539_v61, %v3540_v20 }
 0x33b   : > { %v3645_v51 = vrot.slane %v3644_v35, 4  ;;  %v3562_v10 = vmax.f32 %v3560_v7, %v3561_v59  ;;  %v3583_v39 = vmax.f32 %v3581_v62, %v3582_v33  ;;  %v3500_v24 = vrot.slane %v3499_v21, 2 }
 0x33c   : > { %v3604_v49 = vmax.f32 %v3602_v34, %v3603_v6  ;;  %v3625_v3 = vmax.f32 %v3623_v8, %v3624_v63  ;;  %v3521_v4 = vrot.slane %v3520_v32, 2  ;;  %v3542_v48 = vrot.slane %v3541_v50, 2 }
 0x33d   : > { %v3646_v0 = vmax.f32 %v3644_v35, %v3645_v51  ;;  %v3563_v26 = vrot.slane %v3562_v10, 2  ;;  %v3584_v19 = vrot.slane %v3583_v39, 2  ;;  %v3501_v52 = vmax.f32 %v3499_v21, %v3500_v24 }
 0x33e   : > { %v3605_v9 = vrot.slane %v3604_v49, 2  ;;  %v3626_v40 = vrot.slane %v3625_v3, 2  ;;  %v3522_v46 = vmax.f32 %v3520_v32, %v3521_v4  ;;  %v3543_v53 = vmax.f32 %v3541_v50, %v3542_v48  ;;  %v9806_v32 = vld [vmem:[#allocation68_spill] sm:$0xff] }
 0x33f   : > { %v3647_v45 = vrot.slane %v3646_v0, 2  ;;  %v3564_v60 = vmax.f32 %v3562_v10, %v3563_v26  ;;  %v3585_v56 = vmax.f32 %v3583_v39, %v3584_v19  ;;  %v3502_v7 = vrot.slane %v3501_v52, 1  ;;  %v9808_v10 = vld [vmem:[#allocation56_spill] sm:$0xff] }
 0x340   : > { %v3606_v5 = vmax.f32 %v3604_v49, %v3605_v9  ;;  %v3627_v43 = vmax.f32 %v3625_v3, %v3626_v40  ;;  %v3523_v62 = vrot.slane %v3522_v46, 1  ;;  %v3544_v34 = vrot.slane %v3543_v53, 1 }
 0x341   : > { %v3648_v61 = vmax.f32 %v3646_v0, %v3647_v45  ;;  %v3565_v8 = vrot.slane %v3564_v60, 1  ;;  %v3586_v35 = vrot.slane %v3585_v56, 1  ;;  %v8199_v33 = vmax.f32 %v3501_v52, %v3502_v7  ;;  %v9814_v0 = vld [vmem:[#allocation57_spill] sm:$0xff] }
 0x342   : > { %v3607_v1 = vrot.slane %v3606_v5, 1  ;;  %v3628_v20 = vrot.slane %v3627_v43, 1  ;;  %v8201_v6 = vmax.f32 %v3522_v46, %v3523_v62  ;;  %v8203_v63 = vmax.f32 %v3543_v53, %v3544_v34 }
 0x343   : > { %v3649_v59 = vrot.slane %v3648_v61, 1  ;;  %9798 = vst [vmem:[#allocation35_spill] sm:$0xff] %v8199_v33  ;;  %v8205_v51 = vmax.f32 %v3564_v60, %v3565_v8  ;;  %v8207_v21 = vmax.f32 %v3585_v56, %v3586_v35  ;;  %v9807_v50 = vunpack.c.l.bf16 %v9806_v32  ;;  %v9812_v60 = vld [vmem:[#allocation69_spill] sm:$0xff]  ;;  %v9818_v56 = vld [vmem:[#allocation70_spill] sm:$0xff]  ;;  %v9824_v35 = vld [vmem:[#allocation71_spill] sm:$0xff] }
 0x344   : > { %9799 = vst [vmem:[#allocation19_spill] sm:$0xff] %v8201_v6  ;;  %9800 = vst [vmem:[#allocation40_spill] sm:$0xff] %v8203_v63  ;;  %v8209_v40 = vmax.f32 %v3606_v5, %v3607_v1  ;;  %v8211_v45 = vmax.f32 %v3627_v43, %v3628_v20  ;;  %v9809_v39 = vunpack.c.l.bf16 %v9808_v10  ;;  %v9810_v46 = vunpack.c.h.bf16 %v9806_v32  ;;  %v9820_v43 = vld [vmem:[#allocation62_spill] sm:$0xff]  ;;  %v9826_v20 = vld [vmem:[#allocation63_spill] sm:$0xff] }
 0x345   : > { %9801 = vst [vmem:[#allocation41_spill] sm:$0xff] %v8205_v51  ;;  %9802 = vst [vmem:[#allocation42_spill] sm:$0xff] %v8207_v21  ;;  %v8213_v9 = vmax.f32 %v3648_v61, %v3649_v59  ;;  %v9811_v53 = vunpack.c.h.bf16 %v9808_v10  ;;  %v9813_v3 = vunpack.c.l.bf16 %v9812_v60  ;;  %v9815_v24 = vunpack.c.l.bf16 %v9814_v0 }
 0x346   : > { %9803 = vst [vmem:[#allocation43_spill] sm:$0xff] %v8209_v40  ;;  %9804 = vst [vmem:[#allocation44_spill] sm:$0xff] %v8211_v45  ;;  %v3651_v52 = vmax.f32 %v9809_v39, %v9807_v50  ;;  %v9816_v48 = vunpack.c.h.bf16 %v9812_v60  ;;  %v9817_v26 = vunpack.c.h.bf16 %v9814_v0  ;;  %v9819_v5 = vunpack.c.l.bf16 %v9818_v56  ;;  %v9831_v60 = vld [vmem:[#allocation85_spill] sm:$0xff]  ;;  %v9832_v0 = vld [vmem:[#allocation86_spill] sm:$0xff] }
 0x347   : > { %9805 = vst [vmem:[#allocation45_spill] sm:$0xff] %v8213_v9  ;;  %v3672_v49 = vmax.f32 %v9811_v53, %v9810_v46  ;;  %v3693_v4 = vmax.f32 %v9815_v24, %v9813_v3  ;;  %v9821_v61 = vunpack.c.l.bf16 %v9820_v43  ;;  %v9822_v62 = vunpack.c.h.bf16 %v9818_v56  ;;  %v9830_v46 = vld [vmem:[#allocation84_spill] sm:$0xff]  ;;  %v9834_v56 = vld [vmem:[#allocation90_spill] sm:$0xff] }
 0x348   : > { %v3714_v19 = vmax.f32 %v9817_v26, %v9816_v48  ;;  %v9823_v34 = vunpack.c.h.bf16 %v9820_v43  ;;  %v9825_v1 = vunpack.c.l.bf16 %v9824_v35  ;;  %v9827_v59 = vunpack.c.l.bf16 %v9826_v20  ;;  %v9833_v48 = vld [vmem:[#allocation87_spill] sm:$0xff] }
 0x349   : > { %v3735_v7 = vmax.f32 %v9821_v61, %v9819_v5  ;;  %v9828_v50 = vunpack.c.h.bf16 %v9824_v35  ;;  %v9829_v10 = vunpack.c.h.bf16 %v9826_v20  ;;  %v3665_v53 = vmax.f32 %v9830_v46, %v3651_v52  ;;  %v9835_v43 = vld [vmem:[#allocation91_spill] sm:$0xff] }
 0x34a   : > { %v3756_v8 = vmax.f32 %v9823_v34, %v9822_v62  ;;  %v3777_v32 = vmax.f32 %v9827_v59, %v9825_v1  ;;  %v3686_v3 = vmax.f32 %v9831_v60, %v3672_v49  ;;  %v3707_v24 = vmax.f32 %v9832_v0, %v3693_v4  ;;  %v9836_v62 = vld [vmem:[#allocation92_spill] sm:$0xff]  ;;  %v9837_v1 = vld [vmem:[#allocation93_spill] sm:$0xff] }
 0x34b   : > { %v3798_v39 = vmax.f32 %v9829_v10, %v9828_v50  ;;  %v3728_v26 = vmax.f32 %v9833_v48, %v3714_v19  ;;  %v3749_v5 = vmax.f32 %v9834_v56, %v3735_v7  ;;  %v3666_v35 = vrot.slane %v3665_v53, 4 }
 0x34c   : > { %v3770_v61 = vmax.f32 %v9835_v43, %v3756_v8  ;;  %v3791_v34 = vmax.f32 %v9836_v62, %v3777_v32  ;;  %v3687_v45 = vrot.slane %v3686_v3, 4  ;;  %v3708_v20 = vrot.slane %v3707_v24, 4 }
 0x34d   : > { %v3812_v59 = vmax.f32 %v9837_v1, %v3798_v39  ;;  %v3729_v50 = vrot.slane %v3728_v26, 4  ;;  %v3750_v10 = vrot.slane %v3749_v5, 4  ;;  %v3667_v60 = vmax.f32 %v3665_v53, %v3666_v35 }
 0x34e   : > { %v3771_v52 = vrot.slane %v3770_v61, 4  ;;  %v3792_v46 = vrot.slane %v3791_v34, 4  ;;  %v3688_v4 = vmax.f32 %v3686_v3, %v3687_v45  ;;  %v3709_v0 = vmax.f32 %v3707_v24, %v3708_v20 }
 0x34f   : > { %v3813_v49 = vrot.slane %v3812_v59, 4  ;;  %v3730_v19 = vmax.f32 %v3728_v26, %v3729_v50  ;;  %v3751_v48 = vmax.f32 %v3749_v5, %v3750_v10  ;;  %v3668_v43 = vrot.slane %v3667_v60, 2 }
 0x350   : > { %v3772_v7 = vmax.f32 %v3770_v61, %v3771_v52  ;;  %v3793_v56 = vmax.f32 %v3791_v34, %v3792_v46  ;;  %v3689_v32 = vrot.slane %v3688_v4, 2  ;;  %v3710_v62 = vrot.slane %v3709_v0, 2 }
 0x351   : > { %v3814_v8 = vmax.f32 %v3812_v59, %v3813_v49  ;;  %v3731_v39 = vrot.slane %v3730_v19, 2  ;;  %v3752_v1 = vrot.slane %v3751_v48, 2  ;;  %v3669_v63 = vmax.f32 %v3667_v60, %v3668_v43 }
 0x352   : > { %v3773_v9 = vrot.slane %v3772_v7, 2  ;;  %v3794_v21 = vrot.slane %v3793_v56, 2  ;;  %v3690_v51 = vmax.f32 %v3688_v4, %v3689_v32  ;;  %v3711_v33 = vmax.f32 %v3709_v0, %v3710_v62  ;;  %v9838_v4 = vld [vmem:[#allocation96_spill] sm:$0xff] }
 0x353   : > { %v3815_v40 = vrot.slane %v3814_v8, 2  ;;  %v3732_v6 = vmax.f32 %v3730_v19, %v3731_v39  ;;  %v3753_v53 = vmax.f32 %v3751_v48, %v3752_v1  ;;  %v3670_v26 = vrot.slane %v3669_v63, 1  ;;  %v9840_v19 = vld [vmem:[#allocation80_spill] sm:$0xff] }
 0x354   : > { %v3774_v45 = vmax.f32 %v3772_v7, %v3773_v9  ;;  %v3795_v3 = vmax.f32 %v3793_v56, %v3794_v21  ;;  %v3691_v5 = vrot.slane %v3690_v51, 1  ;;  %v3712_v61 = vrot.slane %v3711_v33, 1 }
 0x355   : > { %v3816_v24 = vmax.f32 %v3814_v8, %v3815_v40  ;;  %v3733_v34 = vrot.slane %v3732_v6, 1  ;;  %v3754_v59 = vrot.slane %v3753_v53, 1  ;;  %v8255_v10 = vmax.f32 %v3669_v63, %v3670_v26  ;;  %v9846_v8 = vld [vmem:[#allocation81_spill] sm:$0xff] }
 0x356   : > { %v3775_v35 = vrot.slane %v3774_v45, 1  ;;  %v3796_v20 = vrot.slane %v3795_v3, 1  ;;  %v8257_v52 = vmax.f32 %v3690_v51, %v3691_v5  ;;  %v8259_v46 = vmax.f32 %v3711_v33, %v3712_v61 }
 0x357   : > { %v3817_v50 = vrot.slane %v3816_v24, 1  ;;  %v8261_v49 = vmax.f32 %v3732_v6, %v3733_v34  ;;  %v8263_v60 = vmax.f32 %v3753_v53, %v3754_v59  ;;  %v9839_v0 = vunpack.c.l.bf16 %v9838_v4  ;;  %v9844_v6 = vld [vmem:[#allocation97_spill] sm:$0xff]  ;;  %v9850_v53 = vld [vmem:[#allocation98_spill] sm:$0xff]  ;;  %v9856_v59 = vld [vmem:[#allocation99_spill] sm:$0xff] }
 0x358   : > { %v8265_v21 = vmax.f32 %v3774_v45, %v3775_v35  ;;  %v8267_v40 = vmax.f32 %v3795_v3, %v3796_v20  ;;  %v9841_v48 = vunpack.c.l.bf16 %v9840_v19  ;;  %v9842_v51 = vunpack.c.h.bf16 %v9838_v4  ;;  %v9852_v3 = vld [vmem:[#allocation82_spill] sm:$0xff]  ;;  %v9858_v20 = vld [vmem:[#allocation83_spill] sm:$0xff] }
 0x359   : > { %v8269_v9 = vmax.f32 %v3816_v24, %v3817_v50  ;;  %v9843_v33 = vunpack.c.h.bf16 %v9840_v19  ;;  %v9845_v56 = vunpack.c.l.bf16 %v9844_v6  ;;  %v9847_v43 = vunpack.c.l.bf16 %v9846_v8 }
 0x35a   : > { %v3819_v63 = vmax.f32 %v9841_v48, %v9839_v0  ;;  %v9848_v62 = vunpack.c.h.bf16 %v9844_v6  ;;  %v9849_v39 = vunpack.c.h.bf16 %v9846_v8  ;;  %v9851_v45 = vunpack.c.l.bf16 %v9850_v53 }
 0x35b   : > { %v3840_v7 = vmax.f32 %v9843_v33, %v9842_v51  ;;  %v3861_v32 = vmax.f32 %v9847_v43, %v9845_v56  ;;  %v9853_v24 = vunpack.c.l.bf16 %v9852_v3  ;;  %v9854_v5 = vunpack.c.h.bf16 %v9850_v53 }
 0x35c   : > { %v3882_v1 = vmax.f32 %v9849_v39, %v9848_v62  ;;  %v9855_v61 = vunpack.c.h.bf16 %v9852_v3  ;;  %v9857_v35 = vunpack.c.l.bf16 %v9856_v59  ;;  %v9859_v50 = vunpack.c.l.bf16 %v9858_v20 }
 0x35d   : > { %v3903_v26 = vmax.f32 %v9853_v24, %v9851_v45  ;;  %v9860_v0 = vunpack.c.h.bf16 %v9856_v59  ;;  %v9861_v19 = vunpack.c.h.bf16 %v9858_v20  ;;  %v3833_v51 = vmax.f32 %v7903_v36, %v3819_v63 }
 0x35e   : > { %v3924_v34 = vmax.f32 %v9855_v61, %v9854_v5  ;;  %v3945_v4 = vmax.f32 %v9859_v50, %v9857_v35  ;;  %v3854_v33 = vmax.f32 %v7905_v14, %v3840_v7  ;;  %v3875_v6 = vmax.f32 %v7907_v11, %v3861_v32 }
 0x35f   : > { %v3966_v48 = vmax.f32 %v9861_v19, %v9860_v0  ;;  %v3896_v56 = vmax.f32 %v7909_v28, %v3882_v1  ;;  %v3917_v8 = vmax.f32 %v7911_v41, %v3903_v26  ;;  %v3834_v53 = vrot.slane %v3833_v51, 4 }
 0x360   : > { %v3938_v43 = vmax.f32 %v7913_v29, %v3924_v34  ;;  %v3959_v62 = vmax.f32 %v7915_v23, %v3945_v4  ;;  %v3855_v45 = vrot.slane %v3854_v33, 4  ;;  %v3876_v3 = vrot.slane %v3875_v6, 4 }
 0x361   : > { %v3980_v39 = vmax.f32 %v7917_v42, %v3966_v48  ;;  %v3897_v24 = vrot.slane %v3896_v56, 4  ;;  %v3918_v5 = vrot.slane %v3917_v8, 4  ;;  %v3835_v7 = vmax.f32 %v3833_v51, %v3834_v53 }
 0x362   : > { %v3939_v36 = vrot.slane %v3938_v43, 4  ;;  %v3960_v63 = vrot.slane %v3959_v62, 4  ;;  %v3856_v11 = vmax.f32 %v3854_v33, %v3855_v45  ;;  %v3877_v32 = vmax.f32 %v3875_v6, %v3876_v3 }
 0x363   : > { %v3981_v14 = vrot.slane %v3980_v39, 4  ;;  %v3898_v28 = vmax.f32 %v3896_v56, %v3897_v24  ;;  %v3919_v1 = vmax.f32 %v3917_v8, %v3918_v5  ;;  %v3836_v61 = vrot.slane %v3835_v7, 2 }
 0x364   : > { %v3940_v41 = vmax.f32 %v3938_v43, %v3939_v36  ;;  %v3961_v26 = vmax.f32 %v3959_v62, %v3960_v63  ;;  %v3857_v23 = vrot.slane %v3856_v11, 2  ;;  %v3878_v34 = vrot.slane %v3877_v32, 2 }
 0x365   : > { %v3982_v29 = vmax.f32 %v3980_v39, %v3981_v14  ;;  %v3899_v42 = vrot.slane %v3898_v28, 2  ;;  %v3920_v59 = vrot.slane %v3919_v1, 2  ;;  %v3837_v4 = vmax.f32 %v3835_v7, %v3836_v61 }
 0x366   : > { %v3941_v35 = vrot.slane %v3940_v41, 2  ;;  %v3962_v20 = vrot.slane %v3961_v26, 2  ;;  %v3858_v0 = vmax.f32 %v3856_v11, %v3857_v23  ;;  %v3879_v19 = vmax.f32 %v3877_v32, %v3878_v34 }
 0x367   : > { %v3983_v50 = vrot.slane %v3982_v29, 2  ;;  %v3900_v48 = vmax.f32 %v3898_v28, %v3899_v42  ;;  %v3921_v51 = vmax.f32 %v3919_v1, %v3920_v59  ;;  %v3838_v8 = vrot.slane %v3837_v4, 1  ;;  %v9862_v1 = vld [vmem:[#allocation100_spill] sm:$0xff]  ;;  %v9868_v59 = vld [vmem:[#allocation101_spill] sm:$0xff] }
 0x368   : > { %v3942_v33 = vmax.f32 %v3940_v41, %v3941_v35  ;;  %v3963_v6 = vmax.f32 %v3961_v26, %v3962_v20  ;;  %v3859_v43 = vrot.slane %v3858_v0, 1  ;;  %v3880_v62 = vrot.slane %v3879_v19, 1  ;;  %v9864_v26 = vld [vmem:[#allocation88_spill] sm:$0xff]  ;;  %v9870_v20 = vld [vmem:[#allocation89_spill] sm:$0xff] }
 0x369   : > { %v3984_v56 = vmax.f32 %v3982_v29, %v3983_v50  ;;  %v3901_v39 = vrot.slane %v3900_v48, 1  ;;  %v3922_v53 = vrot.slane %v3921_v51, 1  ;;  %v8311_v5 = vmax.f32 %v3837_v4, %v3838_v8 }
 0x36a   : > { %v3943_v45 = vrot.slane %v3942_v33, 1  ;;  %v3964_v3 = vrot.slane %v3963_v6, 1  ;;  %v8313_v36 = vmax.f32 %v3858_v0, %v3859_v43  ;;  %v8315_v63 = vmax.f32 %v3879_v19, %v3880_v62 }
 0x36b   : > { %v3985_v24 = vrot.slane %v3984_v56, 1  ;;  %v8317_v14 = vmax.f32 %v3900_v48, %v3901_v39  ;;  %v8319_v7 = vmax.f32 %v3921_v51, %v3922_v53  ;;  %v9863_v41 = vunpack.c.l.bf16 %v9862_v1  ;;  %v9874_v51 = vld [vmem:[#allocation102_spill] sm:$0xff]  ;;  %v9880_v53 = vld [vmem:[#allocation103_spill] sm:$0xff] }
 0x36c   : > { %v8321_v11 = vmax.f32 %v3942_v33, %v3943_v45  ;;  %v8323_v32 = vmax.f32 %v3963_v6, %v3964_v3  ;;  %v9865_v29 = vunpack.c.l.bf16 %v9864_v26  ;;  %v9866_v23 = vunpack.c.h.bf16 %v9862_v1  ;;  %v9876_v6 = vld [vmem:[#allocation94_spill] sm:$0xff]  ;;  %v9882_v3 = vld [vmem:[#allocation95_spill] sm:$0xff] }
 0x36d   : > { %v8325_v28 = vmax.f32 %v3984_v56, %v3985_v24  ;;  %v9867_v34 = vunpack.c.h.bf16 %v9864_v26  ;;  %v9869_v35 = vunpack.c.l.bf16 %v9868_v59  ;;  %v9871_v50 = vunpack.c.l.bf16 %v9870_v20 }
 0x36e   : > { %v3987_v61 = vmax.f32 %v9865_v29, %v9863_v41  ;;  %v9872_v0 = vunpack.c.h.bf16 %v9868_v59  ;;  %v9873_v19 = vunpack.c.h.bf16 %v9870_v20  ;;  %v9875_v33 = vunpack.c.l.bf16 %v9874_v51 }
 0x36f   : > { %v4008_v42 = vmax.f32 %v9867_v34, %v9866_v23  ;;  %v4029_v4 = vmax.f32 %v9871_v50, %v9869_v35  ;;  %v9877_v56 = vunpack.c.l.bf16 %v9876_v6  ;;  %v9878_v43 = vunpack.c.h.bf16 %v9874_v51 }
 0x370   : > { %v4050_v48 = vmax.f32 %v9873_v19, %v9872_v0  ;;  %v9879_v62 = vunpack.c.h.bf16 %v9876_v6  ;;  %v9881_v45 = vunpack.c.l.bf16 %v9880_v53  ;;  %v9883_v24 = vunpack.c.l.bf16 %v9882_v3 }
 0x371   : > { %v4071_v8 = vmax.f32 %v9877_v56, %v9875_v33  ;;  %v9884_v41 = vunpack.c.h.bf16 %v9880_v53  ;;  %v9885_v26 = vunpack.c.h.bf16 %v9882_v3  ;;  %v4001_v23 = vmax.f32 %v7919_v17, %v3987_v61 }
 0x372   : > { %v4092_v39 = vmax.f32 %v9879_v62, %v9878_v43  ;;  %v4113_v1 = vmax.f32 %v9883_v24, %v9881_v45  ;;  %v4022_v34 = vmax.f32 %v7921_v57, %v4008_v42  ;;  %v4043_v59 = vmax.f32 %v7923_v2, %v4029_v4 }
 0x373   : > { %v4134_v29 = vmax.f32 %v9885_v26, %v9884_v41  ;;  %v4064_v35 = vmax.f32 %v7925_v31, %v4050_v48  ;;  %v4085_v20 = vmax.f32 %v7927_v18, %v4071_v8  ;;  %v4002_v51 = vrot.slane %v4001_v23, 4 }
 0x374   : > { %v4106_v50 = vmax.f32 %v7929_v22, %v4092_v39  ;;  %v4127_v0 = vmax.f32 %v7931_v44, %v4113_v1  ;;  %v4023_v33 = vrot.slane %v4022_v34, 4  ;;  %v4044_v6 = vrot.slane %v4043_v59, 4 }
 0x375   : > { %v4148_v19 = vmax.f32 %v7933_v54, %v4134_v29  ;;  %v4065_v56 = vrot.slane %v4064_v35, 4  ;;  %v4086_v43 = vrot.slane %v4085_v20, 4  ;;  %v4003_v42 = vmax.f32 %v4001_v23, %v4002_v51 }
 0x376   : > { %v4107_v17 = vrot.slane %v4106_v50, 4  ;;  %v4128_v61 = vrot.slane %v4127_v0, 4  ;;  %v4024_v2 = vmax.f32 %v4022_v34, %v4023_v33  ;;  %v4045_v4 = vmax.f32 %v4043_v59, %v4044_v6 }
 0x377   : > { %v4149_v57 = vrot.slane %v4148_v19, 4  ;;  %v4066_v31 = vmax.f32 %v4064_v35, %v4065_v56  ;;  %v4087_v48 = vmax.f32 %v4085_v20, %v4086_v43  ;;  %v4004_v62 = vrot.slane %v4003_v42, 2 }
 0x378   : > { %v4108_v18 = vmax.f32 %v4106_v50, %v4107_v17  ;;  %v4129_v8 = vmax.f32 %v4127_v0, %v4128_v61  ;;  %v4025_v44 = vrot.slane %v4024_v2, 2  ;;  %v4046_v39 = vrot.slane %v4045_v4, 2 }
 0x379   : > { %v4150_v22 = vmax.f32 %v4148_v19, %v4149_v57  ;;  %v4067_v54 = vrot.slane %v4066_v31, 2  ;;  %v4088_v53 = vrot.slane %v4087_v48, 2  ;;  %v4005_v1 = vmax.f32 %v4003_v42, %v4004_v62 }
 0x37a   : > { %v4109_v45 = vrot.slane %v4108_v18, 2  ;;  %v4130_v3 = vrot.slane %v4129_v8, 2  ;;  %v4026_v41 = vmax.f32 %v4024_v2, %v4025_v44  ;;  %v4047_v26 = vmax.f32 %v4045_v4, %v4046_v39  ;;  %v9886_v39 = vld [vmem:[#allocation10_spill] sm:$0xff] }
 0x37b   : > { %v4151_v24 = vrot.slane %v4150_v22, 2  ;;  %v4068_v29 = vmax.f32 %v4066_v31, %v4067_v54  ;;  %v4089_v23 = vmax.f32 %v4087_v48, %v4088_v53  ;;  %v4006_v20 = vrot.slane %v4005_v1, 1  ;;  %v9887_v54 = vld [vmem:[#allocation13_spill] sm:$0xff] }
 0x37c   : > { %v4110_v34 = vmax.f32 %v4108_v18, %v4109_v45  ;;  %v4131_v59 = vmax.f32 %v4129_v8, %v4130_v3  ;;  %v4027_v50 = vrot.slane %v4026_v41, 1  ;;  %v4048_v0 = vrot.slane %v4047_v26, 1  ;;  %v9888_v45 = vld [vmem:[#allocation11_spill] sm:$0xff]  ;;  %v9890_v3 = vld [vmem:[#allocation12_spill] sm:$0xff]  ;;  %v9912_v53 = vld [vmem:[#allocation45_spill] sm:$0xff] }
 0x37d   : > { %v4152_v35 = vmax.f32 %v4150_v22, %v4151_v24  ;;  %v4069_v19 = vrot.slane %v4068_v29, 1  ;;  %v4090_v51 = vrot.slane %v4089_v23, 1  ;;  %v8367_v43 = vmax.f32 %v4005_v1, %v4006_v20  ;;  %v9892_v24 = vld [vmem:[#allocation21_spill] sm:$0xff]  ;;  %v9894_v1 = vld [vmem:[#allocation23_spill] sm:$0xff]  ;;  %v9901_v20 = vld [vmem:[#allocation32_spill] sm:$0xff] }
 0x37e   : > { %v4111_v33 = vrot.slane %v4110_v34, 1  ;;  %v4132_v6 = vrot.slane %v4131_v59, 1  ;;  %v8369_v17 = vmax.f32 %v4026_v41, %v4027_v50  ;;  %v8371_v61 = vmax.f32 %v4047_v26, %v4048_v0  ;;  %v9896_v41 = vld [vmem:[#allocation27_spill] sm:$0xff]  ;;  %v9897_v26 = vld [vmem:[#allocation26_spill] sm:$0xff]  ;;  %v9902_v0 = vld [vmem:[#allocation17_spill] sm:$0xff] }
 0x37f   : > { %v4153_v56 = vrot.slane %v4152_v35, 1  ;;  %v8373_v57 = vmax.f32 %v4068_v29, %v4069_v19  ;;  %v8375_v42 = vmax.f32 %v4089_v23, %v4090_v51  ;;  %v4219_v48 = vcombine.low %v7975_v25, %v7977_v15  ;;  %v9889_v25 = vld [vmem:[#allocation14_spill] sm:$0xff]  ;;  %v9898_v23 = vld [vmem:[#allocation29_spill] sm:$0xff]  ;;  %v9910_v15 = vld [vmem:[#allocation43_spill] sm:$0xff] }
 0x380   : > { %v8377_v2 = vmax.f32 %v4110_v34, %v4111_v33  ;;  %v8379_v4 = vmax.f32 %v4131_v59, %v4132_v6  ;;  %v4220_v18 = vcombine.low %v7979_v55, %v7981_v30  ;;  %v4221_v8 = vcombine.low %v7983_v58, %v7985_v12  ;;  %v9891_v55 = vld [vmem:[#allocation15_spill] sm:$0xff]  ;;  %v9893_v58 = vld [vmem:[#allocation20_spill] sm:$0xff]  ;;  %v9903_v19 = vld [vmem:[#allocation33_spill] sm:$0xff] }
 0x381   : > { %v8381_v31 = vmax.f32 %v4152_v35, %v4153_v56  ;;  %v4222_v22 = vcombine.low %v7987_v16, %v7989_v37  ;;  %v4223_v62 = vcombine.low %v8031_v38, %v8033_v13  ;;  %v4227_v30 = vcombine.low %v9891_v55, %v9890_v3  ;;  %v9895_v16 = vld [vmem:[#allocation22_spill] sm:$0xff]  ;;  %v9899_v34 = vld [vmem:[#allocation28_spill] sm:$0xff]  ;;  %v9906_v3 = vld [vmem:[#allocation19_spill] sm:$0xff] }
 0x382   : > { %v4228_v12 = vcombine.low %v9893_v58, %v9892_v24  ;;  %v4229_v37 = vcombine.low %v9895_v16, %v9894_v1  ;;  %v4230_v29 = vcombine.low %v9897_v26, %v9896_v41  ;;  %v4231_v59 = vcombine.low %v9899_v34, %v9898_v23  ;;  %v9900_v35 = vld [vmem:[#allocation16_spill] sm:$0xff]  ;;  %v9904_v33 = vld [vmem:[#allocation18_spill] sm:$0xff]  ;;  %v9907_v55 = vld [vmem:[#allocation35_spill] sm:$0xff] }
 0x383   : > { %v4232_v50 = vcombine.low %v9901_v20, %v9900_v35  ;;  %v9905_v6 = vld [vmem:[#allocation34_spill] sm:$0xff]  ;;  %v4235_v24 = vcombine.low %v9907_v55, %v9906_v3  ;;  %v9908_v58 = vld [vmem:[#allocation41_spill] sm:$0xff]  ;;  %v9909_v1 = vld [vmem:[#allocation40_spill] sm:$0xff]  ;;  %v4239_v44 = vcombine.low %v8255_v10, %v8257_v52  ;;  %v4240_v51 = vcombine.low %v8259_v46, %v8261_v49 }
 0x384   : > { %v4236_v16 = vcombine.low %v9909_v1, %v9908_v58  ;;  %v9911_v41 = vld [vmem:[#allocation42_spill] sm:$0xff]  ;;  %v9913_v23 = vld [vmem:[#allocation44_spill] sm:$0xff]  ;;  %v4241_v56 = vcombine.low %v8263_v60, %v8265_v21  ;;  %v4242_v3 = vcombine.low %v8267_v40, %v8269_v9  ;;  %v4243_v55 = vcombine.low %v8311_v5, %v8313_v36 }
 0x385   : > { %v4237_v26 = vcombine.low %v9911_v41, %v9910_v15  ;;  %v4238_v34 = vcombine.low %v9913_v23, %v9912_v53  ;;  %v4244_v15 = vcombine.low %v8315_v63, %v8317_v14  ;;  %v4245_v53 = vcombine.low %v8319_v7, %v8321_v11 }
 0x386   : > { %v4246_v10 = vcombine.low %v8323_v32, %v8325_v28  ;;  %v4247_v52 = vcombine.low %v8367_v43, %v8369_v17  ;;  %v4248_v46 = vcombine.low %v8371_v61, %v8373_v57  ;;  %v4249_v49 = vcombine.low %v8375_v42, %v8377_v2 }
 0x387   : > { %v4250_v60 = vcombine.low %v8379_v4, %v8381_v31  ;;  %v4251_v21 = vrot.slane %v4227_v30, 7  ;;  %v4256_v5 = vrot.slane %v4235_v24, 6  ;;  %v4261_v36 = vrot.slane %v4243_v55, 5 }
 0x388   : > { %v4266_v14 = vrot.slane %v4228_v12, 7  ;;  %v4269_v7 = vrot.slane %v4236_v16, 6  ;;  %v4272_v32 = vrot.slane %v4244_v15, 5  ;;  %v4275_v28 = vrot.slane %v4229_v37, 7 }
 0x389   : > { %v4253_v63 = vsel %vm4252_vm0, %v4251_v21, %v4219_v48  ;;  %v4278_v43 = vrot.slane %v4237_v26, 6  ;;  %v4281_v57 = vrot.slane %v4245_v53, 5  ;;  %v4284_v42 = vrot.slane %v4230_v29, 7 }
 0x38a   : > { %v4255_v11 = vsel %vm4254_vm1, %v4251_v21, %v4253_v63  ;;  %v4267_v61 = vsel %vm4252_vm0, %v4266_v14, %v4220_v18  ;;  %v4276_v48 = vsel %vm4252_vm0, %v4275_v28, %v4221_v8  ;;  %v4287_v24 = vrot.slane %v4238_v34, 6 }
 0x38b   : > { %v4258_v17 = vsel %vm4257_vm2, %v4256_v5, %v4255_v11  ;;  %v4268_v30 = vsel %vm4254_vm1, %v4266_v14, %v4267_v61  ;;  %v4277_v37 = vsel %vm4254_vm1, %v4275_v28, %v4276_v48  ;;  %v4285_v1 = vsel %vm4252_vm0, %v4284_v42, %v4222_v22  ;;  %v2809_v48 = vld [vmem:[#allocation2 + $0x28] sm:$0xff] }
 0x38c   : > { %v4260_v2 = vsel %vm4259_vm3, %v4256_v5, %v4258_v17  ;;  %v4270_v58 = vsel %vm4257_vm2, %v4269_v7, %v4268_v30  ;;  %v4279_v29 = vsel %vm4257_vm2, %v4278_v43, %v4277_v37  ;;  %v4286_v41 = vsel %vm4254_vm1, %v4284_v42, %v4285_v1  ;;  %v2804_v17 = vld [vmem:[#allocation2] sm:$0xff] }
 0x38d   : > { %v4263_v12 = vsel %vm4262_vm4, %v4261_v36, %v4260_v2  ;;  %v4271_v18 = vsel %vm4259_vm3, %v4269_v7, %v4270_v58  ;;  %v4280_v26 = vsel %vm4259_vm3, %v4278_v43, %v4279_v29  ;;  %v4288_v23 = vsel %vm4257_vm2, %v4287_v24, %v4286_v41  ;;  %v2808_v42 = vld [vmem:[#allocation2 + $0x20] sm:$0xff] }
 0x38e   : > { %v8459_v16 = vsel %vm4264_vm5, %v4261_v36, %v4263_v12  ;;  %v4273_v8 = vsel %vm4262_vm4, %v4272_v32, %v4271_v18  ;;  %v4290_v34 = vrot.slane %v4246_v10, 5  ;;  %v4282_v22 = vsel %vm4262_vm4, %v4281_v57, %v4280_v26 }
 0x38f   : > { %v4274_v55 = vsel %vm4264_vm5, %v4272_v32, %v4273_v8  ;;  %v4289_v15 = vsel %vm4259_vm3, %v4287_v24, %v4288_v23  ;;  %v4293_v53 = vrot.slane %v4231_v59, 7  ;;  %v4283_v21 = vsel %vm4264_vm5, %v4281_v57, %v4282_v22  ;;  %v2807_v57 = vld [vmem:[#allocation2 + $0x8] sm:$0xff]  ;;  %v2810_v24 = vld [vmem:[#allocation2 + $0x38] sm:$0xff] }
 0x390   : > { %v4291_v5 = vsel %vm4262_vm4, %v4290_v34, %v4289_v15  ;;  %v4296_v36 = vrot.slane %v4239_v44, 6  ;;  %v4299_v63 = vrot.slane %v4247_v52, 5  ;;  %v4302_v7 = vrot.slane %v4232_v50, 7 }
 0x391   : > { %v4292_v14 = vsel %vm4264_vm5, %v4290_v34, %v4291_v5  ;;  %v4294_v10 = vsel %vm4252_vm0, %v4293_v53, %v4223_v62  ;;  %v4305_v11 = vrot.slane %v4240_v51, 6  ;;  %v4308_v32 = vrot.slane %v4248_v46, 5 }
 0x392   : > { %v4295_v59 = vsel %vm4254_vm1, %v4293_v53, %v4294_v10  ;;  %v9914_v28 = vcombine.low %v9903_v19, %v9902_v0  ;;  %v4314_v52 = vrot.slane %v4241_v56, 6  ;;  %v9915_v38 = vcombine.low %v8035_v47, %v8037_v27  ;;  %v2803_v27 = vld [vmem:[#allocation2 + $0x30] sm:$0xff] }
 0x393   : > { %v4297_v43 = vsel %vm4257_vm2, %v4296_v36, %v4295_v59  ;;  %v4317_v62 = vrot.slane %v4249_v49, 5  ;;  %v9916_v35 = vcombine.low %v9905_v6, %v9904_v33  ;;  %v9917_v0 = vcombine.low %v9887_v54, %v9886_v39  ;;  %v2805_v39 = vld [vmem:[#allocation2 + $0x18] sm:$0xff] }
 0x394   : > { %v4311_v44 = vrot.slane %v9914_v28, 7  ;;  %v4303_v13 = vsel %vm4252_vm0, %v4302_v7, %v9915_v38  ;;  %v4298_v50 = vsel %vm4259_vm3, %v4296_v36, %v4297_v43  ;;  %v4323_v47 = vrot.slane %v4242_v3, 6  ;;  %v2806_v3 = vld [vmem:[#allocation2 + $0x10] sm:$0xff] }
 0x395   : > { %v4320_v20 = vrot.slane %v9916_v35, 7  ;;  %v4304_v51 = vsel %vm4254_vm1, %v4302_v7, %v4303_v13  ;;  %v4300_v56 = vsel %vm4262_vm4, %v4299_v63, %v4298_v50  ;;  %v9918_v6 = vcombine.low %v9889_v25, %v9888_v45 }
 0x396   : > { %v4312_v19 = vsel %vm4252_vm0, %v4311_v44, %v9917_v0  ;;  %v4306_v46 = vsel %vm4257_vm2, %v4305_v11, %v4304_v51  ;;  %v4301_v54 = vsel %vm4264_vm5, %v4299_v63, %v4300_v56  ;;  %v4326_v25 = vrot.slane %v4250_v60, 5 }
 0x397   : > { %v4313_v33 = vsel %vm4254_vm1, %v4311_v44, %v4312_v19  ;;  %v4321_v49 = vsel %vm4252_vm0, %v4320_v20, %v9918_v6  ;;  %v4307_v61 = vsel %vm4259_vm3, %v4305_v11, %v4306_v46  ;;  %v4337_v1 = vmax.f32 %v2803_v27, %v8459_v16 }
 0x398   : > { %v4315_v40 = vsel %vm4257_vm2, %v4314_v52, %v4313_v33  ;;  %v4322_v9 = vsel %vm4254_vm1, %v4320_v20, %v4321_v49  ;;  %v4309_v2 = vsel %vm4262_vm4, %v4308_v32, %v4307_v61  ;;  %v4338_v41 = vmax.f32 %v2804_v17, %v4274_v55 }
 0x399   : > { %v4316_v30 = vsel %vm4259_vm3, %v4314_v52, %v4315_v40  ;;  %v4324_v45 = vsel %vm4257_vm2, %v4323_v47, %v4322_v9  ;;  %v4310_v12 = vsel %vm4264_vm5, %v4308_v32, %v4309_v2  ;;  %v4339_v8 = vmax.f32 %v2805_v39, %v4283_v21  ;;  %4345 = vst [vmem:[#allocation2 + $0x30] sm:$0xff] %v4337_v1 }
 0x39a   : > { %v4318_v58 = vsel %vm4262_vm4, %v4317_v62, %v4316_v30  ;;  %v4325_v37 = vsel %vm4259_vm3, %v4323_v47, %v4324_v45  ;;  %v4340_v4 = vmax.f32 %v2806_v3, %v4292_v14  ;;  %v4341_v31 = vmax.f32 %v2807_v57, %v4301_v54  ;;  %4346 = vst [vmem:[#allocation2] sm:$0xff] %v4338_v41 }
 0x39b   : > { %v4319_v18 = vsel %vm4264_vm5, %v4317_v62, %v4318_v58  ;;  %v4327_v29 = vsel %vm4262_vm4, %v4326_v25, %v4325_v37  ;;  %v4342_v60 = vmax.f32 %v2808_v42, %v4310_v12  ;;  %4347 = vst [vmem:[#allocation2 + $0x18] sm:$0xff] %v4339_v8  ;;  %4356 = sbr.rel (%p5416_p10) target bundleno = 1424 (0x590), region = 63 }
 0x39c   : > { %v4328_v26 = vsel %vm4264_vm5, %v4326_v25, %v4327_v29  ;;  %v4343_v23 = vmax.f32 %v2809_v48, %v4319_v18  ;;  %4348 = vst [vmem:[#allocation2 + $0x10] sm:$0xff] %v4340_v4  ;;  %4349 = vst [vmem:[#allocation2 + $0x8] sm:$0xff] %v4341_v31 }
 0x39d   : > { %v4344_v34 = vmax.f32 %v2810_v24, %v4328_v26  ;;  %4350 = vst [vmem:[#allocation2 + $0x20] sm:$0xff] %v4342_v60 }
 0x39e   : > { %4351 = vst [vmem:[#allocation2 + $0x28] sm:$0xff] %v4343_v23 }
 0x39f   : > { %4352 = vst [vmem:[#allocation2 + $0x38] sm:$0xff] %v4344_v34 }
 0x3a0   : > { %v4488_v16 = vld [vmem:[%s9420_s1 + $0xf8] sm:$0xff]  ;;  %v4487_v53 = vld [vmem:[%s9420_s1 + $0xf0] sm:$0xff]  ;;  %v4486_v63 = vld [vmem:[%s9420_s1 + $0xe8] sm:$0xff]  ;;  %vm4397_vm6 = vcmask 1043456  }
 0x3a1   : > { %v4520_v55 = vld [vmem:[%s9420_s1 + $0x1f8] sm:$0xff]  ;;  %5426 = vmatprep.subr.mxu0 %v4488_v16  ;;  %v4519_v21 = vld [vmem:[%s9420_s1 + $0x1f0] sm:$0xff]  ;;  %v4518_v14 = vld [vmem:[%s9420_s1 + $0x1e8] sm:$0xff] }
 0x3a2   : > { %v4472_v22 = vld [vmem:[%s9420_s1 + $0x78] sm:$0xff]  ;;  %5461 = vmatprep.subr.mxu1 %v4520_v55  ;;  %v4471_v5 = vld [vmem:[%s9420_s1 + $0x70] sm:$0xff]  ;;  %v4470_v10 = vld [vmem:[%s9420_s1 + $0x68] sm:$0xff] }
 0x3a3   : > { %v4504_v15 = vld [vmem:[%s9420_s1 + $0x178] sm:$0xff]  ;;  %5427 = vmatpush3.msra.mxu0 %v4472_v22  ;;  %v4503_v36 = vld [vmem:[%s9420_s1 + $0x170] sm:$0xff]  ;;  %v4502_v7 = vld [vmem:[%s9420_s1 + $0x168] sm:$0xff] }
 0x3a4   : > { %5462 = vmatpush3.msra.mxu1 %v4504_v15  ;;  %5428 = vmatprep.subr.mxu0 %v4487_v53  ;;  %v4485_v11 = vld [vmem:[%s9420_s1 + $0xe0] sm:$0xff]  ;;  %v4484_v44 = vld [vmem:[%s9420_s1 + $0xd8] sm:$0xff]  ;;  %v4483_v13 = vld [vmem:[%s9420_s1 + $0xd0] sm:$0xff] }
 0x3a5   : > { %5463 = vmatprep.subr.mxu1 %v4519_v21  ;;  %5429 = vmatpush3.msra.mxu0 %v4471_v5  ;;  %v4517_v59 = vld [vmem:[%s9420_s1 + $0x1e0] sm:$0xff]  ;;  %v4516_v52 = vld [vmem:[%s9420_s1 + $0x1d8] sm:$0xff]  ;;  %v4515_v62 = vld [vmem:[%s9420_s1 + $0x1d0] sm:$0xff] }
 0x3a6   : > { %5464 = vmatpush3.msra.mxu1 %v4503_v36  ;;  %5430 = vmatprep.subr.mxu0 %v4486_v63  ;;  %v4469_v32 = vld [vmem:[%s9420_s1 + $0x60] sm:$0xff]  ;;  %v4468_v43 = vld [vmem:[%s9420_s1 + $0x58] sm:$0xff]  ;;  %v4467_v35 = vld [vmem:[%s9420_s1 + $0x50] sm:$0xff] }
 0x3a7   : > { %5465 = vmatprep.subr.mxu1 %v4518_v14  ;;  %v4501_v28 = vld [vmem:[%s9420_s1 + $0x160] sm:$0xff]  ;;  %5431 = vmatpush3.msra.mxu0 %v4470_v10  ;;  %v4500_v38 = vld [vmem:[%s9420_s1 + $0x158] sm:$0xff]  ;;  %v4499_v20 = vld [vmem:[%s9420_s1 + $0x150] sm:$0xff] }
 0x3a8   : > { %5466 = vmatpush3.msra.mxu1 %v4502_v7  ;;  %5432 = vmatprep.subr.mxu0 %v4485_v11  ;;  %v4482_v50 = vld [vmem:[%s9420_s1 + $0xc8] sm:$0xff]  ;;  %v4481_v47 = vld [vmem:[%s9420_s1 + $0xc0] sm:$0xff]  ;;  %v4480_v33 = vld [vmem:[%s9420_s1 + $0xb8] sm:$0xff] }
 0x3a9   : > { %5467 = vmatprep.subr.mxu1 %v4517_v59  ;;  %5433 = vmatpush3.msra.mxu0 %v4469_v32  ;;  %v4514_v51 = vld [vmem:[%s9420_s1 + $0x1c8] sm:$0xff]  ;;  %v4513_v27 = vld [vmem:[%s9420_s1 + $0x1c0] sm:$0xff]  ;;  %v4512_v6 = vld [vmem:[%s9420_s1 + $0x1b8] sm:$0xff] }
 0x3aa   : > { %5468 = vmatpush3.msra.mxu1 %v4501_v28  ;;  %5434 = vmatprep.subr.mxu0 %v4484_v44  ;;  %v4466_v0 = vld [vmem:[%s9420_s1 + $0x48] sm:$0xff]  ;;  %v4465_v56 = vld [vmem:[%s9420_s1 + $0x40] sm:$0xff]  ;;  %v4464_v49 = vld [vmem:[%s9420_s1 + $0x38] sm:$0xff] }
 0x3ab   : > { %5469 = vmatprep.subr.mxu1 %v4516_v52  ;;  %5435 = vmatpush3.msra.mxu0 %v4468_v43  ;;  %v4498_v19 = vld [vmem:[%s9420_s1 + $0x148] sm:$0xff]  ;;  %v4497_v46 = vld [vmem:[%s9420_s1 + $0x140] sm:$0xff]  ;;  %v4496_v17 = vld [vmem:[%s9420_s1 + $0x138] sm:$0xff] }
 0x3ac   : > { %5470 = vmatpush3.msra.mxu1 %v4500_v38  ;;  %5436 = vmatprep.subr.mxu0 %v4483_v13  ;;  %v4479_v39 = vld [vmem:[%s9420_s1 + $0xb0] sm:$0xff]  ;;  %v4478_v9 = vld [vmem:[%s9420_s1 + $0xa8] sm:$0xff]  ;;  %v4477_v2 = vld [vmem:[%s9420_s1 + $0xa0] sm:$0xff] }
 0x3ad   : > { %5471 = vmatprep.subr.mxu1 %v4515_v62  ;;  %5437 = vmatpush3.msra.mxu0 %v4467_v35  ;;  %v4511_v54 = vld [vmem:[%s9420_s1 + $0x1b0] sm:$0xff]  ;;  %v4510_v3 = vld [vmem:[%s9420_s1 + $0x1a8] sm:$0xff]  ;;  %v4509_v30 = vld [vmem:[%s9420_s1 + $0x1a0] sm:$0xff] }
 0x3ae   : > { %5472 = vmatpush3.msra.mxu1 %v4499_v20  ;;  %5438 = vmatprep.subr.mxu0 %v4482_v50  ;;  %v4463_v61 = vld [vmem:[%s9420_s1 + $0x30] sm:$0xff]  ;;  %v4462_v57 = vld [vmem:[%s9420_s1 + $0x28] sm:$0xff]  ;;  %v4461_v45 = vld [vmem:[%s9420_s1 + $0x20] sm:$0xff] }
 0x3af   : > { %5473 = vmatprep.subr.mxu1 %v4514_v51  ;;  %5439 = vmatpush3.msra.mxu0 %v4466_v0  ;;  %v4495_v40 = vld [vmem:[%s9420_s1 + $0x130] sm:$0xff]  ;;  %v4494_v42 = vld [vmem:[%s9420_s1 + $0x128] sm:$0xff]  ;;  %v4493_v25 = vld [vmem:[%s9420_s1 + $0x120] sm:$0xff] }
 0x3b0   : > { %5474 = vmatpush3.msra.mxu1 %v4498_v19  ;;  %5440 = vmatprep.subr.mxu0 %v4481_v47  ;;  %v4476_v48 = vld [vmem:[%s9420_s1 + $0x98] sm:$0xff]  ;;  %v4475_v37 = vld [vmem:[%s9420_s1 + $0x90] sm:$0xff]  ;;  %v4474_v8 = vld [vmem:[%s9420_s1 + $0x88] sm:$0xff] }
 0x3b1   : > { %5475 = vmatprep.subr.mxu1 %v4513_v27  ;;  %5441 = vmatpush3.msra.mxu0 %v4465_v56  ;;  %v4508_v24 = vld [vmem:[%s9420_s1 + $0x198] sm:$0xff]  ;;  %v4507_v1 = vld [vmem:[%s9420_s1 + $0x190] sm:$0xff]  ;;  %v4506_v26 = vld [vmem:[%s9420_s1 + $0x188] sm:$0xff] }
 0x3b2   : > { %5476 = vmatpush3.msra.mxu1 %v4497_v46  ;;  %5442 = vmatprep.subr.mxu0 %v4480_v33  ;;  %v4460_v12 = vld [vmem:[%s9420_s1 + $0x18] sm:$0xff]  ;;  %v4459_v18 = vld [vmem:[%s9420_s1 + $0x10] sm:$0xff]  ;;  %v4458_v4 = vld [vmem:[%s9420_s1 + $0x8] sm:$0xff] }
 0x3b3   : > { %5477 = vmatprep.subr.mxu1 %v4512_v6  ;;  %5443 = vmatpush3.msra.mxu0 %v4464_v49  ;;  %v4492_v58 = vld [vmem:[%s9420_s1 + $0x118] sm:$0xff]  ;;  %v4491_v29 = vld [vmem:[%s9420_s1 + $0x110] sm:$0xff]  ;;  %v4490_v31 = vld [vmem:[%s9420_s1 + $0x108] sm:$0xff] }
 0x3b4   : > { %5478 = vmatpush3.msra.mxu1 %v4496_v17  ;;  %5444 = vmatprep.subr.mxu0 %v4479_v39  ;;  %v8694_v41 = vld [vmem:[#allocation2 + $0x30] sm:$0xff]  ;;  %v8708_v60 = vld [vmem:[#allocation2] sm:$0xff]  ;;  %v4552_v53 = vld [vmem:[%s9420_s1 + $0x2f8] sm:$0xff] }
 0x3b5   : > { %5479 = vmatprep.subr.mxu1 %v4511_v54  ;;  %5445 = vmatpush3.msra.mxu0 %v4463_v61  ;;  %v4473_v23 = vld [vmem:[%s9420_s1 + $0x80] sm:$0xff]  ;;  %v4728_v16 = vcombine.high %v8694_v41, %v8694_v41  ;;  %v4729_v15 = vcombine.high %v8708_v60, %v8708_v60  ;;  %v4584_v21 = vld [vmem:[%s9420_s1 + $0x3f8] sm:$0xff]  ;;  %v4551_v63 = vld [vmem:[%s9420_s1 + $0x2f0] sm:$0xff] }
 0x3b6   : > { %5480 = vmatpush3.msra.mxu1 %v4495_v40  ;;  %5446 = vmatprep.subr.mxu0 %v4478_v9  ;;  %v4505_v34 = vld [vmem:[%s9420_s1 + $0x180] sm:$0xff]  ;;  %v4536_v5 = vld [vmem:[%s9420_s1 + $0x278] sm:$0xff]  ;;  %v4583_v14 = vld [vmem:[%s9420_s1 + $0x3f0] sm:$0xff] }
 0x3b7   : > { %5481 = vmatprep.subr.mxu1 %v4510_v3  ;;  %5447 = vmatpush3.msra.mxu0 %v4462_v57  ;;  %v4457_v55 = vld [vmem:[%s9420_s1] sm:$0xff]  ;;  %v4568_v36 = vld [vmem:[%s9420_s1 + $0x378] sm:$0xff]  ;;  %v4535_v10 = vld [vmem:[%s9420_s1 + $0x270] sm:$0xff] }
 0x3b8   : > { %5482 = vmatpush3.msra.mxu1 %v4494_v42  ;;  %5448 = vmatprep.subr.mxu0 %v4477_v2  ;;  %v4489_v22 = vld [vmem:[%s9420_s1 + $0x100] sm:$0xff]  ;;  %v4567_v7 = vld [vmem:[%s9420_s1 + $0x370] sm:$0xff]  ;;  %v4550_v11 = vld [vmem:[%s9420_s1 + $0x2e8] sm:$0xff] }
 0x3b9   : > { %5483 = vmatprep.subr.mxu1 %v4509_v30  ;;  %5449 = vmatpush3.msra.mxu0 %v4461_v45  ;;  %v4582_v59 = vld [vmem:[%s9420_s1 + $0x3e8] sm:$0xff]  ;;  %v4549_v44 = vld [vmem:[%s9420_s1 + $0x2e0] sm:$0xff]  ;;  %v4548_v13 = vld [vmem:[%s9420_s1 + $0x2d8] sm:$0xff] }
 0x3ba   : > { %5484 = vmatpush3.msra.mxu1 %v4493_v25  ;;  %5450 = vmatprep.subr.mxu0 %v4476_v48  ;;  %v4534_v32 = vld [vmem:[%s9420_s1 + $0x268] sm:$0xff]  ;;  %v4581_v52 = vld [vmem:[%s9420_s1 + $0x3e0] sm:$0xff]  ;;  %v4580_v62 = vld [vmem:[%s9420_s1 + $0x3d8] sm:$0xff] }
 0x3bb   : > { %5485 = vmatprep.subr.mxu1 %v4508_v24  ;;  %5451 = vmatpush3.msra.mxu0 %v4460_v12  ;;  %v4566_v28 = vld [vmem:[%s9420_s1 + $0x368] sm:$0xff]  ;;  %v4533_v43 = vld [vmem:[%s9420_s1 + $0x260] sm:$0xff]  ;;  %v4532_v35 = vld [vmem:[%s9420_s1 + $0x258] sm:$0xff] }
 0x3bc   : > { %5486 = vmatpush3.msra.mxu1 %v4492_v58  ;;  %5452 = vmatprep.subr.mxu0 %v4475_v37  ;;  %v4565_v38 = vld [vmem:[%s9420_s1 + $0x360] sm:$0xff]  ;;  %v4564_v20 = vld [vmem:[%s9420_s1 + $0x358] sm:$0xff]  ;;  %v4547_v50 = vld [vmem:[%s9420_s1 + $0x2d0] sm:$0xff] }
 0x3bd   : > { %5487 = vmatprep.subr.mxu1 %v4507_v1  ;;  %5453 = vmatpush3.msra.mxu0 %v4459_v18  ;;  %v4579_v51 = vld [vmem:[%s9420_s1 + $0x3d0] sm:$0xff]  ;;  %v4546_v47 = vld [vmem:[%s9420_s1 + $0x2c8] sm:$0xff]  ;;  %v4545_v33 = vld [vmem:[%s9420_s1 + $0x2c0] sm:$0xff] }
 0x3be   : > { %5488 = vmatpush3.msra.mxu1 %v4491_v29  ;;  %5454 = vmatprep.subr.mxu0 %v4474_v8  ;;  %v4531_v0 = vld [vmem:[%s9420_s1 + $0x250] sm:$0xff]  ;;  %v4578_v27 = vld [vmem:[%s9420_s1 + $0x3c8] sm:$0xff]  ;;  %v4577_v6 = vld [vmem:[%s9420_s1 + $0x3c0] sm:$0xff] }
 0x3bf   : > { %5489 = vmatprep.subr.mxu1 %v4506_v26  ;;  %5455 = vmatpush3.msra.mxu0 %v4458_v4  ;;  %v4563_v19 = vld [vmem:[%s9420_s1 + $0x350] sm:$0xff]  ;;  %v4530_v56 = vld [vmem:[%s9420_s1 + $0x248] sm:$0xff]  ;;  %v4529_v49 = vld [vmem:[%s9420_s1 + $0x240] sm:$0xff] }
 0x3c0   : > { %5490 = vmatpush3.msra.mxu1 %v4490_v31  ;;  %5456 = vmatprep.subr.mxu0 %v4473_v23  ;;  %v4562_v46 = vld [vmem:[%s9420_s1 + $0x348] sm:$0xff]  ;;  %v4561_v17 = vld [vmem:[%s9420_s1 + $0x340] sm:$0xff]  ;;  %v4544_v39 = vld [vmem:[%s9420_s1 + $0x2b8] sm:$0xff] }
 0x3c1   : > { %5491 = vmatprep.subr.mxu1 %v4505_v34  ;;  %5457 = vmatpush3.msra.mxu0 %v4457_v55  ;;  %v4576_v54 = vld [vmem:[%s9420_s1 + $0x3b8] sm:$0xff]  ;;  %v4543_v9 = vld [vmem:[%s9420_s1 + $0x2b0] sm:$0xff]  ;;  %v4542_v2 = vld [vmem:[%s9420_s1 + $0x2a8] sm:$0xff] }
 0x3c2   : > { %4808 = vmatprep.mubr.f32.mxu0 %v4728_v16  ;;  %5492 = vmatpush3.msra.mxu1 %v4489_v22  ;;  %v4528_v61 = vld [vmem:[%s9420_s1 + $0x238] sm:$0xff]  ;;  %v4575_v3 = vld [vmem:[%s9420_s1 + $0x3b0] sm:$0xff]  ;;  %v4574_v30 = vld [vmem:[%s9420_s1 + $0x3a8] sm:$0xff] }
 0x3c3   : > { %4809 = vmatmul.mubr.f32.vlgmr.msra.gmra.mxu0 %v8694_v41  ;;  %4878 = vmatprep.mubr.f32.mxu1 %v4729_v15  ;;  %v4560_v40 = vld [vmem:[%s9420_s1 + $0x338] sm:$0xff]  ;;  %v4527_v57 = vld [vmem:[%s9420_s1 + $0x230] sm:$0xff]  ;;  %v4526_v45 = vld [vmem:[%s9420_s1 + $0x228] sm:$0xff] }
 0x3c4   : > { %5496 = vmatprep.subr.mxu0 %v4552_v53  ;;  %5531 = vmatprep.subr.mxu1 %v4584_v21  ;;  %v4559_v42 = vld [vmem:[%s9420_s1 + $0x330] sm:$0xff]  ;;  %v4558_v25 = vld [vmem:[%s9420_s1 + $0x328] sm:$0xff]  ;;  %v4541_v48 = vld [vmem:[%s9420_s1 + $0x2a0] sm:$0xff] }
 0x3c5   : > { %4879 = vmatmul.mubr.f32.vlgmr.msra.gmra.mxu1 %v8708_v60  ;;  %5497 = vmatpush3.msra.mxu0 %v4536_v5  ;;  %v4573_v24 = vld [vmem:[%s9420_s1 + $0x3a0] sm:$0xff]  ;;  %v4540_v37 = vld [vmem:[%s9420_s1 + $0x298] sm:$0xff]  ;;  %v4539_v8 = vld [vmem:[%s9420_s1 + $0x290] sm:$0xff] }
 0x3c6   : > { %5532 = vmatpush3.msra.mxu1 %v4568_v36  ;;  %5498 = vmatprep.subr.mxu0 %v4551_v63  ;;  %v4525_v12 = vld [vmem:[%s9420_s1 + $0x220] sm:$0xff]  ;;  %v4572_v1 = vld [vmem:[%s9420_s1 + $0x398] sm:$0xff]  ;;  %v4571_v26 = vld [vmem:[%s9420_s1 + $0x390] sm:$0xff] }
 0x3c7   : > { %5533 = vmatprep.subr.mxu1 %v4583_v14  ;;  %5499 = vmatpush3.msra.mxu0 %v4535_v10  ;;  %v4557_v58 = vld [vmem:[%s9420_s1 + $0x320] sm:$0xff]  ;;  %v4524_v18 = vld [vmem:[%s9420_s1 + $0x218] sm:$0xff]  ;;  %v4523_v4 = vld [vmem:[%s9420_s1 + $0x210] sm:$0xff] }
 0x3c8   : > { %5534 = vmatpush3.msra.mxu1 %v4567_v7  ;;  %5500 = vmatprep.subr.mxu0 %v4550_v11  ;;  %v4556_v29 = vld [vmem:[%s9420_s1 + $0x318] sm:$0xff]  ;;  %v4555_v31 = vld [vmem:[%s9420_s1 + $0x310] sm:$0xff]  ;;  %v4538_v34 = vld [vmem:[%s9420_s1 + $0x288] sm:$0xff] }
 0x3c9   : > { %5535 = vmatprep.subr.mxu1 %v4582_v59  ;;  %5501 = vmatpush3.msra.mxu0 %v4534_v32  ;;  %v8896_v23 = vld [vmem:[#allocation2 + $0x18] sm:$0xff]  ;;  %v4570_v16 = vld [vmem:[%s9420_s1 + $0x388] sm:$0xff]  ;;  %v8910_v15 = vld [vmem:[#allocation2 + $0x10] sm:$0xff] }
 0x3ca   : > { %5536 = vmatpush3.msra.mxu1 %v4566_v28  ;;  %5502 = vmatprep.subr.mxu0 %v4549_v44  ;;  %v4522_v55 = vld [vmem:[%s9420_s1 + $0x208] sm:$0xff]  ;;  %v4537_v53 = vld [vmem:[%s9420_s1 + $0x280] sm:$0xff]  ;;  %v4730_v5 = vcombine.high %v8896_v23, %v8896_v23  ;;  %v4731_v14 = vcombine.high %v8910_v15, %v8910_v15  ;;  %v4616_v10 = vld [vmem:[%s9420_s1 + $0x4f8] sm:$0xff] }
 0x3cb   : > { %5537 = vmatprep.subr.mxu1 %v4581_v52  ;;  %5503 = vmatpush3.msra.mxu0 %v4533_v43  ;;  %v4554_v22 = vld [vmem:[%s9420_s1 + $0x308] sm:$0xff]  ;;  %v4569_v21 = vld [vmem:[%s9420_s1 + $0x380] sm:$0xff]  ;;  %v4648_v7 = vld [vmem:[%s9420_s1 + $0x5f8] sm:$0xff] }
 0x3cc   : > { %5538 = vmatpush3.msra.mxu1 %v4565_v38  ;;  %5504 = vmatprep.subr.mxu0 %v4548_v13  ;;  %v4521_v36 = vld [vmem:[%s9420_s1 + $0x200] sm:$0xff]  ;;  %v4600_v11 = vld [vmem:[%s9420_s1 + $0x478] sm:$0xff]  ;;  %v4615_v32 = vld [vmem:[%s9420_s1 + $0x4f0] sm:$0xff] }
 0x3cd   : > { %5539 = vmatprep.subr.mxu1 %v4580_v62  ;;  %5505 = vmatpush3.msra.mxu0 %v4532_v35  ;;  %v4553_v63 = vld [vmem:[%s9420_s1 + $0x300] sm:$0xff]  ;;  %v4632_v59 = vld [vmem:[%s9420_s1 + $0x578] sm:$0xff]  ;;  %v4647_v28 = vld [vmem:[%s9420_s1 + $0x5f0] sm:$0xff] }
 0x3ce   : > { %5540 = vmatpush3.msra.mxu1 %v4564_v20  ;;  %5506 = vmatprep.subr.mxu0 %v4547_v50  ;;  %v4599_v44 = vld [vmem:[%s9420_s1 + $0x470] sm:$0xff]  ;;  %v4614_v43 = vld [vmem:[%s9420_s1 + $0x4e8] sm:$0xff]  ;;  %v4613_v35 = vld [vmem:[%s9420_s1 + $0x4e0] sm:$0xff] }
 0x3cf   : > { %5541 = vmatprep.subr.mxu1 %v4579_v51  ;;  %5507 = vmatpush3.msra.mxu0 %v4531_v0  ;;  %v4631_v52 = vld [vmem:[%s9420_s1 + $0x570] sm:$0xff]  ;;  %v4646_v38 = vld [vmem:[%s9420_s1 + $0x5e8] sm:$0xff]  ;;  %v4645_v20 = vld [vmem:[%s9420_s1 + $0x5e0] sm:$0xff] }
 0x3d0   : > { %5542 = vmatpush3.msra.mxu1 %v4563_v19  ;;  %5508 = vmatprep.subr.mxu0 %v4546_v47  ;;  %v4598_v13 = vld [vmem:[%s9420_s1 + $0x468] sm:$0xff]  ;;  %v4597_v50 = vld [vmem:[%s9420_s1 + $0x460] sm:$0xff]  ;;  %v4612_v0 = vld [vmem:[%s9420_s1 + $0x4d8] sm:$0xff] }
 0x3d1   : > { %5543 = vmatprep.subr.mxu1 %v4578_v27  ;;  %5509 = vmatpush3.msra.mxu0 %v4530_v56  ;;  %v4630_v62 = vld [vmem:[%s9420_s1 + $0x568] sm:$0xff]  ;;  %v4629_v51 = vld [vmem:[%s9420_s1 + $0x560] sm:$0xff]  ;;  %v4644_v19 = vld [vmem:[%s9420_s1 + $0x5d8] sm:$0xff] }
 0x3d2   : > { %5544 = vmatpush3.msra.mxu1 %v4562_v46  ;;  %5510 = vmatprep.subr.mxu0 %v4545_v33  ;;  %v4596_v47 = vld [vmem:[%s9420_s1 + $0x458] sm:$0xff]  ;;  %v4611_v56 = vld [vmem:[%s9420_s1 + $0x4d0] sm:$0xff] }
 0x3d3   : > { %5545 = vmatprep.subr.mxu1 %v4577_v6  ;;  %5511 = vmatpush3.msra.mxu0 %v4529_v49  ;;  %v4628_v27 = vld [vmem:[%s9420_s1 + $0x558] sm:$0xff]  ;;  %v4643_v46 = vld [vmem:[%s9420_s1 + $0x5d0] sm:$0xff]  ;;  %v4610_v49 = vld [vmem:[%s9420_s1 + $0x4c8] sm:$0xff] }
 0x3d4   : > { %5546 = vmatpush3.msra.mxu1 %v4561_v17  ;;  %5512 = vmatprep.subr.mxu0 %v4544_v39  ;;  %v4595_v33 = vld [vmem:[%s9420_s1 + $0x450] sm:$0xff]  ;;  %v4642_v17 = vld [vmem:[%s9420_s1 + $0x5c8] sm:$0xff] }
 0x3d5   : > { %5547 = vmatprep.subr.mxu1 %v4576_v54  ;;  %5513 = vmatpush3.msra.mxu0 %v4528_v61  ;;  %v4627_v6 = vld [vmem:[%s9420_s1 + $0x550] sm:$0xff]  ;;  %v4594_v39 = vld [vmem:[%s9420_s1 + $0x448] sm:$0xff]  ;;  %v4609_v61 = vld [vmem:[%s9420_s1 + $0x4c0] sm:$0xff] }
 0x3d6   : > { %5548 = vmatpush3.msra.mxu1 %v4560_v40  ;;  %5514 = vmatprep.subr.mxu0 %v4543_v9  ;;  %v4626_v54 = vld [vmem:[%s9420_s1 + $0x548] sm:$0xff]  ;;  %v4641_v40 = vld [vmem:[%s9420_s1 + $0x5c0] sm:$0xff] }
 0x3d7   : > { %5549 = vmatprep.subr.mxu1 %v4575_v3  ;;  %5515 = vmatpush3.msra.mxu0 %v4527_v57  ;;  %v4593_v9 = vld [vmem:[%s9420_s1 + $0x440] sm:$0xff]  ;;  %v4608_v57 = vld [vmem:[%s9420_s1 + $0x4b8] sm:$0xff] }
 0x3d8   : > { %5550 = vmatpush3.msra.mxu1 %v4559_v42  ;;  %5516 = vmatprep.subr.mxu0 %v4542_v2  ;;  %v4625_v3 = vld [vmem:[%s9420_s1 + $0x540] sm:$0xff]  ;;  %v4640_v42 = vld [vmem:[%s9420_s1 + $0x5b8] sm:$0xff] }
 0x3d9   : > { %5551 = vmatprep.subr.mxu1 %v4574_v30  ;;  %5517 = vmatpush3.msra.mxu0 %v4526_v45  ;;  %v4592_v2 = vld [vmem:[%s9420_s1 + $0x438] sm:$0xff]  ;;  %v4607_v45 = vld [vmem:[%s9420_s1 + $0x4b0] sm:$0xff] }
 0x3da   : > { %5552 = vmatpush3.msra.mxu1 %v4558_v25  ;;  %5518 = vmatprep.subr.mxu0 %v4541_v48  ;;  %v4624_v30 = vld [vmem:[%s9420_s1 + $0x538] sm:$0xff]  ;;  %v4639_v25 = vld [vmem:[%s9420_s1 + $0x5b0] sm:$0xff] }
 0x3db   : > { %5553 = vmatprep.subr.mxu1 %v4573_v24  ;;  %5519 = vmatpush3.msra.mxu0 %v4525_v12  ;;  %v4591_v48 = vld [vmem:[%s9420_s1 + $0x430] sm:$0xff]  ;;  %v4606_v12 = vld [vmem:[%s9420_s1 + $0x4a8] sm:$0xff] }
 0x3dc   : > { %5554 = vmatpush3.msra.mxu1 %v4557_v58  ;;  %5520 = vmatprep.subr.mxu0 %v4540_v37  ;;  %v4623_v24 = vld [vmem:[%s9420_s1 + $0x530] sm:$0xff]  ;;  %v4638_v58 = vld [vmem:[%s9420_s1 + $0x5a8] sm:$0xff] }
 0x3dd   : > { %5555 = vmatprep.subr.mxu1 %v4572_v1  ;;  %5521 = vmatpush3.msra.mxu0 %v4524_v18  ;;  %v4590_v37 = vld [vmem:[%s9420_s1 + $0x428] sm:$0xff]  ;;  %v4605_v18 = vld [vmem:[%s9420_s1 + $0x4a0] sm:$0xff] }
 0x3de   : > { %5556 = vmatpush3.msra.mxu1 %v4556_v29  ;;  %5522 = vmatprep.subr.mxu0 %v4539_v8  ;;  %v4622_v1 = vld [vmem:[%s9420_s1 + $0x528] sm:$0xff]  ;;  %v4637_v29 = vld [vmem:[%s9420_s1 + $0x5a0] sm:$0xff] }
 0x3df   : > { %5557 = vmatprep.subr.mxu1 %v4571_v26  ;;  %5523 = vmatpush3.msra.mxu0 %v4523_v4  ;;  %v4589_v8 = vld [vmem:[%s9420_s1 + $0x420] sm:$0xff]  ;;  %v4604_v4 = vld [vmem:[%s9420_s1 + $0x498] sm:$0xff] }
 0x3e0   : > { %5558 = vmatpush3.msra.mxu1 %v4555_v31  ;;  %5524 = vmatprep.subr.mxu0 %v4538_v34  ;;  %v4621_v26 = vld [vmem:[%s9420_s1 + $0x520] sm:$0xff]  ;;  %v4636_v31 = vld [vmem:[%s9420_s1 + $0x598] sm:$0xff] }
 0x3e1   : > { %5559 = vmatprep.subr.mxu1 %v4570_v16  ;;  %5525 = vmatpush3.msra.mxu0 %v4522_v55  ;;  %v4588_v34 = vld [vmem:[%s9420_s1 + $0x418] sm:$0xff]  ;;  %v4603_v55 = vld [vmem:[%s9420_s1 + $0x490] sm:$0xff] }
 0x3e2   : > { %5560 = vmatpush3.msra.mxu1 %v4554_v22  ;;  %5526 = vmatprep.subr.mxu0 %v4537_v53  ;;  %v4620_v16 = vld [vmem:[%s9420_s1 + $0x518] sm:$0xff]  ;;  %v4635_v22 = vld [vmem:[%s9420_s1 + $0x590] sm:$0xff] }
 0x3e3   : > { %5561 = vmatprep.subr.mxu1 %v4569_v21  ;;  %5527 = vmatpush3.msra.mxu0 %v4521_v36  ;;  %v4587_v53 = vld [vmem:[%s9420_s1 + $0x410] sm:$0xff]  ;;  %v4602_v36 = vld [vmem:[%s9420_s1 + $0x488] sm:$0xff] }
 0x3e4   : > { %4948 = vmatprep.mubr.f32.mxu0 %v4730_v5  ;;  %5562 = vmatpush3.msra.mxu1 %v4553_v63  ;;  %v4619_v21 = vld [vmem:[%s9420_s1 + $0x510] sm:$0xff]  ;;  %v9098_v5 = vld [vmem:[#allocation2 + $0x8] sm:$0xff] }
 0x3e5   : > { %4949 = vmatmul.mubr.f32.vlgmr.msra.gmra.mxu0 %v8896_v23  ;;  %5018 = vmatprep.mubr.f32.mxu1 %v4731_v14  ;;  %v4634_v63 = vld [vmem:[%s9420_s1 + $0x588] sm:$0xff] }
 0x3e6   : > { %5566 = vmatprep.subr.mxu0 %v4616_v10  ;;  %5601 = vmatprep.subr.mxu1 %v4648_v7  ;;  %v4586_v14 = vld [vmem:[%s9420_s1 + $0x408] sm:$0xff]  ;;  %v9112_v7 = vld [vmem:[#allocation2 + $0x20] sm:$0xff] }
 0x3e7   : > { %5019 = vmatmul.mubr.f32.vlgmr.msra.gmra.mxu1 %v8910_v15  ;;  %5567 = vmatpush3.msra.mxu0 %v4600_v11  ;;  %v4618_v10 = vld [vmem:[%s9420_s1 + $0x508] sm:$0xff]  ;;  %v4601_v11 = vld [vmem:[%s9420_s1 + $0x480] sm:$0xff] }
 0x3e8   : > { %5602 = vmatpush3.msra.mxu1 %v4632_v59  ;;  %5568 = vmatprep.subr.mxu0 %v4615_v32  ;;  %v4633_v59 = vld [vmem:[%s9420_s1 + $0x580] sm:$0xff]  ;;  %v4732_v32 = vcombine.high %v9098_v5, %v9098_v5 }
 0x3e9   : > { %5603 = vmatprep.subr.mxu1 %v4647_v28  ;;  %5569 = vmatpush3.msra.mxu0 %v4599_v44  ;;  %v4585_v28 = vld [vmem:[%s9420_s1 + $0x400] sm:$0xff] }
 0x3ea   : > { %5604 = vmatpush3.msra.mxu1 %v4631_v52  ;;  %5570 = vmatprep.subr.mxu0 %v4614_v43  ;;  %v4617_v44 = vld [vmem:[%s9420_s1 + $0x500] sm:$0xff]  ;;  %v4733_v52 = vcombine.high %v9112_v7, %v9112_v7  ;;  %v4680_v43 = vld [vmem:[%s9420_s1 + $0x6f8] sm:$0xff] }
 0x3eb   : > { %5605 = vmatprep.subr.mxu1 %v4646_v38  ;;  %5571 = vmatpush3.msra.mxu0 %v4598_v13  ;;  %v4712_v38 = vld [vmem:[%s9420_s1 + $0x7f8] sm:$0xff] }
 0x3ec   : > { %5606 = vmatpush3.msra.mxu1 %v4630_v62  ;;  %5572 = vmatprep.subr.mxu0 %v4613_v35  ;;  %v4664_v13 = vld [vmem:[%s9420_s1 + $0x678] sm:$0xff]  ;;  %v4679_v35 = vld [vmem:[%s9420_s1 + $0x6f0] sm:$0xff] }
 0x3ed   : > { %5607 = vmatprep.subr.mxu1 %v4645_v20  ;;  %5573 = vmatpush3.msra.mxu0 %v4597_v50  ;;  %v4696_v62 = vld [vmem:[%s9420_s1 + $0x778] sm:$0xff]  ;;  %v4711_v20 = vld [vmem:[%s9420_s1 + $0x7f0] sm:$0xff] }
 0x3ee   : > { %5608 = vmatpush3.msra.mxu1 %v4629_v51  ;;  %5574 = vmatprep.subr.mxu0 %v4612_v0  ;;  %v4663_v50 = vld [vmem:[%s9420_s1 + $0x670] sm:$0xff]  ;;  %v4678_v0 = vld [vmem:[%s9420_s1 + $0x6e8] sm:$0xff] }
 0x3ef   : > { %5609 = vmatprep.subr.mxu1 %v4644_v19  ;;  %5575 = vmatpush3.msra.mxu0 %v4596_v47  ;;  %v4695_v51 = vld [vmem:[%s9420_s1 + $0x770] sm:$0xff]  ;;  %v4710_v19 = vld [vmem:[%s9420_s1 + $0x7e8] sm:$0xff] }
 0x3f0   : > { %5610 = vmatpush3.msra.mxu1 %v4628_v27  ;;  %5576 = vmatprep.subr.mxu0 %v4611_v56  ;;  %v4662_v47 = vld [vmem:[%s9420_s1 + $0x668] sm:$0xff]  ;;  %v4677_v56 = vld [vmem:[%s9420_s1 + $0x6e0] sm:$0xff] }
 0x3f1   : > { %5611 = vmatprep.subr.mxu1 %v4643_v46  ;;  %5577 = vmatpush3.msra.mxu0 %v4595_v33  ;;  %v4694_v27 = vld [vmem:[%s9420_s1 + $0x768] sm:$0xff]  ;;  %v4709_v46 = vld [vmem:[%s9420_s1 + $0x7e0] sm:$0xff] }
 0x3f2   : > { %5612 = vmatpush3.msra.mxu1 %v4627_v6  ;;  %5578 = vmatprep.subr.mxu0 %v4610_v49  ;;  %v4661_v33 = vld [vmem:[%s9420_s1 + $0x660] sm:$0xff]  ;;  %v4676_v49 = vld [vmem:[%s9420_s1 + $0x6d8] sm:$0xff] }
 0x3f3   : > { %5613 = vmatprep.subr.mxu1 %v4642_v17  ;;  %5579 = vmatpush3.msra.mxu0 %v4594_v39  ;;  %v4693_v6 = vld [vmem:[%s9420_s1 + $0x760] sm:$0xff]  ;;  %v4708_v17 = vld [vmem:[%s9420_s1 + $0x7d8] sm:$0xff] }
 0x3f4   : > { %5614 = vmatpush3.msra.mxu1 %v4626_v54  ;;  %5580 = vmatprep.subr.mxu0 %v4609_v61  ;;  %v4660_v39 = vld [vmem:[%s9420_s1 + $0x658] sm:$0xff]  ;;  %v4675_v61 = vld [vmem:[%s9420_s1 + $0x6d0] sm:$0xff] }
 0x3f5   : > { %5615 = vmatprep.subr.mxu1 %v4641_v40  ;;  %5581 = vmatpush3.msra.mxu0 %v4593_v9  ;;  %v4692_v54 = vld [vmem:[%s9420_s1 + $0x758] sm:$0xff]  ;;  %v4707_v40 = vld [vmem:[%s9420_s1 + $0x7d0] sm:$0xff] }
 0x3f6   : > { %5616 = vmatpush3.msra.mxu1 %v4625_v3  ;;  %5582 = vmatprep.subr.mxu0 %v4608_v57  ;;  %v4659_v9 = vld [vmem:[%s9420_s1 + $0x650] sm:$0xff]  ;;  %v4674_v57 = vld [vmem:[%s9420_s1 + $0x6c8] sm:$0xff] }
 0x3f7   : > { %5617 = vmatprep.subr.mxu1 %v4640_v42  ;;  %5583 = vmatpush3.msra.mxu0 %v4592_v2  ;;  %v4691_v3 = vld [vmem:[%s9420_s1 + $0x750] sm:$0xff]  ;;  %v4706_v42 = vld [vmem:[%s9420_s1 + $0x7c8] sm:$0xff] }
 0x3f8   : > { %5618 = vmatpush3.msra.mxu1 %v4624_v30  ;;  %5584 = vmatprep.subr.mxu0 %v4607_v45  ;;  %v4658_v2 = vld [vmem:[%s9420_s1 + $0x648] sm:$0xff]  ;;  %v4673_v45 = vld [vmem:[%s9420_s1 + $0x6c0] sm:$0xff] }
 0x3f9   : > { %5619 = vmatprep.subr.mxu1 %v4639_v25  ;;  %5585 = vmatpush3.msra.mxu0 %v4591_v48  ;;  %v4690_v30 = vld [vmem:[%s9420_s1 + $0x748] sm:$0xff]  ;;  %v4705_v25 = vld [vmem:[%s9420_s1 + $0x7c0] sm:$0xff] }
 0x3fa   : > { %5620 = vmatpush3.msra.mxu1 %v4623_v24  ;;  %5586 = vmatprep.subr.mxu0 %v4606_v12  ;;  %v4657_v48 = vld [vmem:[%s9420_s1 + $0x640] sm:$0xff]  ;;  %v4672_v12 = vld [vmem:[%s9420_s1 + $0x6b8] sm:$0xff] }
 0x3fb   : > { %5621 = vmatprep.subr.mxu1 %v4638_v58  ;;  %5587 = vmatpush3.msra.mxu0 %v4590_v37  ;;  %v4689_v24 = vld [vmem:[%s9420_s1 + $0x740] sm:$0xff]  ;;  %v4704_v58 = vld [vmem:[%s9420_s1 + $0x7b8] sm:$0xff] }
 0x3fc   : > { %5622 = vmatpush3.msra.mxu1 %v4622_v1  ;;  %5588 = vmatprep.subr.mxu0 %v4605_v18  ;;  %v4656_v37 = vld [vmem:[%s9420_s1 + $0x638] sm:$0xff]  ;;  %v4671_v18 = vld [vmem:[%s9420_s1 + $0x6b0] sm:$0xff] }
 0x3fd   : > { %5623 = vmatprep.subr.mxu1 %v4637_v29  ;;  %5589 = vmatpush3.msra.mxu0 %v4589_v8  ;;  %v4688_v1 = vld [vmem:[%s9420_s1 + $0x738] sm:$0xff]  ;;  %v4703_v29 = vld [vmem:[%s9420_s1 + $0x7b0] sm:$0xff] }
 0x3fe   : > { %5624 = vmatpush3.msra.mxu1 %v4621_v26  ;;  %5590 = vmatprep.subr.mxu0 %v4604_v4  ;;  %v4655_v8 = vld [vmem:[%s9420_s1 + $0x630] sm:$0xff]  ;;  %v4670_v4 = vld [vmem:[%s9420_s1 + $0x6a8] sm:$0xff] }
 0x3ff   : > { %5625 = vmatprep.subr.mxu1 %v4636_v31  ;;  %5591 = vmatpush3.msra.mxu0 %v4588_v34  ;;  %v4687_v26 = vld [vmem:[%s9420_s1 + $0x730] sm:$0xff]  ;;  %v4702_v31 = vld [vmem:[%s9420_s1 + $0x7a8] sm:$0xff] }
 0x400   : > { %5626 = vmatpush3.msra.mxu1 %v4620_v16  ;;  %5592 = vmatprep.subr.mxu0 %v4603_v55  ;;  %v4654_v34 = vld [vmem:[%s9420_s1 + $0x628] sm:$0xff]  ;;  %v4669_v55 = vld [vmem:[%s9420_s1 + $0x6a0] sm:$0xff] }
 0x401   : > { %5627 = vmatprep.subr.mxu1 %v4635_v22  ;;  %5593 = vmatpush3.msra.mxu0 %v4587_v53  ;;  %v4686_v16 = vld [vmem:[%s9420_s1 + $0x728] sm:$0xff]  ;;  %v4701_v22 = vld [vmem:[%s9420_s1 + $0x7a0] sm:$0xff] }
 0x402   : > { %5628 = vmatpush3.msra.mxu1 %v4619_v21  ;;  %5594 = vmatprep.subr.mxu0 %v4602_v36  ;;  %v4653_v53 = vld [vmem:[%s9420_s1 + $0x620] sm:$0xff]  ;;  %v4668_v36 = vld [vmem:[%s9420_s1 + $0x698] sm:$0xff] }
 0x403   : > { %5629 = vmatprep.subr.mxu1 %v4634_v63  ;;  %5595 = vmatpush3.msra.mxu0 %v4586_v14  ;;  %v4685_v21 = vld [vmem:[%s9420_s1 + $0x720] sm:$0xff]  ;;  %v4700_v63 = vld [vmem:[%s9420_s1 + $0x798] sm:$0xff] }
 0x404   : > { %5630 = vmatpush3.msra.mxu1 %v4618_v10  ;;  %5596 = vmatprep.subr.mxu0 %v4601_v11  ;;  %v4652_v14 = vld [vmem:[%s9420_s1 + $0x618] sm:$0xff]  ;;  %v4667_v11 = vld [vmem:[%s9420_s1 + $0x690] sm:$0xff] }
 0x405   : > { %5631 = vmatprep.subr.mxu1 %v4633_v59  ;;  %5597 = vmatpush3.msra.mxu0 %v4585_v28  ;;  %v4684_v10 = vld [vmem:[%s9420_s1 + $0x718] sm:$0xff]  ;;  %v4699_v59 = vld [vmem:[%s9420_s1 + $0x790] sm:$0xff] }
 0x406   : > { %5088 = vmatprep.mubr.f32.mxu0 %v4732_v32  ;;  %5632 = vmatpush3.msra.mxu1 %v4617_v44  ;;  %v4651_v32 = vld [vmem:[%s9420_s1 + $0x610] sm:$0xff]  ;;  %v9300_v44 = vld [vmem:[#allocation2 + $0x28] sm:$0xff] }
 0x407   : > { %5089 = vmatmul.mubr.f32.vlgmr.msra.gmra.mxu0 %v9098_v5  ;;  %5158 = vmatprep.mubr.f32.mxu1 %v4733_v52  ;;  %v4683_v28 = vld [vmem:[%s9420_s1 + $0x710] sm:$0xff]  ;;  %v4666_v52 = vld [vmem:[%s9420_s1 + $0x688] sm:$0xff] }
 0x408   : > { %5636 = vmatprep.subr.mxu0 %v4680_v43  ;;  %5671 = vmatprep.subr.mxu1 %v4712_v38  ;;  %v4698_v43 = vld [vmem:[%s9420_s1 + $0x788] sm:$0xff]  ;;  %v9308_v38 = vld [vmem:[#allocation2 + $0x38] sm:$0xff] }
 0x409   : > { %5159 = vmatmul.mubr.f32.vlgmr.msra.gmra.mxu1 %v9112_v7  ;;  %5637 = vmatpush3.msra.mxu0 %v4664_v13  ;;  %v4650_v13 = vld [vmem:[%s9420_s1 + $0x608] sm:$0xff] }
 0x40a   : > { %5672 = vmatpush3.msra.mxu1 %v4696_v62  ;;  %5638 = vmatprep.subr.mxu0 %v4679_v35  ;;  %v4682_v62 = vld [vmem:[%s9420_s1 + $0x708] sm:$0xff]  ;;  %v4665_v35 = vld [vmem:[%s9420_s1 + $0x680] sm:$0xff] }
 0x40b   : > { %5673 = vmatprep.subr.mxu1 %v4711_v20  ;;  %5639 = vmatpush3.msra.mxu0 %v4663_v50  ;;  %v4697_v20 = vld [vmem:[%s9420_s1 + $0x780] sm:$0xff]  ;;  %v4734_v50 = vcombine.high %v9300_v44, %v9300_v44 }
 0x40c   : > { %5674 = vmatpush3.msra.mxu1 %v4695_v51  ;;  %5640 = vmatprep.subr.mxu0 %v4678_v0  ;;  %v4649_v51 = vld [vmem:[%s9420_s1 + $0x600] sm:$0xff]  ;;  %v4735_v0 = vcombine.high %v9308_v38, %v9308_v38 }
 0x40d   : > { %5675 = vmatprep.subr.mxu1 %v4710_v19  ;;  %5641 = vmatpush3.msra.mxu0 %v4662_v47  ;;  %v4681_v19 = vld [vmem:[%s9420_s1 + $0x700] sm:$0xff]  ;;  %v4365_v47 = vmul.f32 %v8694_v41, %v8694_v41 }
 0x40e   : > { %5676 = vmatpush3.msra.mxu1 %v4694_v27  ;;  %5642 = vmatprep.subr.mxu0 %v4677_v56 }
 0x40f   : > { %5677 = vmatprep.subr.mxu1 %v4709_v46  ;;  %5643 = vmatpush3.msra.mxu0 %v4661_v33  ;;  %v4381_v27 = vcombine.high %v4365_v47, %v4365_v47  ;;  %v4398_v56 = vsel %vm4397_vm6, %v4365_v47, 0.0  ;;  %v4366_v33 = vmul.f32 %v8708_v60, %v8708_v60  ;;  %v4368_v60 = vmul.f32 %v8910_v15, %v8910_v15 }
 0x410   : > { %5678 = vmatpush3.msra.mxu1 %v4693_v6  ;;  %5644 = vmatprep.subr.mxu0 %v4676_v49 }
 0x411   : > { %5679 = vmatprep.subr.mxu1 %v4708_v17  ;;  %5645 = vmatpush3.msra.mxu0 %v4660_v39  ;;  %v4399_v46 = vsel %vm4397_vm6, %v4381_v27, 0.0  ;;  %v4382_v49 = vcombine.high %v4366_v33, %v4366_v33  ;;  %v4401_v17 = vsel %vm4397_vm6, %v4366_v33, 0.0 }
 0x412   : > { %5680 = vmatpush3.msra.mxu1 %v4692_v54  ;;  %5646 = vmatprep.subr.mxu0 %v4675_v61  ;;  %v4400_v6 = vadd.f32 %v4399_v46, %v4398_v56  ;;  %v4367_v61 = vmul.f32 %v8896_v23, %v8896_v23 }
 0x413   : > { %5681 = vmatprep.subr.mxu1 %v4707_v40  ;;  %5647 = vmatpush3.msra.mxu0 %v4659_v9  ;;  %v4403_v54 = vsel %vm4397_vm6, %v4382_v49, 0.0 }
 0x414   : > { %5682 = vmatpush3.msra.mxu1 %v4691_v3  ;;  %5648 = vmatprep.subr.mxu0 %v4674_v57  ;;  %v4402_v39 = vadd.f32 %v4401_v17, %v4400_v6  ;;  %v4383_v40 = vcombine.high %v4367_v61, %v4367_v61  ;;  %v4405_v9 = vsel %vm4397_vm6, %v4367_v61, 0.0 }
 0x415   : > { %5683 = vmatprep.subr.mxu1 %v4706_v42  ;;  %5649 = vmatpush3.msra.mxu0 %v4658_v2  ;;  %v4384_v2 = vcombine.high %v4368_v60, %v4368_v60 }
 0x416   : > { %5684 = vmatpush3.msra.mxu1 %v4690_v30  ;;  %5650 = vmatprep.subr.mxu0 %v4673_v45  ;;  %v4404_v41 = vadd.f32 %v4403_v54, %v4402_v39  ;;  %v4407_v57 = vsel %vm4397_vm6, %v4383_v40, 0.0  ;;  %v4409_v30 = vsel %vm4397_vm6, %v4368_v60, 0.0  ;;  %v4369_v45 = vmul.f32 %v9098_v5, %v9098_v5 }
 0x417   : > { %5685 = vmatprep.subr.mxu1 %v4705_v25  ;;  %5651 = vmatpush3.msra.mxu0 %v4657_v48  ;;  %v4411_v48 = vsel %vm4397_vm6, %v4384_v2, 0.0 }
 0x418   : > { %5686 = vmatpush3.msra.mxu1 %v4689_v24  ;;  %5652 = vmatprep.subr.mxu0 %v4672_v12  ;;  %v4406_v3 = vadd.f32 %v4405_v9, %v4404_v41  ;;  %v4385_v24 = vcombine.high %v4369_v45, %v4369_v45  ;;  %v4413_v12 = vsel %vm4397_vm6, %v4369_v45, 0.0 }
 0x419   : > { %5687 = vmatprep.subr.mxu1 %v4704_v58  ;;  %5653 = vmatpush3.msra.mxu0 %v4656_v37  ;;  %v4370_v37 = vmul.f32 %v9112_v7, %v9112_v7 }
 0x41a   : > { %5688 = vmatpush3.msra.mxu1 %v4688_v1  ;;  %5654 = vmatprep.subr.mxu0 %v4671_v18  ;;  %v4408_v42 = vadd.f32 %v4407_v57, %v4406_v3  ;;  %v4415_v18 = vsel %vm4397_vm6, %v4385_v24, 0.0 }
 0x41b   : > { %5689 = vmatprep.subr.mxu1 %v4703_v29  ;;  %5655 = vmatpush3.msra.mxu0 %v4655_v8  ;;  %v4386_v8 = vcombine.high %v4370_v37, %v4370_v37 }
 0x41c   : > { %5690 = vmatpush3.msra.mxu1 %v4687_v26  ;;  %5656 = vmatprep.subr.mxu0 %v4670_v4  ;;  %v4410_v25 = vadd.f32 %v4409_v30, %v4408_v42  ;;  %v4417_v26 = vsel %vm4397_vm6, %v4370_v37, 0.0 }
 0x41d   : > { %5691 = vmatprep.subr.mxu1 %v4702_v31  ;;  %5657 = vmatpush3.msra.mxu0 %v4654_v34  ;;  %v4371_v31 = vmul.f32 %v9300_v44, %v9300_v44  ;;  %v4419_v34 = vsel %vm4397_vm6, %v4386_v8, 0.0 }
 0x41e   : > { %5692 = vmatpush3.msra.mxu1 %v4686_v16  ;;  %5658 = vmatprep.subr.mxu0 %v4669_v55  ;;  %v4412_v58 = vadd.f32 %v4411_v48, %v4410_v25 }
 0x41f   : > { %5693 = vmatprep.subr.mxu1 %v4701_v22  ;;  %5659 = vmatpush3.msra.mxu0 %v4653_v53  ;;  %v4387_v55 = vcombine.high %v4371_v31, %v4371_v31  ;;  %v4421_v22 = vsel %vm4397_vm6, %v4371_v31, 0.0  ;;  %v5774_v31 = vld [vmem:[#allocation2 + $0x30] sm:$0xff] }
 0x420   : > { %5694 = vmatpush3.msra.mxu1 %v4685_v21  ;;  %5660 = vmatprep.subr.mxu0 %v4668_v36  ;;  %v4414_v1 = vadd.f32 %v4413_v12, %v4412_v58  ;;  %v4372_v21 = vmul.f32 %v9308_v38, %v9308_v38  ;;  %v5873_v58 = vmov 839922192  }
 0x421   : > { %5695 = vmatprep.subr.mxu1 %v4700_v63  ;;  %5661 = vmatpush3.msra.mxu0 %v4652_v14  ;;  %v4423_v36 = vsel %vm4397_vm6, %v4387_v55, 0.0  ;;  %v4434_v37 = vunpack.c.l.s4 %v5873_v58 }
 0x422   : > { %5696 = vmatpush3.msra.mxu1 %v4684_v10  ;;  %5662 = vmatprep.subr.mxu0 %v4667_v11  ;;  %v4416_v29 = vadd.f32 %v4415_v18, %v4414_v1  ;;  %v4388_v14 = vcombine.high %v4372_v21, %v4372_v21  ;;  %v4425_v10 = vsel %vm4397_vm6, %v4372_v21, 0.0  ;;  %v4436_v1 = vlaneseq }
 0x423   : > { %5697 = vmatprep.subr.mxu1 %v4699_v59  ;;  %5663 = vmatpush3.msra.mxu0 %v4651_v32  ;;  %v4435_v18 = vunpack.c.0.s8 %v4434_v37 }
 0x424   : > { %5698 = vmatpush3.msra.mxu1 %v4683_v28  ;;  %5664 = vmatprep.subr.mxu0 %v4666_v52  ;;  %v4418_v4 = vadd.f32 %v4417_v26, %v4416_v29  ;;  %v4427_v59 = vsel %vm4397_vm6, %v4388_v14, 0.0  ;;  %v4437_v29 = vshrl.u32 %v4436_v1, 7 }
 0x425   : > { %5699 = vmatprep.subr.mxu1 %v4698_v43  ;;  %5665 = vmatpush3.msra.mxu0 %v4650_v13 }
 0x426   : > { %5700 = vmatpush3.msra.mxu1 %v4682_v62  ;;  %5666 = vmatprep.subr.mxu0 %v4665_v35  ;;  %v4420_v16 = vadd.f32 %v4419_v34, %v4418_v4  ;;  %v5417_v35 = vld [vmem:[%s9421_s2] ss:$0 sm:$0xff]  ;;  %v4438_v8 = vsub.s32 %v4435_v18, %v4437_v29 }
 0x427   : > { %5701 = vmatprep.subr.mxu1 %v4697_v20  ;;  %5667 = vmatpush3.msra.mxu0 %v4649_v51 }
 0x428   : > { %5228 = vmatprep.mubr.f32.mxu0 %v4734_v50  ;;  %5702 = vmatpush3.msra.mxu1 %v4681_v19  ;;  %v4422_v53 = vadd.f32 %v4421_v22, %v4420_v16  ;;  %v5775_v16 = vld [vmem:[#allocation2] sm:$0xff] }
 0x429   : > { %5298 = vmatprep.mubr.f32.mxu1 %v4735_v0  ;;  %5229 = vmatmul.mubr.f32.vlgmr.msra.gmra.mxu0 %v9300_v44 }
 0x42a   : > { %5299 = vmatmul.mubr.f32.vlgmr.msra.gmra.mxu1 %v9308_v38  ;;  %v4424_v63 = vadd.f32 %v4423_v36, %v4422_v53 }
 0x42c   : > { %v4426_v11 = vadd.f32 %v4425_v10, %v4424_v63 }
 0x42e   : > { %v4428_v32 = vadd.f32 %v4427_v59, %v4426_v11 }
 0x430   : > { %4429 = vadd.xlane.f32.xlu0 %v4428_v32 }
 0x483   : > { %v5458_v28 = vpop.f32.mrf.mxu0 }
 0x485   : > { %v5493_v52 = vpop.f32.mrf.mxu1  ;;  %v5459_v43 = vpop.f32.mrf.mxu0 }
 0x486   : > { %v5460_v62 = vadd.f32 %v5459_v43, %v5458_v28 }
 0x487   : > { %v5494_v20 = vpop.f32.mrf.mxu1 }
 0x488   : > { %v4811_v0 = vadd.f32 %v5460_v62, %v5417_v35  ;;  %v5495_v19 = vadd.f32 %v5494_v20, %v5493_v52 }
 0x48a   : > { %v4881_v46 = vadd.f32 %v5495_v19, %v4811_v0 }
 0x4a5   : > { %v5528_v13 = vpop.f32.mrf.mxu0 }
 0x4a7   : > { %v5563_v50 = vpop.f32.mrf.mxu1  ;;  %v5529_v51 = vpop.f32.mrf.mxu0 }
 0x4a8   : > { %v5530_v27 = vadd.f32 %v5529_v51, %v5528_v13 }
 0x4a9   : > { %v5564_v56 = vpop.f32.mrf.mxu1 }
 0x4aa   : > { %v4951_v49 = vadd.f32 %v5530_v27, %v4881_v46  ;;  %v5565_v17 = vadd.f32 %v5564_v56, %v5563_v50 }
 0x4ac   : > { %v5021_v61 = vadd.f32 %v5565_v17, %v4951_v49 }
 0x4b9   : > { %v4430_v12 = vpop.xlane.xlu0 %4429 }
 0x4ba   : > { %5770 = vrsqrt.f32 %v4430_v12 }
 0x4c7   : > { %v5598_v47 = vpop.f32.mrf.mxu0  ;;  %v5771_v26 = vpop.eup %5770 }
 0x4c8   : > { %v4439_v4 = vrot.slane %v5771_v26, %v4438_v8 }
 0x4c9   : > { %v5633_v33 = vpop.f32.mrf.mxu1  ;;  %v5599_v6 = vpop.f32.mrf.mxu0 }
 0x4ca   : > { %v5600_v39 = vadd.f32 %v5599_v6, %v5598_v47  ;;  %v4441_v34 = vmul.f32 %v5774_v31, %v4439_v4  ;;  %v4442_v55 = vmul.f32 %v5775_v16, %v4439_v4  ;;  %v4443_v22 = vmul.f32 %v4439_v4, %v8896_v23 }
 0x4cb   : > { %v5634_v54 = vpop.f32.mrf.mxu1  ;;  %v4444_v53 = vmul.f32 %v4439_v4, %v8910_v15  ;;  %v4445_v21 = vmul.f32 %v4439_v4, %v9098_v5  ;;  %v4446_v36 = vmul.f32 %v4439_v4, %v9112_v7  ;;  %v4447_v63 = vmul.f32 %v4439_v4, %v9300_v44 }
 0x4cc   : > { %v5091_v41 = vadd.f32 %v5600_v39, %v5021_v61  ;;  %v5635_v40 = vadd.f32 %v5634_v54, %v5633_v33  ;;  %v4448_v14 = vmul.f32 %v4439_v4, %v9308_v38  ;;  %4449 = vst [vmem:[#allocation4] sm:$0xff] %v4441_v34  ;;  %4450 = vst [vmem:[#allocation4 + $0x8] sm:$0xff] %v4442_v55 }
 0x4cd   : > { %4451 = vst [vmem:[#allocation4 + $0x10] sm:$0xff] %v4443_v22  ;;  %4452 = vst [vmem:[#allocation4 + $0x18] sm:$0xff] %v4444_v53 }
 0x4ce   : > { %v5161_v42 = vadd.f32 %v5635_v40, %v5091_v41  ;;  %4453 = vst [vmem:[#allocation4 + $0x20] sm:$0xff] %v4445_v21  ;;  %4454 = vst [vmem:[#allocation4 + $0x28] sm:$0xff] %v4446_v36 }
 0x4cf   : > { %4455 = vst [vmem:[#allocation4 + $0x30] sm:$0xff] %v4447_v63  ;;  %4456 = vst [vmem:[#allocation4 + $0x38] sm:$0xff] %v4448_v14 }
 0x4e9   : > { %v5668_v9 = vpop.f32.mrf.mxu0 }
 0x4ea   : > { %v5703_v3 = vpop.f32.mrf.mxu1 }
 0x4eb   : > { %v5669_v57 = vpop.f32.mrf.mxu0 }
 0x4ec   : > { %v5704_v60 = vpop.f32.mrf.mxu1  ;;  %v5670_v2 = vadd.f32 %v5669_v57, %v5668_v9 }
 0x4ed   : > { %v5705_v45 = vadd.f32 %v5704_v60, %v5703_v3 }
 0x4ee   : > { %v5231_v30 = vadd.f32 %v5670_v2, %v5161_v42 }
 0x4f0   : > { %v5301_v25 = vadd.f32 %v5705_v45, %v5231_v30 }
 0x4f2   : > { %v5304_v48 = vmul.f32 %v5301_v25, %v5301_v25 }
 0x4f4   : > { %v5305_v24 = vsel %vm4397_vm6, %v5304_v48, 0.0 }
 0x4f5   : > { %5306 = vadd.xlane.f32.xlu0 %v5305_v24 }
 0x57e   : > { %v5307_v10 = vpop.xlane.xlu0 %5306 }
 0x57f   : > { %5772 = vrsqrt.f32 %v5307_v10 }
 0x58c   : > { %v5773_v23 = vpop.eup %5772 }
 0x58d   : > { %v5309_v15 = vmul.f32 %v5773_v23, %v5301_v25 }
 0x58f   : > { %5310 = vst [vmem:[#allocation6] sm:$0xf] %v5309_v15 }
 0x590 PF: > { %p9378_p11 = scmp.eq.s32.totalorder %s5406_s20, 1  ;;  %s5874_s30 = smov [#allocation4]  }
 0x591   : > { %s5321_s5 = sshll.u32 %s5874_s30, 4  ;;  %s5875_s6 = smov [#allocation6]   ;;  %s5322_s5 = int_to_ptr.vmem [resolvable:$true] %s5321_s5 }
 0x592   : > { %s5334_s7 = sshll.u32 %s5875_s6, 4  ;;  %s5776_s8 = scalar_lea.vmem %s5322_s5, 1024  ;;  %s5335_s7 = int_to_ptr.vmem [resolvable:$true] %s5334_s7 }
 0x593   : > { %p5777_p12 = scmp.ne.s32.totalorder %s5322_s5, %s5776_s8  ;;  %p5783_p1 = scmp.lt.s32.totalorder %s5322_s5, %s5322_s5 }
 0x594   : > { %p5784_p2 = scmp.lt.s32.totalorder %s5776_s8, %s5776_s8 }
 0x595   : > { %p5778_p13 = pnand %p5777_p12, %p9378_p11 }
 0x596   : > { %p5785_p3 = por %p5784_p2, %p5783_p1 }
 0x597   : > { %p5779_p0 = pneg %p5778_p13 }
 0x599   : > { %p5786_p4 = pnand %p5785_p3, %p5779_p0 }
 0x59b   : > { %5789 = shalt.err (!%p5786_p4)
}
 0x59c   : > { %5707 = dma.vmem_to_hbm [thread:$0]  (%p9378_p11), %s5322_s5, 1024, %s9422_s3, [#allocation5]  }
 0x59d   : > { %s5800_s10 = scalar_lea.vmem %s5335_s7, 64  ;;  %p5807_p8 = scmp.lt.s32.totalorder %s5335_s7, %s5335_s7 }
 0x59e   : > { %p5801_p5 = scmp.ne.s32.totalorder %s5335_s7, %s5800_s10  ;;  %p5808_p9 = scmp.lt.s32.totalorder %s5800_s10, %s5800_s10 }
 0x5a0   : > { %p5802_p6 = pnand %p5801_p5, %p9378_p11  ;;  %p5809_p10 = por %p5808_p9, %p5807_p8 }
 0x5a2   : > { %p5803_p7 = pneg %p5802_p6 }
 0x5a4   : > { %p5810_p12 = pnand %p5809_p10, %p5803_p7 }
 0x5a6   : > { %5813 = shalt.err (!%p5810_p12)
}
 0x5a7   : > { %5709 = dma.vmem_to_hbm [thread:$0]  (%p9378_p11), %s5335_s7, 64, %s9423_s4, [#allocation7]  }
 0x5a8   : > { %5845 = dma.done.wait (%p9378_p11), [#allocation5], 1024  }
 0x5a9   : > { %5847 = vsyncadd (%p9378_p11), [#allocation5], 4294966272 }
 0x5aa   : > { %5849 = dma.done.wait (%p9378_p11), [#allocation7], 64  }
 0x5ab   : > { %5851 = vsyncadd (%p9378_p11), [#allocation7], 4294967232 }
 0x5ac PF: > { %s17_s19 = sadd.s32 1, %s5870_s19   ;;  %s9920_s15 = smov %s5858_s16 }
 0x5ad   : > { %p14_p13 = scmp.ge.s32.totalorder %s17_s19, 4   ;;  %s9921_s16 = smov %s5937_s24 }
 0x5ae   : > { %s9922_s17 = smov %s5866_s18  ;;  %s9923_s18 = smov %s9925_s21 }
 0x5af   :  { %16 = sbr.rel (!%p14_p13) target bundleno = 4 (0x4), region = 105 }
 0x5b4   :  { %5351 = vsyncpa [#allocation5], 1 }
 0x5b5   :  { %5353 = vsyncpa [#allocation5 + $0x1], 1 }
 0x5b6   :  { %5354 = vsyncpa [#allocation7], 1 }

</bundles_post_ra>
